<compile_context>
chip_gen: v7x
topology: tpu7x:2x2x1
jax: 0.10.0
libtpu: 0.0.40
codegen_flags: <defaults>
</compile_context>

<pallas_src>
import math

import jax
import jax.numpy as jnp
from jax.experimental import pallas as pl
from jax.experimental.pallas import tpu as pltpu

# ----------------------------- configuration --------------------------------
B = 2              # batch
S = 8              # text sequence length
H = 64             # hidden size (scaled from 768)
NH = 4             # attention heads (scaled from 12)
DH = H // NH       # head dim
FFN = 4 * H        # BERT intermediate size
NUM_LAYERS = 4     # scaled from 12
M_AUX = 4          # args.m — number of aux images (matches the 4 label tokens)
IMG = 16           # image spatial size (scaled from 224)
C_IN = 3           # image channels
V_FEAT = 256       # ResNet50 feature dim (scaled from 2048)
VOCAB = 50
MAX_POS = 64
NUM_LABELS = 5     # len(label_list)
LANE = 128         # lane-dense padded width for the narrow outputs
# original label token ids [2711, 3029, 3295, 25408] remapped into the small vocab
LABEL_TOKEN_IDS = (11, 19, 25, 38)

SCALE = 1.0 / math.sqrt(DH)

# ------------------------- in-kernel math helpers ----------------------------


def _layernorm(x, g, b):
    mu = jnp.mean(x, axis=-1, keepdims=True)
    d = x - mu
    var = jnp.mean(d * d, axis=-1, keepdims=True)
    return d * jax.lax.rsqrt(var + 1e-12) * g + b


def _gelu(x):
    # TODO(synk): HF BERT uses the erf-based gelu; tanh approximation used here.
    return 0.5 * x * (1.0 + jnp.tanh(0.7978845608028654 * (x + 0.044715 * x * x * x)))


def _attend(q, k, v, bias):
    """softmax(q k^T / sqrt(DH) + bias) v for one (batch, head) tile, in VMEM."""
    s = jax.lax.dot_general(q, k, (((1,), (1,)), ((), ())),
                            preferred_element_type=jnp.float32) * SCALE
    if bias is not None:
        s = s + bias
    s = s - jnp.max(s, axis=-1, keepdims=True)
    e = jnp.exp(s)
    p = e * pl.reciprocal(jnp.sum(e, axis=-1, keepdims=True), approx=True)
    return jnp.dot(p, v, preferred_element_type=jnp.float32)


def _mha(query, key, value, w_ref, b_ref, lq, lkv, bias=None, shared_query=False):
    """Multi-head cross attention over all (batch, head) tiles, fully in VMEM.

    TODO(synk): the CrossAttention class definition is not part of the spec; a
    standard q/k/v/out-projection MHA with the scalar `bias` added to the
    pre-softmax scores is assumed.
    """
    wq, wk, wv, wo = w_ref[0], w_ref[1], w_ref[2], w_ref[3]
    bq, bk, bv, bo = b_ref[0:1, :], b_ref[1:2, :], b_ref[2:3, :], b_ref[3:4, :]
    qp = jnp.dot(query, wq, preferred_element_type=jnp.float32) + bq
    kp = jnp.dot(key, wk, preferred_element_type=jnp.float32) + bk
    vp = jnp.dot(value, wv, preferred_element_type=jnp.float32) + bv
    rows = []
    for bi in range(B):
        qb = qp if shared_query else qp[bi * lq:(bi + 1) * lq, :]
        kb = kp[bi * lkv:(bi + 1) * lkv, :]
        vb = vp[bi * lkv:(bi + 1) * lkv, :]
        bias_b = None if bias is None else bias[bi:bi + 1, 0:1]
        heads = [_attend(qb[:, h * DH:(h + 1) * DH],
                         kb[:, h * DH:(h + 1) * DH],
                         vb[:, h * DH:(h + 1) * DH], bias_b)
                 for h in range(NH)]
        rows.append(jnp.concatenate(heads, axis=-1))
    ctx = jnp.concatenate(rows, axis=0)                               # (B*lq, H)
    return jnp.dot(ctx, wo, preferred_element_type=jnp.float32) + bo


def _bilinear(x1, x2, w, b_scalar):
    """nn.Bilinear(H, H, 1): per-row x1 @ W @ x2^T + b."""
    t = jnp.dot(x1, w, preferred_element_type=jnp.float32)
    return jnp.sum(t * x2, axis=-1, keepdims=True) + b_scalar


# ------------------------------ Pallas kernels -------------------------------


def _vision_kernel(main_ref, aux_ref, imgw_ref, imgb_ref, v2tw_ref, v2tb_ref,
                   aew1_ref, aeb1_ref, aew2_ref, aeb2_ref,
                   imgx_ref, zaux_ref):
    """ImageModel + vis2text + img_auto_encoding for main and aux images, 1 launch.

    TODO(synk): the pretrained ResNet50 backbone is not reproducible in-script;
    replaced by a deterministic global-average-pool + linear feature extractor.
    """
    main_pool = jnp.mean(main_ref[...], axis=-1)                      # (B, C_IN)
    aux_pool = jnp.mean(aux_ref[...], axis=-1)                        # (B*M, C_IN)
    w, bw = imgw_ref[...], imgb_ref[...]
    feat_main = jnp.maximum(
        jnp.dot(main_pool, w, preferred_element_type=jnp.float32) + bw, 0.0)
    feat_aux = jnp.maximum(
        jnp.dot(aux_pool, w, preferred_element_type=jnp.float32) + bw, 0.0)
    # img_x = vis2text(img_x_)
    imgx_ref[...] = (jnp.dot(feat_main, v2tw_ref[...],
                             preferred_element_type=jnp.float32) + v2tb_ref[...])
    # z_aux_img = img_auto_encoding(aux_x_) = Linear -> Tanh -> Linear
    z1 = jnp.tanh(jnp.dot(feat_aux, aew1_ref[...],
                          preferred_element_type=jnp.float32) + aeb1_ref[...])
    zaux_ref[...] = (jnp.dot(z1, aew2_ref[...],
                             preferred_element_type=jnp.float32) + aeb2_ref[...])


def _encoder_kernel(emb_ref, maskb_ref, embg_ref, embb_ref,
                    wqkv_ref, bqkv_ref, wo_ref, bo_ref,
                    ln1g_ref, ln1b_ref, wi_ref, bi_ref, wf_ref, bf_ref,
                    ln2g_ref, ln2b_ref, o_ref, h_sc):
    """Embedding LayerNorm (step 0) + one fully-fused BERT encoder layer per grid
    step.  Hidden state carried across the layer axis in a VMEM scratch."""
    l = pl.program_id(0)

    @pl.when(l == 0)
    def _():
        h_sc[...] = _layernorm(emb_ref[...], embg_ref[...], embb_ref[...])

    x = h_sc[...]                                                     # (B*S, H)
    qkv = (jnp.dot(x, wqkv_ref[...], preferred_element_type=jnp.float32)
           + bqkv_ref[...])                                           # (B*S, 3H)
    q, k, v = qkv[:, :H], qkv[:, H:2 * H], qkv[:, 2 * H:]
    rows = []
    for bi in range(B):
        qb = q[bi * S:(bi + 1) * S, :]
        kb = k[bi * S:(bi + 1) * S, :]
        vb = v[bi * S:(bi + 1) * S, :]
        mask_b = maskb_ref[bi:bi + 1, :]                              # (1, S)
        heads = [_attend(qb[:, hh * DH:(hh + 1) * DH],
                         kb[:, hh * DH:(hh + 1) * DH],
                         vb[:, hh * DH:(hh + 1) * DH], mask_b)
                 for hh in range(NH)]
        rows.append(jnp.concatenate(heads, axis=-1))
    ctx = jnp.concatenate(rows, axis=0)                               # (B*S, H)
    attn_out = (jnp.dot(ctx, wo_ref[...], preferred_element_type=jnp.float32)
                + bo_ref[...])
    h1 = _layernorm(attn_out + x, ln1g_ref[...], ln1b_ref[...])
    inter = _gelu(jnp.dot(h1, wi_ref[...], preferred_element_type=jnp.float32)
                  + bi_ref[...])
    ffn = (jnp.dot(inter, wf_ref[...], preferred_element_type=jnp.float32)
           + bf_ref[...])
    new_h = _layernorm(ffn + h1, ln2g_ref[...], ln2b_ref[...])
    h_sc[...] = new_h

    @pl.when(l == pl.num_programs(0) - 1)
    def _():
        o_ref[...] = new_h


def _head_kernel(seq_ref, labels_ref, imgx_ref, zaux_ref, zauxp_ref,
                 pw_ref, pb_ref, bilw_ref, bilb_ref,
                 aw1_ref, ab1_ref, aw2_ref, ab2_ref, aw3_ref, ab3_ref,
                 linw_ref, linb_ref, fcw_ref, fcb_ref,
                 emis_ref, score_ref):
    """Everything after the BERT encoder in one launch: pooler, use_bias Bilinears,
    use_align cross_attn + discriminator, use_attn attentions, fusion Linear, fc."""
    seq = seq_ref[...]                                                # (B*S, H)
    labels = labels_ref[...]                                          # (M, H)
    imgx = imgx_ref[...]                                              # (B, H)
    zaux = zaux_ref[...]                                              # (B*M, H)
    zauxp = zauxp_ref[...]                                            # (B*M, H)

    # BERT pooler: tanh(W h[:, 0])
    cls = jnp.concatenate([seq[bi * S:bi * S + 1, :] for bi in range(B)], axis=0)
    pooled = jnp.tanh(jnp.dot(cls, pw_ref[...],
                              preferred_element_type=jnp.float32) + pb_ref[...])

    # use_bias: img2txt / txt2img Bilinear scalar biases
    i2t_bias = _bilinear(imgx, pooled, bilw_ref[0], bilb_ref[0:1, 0:1])   # (B, 1)
    t2i_bias = _bilinear(pooled, imgx, bilw_ref[1], bilb_ref[0:1, 1:2])   # (B, 1)

    # use_align: z_label_txt = cross_attn(text_labels, seq, seq); discriminator
    z_label = _mha(labels, seq, seq, aw1_ref, ab1_ref, M_AUX, S,
                   bias=None, shared_query=True)                          # (B*M, H)
    pos = _bilinear(zaux, z_label, bilw_ref[2], bilb_ref[0:1, 2:3])       # (B*M, 1)
    neg = _bilinear(zauxp, z_label, bilw_ref[2], bilb_ref[0:1, 2:3])      # (B*M, 1)
    # lane-dense padded store of the 2 discriminator scores
    score_ref[...] = jnp.concatenate(
        [pos, neg, jnp.zeros((B * M_AUX, LANE - 2), jnp.float32)], axis=-1)

    # use_attn: img2txt + txt2txt cross attention, fusion linear, classifier
    cross_img = _mha(zaux, seq, seq, aw2_ref, ab2_ref, M_AUX, S, bias=i2t_bias)
    cross_out = _mha(seq, cross_img, zaux, aw3_ref, ab3_ref, S, M_AUX, bias=t2i_bias)
    fused = jnp.concatenate([cross_out, seq], axis=-1)                    # (B*S, 2H)
    outputs = (jnp.dot(fused, linw_ref[...], preferred_element_type=jnp.float32)
               + linb_ref[...])
    emis_ref[...] = (jnp.dot(outputs, fcw_ref[...],
                             preferred_element_type=jnp.float32) + fcb_ref[...])


# ------------------------------ kernel wrappers -------------------------------


def vision_forward(images, aux_imgs, p):
    main_flat = images.reshape(B, C_IN, IMG * IMG)
    aux_flat = aux_imgs.reshape(B * M_AUX, C_IN, IMG * IMG)
    return pl.pallas_call(
        _vision_kernel,
        out_shape=(jax.ShapeDtypeStruct((B, H), jnp.float32),
                   jax.ShapeDtypeStruct((B * M_AUX, H), jnp.float32)),
    )(main_flat, aux_flat, p["img_w"], p["img_b"], p["vis2text_w"], p["vis2text_b"],
      p["ae_w1"], p["ae_b1"], p["ae_w2"], p["ae_b2"])


def bert_encoder(emb2d, mask_bias, p):
    """Single pallas_call over all layers: grid=(NUM_LAYERS,), stacked weights."""

    def full_spec(shape):
        n = len(shape)
        return pl.BlockSpec(shape, lambda l, n=n: (0,) * n)

    def layer_spec(shape):
        n = len(shape)
        return pl.BlockSpec((pl.Squeezed(),) + shape,
                            lambda l, n=n: (l,) + (0,) * n)

    grid_spec = pltpu.PrefetchScalarGridSpec(
        num_scalar_prefetch=0,
        grid=(NUM_LAYERS,),
        in_specs=[
            full_spec((B * S, H)),          # embeddings
            full_spec((B, S)),              # attention-mask bias
            full_spec((1, H)), full_spec((1, H)),          # embedding LN
            layer_spec((H, 3 * H)), layer_spec((1, 3 * H)),  # fused QKV
            layer_spec((H, H)), layer_spec((1, H)),          # attn out proj
            layer_spec((1, H)), layer_spec((1, H)),          # LN1
            layer_spec((H, FFN)), layer_spec((1, FFN)),      # FFN in
            layer_spec((FFN, H)), layer_spec((1, H)),        # FFN out
            layer_spec((1, H)), layer_spec((1, H)),          # LN2
        ],
        out_specs=pl.BlockSpec((B * S, H), lambda l: (0, 0)),
        scratch_shapes=[pltpu.VMEM((B * S, H), jnp.float32)],
    )
    return pl.pallas_call(
        _encoder_kernel,
        out_shape=jax.ShapeDtypeStruct((B * S, H), jnp.float32),
        grid_spec=grid_spec,
        compiler_params=pltpu.CompilerParams(dimension_semantics=("arbitrary",)),
    )(emb2d, mask_bias, p["emb_ln_g"], p["emb_ln_b"],
      p["enc_wqkv"], p["enc_bqkv"], p["enc_wo"], p["enc_bo"],
      p["enc_ln1_g"], p["enc_ln1_b"], p["enc_wi"], p["enc_bi"],
      p["enc_wf"], p["enc_bf"], p["enc_ln2_g"], p["enc_ln2_b"])


def head_forward(seq2d, labels_emb, img_x, z_aux, z_aux_perm, p):
    # Pad the narrow (NUM_LABELS-wide) classifier to a lane-dense 128-wide slab.
    fcw_pad = jnp.pad(p["fc_w"], ((0, 0), (0, LANE - NUM_LABELS)))
    fcb_pad = jnp.pad(p["fc_b"], ((0, 0), (0, LANE - NUM_LABELS)))
    return pl.pallas_call(
        _head_kernel,
        out_shape=(jax.ShapeDtypeStruct((B * S, LANE), jnp.float32),
                   jax.ShapeDtypeStruct((B * M_AUX, LANE), jnp.float32)),
    )(seq2d, labels_emb, img_x, z_aux, z_aux_perm,
      p["pooler_w"], p["pooler_b"], p["bil_w"], p["bil_b"],
      p["attn_align_w"], p["attn_align_b"],
      p["attn_i2t_w"], p["attn_i2t_b"],
      p["attn_t2t_w"], p["attn_t2t_b"],
      p["lin_w"], p["lin_b"], fcw_pad, fcb_pad)


# ---------------------------------- CRF decode --------------------------------


def crf_viterbi_decode(emissions, mask, p):
    """torchcrf CRF.decode (batch_first). Plain JAX sequential Viterbi DP.

    TODO(synk): backtracking assumes full-length sequences (mask only gates the
    forward recursion); exact for the all-ones masks used in this demo.
    """
    start, end, trans = p["crf_start"], p["crf_end"], p["crf_trans"]
    score = start[None, :] + emissions[:, 0]                          # (B, L)
    history = []
    for i in range(1, S):
        nxt = score[:, :, None] + trans[None, :, :] + emissions[:, i][:, None, :]
        best_prev = jnp.argmax(nxt, axis=1)                           # (B, L)
        nxt = jnp.max(nxt, axis=1)                                    # (B, L)
        keep = (mask[:, i] > 0)[:, None]
        score = jnp.where(keep, nxt, score)
        history.append(best_prev)
    score = score + end[None, :]
    cur = jnp.argmax(score, axis=-1)                                  # (B,)
    tags = [cur]
    for bp in reversed(history):
        cur = jnp.take_along_axis(bp, cur[:, None], axis=1)[:, 0]
        tags.append(cur)
    tags.reverse()
    return jnp.stack(tags, axis=1).astype(jnp.int32)                  # (B, S)


# ------------------------------------ forward ---------------------------------


def hvpnet_ner_forward(input_ids, attention_mask, token_type_ids,
                       images, aux_imgs, params, labels=None):
    # --- ImageModel (ResNet50 stand-in) + vis2text / img_auto_encoding ---
    img_x, z_aux = vision_forward(images, aux_imgs, params)
    # neg_aux_img = z_aux_img[torch.randperm(bsz)] — fixed key for determinism
    perm = jax.random.permutation(jax.random.PRNGKey(42), B)
    z_aux_perm = z_aux.reshape(B, M_AUX, H)[perm].reshape(B * M_AUX, H)

    # --- BertModel: embeddings + encoder (pooler lives inside the head kernel) ---
    pos_ids = jnp.arange(S, dtype=jnp.int32)
    emb = (jnp.take(params["word_emb"], input_ids, axis=0)
           + jnp.take(params["pos_emb"], pos_ids, axis=0)[None, :, :]
           + jnp.take(params["type_emb"], token_type_ids, axis=0))
    mask_bias = (1.0 - attention_mask.astype(jnp.float32)) * -10000.0     # (B, S)
    # single launch: embedding LN + all NUM_LAYERS encoder layers
    seq = bert_encoder(emb.reshape(B * S, H), mask_bias, params)
    # sequence_output (Dropout(0.1): eval no-op)

    # --- text label embeddings for the use_align branch ---
    labels_emb = jnp.take(params["word_emb"],
                          jnp.asarray(LABEL_TOKEN_IDS, jnp.int32), axis=0)

    # --- fused post-encoder head ---
    emis_pad, score_pad = head_forward(seq, labels_emb, img_x, z_aux, z_aux_perm,
                                       params)
    emissions = emis_pad[:, :NUM_LABELS].reshape(B, S, NUM_LABELS)
    scores = score_pad[:, :2]                                             # (B*M, 2)

    # dis_loss = binary_cross_entropy(sigmoid([pos, neg]), labels with col0 = 1)
    dis_logits = jnp.clip(jax.nn.sigmoid(scores), 1e-7, 1.0 - 1e-7)       # (B*M, 2)
    dis_labels = jnp.zeros_like(dis_logits).at[:, 0].set(1.0)
    dis_loss = -jnp.mean(dis_labels * jnp.log(dis_logits)
                         + (1.0 - dis_labels) * jnp.log(1.0 - dis_logits))

    # --- CRF decode (labels is None in this demo, so CRF NLL loss is None) ---
    logits = crf_viterbi_decode(emissions, attention_mask, params)
    loss = None
    return (loss, logits, emissions), dis_loss


# ------------------------------- parameter init -------------------------------


def init_params(key):
    keys = iter(jax.random.split(key, 64))

    def nrm(shape, scale=0.02):
        return scale * jax.random.normal(next(keys), shape, dtype=jnp.float32)

    def zeros(shape):
        return jnp.zeros(shape, jnp.float32)

    def ones(shape):
        return jnp.ones(shape, jnp.float32)

    L = NUM_LAYERS
    params = {
        # BERT embeddings + pooler
        "word_emb": nrm((VOCAB, H)),
        "pos_emb": nrm((MAX_POS, H)),
        "type_emb": nrm((2, H)),
        "emb_ln_g": ones((1, H)), "emb_ln_b": zeros((1, H)),
        "pooler_w": nrm((H, H)), "pooler_b": zeros((1, H)),
        # BERT encoder: per-layer weights stacked along a leading layer axis so a
        # single grid-pipelined pallas_call can stream them layer by layer.
        "enc_wqkv": nrm((L, H, 3 * H)), "enc_bqkv": zeros((L, 1, 3 * H)),
        "enc_wo": nrm((L, H, H)), "enc_bo": zeros((L, 1, H)),
        "enc_ln1_g": ones((L, 1, H)), "enc_ln1_b": zeros((L, 1, H)),
        "enc_wi": nrm((L, H, FFN)), "enc_bi": zeros((L, 1, FFN)),
        "enc_wf": nrm((L, FFN, H)), "enc_bf": zeros((L, 1, H)),
        "enc_ln2_g": ones((L, 1, H)), "enc_ln2_b": zeros((L, 1, H)),
        # ImageModel stand-in + vis2text + img_auto_encoding
        "img_w": nrm((C_IN, V_FEAT)), "img_b": zeros((1, V_FEAT)),
        "vis2text_w": nrm((V_FEAT, H)), "vis2text_b": zeros((1, H)),
        "ae_w1": nrm((V_FEAT, H)), "ae_b1": zeros((1, H)),
        "ae_w2": nrm((H, H)), "ae_b2": zeros((1, H)),
        # Bilinear layers stacked: [img2txt_bias, txt2img_bias, discriminator]
        "bil_w": nrm((3, H, H)), "bil_b": zeros((1, 3)),
        # CrossAttention weight stacks: [wq, wk, wv, wo] / biases [bq, bk, bv, bo]
        "attn_align_w": nrm((4, H, H)), "attn_align_b": zeros((4, H)),
        "attn_i2t_w": nrm((4, H, H)), "attn_i2t_b": zeros((4, H)),
        "attn_t2t_w": nrm((4, H, H)), "attn_t2t_b": zeros((4, H)),
        # fusion linear (2H -> H) and token classifier fc (H -> NUM_LABELS)
        "lin_w": nrm((2 * H, H)), "lin_b": zeros((1, H)),
        "fc_w": nrm((H, NUM_LABELS)), "fc_b": zeros((1, NUM_LABELS)),
        # CRF parameters
        "crf_start": nrm((NUM_LABELS,), 0.1),
        "crf_end": nrm((NUM_LABELS,), 0.1),
        "crf_trans": nrm((NUM_LABELS, NUM_LABELS), 0.1),
    }
    return params


# ------------------------------------ main ------------------------------------

if __name__ == "__main__":
    master = jax.random.PRNGKey(0)
    k_ids, k_img, k_aux, k_par = jax.random.split(master, 4)

    input_ids = jax.random.randint(k_ids, (B, S), 0, VOCAB, dtype=jnp.int32)
    attention_mask = jnp.ones((B, S), dtype=jnp.float32)
    token_type_ids = jnp.zeros((B, S), dtype=jnp.int32)
    images = jax.random.normal(k_img, (B, C_IN, IMG, IMG), dtype=jnp.float32)
    aux_imgs = jax.random.normal(k_aux, (B, M_AUX, C_IN, IMG, IMG), dtype=jnp.float32)

    params = init_params(k_par)

    fwd = jax.jit(hvpnet_ner_forward)
    (loss, logits, emissions), dis_loss = fwd(
        input_ids, attention_mask, token_type_ids, images, aux_imgs, params)
    logits, emissions, dis_loss = jax.block_until_ready((logits, emissions, dis_loss))

    assert logits.shape == (B, S)
    assert emissions.shape == (B, S, NUM_LABELS)
    assert dis_loss.shape == ()
    assert bool(jnp.all(jnp.isfinite(emissions)))
    assert bool(jnp.isfinite(dis_loss))
    print("KERNEL_OK")
</pallas_src>

<mosaic_0001>
module attributes {stable_mosaic.version = 11 : i64} {
  func.func @_encoder_kernel(%arg0: i32, %arg1: memref<16x64xf32, #tpu.memory_space<vmem>>, %arg2: memref<2x8xf32, #tpu.memory_space<vmem>>, %arg3: memref<1x64xf32, #tpu.memory_space<vmem>>, %arg4: memref<1x64xf32, #tpu.memory_space<vmem>>, %arg5: memref<1x64x192xf32, #tpu.memory_space<vmem>>, %arg6: memref<1x1x192xf32, #tpu.memory_space<vmem>>, %arg7: memref<1x64x64xf32, #tpu.memory_space<vmem>>, %arg8: memref<1x1x64xf32, #tpu.memory_space<vmem>>, %arg9: memref<1x1x64xf32, #tpu.memory_space<vmem>>, %arg10: memref<1x1x64xf32, #tpu.memory_space<vmem>>, %arg11: memref<1x64x256xf32, #tpu.memory_space<vmem>>, %arg12: memref<1x1x256xf32, #tpu.memory_space<vmem>>, %arg13: memref<1x256x64xf32, #tpu.memory_space<vmem>>, %arg14: memref<1x1x64xf32, #tpu.memory_space<vmem>>, %arg15: memref<1x1x64xf32, #tpu.memory_space<vmem>>, %arg16: memref<1x1x64xf32, #tpu.memory_space<vmem>>, %arg17: memref<16x64xf32, #tpu.memory_space<vmem>>, %arg18: memref<16x64xf32, #tpu.memory_space<vmem>>) attributes {dimension_semantics = [#tpu.dimension_semantics<arbitrary>], iteration_bounds = array<i64: 4>, scalar_prefetch = 0 : i64, scratch_operands = 1 : i64, tpu.core_type = #tpu.core_type<tc>, window_params = [{pipeline_mode = #tpu.pipeline_mode<synchronous>, transform_indices = @transform_0, window_bounds = array<i64: 16, 64>}, {pipeline_mode = #tpu.pipeline_mode<synchronous>, transform_indices = @transform_1, window_bounds = array<i64: 2, 8>}, {pipeline_mode = #tpu.pipeline_mode<synchronous>, transform_indices = @transform_2, window_bounds = array<i64: 1, 64>}, {pipeline_mode = #tpu.pipeline_mode<synchronous>, transform_indices = @transform_3, window_bounds = array<i64: 1, 64>}, {transform_indices = @transform_4, window_bounds = array<i64: 1, 64, 192>}, {transform_indices = @transform_5, window_bounds = array<i64: 1, 1, 192>}, {transform_indices = @transform_6, window_bounds = array<i64: 1, 64, 64>}, {transform_indices = @transform_7, window_bounds = array<i64: 1, 1, 64>}, {transform_indices = @transform_8, window_bounds = array<i64: 1, 1, 64>}, {transform_indices = @transform_9, window_bounds = array<i64: 1, 1, 64>}, {transform_indices = @transform_10, window_bounds = array<i64: 1, 64, 256>}, {transform_indices = @transform_11, window_bounds = array<i64: 1, 1, 256>}, {transform_indices = @transform_12, window_bounds = array<i64: 1, 256, 64>}, {transform_indices = @transform_13, window_bounds = array<i64: 1, 1, 64>}, {transform_indices = @transform_14, window_bounds = array<i64: 1, 1, 64>}, {transform_indices = @transform_15, window_bounds = array<i64: 1, 1, 64>}, {pipeline_mode = #tpu.pipeline_mode<synchronous>, transform_indices = @transform_16, window_bounds = array<i64: 16, 64>}]} {
    %c0_i32 = arith.constant 0 : i32
    %0 = arith.cmpi eq, %arg0, %c0_i32 : i32
    %1 = arith.extui %0 : i1 to i32
    %c0_i32_0 = arith.constant 0 : i32
    %2 = arith.cmpi ne, %1, %c0_i32_0 : i32
    scf.if %2 {
      %c0_101 = arith.constant 0 : index
      %c0_102 = arith.constant 0 : index
      %265 = vector.load %arg1[%c0_101, %c0_102] : memref<16x64xf32, #tpu.memory_space<vmem>>, vector<16x64xf32>
      %c0_103 = arith.constant 0 : index
      %c0_104 = arith.constant 0 : index
      %266 = vector.load %arg3[%c0_103, %c0_104] : memref<1x64xf32, #tpu.memory_space<vmem>>, vector<1x64xf32>
      %c0_105 = arith.constant 0 : index
      %c0_106 = arith.constant 0 : index
      %267 = vector.load %arg4[%c0_105, %c0_106] : memref<1x64xf32, #tpu.memory_space<vmem>>, vector<1x64xf32>
      %cst_107 = arith.constant dense<0.000000e+00> : vector<16xf32>
      %268 = vector.multi_reduction <add>, %265, %cst_107 [1] : vector<16x64xf32> to vector<16xf32>
      %269 = vector.shape_cast %268 : vector<16xf32> to vector<16x1xf32>
      %cst_108 = arith.constant 6.400000e+01 : f32
      %270 = vector.broadcast %cst_108 : f32 to vector<16x1xf32>
      %271 = arith.divf %269, %270 : vector<16x1xf32>
      %272 = vector.broadcast %271 : vector<16x1xf32> to vector<16x64xf32>
      %273 = arith.subf %265, %272 : vector<16x64xf32>
      %274 = arith.mulf %273, %273 : vector<16x64xf32>
      %cst_109 = arith.constant dense<0.000000e+00> : vector<16xf32>
      %275 = vector.multi_reduction <add>, %274, %cst_109 [1] : vector<16x64xf32> to vector<16xf32>
      %276 = vector.shape_cast %275 : vector<16xf32> to vector<16x1xf32>
      %cst_110 = arith.constant 6.400000e+01 : f32
      %277 = vector.broadcast %cst_110 : f32 to vector<16x1xf32>
      %278 = arith.divf %276, %277 : vector<16x1xf32>
      %cst_111 = arith.constant 9.99999996E-13 : f32
      %279 = vector.broadcast %cst_111 : f32 to vector<16x1xf32>
      %280 = arith.addf %278, %279 : vector<16x1xf32>
      %281 = math.rsqrt %280 : vector<16x1xf32>
      %282 = vector.broadcast %281 : vector<16x1xf32> to vector<16x64xf32>
      %283 = arith.mulf %273, %282 : vector<16x64xf32>
      %284 = vector.broadcast %266 : vector<1x64xf32> to vector<16x64xf32>
      %285 = arith.mulf %283, %284 : vector<16x64xf32>
      %286 = vector.broadcast %267 : vector<1x64xf32> to vector<16x64xf32>
      %287 = arith.addf %285, %286 : vector<16x64xf32>
      %c0_112 = arith.constant 0 : index
      %c0_113 = arith.constant 0 : index
      %288 = vector.load %arg18[%c0_112, %c0_113] : memref<16x64xf32, #tpu.memory_space<vmem>>, vector<16x64xf32>
      tpu.vector_store %arg18[%c0_112, %c0_113], %287 {strides = array<i32>} : memref<16x64xf32, #tpu.memory_space<vmem>>, vector<16x64xf32>,
    } else {
    }
    %c0 = arith.constant 0 : index
    %c0_1 = arith.constant 0 : index
    %3 = vector.load %arg18[%c0, %c0_1] : memref<16x64xf32, #tpu.memory_space<vmem>>, vector<16x64xf32>
    %c0_2 = arith.constant 0 : index
    %c0_3 = arith.constant 0 : index
    %c0_4 = arith.constant 0 : index
    %4 = vector.load %arg5[%c0_2, %c0_3, %c0_4] : memref<1x64x192xf32, #tpu.memory_space<vmem>>, vector<1x64x192xf32>
    %5 = vector.shape_cast %4 : vector<1x64x192xf32> to vector<64x192xf32>
    %cst = arith.constant dense<0.000000e+00> : vector<16x192xf32>
    %6 = tpu.matmul %3, %5, %cst {dimension_numbers = #tpu.dot_dimension_numbers<[1], [0], [0], [1], [0, 0, 1, 1], [], []>} : vector<16x64xf32>, vector<64x192xf32>, vector<16x192xf32> -> vector<16x192xf32>
    %c0_5 = arith.constant 0 : index
    %c0_6 = arith.constant 0 : index
    %c0_7 = arith.constant 0 : index
    %7 = vector.load %arg6[%c0_5, %c0_6, %c0_7] : memref<1x1x192xf32, #tpu.memory_space<vmem>>, vector<1x1x192xf32>
    %8 = vector.shape_cast %7 : vector<1x1x192xf32> to vector<1x192xf32>
    %9 = vector.broadcast %8 : vector<1x192xf32> to vector<16x192xf32>
    %10 = arith.addf %6, %9 : vector<16x192xf32>
    %11 = vector.extract_strided_slice %10 {offsets = [0, 0], sizes = [16, 64], strides = [1, 1]} : vector<16x192xf32> to vector<16x64xf32>
    %12 = vector.extract_strided_slice %10 {offsets = [0, 64], sizes = [16, 64], strides = [1, 1]} : vector<16x192xf32> to vector<16x64xf32>
    %13 = vector.extract_strided_slice %10 {offsets = [0, 128], sizes = [16, 64], strides = [1, 1]} : vector<16x192xf32> to vector<16x64xf32>
    %14 = vector.extract_strided_slice %11 {offsets = [0, 0], sizes = [8, 64], strides = [1, 1]} : vector<16x64xf32> to vector<8x64xf32>
    %15 = vector.extract_strided_slice %12 {offsets = [0, 0], sizes = [8, 64], strides = [1, 1]} : vector<16x64xf32> to vector<8x64xf32>
    %16 = vector.extract_strided_slice %13 {offsets = [0, 0], sizes = [8, 64], strides = [1, 1]} : vector<16x64xf32> to vector<8x64xf32>
    %c0_8 = arith.constant 0 : index
    %c0_9 = arith.constant 0 : index
    %17 = vector.load %arg2[%c0_8, %c0_9] : memref<2x8xf32, #tpu.memory_space<vmem>>, vector<1x8xf32>
    %18 = vector.extract_strided_slice %14 {offsets = [0, 0], sizes = [8, 16], strides = [1, 1]} : vector<8x64xf32> to vector<8x16xf32>
    %19 = vector.extract_strided_slice %15 {offsets = [0, 0], sizes = [8, 16], strides = [1, 1]} : vector<8x64xf32> to vector<8x16xf32>
    %20 = vector.extract_strided_slice %16 {offsets = [0, 0], sizes = [8, 16], strides = [1, 1]} : vector<8x64xf32> to vector<8x16xf32>
    %cst_10 = arith.constant dense<0.000000e+00> : vector<8x8xf32>
    %21 = tpu.matmul %18, %19, %cst_10 {dimension_numbers = #tpu.dot_dimension_numbers<[1], [1], [0], [0], [0, 0, 1, 0], [], []>} : vector<8x16xf32>, vector<8x16xf32>, vector<8x8xf32> -> vector<8x8xf32>
    %cst_11 = arith.constant 2.500000e-01 : f32
    %22 = vector.broadcast %cst_11 : f32 to vector<8x8xf32>
    %23 = arith.mulf %21, %22 : vector<8x8xf32>
    %24 = vector.broadcast %17 : vector<1x8xf32> to vector<8x8xf32>
    %25 = arith.addf %23, %24 : vector<8x8xf32>
    %cst_12 = arith.constant dense<0xFF800000> : vector<8xf32>
    %26 = vector.multi_reduction <maximumf>, %25, %cst_12 [1] : vector<8x8xf32> to vector<8xf32>
    %27 = vector.shape_cast %26 : vector<8xf32> to vector<8x1xf32>
    %28 = vector.broadcast %27 : vector<8x1xf32> to vector<8x8xf32>
    %29 = arith.subf %25, %28 : vector<8x8xf32>
    %30 = math.exp %29 : vector<8x8xf32>
    %cst_13 = arith.constant dense<0.000000e+00> : vector<8xf32>
    %31 = vector.multi_reduction <add>, %30, %cst_13 [1] : vector<8x8xf32> to vector<8xf32>
    %32 = vector.shape_cast %31 : vector<8xf32> to vector<8x1xf32>
    %33 = tpu.reciprocal %32 {approx = true} : vector<8x1xf32> -> vector<8x1xf32>
    %34 = vector.broadcast %33 : vector<8x1xf32> to vector<8x8xf32>
    %35 = arith.mulf %30, %34 : vector<8x8xf32>
    %cst_14 = arith.constant dense<0.000000e+00> : vector<8x16xf32>
    %36 = tpu.matmul %35, %20, %cst_14 {dimension_numbers = #tpu.dot_dimension_numbers<[1], [0], [0], [1], [0, 0, 1, 1], [], []>} : vector<8x8xf32>, vector<8x16xf32>, vector<8x16xf32> -> vector<8x16xf32>
    %37 = vector.extract_strided_slice %14 {offsets = [0, 16], sizes = [8, 16], strides = [1, 1]} : vector<8x64xf32> to vector<8x16xf32>
    %38 = vector.extract_strided_slice %15 {offsets = [0, 16], sizes = [8, 16], strides = [1, 1]} : vector<8x64xf32> to vector<8x16xf32>
    %39 = vector.extract_strided_slice %16 {offsets = [0, 16], sizes = [8, 16], strides = [1, 1]} : vector<8x64xf32> to vector<8x16xf32>
    %cst_15 = arith.constant dense<0.000000e+00> : vector<8x8xf32>
    %40 = tpu.matmul %37, %38, %cst_15 {dimension_numbers = #tpu.dot_dimension_numbers<[1], [1], [0], [0], [0, 0, 1, 0], [], []>} : vector<8x16xf32>, vector<8x16xf32>, vector<8x8xf32> -> vector<8x8xf32>
    %cst_16 = arith.constant 2.500000e-01 : f32
    %41 = vector.broadcast %cst_16 : f32 to vector<8x8xf32>
    %42 = arith.mulf %40, %41 : vector<8x8xf32>
    %43 = vector.broadcast %17 : vector<1x8xf32> to vector<8x8xf32>
    %44 = arith.addf %42, %43 : vector<8x8xf32>
    %cst_17 = arith.constant dense<0xFF800000> : vector<8xf32>
    %45 = vector.multi_reduction <maximumf>, %44, %cst_17 [1] : vector<8x8xf32> to vector<8xf32>
    %46 = vector.shape_cast %45 : vector<8xf32> to vector<8x1xf32>
    %47 = vector.broadcast %46 : vector<8x1xf32> to vector<8x8xf32>
    %48 = arith.subf %44, %47 : vector<8x8xf32>
    %49 = math.exp %48 : vector<8x8xf32>
    %cst_18 = arith.constant dense<0.000000e+00> : vector<8xf32>
    %50 = vector.multi_reduction <add>, %49, %cst_18 [1] : vector<8x8xf32> to vector<8xf32>
    %51 = vector.shape_cast %50 : vector<8xf32> to vector<8x1xf32>
    %52 = tpu.reciprocal %51 {approx = true} : vector<8x1xf32> -> vector<8x1xf32>
    %53 = vector.broadcast %52 : vector<8x1xf32> to vector<8x8xf32>
    %54 = arith.mulf %49, %53 : vector<8x8xf32>
    %cst_19 = arith.constant dense<0.000000e+00> : vector<8x16xf32>
    %55 = tpu.matmul %54, %39, %cst_19 {dimension_numbers = #tpu.dot_dimension_numbers<[1], [0], [0], [1], [0, 0, 1, 1], [], []>} : vector<8x8xf32>, vector<8x16xf32>, vector<8x16xf32> -> vector<8x16xf32>
    %56 = vector.extract_strided_slice %14 {offsets = [0, 32], sizes = [8, 16], strides = [1, 1]} : vector<8x64xf32> to vector<8x16xf32>
    %57 = vector.extract_strided_slice %15 {offsets = [0, 32], sizes = [8, 16], strides = [1, 1]} : vector<8x64xf32> to vector<8x16xf32>
    %58 = vector.extract_strided_slice %16 {offsets = [0, 32], sizes = [8, 16], strides = [1, 1]} : vector<8x64xf32> to vector<8x16xf32>
    %cst_20 = arith.constant dense<0.000000e+00> : vector<8x8xf32>
    %59 = tpu.matmul %56, %57, %cst_20 {dimension_numbers = #tpu.dot_dimension_numbers<[1], [1], [0], [0], [0, 0, 1, 0], [], []>} : vector<8x16xf32>, vector<8x16xf32>, vector<8x8xf32> -> vector<8x8xf32>
    %cst_21 = arith.constant 2.500000e-01 : f32
    %60 = vector.broadcast %cst_21 : f32 to vector<8x8xf32>
    %61 = arith.mulf %59, %60 : vector<8x8xf32>
    %62 = vector.broadcast %17 : vector<1x8xf32> to vector<8x8xf32>
    %63 = arith.addf %61, %62 : vector<8x8xf32>
    %cst_22 = arith.constant dense<0xFF800000> : vector<8xf32>
    %64 = vector.multi_reduction <maximumf>, %63, %cst_22 [1] : vector<8x8xf32> to vector<8xf32>
    %65 = vector.shape_cast %64 : vector<8xf32> to vector<8x1xf32>
    %66 = vector.broadcast %65 : vector<8x1xf32> to vector<8x8xf32>
    %67 = arith.subf %63, %66 : vector<8x8xf32>
    %68 = math.exp %67 : vector<8x8xf32>
    %cst_23 = arith.constant dense<0.000000e+00> : vector<8xf32>
    %69 = vector.multi_reduction <add>, %68, %cst_23 [1] : vector<8x8xf32> to vector<8xf32>
    %70 = vector.shape_cast %69 : vector<8xf32> to vector<8x1xf32>
    %71 = tpu.reciprocal %70 {approx = true} : vector<8x1xf32> -> vector<8x1xf32>
    %72 = vector.broadcast %71 : vector<8x1xf32> to vector<8x8xf32>
    %73 = arith.mulf %68, %72 : vector<8x8xf32>
    %cst_24 = arith.constant dense<0.000000e+00> : vector<8x16xf32>
    %74 = tpu.matmul %73, %58, %cst_24 {dimension_numbers = #tpu.dot_dimension_numbers<[1], [0], [0], [1], [0, 0, 1, 1], [], []>} : vector<8x8xf32>, vector<8x16xf32>, vector<8x16xf32> -> vector<8x16xf32>
    %75 = vector.extract_strided_slice %14 {offsets = [0, 48], sizes = [8, 16], strides = [1, 1]} : vector<8x64xf32> to vector<8x16xf32>
    %76 = vector.extract_strided_slice %15 {offsets = [0, 48], sizes = [8, 16], strides = [1, 1]} : vector<8x64xf32> to vector<8x16xf32>
    %77 = vector.extract_strided_slice %16 {offsets = [0, 48], sizes = [8, 16], strides = [1, 1]} : vector<8x64xf32> to vector<8x16xf32>
    %cst_25 = arith.constant dense<0.000000e+00> : vector<8x8xf32>
    %78 = tpu.matmul %75, %76, %cst_25 {dimension_numbers = #tpu.dot_dimension_numbers<[1], [1], [0], [0], [0, 0, 1, 0], [], []>} : vector<8x16xf32>, vector<8x16xf32>, vector<8x8xf32> -> vector<8x8xf32>
    %cst_26 = arith.constant 2.500000e-01 : f32
    %79 = vector.broadcast %cst_26 : f32 to vector<8x8xf32>
    %80 = arith.mulf %78, %79 : vector<8x8xf32>
    %81 = vector.broadcast %17 : vector<1x8xf32> to vector<8x8xf32>
    %82 = arith.addf %80, %81 : vector<8x8xf32>
    %cst_27 = arith.constant dense<0xFF800000> : vector<8xf32>
    %83 = vector.multi_reduction <maximumf>, %82, %cst_27 [1] : vector<8x8xf32> to vector<8xf32>
    %84 = vector.shape_cast %83 : vector<8xf32> to vector<8x1xf32>
    %85 = vector.broadcast %84 : vector<8x1xf32> to vector<8x8xf32>
    %86 = arith.subf %82, %85 : vector<8x8xf32>
    %87 = math.exp %86 : vector<8x8xf32>
    %cst_28 = arith.constant dense<0.000000e+00> : vector<8xf32>
    %88 = vector.multi_reduction <add>, %87, %cst_28 [1] : vector<8x8xf32> to vector<8xf32>
    %89 = vector.shape_cast %88 : vector<8xf32> to vector<8x1xf32>
    %90 = tpu.reciprocal %89 {approx = true} : vector<8x1xf32> -> vector<8x1xf32>
    %91 = vector.broadcast %90 : vector<8x1xf32> to vector<8x8xf32>
    %92 = arith.mulf %87, %91 : vector<8x8xf32>
    %cst_29 = arith.constant dense<0.000000e+00> : vector<8x16xf32>
    %93 = tpu.matmul %92, %77, %cst_29 {dimension_numbers = #tpu.dot_dimension_numbers<[1], [0], [0], [1], [0, 0, 1, 1], [], []>} : vector<8x8xf32>, vector<8x16xf32>, vector<8x16xf32> -> vector<8x16xf32>
    %94 = tpu.concatenate %36, %55, %74, %93 in 1 : vector<8x16xf32>, vector<8x16xf32>, vector<8x16xf32>, vector<8x16xf32> -> vector<8x64xf32>
    %95 = vector.extract_strided_slice %11 {offsets = [8, 0], sizes = [8, 64], strides = [1, 1]} : vector<16x64xf32> to vector<8x64xf32>
    %96 = vector.extract_strided_slice %12 {offsets = [8, 0], sizes = [8, 64], strides = [1, 1]} : vector<16x64xf32> to vector<8x64xf32>
    %97 = vector.extract_strided_slice %13 {offsets = [8, 0], sizes = [8, 64], strides = [1, 1]} : vector<16x64xf32> to vector<8x64xf32>
    %c1 = arith.constant 1 : index
    %c0_30 = arith.constant 0 : index
    %98 = vector.load %arg2[%c1, %c0_30] : memref<2x8xf32, #tpu.memory_space<vmem>>, vector<1x8xf32>
    %99 = vector.extract_strided_slice %95 {offsets = [0, 0], sizes = [8, 16], strides = [1, 1]} : vector<8x64xf32> to vector<8x16xf32>
    %100 = vector.extract_strided_slice %96 {offsets = [0, 0], sizes = [8, 16], strides = [1, 1]} : vector<8x64xf32> to vector<8x16xf32>
    %101 = vector.extract_strided_slice %97 {offsets = [0, 0], sizes = [8, 16], strides = [1, 1]} : vector<8x64xf32> to vector<8x16xf32>
    %cst_31 = arith.constant dense<0.000000e+00> : vector<8x8xf32>
    %102 = tpu.matmul %99, %100, %cst_31 {dimension_numbers = #tpu.dot_dimension_numbers<[1], [1], [0], [0], [0, 0, 1, 0], [], []>} : vector<8x16xf32>, vector<8x16xf32>, vector<8x8xf32> -> vector<8x8xf32>
    %cst_32 = arith.constant 2.500000e-01 : f32
    %103 = vector.broadcast %cst_32 : f32 to vector<8x8xf32>
    %104 = arith.mulf %102, %103 : vector<8x8xf32>
    %105 = vector.broadcast %98 : vector<1x8xf32> to vector<8x8xf32>
    %106 = arith.addf %104, %105 : vector<8x8xf32>
    %cst_33 = arith.constant dense<0xFF800000> : vector<8xf32>
    %107 = vector.multi_reduction <maximumf>, %106, %cst_33 [1] : vector<8x8xf32> to vector<8xf32>
    %108 = vector.shape_cast %107 : vector<8xf32> to vector<8x1xf32>
    %109 = vector.broadcast %108 : vector<8x1xf32> to vector<8x8xf32>
    %110 = arith.subf %106, %109 : vector<8x8xf32>
    %111 = math.exp %110 : vector<8x8xf32>
    %cst_34 = arith.constant dense<0.000000e+00> : vector<8xf32>
    %112 = vector.multi_reduction <add>, %111, %cst_34 [1] : vector<8x8xf32> to vector<8xf32>
    %113 = vector.shape_cast %112 : vector<8xf32> to vector<8x1xf32>
    %114 = tpu.reciprocal %113 {approx = true} : vector<8x1xf32> -> vector<8x1xf32>
    %115 = vector.broadcast %114 : vector<8x1xf32> to vector<8x8xf32>
    %116 = arith.mulf %111, %115 : vector<8x8xf32>
    %cst_35 = arith.constant dense<0.000000e+00> : vector<8x16xf32>
    %117 = tpu.matmul %116, %101, %cst_35 {dimension_numbers = #tpu.dot_dimension_numbers<[1], [0], [0], [1], [0, 0, 1, 1], [], []>} : vector<8x8xf32>, vector<8x16xf32>, vector<8x16xf32> -> vector<8x16xf32>
    %118 = vector.extract_strided_slice %95 {offsets = [0, 16], sizes = [8, 16], strides = [1, 1]} : vector<8x64xf32> to vector<8x16xf32>
    %119 = vector.extract_strided_slice %96 {offsets = [0, 16], sizes = [8, 16], strides = [1, 1]} : vector<8x64xf32> to vector<8x16xf32>
    %120 = vector.extract_strided_slice %97 {offsets = [0, 16], sizes = [8, 16], strides = [1, 1]} : vector<8x64xf32> to vector<8x16xf32>
    %cst_36 = arith.constant dense<0.000000e+00> : vector<8x8xf32>
    %121 = tpu.matmul %118, %119, %cst_36 {dimension_numbers = #tpu.dot_dimension_numbers<[1], [1], [0], [0], [0, 0, 1, 0], [], []>} : vector<8x16xf32>, vector<8x16xf32>, vector<8x8xf32> -> vector<8x8xf32>
    %cst_37 = arith.constant 2.500000e-01 : f32
    %122 = vector.broadcast %cst_37 : f32 to vector<8x8xf32>
    %123 = arith.mulf %121, %122 : vector<8x8xf32>
    %124 = vector.broadcast %98 : vector<1x8xf32> to vector<8x8xf32>
    %125 = arith.addf %123, %124 : vector<8x8xf32>
    %cst_38 = arith.constant dense<0xFF800000> : vector<8xf32>
    %126 = vector.multi_reduction <maximumf>, %125, %cst_38 [1] : vector<8x8xf32> to vector<8xf32>
    %127 = vector.shape_cast %126 : vector<8xf32> to vector<8x1xf32>
    %128 = vector.broadcast %127 : vector<8x1xf32> to vector<8x8xf32>
    %129 = arith.subf %125, %128 : vector<8x8xf32>
    %130 = math.exp %129 : vector<8x8xf32>
    %cst_39 = arith.constant dense<0.000000e+00> : vector<8xf32>
    %131 = vector.multi_reduction <add>, %130, %cst_39 [1] : vector<8x8xf32> to vector<8xf32>
    %132 = vector.shape_cast %131 : vector<8xf32> to vector<8x1xf32>
    %133 = tpu.reciprocal %132 {approx = true} : vector<8x1xf32> -> vector<8x1xf32>
    %134 = vector.broadcast %133 : vector<8x1xf32> to vector<8x8xf32>
    %135 = arith.mulf %130, %134 : vector<8x8xf32>
    %cst_40 = arith.constant dense<0.000000e+00> : vector<8x16xf32>
    %136 = tpu.matmul %135, %120, %cst_40 {dimension_numbers = #tpu.dot_dimension_numbers<[1], [0], [0], [1], [0, 0, 1, 1], [], []>} : vector<8x8xf32>, vector<8x16xf32>, vector<8x16xf32> -> vector<8x16xf32>
    %137 = vector.extract_strided_slice %95 {offsets = [0, 32], sizes = [8, 16], strides = [1, 1]} : vector<8x64xf32> to vector<8x16xf32>
    %138 = vector.extract_strided_slice %96 {offsets = [0, 32], sizes = [8, 16], strides = [1, 1]} : vector<8x64xf32> to vector<8x16xf32>
    %139 = vector.extract_strided_slice %97 {offsets = [0, 32], sizes = [8, 16], strides = [1, 1]} : vector<8x64xf32> to vector<8x16xf32>
    %cst_41 = arith.constant dense<0.000000e+00> : vector<8x8xf32>
    %140 = tpu.matmul %137, %138, %cst_41 {dimension_numbers = #tpu.dot_dimension_numbers<[1], [1], [0], [0], [0, 0, 1, 0], [], []>} : vector<8x16xf32>, vector<8x16xf32>, vector<8x8xf32> -> vector<8x8xf32>
    %cst_42 = arith.constant 2.500000e-01 : f32
    %141 = vector.broadcast %cst_42 : f32 to vector<8x8xf32>
    %142 = arith.mulf %140, %141 : vector<8x8xf32>
    %143 = vector.broadcast %98 : vector<1x8xf32> to vector<8x8xf32>
    %144 = arith.addf %142, %143 : vector<8x8xf32>
    %cst_43 = arith.constant dense<0xFF800000> : vector<8xf32>
    %145 = vector.multi_reduction <maximumf>, %144, %cst_43 [1] : vector<8x8xf32> to vector<8xf32>
    %146 = vector.shape_cast %145 : vector<8xf32> to vector<8x1xf32>
    %147 = vector.broadcast %146 : vector<8x1xf32> to vector<8x8xf32>
    %148 = arith.subf %144, %147 : vector<8x8xf32>
    %149 = math.exp %148 : vector<8x8xf32>
    %cst_44 = arith.constant dense<0.000000e+00> : vector<8xf32>
    %150 = vector.multi_reduction <add>, %149, %cst_44 [1] : vector<8x8xf32> to vector<8xf32>
    %151 = vector.shape_cast %150 : vector<8xf32> to vector<8x1xf32>
    %152 = tpu.reciprocal %151 {approx = true} : vector<8x1xf32> -> vector<8x1xf32>
    %153 = vector.broadcast %152 : vector<8x1xf32> to vector<8x8xf32>
    %154 = arith.mulf %149, %153 : vector<8x8xf32>
    %cst_45 = arith.constant dense<0.000000e+00> : vector<8x16xf32>
    %155 = tpu.matmul %154, %139, %cst_45 {dimension_numbers = #tpu.dot_dimension_numbers<[1], [0], [0], [1], [0, 0, 1, 1], [], []>} : vector<8x8xf32>, vector<8x16xf32>, vector<8x16xf32> -> vector<8x16xf32>
    %156 = vector.extract_strided_slice %95 {offsets = [0, 48], sizes = [8, 16], strides = [1, 1]} : vector<8x64xf32> to vector<8x16xf32>
    %157 = vector.extract_strided_slice %96 {offsets = [0, 48], sizes = [8, 16], strides = [1, 1]} : vector<8x64xf32> to vector<8x16xf32>
    %158 = vector.extract_strided_slice %97 {offsets = [0, 48], sizes = [8, 16], strides = [1, 1]} : vector<8x64xf32> to vector<8x16xf32>
    %cst_46 = arith.constant dense<0.000000e+00> : vector<8x8xf32>
    %159 = tpu.matmul %156, %157, %cst_46 {dimension_numbers = #tpu.dot_dimension_numbers<[1], [1], [0], [0], [0, 0, 1, 0], [], []>} : vector<8x16xf32>, vector<8x16xf32>, vector<8x8xf32> -> vector<8x8xf32>
    %cst_47 = arith.constant 2.500000e-01 : f32
    %160 = vector.broadcast %cst_47 : f32 to vector<8x8xf32>
    %161 = arith.mulf %159, %160 : vector<8x8xf32>
    %162 = vector.broadcast %98 : vector<1x8xf32> to vector<8x8xf32>
    %163 = arith.addf %161, %162 : vector<8x8xf32>
    %cst_48 = arith.constant dense<0xFF800000> : vector<8xf32>
    %164 = vector.multi_reduction <maximumf>, %163, %cst_48 [1] : vector<8x8xf32> to vector<8xf32>
    %165 = vector.shape_cast %164 : vector<8xf32> to vector<8x1xf32>
    %166 = vector.broadcast %165 : vector<8x1xf32> to vector<8x8xf32>
    %167 = arith.subf %163, %166 : vector<8x8xf32>
    %168 = math.exp %167 : vector<8x8xf32>
    %cst_49 = arith.constant dense<0.000000e+00> : vector<8xf32>
    %169 = vector.multi_reduction <add>, %168, %cst_49 [1] : vector<8x8xf32> to vector<8xf32>
    %170 = vector.shape_cast %169 : vector<8xf32> to vector<8x1xf32>
    %171 = tpu.reciprocal %170 {approx = true} : vector<8x1xf32> -> vector<8x1xf32>
    %172 = vector.broadcast %171 : vector<8x1xf32> to vector<8x8xf32>
    %173 = arith.mulf %168, %172 : vector<8x8xf32>
    %cst_50 = arith.constant dense<0.000000e+00> : vector<8x16xf32>
    %174 = tpu.matmul %173, %158, %cst_50 {dimension_numbers = #tpu.dot_dimension_numbers<[1], [0], [0], [1], [0, 0, 1, 1], [], []>} : vector<8x8xf32>, vector<8x16xf32>, vector<8x16xf32> -> vector<8x16xf32>
    %175 = tpu.concatenate %117, %136, %155, %174 in 1 : vector<8x16xf32>, vector<8x16xf32>, vector<8x16xf32>, vector<8x16xf32> -> vector<8x64xf32>
    %176 = tpu.concatenate %94, %175 in 0 : vector<8x64xf32>, vector<8x64xf32> -> vector<16x64xf32>
    %c0_51 = arith.constant 0 : index
    %c0_52 = arith.constant 0 : index
    %c0_53 = arith.constant 0 : index
    %177 = vector.load %arg7[%c0_51, %c0_52, %c0_53] : memref<1x64x64xf32, #tpu.memory_space<vmem>>, vector<1x64x64xf32>
    %178 = vector.shape_cast %177 : vector<1x64x64xf32> to vector<64x64xf32>
    %cst_54 = arith.constant dense<0.000000e+00> : vector<16x64xf32>
    %179 = tpu.matmul %176, %178, %cst_54 {dimension_numbers = #tpu.dot_dimension_numbers<[1], [0], [0], [1], [0, 0, 1, 1], [], []>} : vector<16x64xf32>, vector<64x64xf32>, vector<16x64xf32> -> vector<16x64xf32>
    %c0_55 = arith.constant 0 : index
    %c0_56 = arith.constant 0 : index
    %c0_57 = arith.constant 0 : index
    %180 = vector.load %arg8[%c0_55, %c0_56, %c0_57] : memref<1x1x64xf32, #tpu.memory_space<vmem>>, vector<1x1x64xf32>
    %181 = vector.shape_cast %180 : vector<1x1x64xf32> to vector<1x64xf32>
    %182 = vector.broadcast %181 : vector<1x64xf32> to vector<16x64xf32>
    %183 = arith.addf %179, %182 : vector<16x64xf32>
    %184 = arith.addf %183, %3 : vector<16x64xf32>
    %c0_58 = arith.constant 0 : index
    %c0_59 = arith.constant 0 : index
    %c0_60 = arith.constant 0 : index
    %185 = vector.load %arg9[%c0_58, %c0_59, %c0_60] : memref<1x1x64xf32, #tpu.memory_space<vmem>>, vector<1x1x64xf32>
    %186 = vector.shape_cast %185 : vector<1x1x64xf32> to vector<1x64xf32>
    %c0_61 = arith.constant 0 : index
    %c0_62 = arith.constant 0 : index
    %c0_63 = arith.constant 0 : index
    %187 = vector.load %arg10[%c0_61, %c0_62, %c0_63] : memref<1x1x64xf32, #tpu.memory_space<vmem>>, vector<1x1x64xf32>
    %188 = vector.shape_cast %187 : vector<1x1x64xf32> to vector<1x64xf32>
    %cst_64 = arith.constant dense<0.000000e+00> : vector<16xf32>
    %189 = vector.multi_reduction <add>, %184, %cst_64 [1] : vector<16x64xf32> to vector<16xf32>
    %190 = vector.shape_cast %189 : vector<16xf32> to vector<16x1xf32>
    %cst_65 = arith.constant 6.400000e+01 : f32
    %191 = vector.broadcast %cst_65 : f32 to vector<16x1xf32>
    %192 = arith.divf %190, %191 : vector<16x1xf32>
    %193 = vector.broadcast %192 : vector<16x1xf32> to vector<16x64xf32>
    %194 = arith.subf %184, %193 : vector<16x64xf32>
    %195 = arith.mulf %194, %194 : vector<16x64xf32>
    %cst_66 = arith.constant dense<0.000000e+00> : vector<16xf32>
    %196 = vector.multi_reduction <add>, %195, %cst_66 [1] : vector<16x64xf32> to vector<16xf32>
    %197 = vector.shape_cast %196 : vector<16xf32> to vector<16x1xf32>
    %cst_67 = arith.constant 6.400000e+01 : f32
    %198 = vector.broadcast %cst_67 : f32 to vector<16x1xf32>
    %199 = arith.divf %197, %198 : vector<16x1xf32>
    %cst_68 = arith.constant 9.99999996E-13 : f32
    %200 = vector.broadcast %cst_68 : f32 to vector<16x1xf32>
    %201 = arith.addf %199, %200 : vector<16x1xf32>
    %202 = math.rsqrt %201 : vector<16x1xf32>
    %203 = vector.broadcast %202 : vector<16x1xf32> to vector<16x64xf32>
    %204 = arith.mulf %194, %203 : vector<16x64xf32>
    %205 = vector.broadcast %186 : vector<1x64xf32> to vector<16x64xf32>
    %206 = arith.mulf %204, %205 : vector<16x64xf32>
    %207 = vector.broadcast %188 : vector<1x64xf32> to vector<16x64xf32>
    %208 = arith.addf %206, %207 : vector<16x64xf32>
    %c0_69 = arith.constant 0 : index
    %c0_70 = arith.constant 0 : index
    %c0_71 = arith.constant 0 : index
    %209 = vector.load %arg11[%c0_69, %c0_70, %c0_71] : memref<1x64x256xf32, #tpu.memory_space<vmem>>, vector<1x64x256xf32>
    %210 = vector.shape_cast %209 : vector<1x64x256xf32> to vector<64x256xf32>
    %cst_72 = arith.constant dense<0.000000e+00> : vector<16x256xf32>
    %211 = tpu.matmul %208, %210, %cst_72 {dimension_numbers = #tpu.dot_dimension_numbers<[1], [0], [0], [1], [0, 0, 1, 1], [], []>} : vector<16x64xf32>, vector<64x256xf32>, vector<16x256xf32> -> vector<16x256xf32>
    %c0_73 = arith.constant 0 : index
    %c0_74 = arith.constant 0 : index
    %c0_75 = arith.constant 0 : index
    %212 = vector.load %arg12[%c0_73, %c0_74, %c0_75] : memref<1x1x256xf32, #tpu.memory_space<vmem>>, vector<1x1x256xf32>
    %213 = vector.shape_cast %212 : vector<1x1x256xf32> to vector<1x256xf32>
    %214 = vector.broadcast %213 : vector<1x256xf32> to vector<16x256xf32>
    %215 = arith.addf %211, %214 : vector<16x256xf32>
    %cst_76 = arith.constant 5.000000e-01 : f32
    %216 = vector.broadcast %cst_76 : f32 to vector<16x256xf32>
    %217 = arith.mulf %216, %215 : vector<16x256xf32>
    %cst_77 = arith.constant 4.471500e-02 : f32
    %218 = vector.broadcast %cst_77 : f32 to vector<16x256xf32>
    %219 = arith.mulf %218, %215 : vector<16x256xf32>
    %220 = arith.mulf %219, %215 : vector<16x256xf32>
    %221 = arith.mulf %220, %215 : vector<16x256xf32>
    %222 = arith.addf %215, %221 : vector<16x256xf32>
    %cst_78 = arith.constant 0.797884583 : f32
    %223 = vector.broadcast %cst_78 : f32 to vector<16x256xf32>
    %224 = arith.mulf %223, %222 : vector<16x256xf32>
    %225 = math.tanh %224 : vector<16x256xf32>
    %cst_79 = arith.constant 1.000000e+00 : f32
    %226 = vector.broadcast %cst_79 : f32 to vector<16x256xf32>
    %227 = arith.addf %226, %225 : vector<16x256xf32>
    %228 = arith.mulf %217, %227 : vector<16x256xf32>
    %c0_80 = arith.constant 0 : index
    %c0_81 = arith.constant 0 : index
    %c0_82 = arith.constant 0 : index
    %229 = vector.load %arg13[%c0_80, %c0_81, %c0_82] : memref<1x256x64xf32, #tpu.memory_space<vmem>>, vector<1x256x64xf32>
    %230 = vector.shape_cast %229 : vector<1x256x64xf32> to vector<256x64xf32>
    %cst_83 = arith.constant dense<0.000000e+00> : vector<16x64xf32>
    %231 = tpu.matmul %228, %230, %cst_83 {dimension_numbers = #tpu.dot_dimension_numbers<[1], [0], [0], [1], [0, 0, 1, 1], [], []>} : vector<16x256xf32>, vector<256x64xf32>, vector<16x64xf32> -> vector<16x64xf32>
    %c0_84 = arith.constant 0 : index
    %c0_85 = arith.constant 0 : index
    %c0_86 = arith.constant 0 : index
    %232 = vector.load %arg14[%c0_84, %c0_85, %c0_86] : memref<1x1x64xf32, #tpu.memory_space<vmem>>, vector<1x1x64xf32>
    %233 = vector.shape_cast %232 : vector<1x1x64xf32> to vector<1x64xf32>
    %234 = vector.broadcast %233 : vector<1x64xf32> to vector<16x64xf32>
    %235 = arith.addf %231, %234 : vector<16x64xf32>
    %236 = arith.addf %235, %208 : vector<16x64xf32>
    %c0_87 = arith.constant 0 : index
    %c0_88 = arith.constant 0 : index
    %c0_89 = arith.constant 0 : index
    %237 = vector.load %arg15[%c0_87, %c0_88, %c0_89] : memref<1x1x64xf32, #tpu.memory_space<vmem>>, vector<1x1x64xf32>
    %238 = vector.shape_cast %237 : vector<1x1x64xf32> to vector<1x64xf32>
    %c0_90 = arith.constant 0 : index
    %c0_91 = arith.constant 0 : index
    %c0_92 = arith.constant 0 : index
    %239 = vector.load %arg16[%c0_90, %c0_91, %c0_92] : memref<1x1x64xf32, #tpu.memory_space<vmem>>, vector<1x1x64xf32>
    %240 = vector.shape_cast %239 : vector<1x1x64xf32> to vector<1x64xf32>
    %cst_93 = arith.constant dense<0.000000e+00> : vector<16xf32>
    %241 = vector.multi_reduction <add>, %236, %cst_93 [1] : vector<16x64xf32> to vector<16xf32>
    %242 = vector.shape_cast %241 : vector<16xf32> to vector<16x1xf32>
    %cst_94 = arith.constant 6.400000e+01 : f32
    %243 = vector.broadcast %cst_94 : f32 to vector<16x1xf32>
    %244 = arith.divf %242, %243 : vector<16x1xf32>
    %245 = vector.broadcast %244 : vector<16x1xf32> to vector<16x64xf32>
    %246 = arith.subf %236, %245 : vector<16x64xf32>
    %247 = arith.mulf %246, %246 : vector<16x64xf32>
    %cst_95 = arith.constant dense<0.000000e+00> : vector<16xf32>
    %248 = vector.multi_reduction <add>, %247, %cst_95 [1] : vector<16x64xf32> to vector<16xf32>
    %249 = vector.shape_cast %248 : vector<16xf32> to vector<16x1xf32>
    %cst_96 = arith.constant 6.400000e+01 : f32
    %250 = vector.broadcast %cst_96 : f32 to vector<16x1xf32>
    %251 = arith.divf %249, %250 : vector<16x1xf32>
    %cst_97 = arith.constant 9.99999996E-13 : f32
    %252 = vector.broadcast %cst_97 : f32 to vector<16x1xf32>
    %253 = arith.addf %251, %252 : vector<16x1xf32>
    %254 = math.rsqrt %253 : vector<16x1xf32>
    %255 = vector.broadcast %254 : vector<16x1xf32> to vector<16x64xf32>
    %256 = arith.mulf %246, %255 : vector<16x64xf32>
    %257 = vector.broadcast %238 : vector<1x64xf32> to vector<16x64xf32>
    %258 = arith.mulf %256, %257 : vector<16x64xf32>
    %259 = vector.broadcast %240 : vector<1x64xf32> to vector<16x64xf32>
    %260 = arith.addf %258, %259 : vector<16x64xf32>
    %c0_98 = arith.constant 0 : index
    %c0_99 = arith.constant 0 : index
    %261 = vector.load %arg18[%c0_98, %c0_99] : memref<16x64xf32, #tpu.memory_space<vmem>>, vector<16x64xf32>
    tpu.vector_store %arg18[%c0_98, %c0_99], %260 {strides = array<i32>} : memref<16x64xf32, #tpu.memory_space<vmem>>, vector<16x64xf32>,
    %c3_i32 = arith.constant 3 : i32
    %262 = arith.cmpi eq, %arg0, %c3_i32 : i32
    %263 = arith.extui %262 : i1 to i32
    %c0_i32_100 = arith.constant 0 : i32
    %264 = arith.cmpi ne, %263, %c0_i32_100 : i32
    scf.if %264 {
      %c0_101 = arith.constant 0 : index
      %c0_102 = arith.constant 0 : index
      %265 = vector.load %arg17[%c0_101, %c0_102] : memref<16x64xf32, #tpu.memory_space<vmem>>, vector<16x64xf32>
      tpu.vector_store %arg17[%c0_101, %c0_102], %260 {strides = array<i32>} : memref<16x64xf32, #tpu.memory_space<vmem>>, vector<16x64xf32>,
    } else {
    }
    return
  }
  func.func @transform_0(%arg0: i32) -> (i32, i32) {
    %c0_i32 = arith.constant 0 : i32
    %c0_i32_0 = arith.constant 0 : i32
    %c0_i32_1 = arith.constant 0 : i32
    return %c0_i32, %c0_i32_0 : i32, i32
  }
  func.func @transform_1(%arg0: i32) -> (i32, i32) {
    %c0_i32 = arith.constant 0 : i32
    %c0_i32_0 = arith.constant 0 : i32
    %c0_i32_1 = arith.constant 0 : i32
    return %c0_i32, %c0_i32_0 : i32, i32
  }
  func.func @transform_2(%arg0: i32) -> (i32, i32) {
    %c0_i32 = arith.constant 0 : i32
    %c0_i32_0 = arith.constant 0 : i32
    %c0_i32_1 = arith.constant 0 : i32
    return %c0_i32, %c0_i32_0 : i32, i32
  }
  func.func @transform_3(%arg0: i32) -> (i32, i32) {
    %c0_i32 = arith.constant 0 : i32
    %c0_i32_0 = arith.constant 0 : i32
    %c0_i32_1 = arith.constant 0 : i32
    return %c0_i32, %c0_i32_0 : i32, i32
  }
  func.func @transform_4(%arg0: i32) -> (i32, i32, i32) {
    %c0_i32 = arith.constant 0 : i32
    %c0_i32_0 = arith.constant 0 : i32
    %c0_i32_1 = arith.constant 0 : i32
    return %arg0, %c0_i32, %c0_i32_0 : i32, i32, i32
  }
  func.func @transform_5(%arg0: i32) -> (i32, i32, i32) {
    %c0_i32 = arith.constant 0 : i32
    %c0_i32_0 = arith.constant 0 : i32
    %c0_i32_1 = arith.constant 0 : i32
    return %arg0, %c0_i32, %c0_i32_0 : i32, i32, i32
  }
  func.func @transform_6(%arg0: i32) -> (i32, i32, i32) {
    %c0_i32 = arith.constant 0 : i32
    %c0_i32_0 = arith.constant 0 : i32
    %c0_i32_1 = arith.constant 0 : i32
    return %arg0, %c0_i32, %c0_i32_0 : i32, i32, i32
  }
  func.func @transform_7(%arg0: i32) -> (i32, i32, i32) {
    %c0_i32 = arith.constant 0 : i32
    %c0_i32_0 = arith.constant 0 : i32
    %c0_i32_1 = arith.constant 0 : i32
    return %arg0, %c0_i32, %c0_i32_0 : i32, i32, i32
  }
  func.func @transform_8(%arg0: i32) -> (i32, i32, i32) {
    %c0_i32 = arith.constant 0 : i32
    %c0_i32_0 = arith.constant 0 : i32
    %c0_i32_1 = arith.constant 0 : i32
    return %arg0, %c0_i32, %c0_i32_0 : i32, i32, i32
  }
  func.func @transform_9(%arg0: i32) -> (i32, i32, i32) {
    %c0_i32 = arith.constant 0 : i32
    %c0_i32_0 = arith.constant 0 : i32
    %c0_i32_1 = arith.constant 0 : i32
    return %arg0, %c0_i32, %c0_i32_0 : i32, i32, i32
  }
  func.func @transform_10(%arg0: i32) -> (i32, i32, i32) {
    %c0_i32 = arith.constant 0 : i32
    %c0_i32_0 = arith.constant 0 : i32
    %c0_i32_1 = arith.constant 0 : i32
    return %arg0, %c0_i32, %c0_i32_0 : i32, i32, i32
  }
  func.func @transform_11(%arg0: i32) -> (i32, i32, i32) {
    %c0_i32 = arith.constant 0 : i32
    %c0_i32_0 = arith.constant 0 : i32
    %c0_i32_1 = arith.constant 0 : i32
    return %arg0, %c0_i32, %c0_i32_0 : i32, i32, i32
  }
  func.func @transform_12(%arg0: i32) -> (i32, i32, i32) {
    %c0_i32 = arith.constant 0 : i32
    %c0_i32_0 = arith.constant 0 : i32
    %c0_i32_1 = arith.constant 0 : i32
    return %arg0, %c0_i32, %c0_i32_0 : i32, i32, i32
  }
  func.func @transform_13(%arg0: i32) -> (i32, i32, i32) {
    %c0_i32 = arith.constant 0 : i32
    %c0_i32_0 = arith.constant 0 : i32
    %c0_i32_1 = arith.constant 0 : i32
    return %arg0, %c0_i32, %c0_i32_0 : i32, i32, i32
  }
  func.func @transform_14(%arg0: i32) -> (i32, i32, i32) {
    %c0_i32 = arith.constant 0 : i32
    %c0_i32_0 = arith.constant 0 : i32
    %c0_i32_1 = arith.constant 0 : i32
    return %arg0, %c0_i32, %c0_i32_0 : i32, i32, i32
  }
  func.func @transform_15(%arg0: i32) -> (i32, i32, i32) {
    %c0_i32 = arith.constant 0 : i32
    %c0_i32_0 = arith.constant 0 : i32
    %c0_i32_1 = arith.constant 0 : i32
    return %arg0, %c0_i32, %c0_i32_0 : i32, i32, i32
  }
  func.func @transform_16(%arg0: i32) -> (i32, i32) {
    %c0_i32 = arith.constant 0 : i32
    %c0_i32_0 = arith.constant 0 : i32
    %c0_i32_1 = arith.constant 0 : i32
    return %c0_i32, %c0_i32_0 : i32, i32
  }
}

module attributes {stable_mosaic.version = 11 : i64} {
  func.func @_vision_kernel(%arg0: memref<2x3x256xf32, #tpu.memory_space<vmem>>, %arg1: memref<8x3x256xf32, #tpu.memory_space<vmem>>, %arg2: memref<3x256xf32, #tpu.memory_space<vmem>>, %arg3: memref<1x256xf32, #tpu.memory_space<vmem>>, %arg4: memref<256x64xf32, #tpu.memory_space<vmem>>, %arg5: memref<1x64xf32, #tpu.memory_space<vmem>>, %arg6: memref<256x64xf32, #tpu.memory_space<vmem>>, %arg7: memref<1x64xf32, #tpu.memory_space<vmem>>, %arg8: memref<64x64xf32, #tpu.memory_space<vmem>>, %arg9: memref<1x64xf32, #tpu.memory_space<vmem>>, %arg10: memref<2x64xf32, #tpu.memory_space<vmem>>, %arg11: memref<8x64xf32, #tpu.memory_space<vmem>>) attributes {dimension_semantics = [], scalar_prefetch = 0 : i64, scratch_operands = 0 : i64, tpu.core_type = #tpu.core_type<tc>} {
    %c0 = arith.constant 0 : index
    %c0_0 = arith.constant 0 : index
    %c0_1 = arith.constant 0 : index
    %0 = vector.load %arg0[%c0, %c0_0, %c0_1] : memref<2x3x256xf32, #tpu.memory_space<vmem>>, vector<2x3x256xf32>
    %cst = arith.constant dense<0.000000e+00> : vector<2x3xf32>
    %1 = vector.multi_reduction <add>, %0, %cst [2] : vector<2x3x256xf32> to vector<2x3xf32>
    %cst_2 = arith.constant 2.560000e+02 : f32
    %2 = vector.broadcast %cst_2 : f32 to vector<2x3xf32>
    %3 = arith.divf %1, %2 : vector<2x3xf32>
    %c0_3 = arith.constant 0 : index
    %c0_4 = arith.constant 0 : index
    %c0_5 = arith.constant 0 : index
    %4 = vector.load %arg1[%c0_3, %c0_4, %c0_5] : memref<8x3x256xf32, #tpu.memory_space<vmem>>, vector<8x3x256xf32>
    %cst_6 = arith.constant dense<0.000000e+00> : vector<8x3xf32>
    %5 = vector.multi_reduction <add>, %4, %cst_6 [2] : vector<8x3x256xf32> to vector<8x3xf32>
    %cst_7 = arith.constant 2.560000e+02 : f32
    %6 = vector.broadcast %cst_7 : f32 to vector<8x3xf32>
    %7 = arith.divf %5, %6 : vector<8x3xf32>
    %c0_8 = arith.constant 0 : index
    %c0_9 = arith.constant 0 : index
    %8 = vector.load %arg2[%c0_8, %c0_9] : memref<3x256xf32, #tpu.memory_space<vmem>>, vector<3x256xf32>
    %c0_10 = arith.constant 0 : index
    %c0_11 = arith.constant 0 : index
    %9 = vector.load %arg3[%c0_10, %c0_11] : memref<1x256xf32, #tpu.memory_space<vmem>>, vector<1x256xf32>
    %cst_12 = arith.constant dense<0.000000e+00> : vector<2x256xf32>
    %10 = tpu.matmul %3, %8, %cst_12 {dimension_numbers = #tpu.dot_dimension_numbers<[1], [0], [0], [1], [0, 0, 1, 1], [], []>} : vector<2x3xf32>, vector<3x256xf32>, vector<2x256xf32> -> vector<2x256xf32>
    %11 = vector.broadcast %9 : vector<1x256xf32> to vector<2x256xf32>
    %12 = arith.addf %10, %11 : vector<2x256xf32>
    %cst_13 = arith.constant 0.000000e+00 : f32
    %13 = vector.broadcast %cst_13 : f32 to vector<2x256xf32>
    %14 = arith.maximumf %12, %13 : vector<2x256xf32>
    %cst_14 = arith.constant dense<0.000000e+00> : vector<8x256xf32>
    %15 = tpu.matmul %7, %8, %cst_14 {dimension_numbers = #tpu.dot_dimension_numbers<[1], [0], [0], [1], [0, 0, 1, 1], [], []>} : vector<8x3xf32>, vector<3x256xf32>, vector<8x256xf32> -> vector<8x256xf32>
    %16 = vector.broadcast %9 : vector<1x256xf32> to vector<8x256xf32>
    %17 = arith.addf %15, %16 : vector<8x256xf32>
    %cst_15 = arith.constant 0.000000e+00 : f32
    %18 = vector.broadcast %cst_15 : f32 to vector<8x256xf32>
    %19 = arith.maximumf %17, %18 : vector<8x256xf32>
    %c0_16 = arith.constant 0 : index
    %c0_17 = arith.constant 0 : index
    %20 = vector.load %arg4[%c0_16, %c0_17] : memref<256x64xf32, #tpu.memory_space<vmem>>, vector<256x64xf32>
    %cst_18 = arith.constant dense<0.000000e+00> : vector<2x64xf32>
    %21 = tpu.matmul %14, %20, %cst_18 {dimension_numbers = #tpu.dot_dimension_numbers<[1], [0], [0], [1], [0, 0, 1, 1], [], []>} : vector<2x256xf32>, vector<256x64xf32>, vector<2x64xf32> -> vector<2x64xf32>
    %c0_19 = arith.constant 0 : index
    %c0_20 = arith.constant 0 : index
    %22 = vector.load %arg5[%c0_19, %c0_20] : memref<1x64xf32, #tpu.memory_space<vmem>>, vector<1x64xf32>
    %23 = vector.broadcast %22 : vector<1x64xf32> to vector<2x64xf32>
    %24 = arith.addf %21, %23 : vector<2x64xf32>
    %c0_21 = arith.constant 0 : index
    %c0_22 = arith.constant 0 : index
    %25 = vector.load %arg10[%c0_21, %c0_22] : memref<2x64xf32, #tpu.memory_space<vmem>>, vector<2x64xf32>
    tpu.vector_store %arg10[%c0_21, %c0_22], %24 {strides = array<i32>} : memref<2x64xf32, #tpu.memory_space<vmem>>, vector<2x64xf32>,
    %c0_23 = arith.constant 0 : index
    %c0_24 = arith.constant 0 : index
    %26 = vector.load %arg6[%c0_23, %c0_24] : memref<256x64xf32, #tpu.memory_space<vmem>>, vector<256x64xf32>
    %cst_25 = arith.constant dense<0.000000e+00> : vector<8x64xf32>
    %27 = tpu.matmul %19, %26, %cst_25 {dimension_numbers = #tpu.dot_dimension_numbers<[1], [0], [0], [1], [0, 0, 1, 1], [], []>} : vector<8x256xf32>, vector<256x64xf32>, vector<8x64xf32> -> vector<8x64xf32>
    %c0_26 = arith.constant 0 : index
    %c0_27 = arith.constant 0 : index
    %28 = vector.load %arg7[%c0_26, %c0_27] : memref<1x64xf32, #tpu.memory_space<vmem>>, vector<1x64xf32>
    %29 = vector.broadcast %28 : vector<1x64xf32> to vector<8x64xf32>
    %30 = arith.addf %27, %29 : vector<8x64xf32>
    %31 = math.tanh %30 : vector<8x64xf32>
    %c0_28 = arith.constant 0 : index
    %c0_29 = arith.constant 0 : index
    %32 = vector.load %arg8[%c0_28, %c0_29] : memref<64x64xf32, #tpu.memory_space<vmem>>, vector<64x64xf32>
    %cst_30 = arith.constant dense<0.000000e+00> : vector<8x64xf32>
    %33 = tpu.matmul %31, %32, %cst_30 {dimension_numbers = #tpu.dot_dimension_numbers<[1], [0], [0], [1], [0, 0, 1, 1], [], []>} : vector<8x64xf32>, vector<64x64xf32>, vector<8x64xf32> -> vector<8x64xf32>
    %c0_31 = arith.constant 0 : index
    %c0_32 = arith.constant 0 : index
    %34 = vector.load %arg9[%c0_31, %c0_32] : memref<1x64xf32, #tpu.memory_space<vmem>>, vector<1x64xf32>
    %35 = vector.broadcast %34 : vector<1x64xf32> to vector<8x64xf32>
    %36 = arith.addf %33, %35 : vector<8x64xf32>
    %c0_33 = arith.constant 0 : index
    %c0_34 = arith.constant 0 : index
    %37 = vector.load %arg11[%c0_33, %c0_34] : memref<8x64xf32, #tpu.memory_space<vmem>>, vector<8x64xf32>
    tpu.vector_store %arg11[%c0_33, %c0_34], %36 {strides = array<i32>} : memref<8x64xf32, #tpu.memory_space<vmem>>, vector<8x64xf32>,
    return
  }
}

module attributes {stable_mosaic.version = 11 : i64} {
  func.func @_head_kernel(%arg0: memref<16x64xf32, #tpu.memory_space<vmem>>, %arg1: memref<4x64xf32, #tpu.memory_space<vmem>>, %arg2: memref<2x64xf32, #tpu.memory_space<vmem>>, %arg3: memref<8x64xf32, #tpu.memory_space<vmem>>, %arg4: memref<8x64xf32, #tpu.memory_space<vmem>>, %arg5: memref<64x64xf32, #tpu.memory_space<vmem>>, %arg6: memref<1x64xf32, #tpu.memory_space<vmem>>, %arg7: memref<3x64x64xf32, #tpu.memory_space<vmem>>, %arg8: memref<1x3xf32, #tpu.memory_space<vmem>>, %arg9: memref<4x64x64xf32, #tpu.memory_space<vmem>>, %arg10: memref<4x64xf32, #tpu.memory_space<vmem>>, %arg11: memref<4x64x64xf32, #tpu.memory_space<vmem>>, %arg12: memref<4x64xf32, #tpu.memory_space<vmem>>, %arg13: memref<4x64x64xf32, #tpu.memory_space<vmem>>, %arg14: memref<4x64xf32, #tpu.memory_space<vmem>>, %arg15: memref<128x64xf32, #tpu.memory_space<vmem>>, %arg16: memref<1x64xf32, #tpu.memory_space<vmem>>, %arg17: memref<64x128xf32, #tpu.memory_space<vmem>>, %arg18: memref<1x128xf32, #tpu.memory_space<vmem>>, %arg19: memref<16x128xf32, #tpu.memory_space<vmem>>, %arg20: memref<8x128xf32, #tpu.memory_space<vmem>>) attributes {dimension_semantics = [], scalar_prefetch = 0 : i64, scratch_operands = 0 : i64, tpu.core_type = #tpu.core_type<tc>} {
    %c0 = arith.constant 0 : index
    %c0_0 = arith.constant 0 : index
    %0 = vector.load %arg0[%c0, %c0_0] : memref<16x64xf32, #tpu.memory_space<vmem>>, vector<16x64xf32>
    %c0_1 = arith.constant 0 : index
    %c0_2 = arith.constant 0 : index
    %1 = vector.load %arg1[%c0_1, %c0_2] : memref<4x64xf32, #tpu.memory_space<vmem>>, vector<4x64xf32>
    %c0_3 = arith.constant 0 : index
    %c0_4 = arith.constant 0 : index
    %2 = vector.load %arg2[%c0_3, %c0_4] : memref<2x64xf32, #tpu.memory_space<vmem>>, vector<2x64xf32>
    %c0_5 = arith.constant 0 : index
    %c0_6 = arith.constant 0 : index
    %3 = vector.load %arg3[%c0_5, %c0_6] : memref<8x64xf32, #tpu.memory_space<vmem>>, vector<8x64xf32>
    %c0_7 = arith.constant 0 : index
    %c0_8 = arith.constant 0 : index
    %4 = vector.load %arg4[%c0_7, %c0_8] : memref<8x64xf32, #tpu.memory_space<vmem>>, vector<8x64xf32>
    %5 = vector.extract_strided_slice %0 {offsets = [0, 0], sizes = [1, 64], strides = [1, 1]} : vector<16x64xf32> to vector<1x64xf32>
    %6 = vector.extract_strided_slice %0 {offsets = [8, 0], sizes = [1, 64], strides = [1, 1]} : vector<16x64xf32> to vector<1x64xf32>
    %7 = tpu.concatenate %5, %6 in 0 : vector<1x64xf32>, vector<1x64xf32> -> vector<2x64xf32>
    %c0_9 = arith.constant 0 : index
    %c0_10 = arith.constant 0 : index
    %8 = vector.load %arg5[%c0_9, %c0_10] : memref<64x64xf32, #tpu.memory_space<vmem>>, vector<64x64xf32>
    %cst = arith.constant dense<0.000000e+00> : vector<2x64xf32>
    %9 = tpu.matmul %7, %8, %cst {dimension_numbers = #tpu.dot_dimension_numbers<[1], [0], [0], [1], [0, 0, 1, 1], [], []>} : vector<2x64xf32>, vector<64x64xf32>, vector<2x64xf32> -> vector<2x64xf32>
    %c0_11 = arith.constant 0 : index
    %c0_12 = arith.constant 0 : index
    %10 = vector.load %arg6[%c0_11, %c0_12] : memref<1x64xf32, #tpu.memory_space<vmem>>, vector<1x64xf32>
    %11 = vector.broadcast %10 : vector<1x64xf32> to vector<2x64xf32>
    %12 = arith.addf %9, %11 : vector<2x64xf32>
    %13 = math.tanh %12 : vector<2x64xf32>
    %c0_13 = arith.constant 0 : index
    %c0_14 = arith.constant 0 : index
    %c0_15 = arith.constant 0 : index
    %14 = vector.load %arg7[%c0_13, %c0_14, %c0_15] : memref<3x64x64xf32, #tpu.memory_space<vmem>>, vector<1x64x64xf32>
    %15 = vector.shape_cast %14 : vector<1x64x64xf32> to vector<64x64xf32>
    %c0_16 = arith.constant 0 : index
    %c0_17 = arith.constant 0 : index
    %16 = vector.load %arg8[%c0_16, %c0_17] : memref<1x3xf32, #tpu.memory_space<vmem>>, vector<1x1xf32>
    %cst_18 = arith.constant dense<0.000000e+00> : vector<2x64xf32>
    %17 = tpu.matmul %2, %15, %cst_18 {dimension_numbers = #tpu.dot_dimension_numbers<[1], [0], [0], [1], [0, 0, 1, 1], [], []>} : vector<2x64xf32>, vector<64x64xf32>, vector<2x64xf32> -> vector<2x64xf32>
    %18 = arith.mulf %17, %13 : vector<2x64xf32>
    %cst_19 = arith.constant dense<0.000000e+00> : vector<2xf32>
    %19 = vector.multi_reduction <add>, %18, %cst_19 [1] : vector<2x64xf32> to vector<2xf32>
    %20 = vector.shape_cast %19 : vector<2xf32> to vector<2x1xf32>
    %21 = vector.broadcast %16 : vector<1x1xf32> to vector<2x1xf32>
    %22 = arith.addf %20, %21 : vector<2x1xf32>
    %c1 = arith.constant 1 : index
    %c0_20 = arith.constant 0 : index
    %c0_21 = arith.constant 0 : index
    %23 = vector.load %arg7[%c1, %c0_20, %c0_21] : memref<3x64x64xf32, #tpu.memory_space<vmem>>, vector<1x64x64xf32>
    %24 = vector.shape_cast %23 : vector<1x64x64xf32> to vector<64x64xf32>
    %c0_22 = arith.constant 0 : index
    %c1_23 = arith.constant 1 : index
    %25 = vector.load %arg8[%c0_22, %c1_23] : memref<1x3xf32, #tpu.memory_space<vmem>>, vector<1x1xf32>
    %cst_24 = arith.constant dense<0.000000e+00> : vector<2x64xf32>
    %26 = tpu.matmul %13, %24, %cst_24 {dimension_numbers = #tpu.dot_dimension_numbers<[1], [0], [0], [1], [0, 0, 1, 1], [], []>} : vector<2x64xf32>, vector<64x64xf32>, vector<2x64xf32> -> vector<2x64xf32>
    %27 = arith.mulf %26, %2 : vector<2x64xf32>
    %cst_25 = arith.constant dense<0.000000e+00> : vector<2xf32>
    %28 = vector.multi_reduction <add>, %27, %cst_25 [1] : vector<2x64xf32> to vector<2xf32>
    %29 = vector.shape_cast %28 : vector<2xf32> to vector<2x1xf32>
    %30 = vector.broadcast %25 : vector<1x1xf32> to vector<2x1xf32>
    %31 = arith.addf %29, %30 : vector<2x1xf32>
    %c0_26 = arith.constant 0 : index
    %c0_27 = arith.constant 0 : index
    %c0_28 = arith.constant 0 : index
    %32 = vector.load %arg9[%c0_26, %c0_27, %c0_28] : memref<4x64x64xf32, #tpu.memory_space<vmem>>, vector<1x64x64xf32>
    %33 = vector.shape_cast %32 : vector<1x64x64xf32> to vector<64x64xf32>
    %c1_29 = arith.constant 1 : index
    %c0_30 = arith.constant 0 : index
    %c0_31 = arith.constant 0 : index
    %34 = vector.load %arg9[%c1_29, %c0_30, %c0_31] : memref<4x64x64xf32, #tpu.memory_space<vmem>>, vector<1x64x64xf32>
    %35 = vector.shape_cast %34 : vector<1x64x64xf32> to vector<64x64xf32>
    %c2 = arith.constant 2 : index
    %c0_32 = arith.constant 0 : index
    %c0_33 = arith.constant 0 : index
    %36 = vector.load %arg9[%c2, %c0_32, %c0_33] : memref<4x64x64xf32, #tpu.memory_space<vmem>>, vector<1x64x64xf32>
    %37 = vector.shape_cast %36 : vector<1x64x64xf32> to vector<64x64xf32>
    %c3 = arith.constant 3 : index
    %c0_34 = arith.constant 0 : index
    %c0_35 = arith.constant 0 : index
    %38 = vector.load %arg9[%c3, %c0_34, %c0_35] : memref<4x64x64xf32, #tpu.memory_space<vmem>>, vector<1x64x64xf32>
    %39 = vector.shape_cast %38 : vector<1x64x64xf32> to vector<64x64xf32>
    %c0_36 = arith.constant 0 : index
    %c0_37 = arith.constant 0 : index
    %40 = vector.load %arg10[%c0_36, %c0_37] : memref<4x64xf32, #tpu.memory_space<vmem>>, vector<1x64xf32>
    %c1_38 = arith.constant 1 : index
    %c0_39 = arith.constant 0 : index
    %41 = vector.load %arg10[%c1_38, %c0_39] : memref<4x64xf32, #tpu.memory_space<vmem>>, vector<1x64xf32>
    %c2_40 = arith.constant 2 : index
    %c0_41 = arith.constant 0 : index
    %42 = vector.load %arg10[%c2_40, %c0_41] : memref<4x64xf32, #tpu.memory_space<vmem>>, vector<1x64xf32>
    %c3_42 = arith.constant 3 : index
    %c0_43 = arith.constant 0 : index
    %43 = vector.load %arg10[%c3_42, %c0_43] : memref<4x64xf32, #tpu.memory_space<vmem>>, vector<1x64xf32>
    %cst_44 = arith.constant dense<0.000000e+00> : vector<4x64xf32>
    %44 = tpu.matmul %1, %33, %cst_44 {dimension_numbers = #tpu.dot_dimension_numbers<[1], [0], [0], [1], [0, 0, 1, 1], [], []>} : vector<4x64xf32>, vector<64x64xf32>, vector<4x64xf32> -> vector<4x64xf32>
    %45 = vector.broadcast %40 : vector<1x64xf32> to vector<4x64xf32>
    %46 = arith.addf %44, %45 : vector<4x64xf32>
    %cst_45 = arith.constant dense<0.000000e+00> : vector<16x64xf32>
    %47 = tpu.matmul %0, %35, %cst_45 {dimension_numbers = #tpu.dot_dimension_numbers<[1], [0], [0], [1], [0, 0, 1, 1], [], []>} : vector<16x64xf32>, vector<64x64xf32>, vector<16x64xf32> -> vector<16x64xf32>
    %48 = vector.broadcast %41 : vector<1x64xf32> to vector<16x64xf32>
    %49 = arith.addf %47, %48 : vector<16x64xf32>
    %cst_46 = arith.constant dense<0.000000e+00> : vector<16x64xf32>
    %50 = tpu.matmul %0, %37, %cst_46 {dimension_numbers = #tpu.dot_dimension_numbers<[1], [0], [0], [1], [0, 0, 1, 1], [], []>} : vector<16x64xf32>, vector<64x64xf32>, vector<16x64xf32> -> vector<16x64xf32>
    %51 = vector.broadcast %42 : vector<1x64xf32> to vector<16x64xf32>
    %52 = arith.addf %50, %51 : vector<16x64xf32>
    %53 = vector.extract_strided_slice %49 {offsets = [0, 0], sizes = [8, 64], strides = [1, 1]} : vector<16x64xf32> to vector<8x64xf32>
    %54 = vector.extract_strided_slice %52 {offsets = [0, 0], sizes = [8, 64], strides = [1, 1]} : vector<16x64xf32> to vector<8x64xf32>
    %55 = vector.extract_strided_slice %46 {offsets = [0, 0], sizes = [4, 16], strides = [1, 1]} : vector<4x64xf32> to vector<4x16xf32>
    %56 = vector.extract_strided_slice %53 {offsets = [0, 0], sizes = [8, 16], strides = [1, 1]} : vector<8x64xf32> to vector<8x16xf32>
    %57 = vector.extract_strided_slice %54 {offsets = [0, 0], sizes = [8, 16], strides = [1, 1]} : vector<8x64xf32> to vector<8x16xf32>
    %cst_47 = arith.constant dense<0.000000e+00> : vector<4x8xf32>
    %58 = tpu.matmul %55, %56, %cst_47 {dimension_numbers = #tpu.dot_dimension_numbers<[1], [1], [0], [0], [0, 0, 1, 0], [], []>} : vector<4x16xf32>, vector<8x16xf32>, vector<4x8xf32> -> vector<4x8xf32>
    %cst_48 = arith.constant 2.500000e-01 : f32
    %59 = vector.broadcast %cst_48 : f32 to vector<4x8xf32>
    %60 = arith.mulf %58, %59 : vector<4x8xf32>
    %cst_49 = arith.constant dense<0xFF800000> : vector<4xf32>
    %61 = vector.multi_reduction <maximumf>, %60, %cst_49 [1] : vector<4x8xf32> to vector<4xf32>
    %62 = vector.shape_cast %61 : vector<4xf32> to vector<4x1xf32>
    %63 = vector.broadcast %62 : vector<4x1xf32> to vector<4x8xf32>
    %64 = arith.subf %60, %63 : vector<4x8xf32>
    %65 = math.exp %64 : vector<4x8xf32>
    %cst_50 = arith.constant dense<0.000000e+00> : vector<4xf32>
    %66 = vector.multi_reduction <add>, %65, %cst_50 [1] : vector<4x8xf32> to vector<4xf32>
    %67 = vector.shape_cast %66 : vector<4xf32> to vector<4x1xf32>
    %68 = tpu.reciprocal %67 {approx = true} : vector<4x1xf32> -> vector<4x1xf32>
    %69 = vector.broadcast %68 : vector<4x1xf32> to vector<4x8xf32>
    %70 = arith.mulf %65, %69 : vector<4x8xf32>
    %cst_51 = arith.constant dense<0.000000e+00> : vector<4x16xf32>
    %71 = tpu.matmul %70, %57, %cst_51 {dimension_numbers = #tpu.dot_dimension_numbers<[1], [0], [0], [1], [0, 0, 1, 1], [], []>} : vector<4x8xf32>, vector<8x16xf32>, vector<4x16xf32> -> vector<4x16xf32>
    %72 = vector.extract_strided_slice %46 {offsets = [0, 16], sizes = [4, 16], strides = [1, 1]} : vector<4x64xf32> to vector<4x16xf32>
    %73 = vector.extract_strided_slice %53 {offsets = [0, 16], sizes = [8, 16], strides = [1, 1]} : vector<8x64xf32> to vector<8x16xf32>
    %74 = vector.extract_strided_slice %54 {offsets = [0, 16], sizes = [8, 16], strides = [1, 1]} : vector<8x64xf32> to vector<8x16xf32>
    %cst_52 = arith.constant dense<0.000000e+00> : vector<4x8xf32>
    %75 = tpu.matmul %72, %73, %cst_52 {dimension_numbers = #tpu.dot_dimension_numbers<[1], [1], [0], [0], [0, 0, 1, 0], [], []>} : vector<4x16xf32>, vector<8x16xf32>, vector<4x8xf32> -> vector<4x8xf32>
    %cst_53 = arith.constant 2.500000e-01 : f32
    %76 = vector.broadcast %cst_53 : f32 to vector<4x8xf32>
    %77 = arith.mulf %75, %76 : vector<4x8xf32>
    %cst_54 = arith.constant dense<0xFF800000> : vector<4xf32>
    %78 = vector.multi_reduction <maximumf>, %77, %cst_54 [1] : vector<4x8xf32> to vector<4xf32>
    %79 = vector.shape_cast %78 : vector<4xf32> to vector<4x1xf32>
    %80 = vector.broadcast %79 : vector<4x1xf32> to vector<4x8xf32>
    %81 = arith.subf %77, %80 : vector<4x8xf32>
    %82 = math.exp %81 : vector<4x8xf32>
    %cst_55 = arith.constant dense<0.000000e+00> : vector<4xf32>
    %83 = vector.multi_reduction <add>, %82, %cst_55 [1] : vector<4x8xf32> to vector<4xf32>
    %84 = vector.shape_cast %83 : vector<4xf32> to vector<4x1xf32>
    %85 = tpu.reciprocal %84 {approx = true} : vector<4x1xf32> -> vector<4x1xf32>
    %86 = vector.broadcast %85 : vector<4x1xf32> to vector<4x8xf32>
    %87 = arith.mulf %82, %86 : vector<4x8xf32>
    %cst_56 = arith.constant dense<0.000000e+00> : vector<4x16xf32>
    %88 = tpu.matmul %87, %74, %cst_56 {dimension_numbers = #tpu.dot_dimension_numbers<[1], [0], [0], [1], [0, 0, 1, 1], [], []>} : vector<4x8xf32>, vector<8x16xf32>, vector<4x16xf32> -> vector<4x16xf32>
    %89 = vector.extract_strided_slice %46 {offsets = [0, 32], sizes = [4, 16], strides = [1, 1]} : vector<4x64xf32> to vector<4x16xf32>
    %90 = vector.extract_strided_slice %53 {offsets = [0, 32], sizes = [8, 16], strides = [1, 1]} : vector<8x64xf32> to vector<8x16xf32>
    %91 = vector.extract_strided_slice %54 {offsets = [0, 32], sizes = [8, 16], strides = [1, 1]} : vector<8x64xf32> to vector<8x16xf32>
    %cst_57 = arith.constant dense<0.000000e+00> : vector<4x8xf32>
    %92 = tpu.matmul %89, %90, %cst_57 {dimension_numbers = #tpu.dot_dimension_numbers<[1], [1], [0], [0], [0, 0, 1, 0], [], []>} : vector<4x16xf32>, vector<8x16xf32>, vector<4x8xf32> -> vector<4x8xf32>
    %cst_58 = arith.constant 2.500000e-01 : f32
    %93 = vector.broadcast %cst_58 : f32 to vector<4x8xf32>
    %94 = arith.mulf %92, %93 : vector<4x8xf32>
    %cst_59 = arith.constant dense<0xFF800000> : vector<4xf32>
    %95 = vector.multi_reduction <maximumf>, %94, %cst_59 [1] : vector<4x8xf32> to vector<4xf32>
    %96 = vector.shape_cast %95 : vector<4xf32> to vector<4x1xf32>
    %97 = vector.broadcast %96 : vector<4x1xf32> to vector<4x8xf32>
    %98 = arith.subf %94, %97 : vector<4x8xf32>
    %99 = math.exp %98 : vector<4x8xf32>
    %cst_60 = arith.constant dense<0.000000e+00> : vector<4xf32>
    %100 = vector.multi_reduction <add>, %99, %cst_60 [1] : vector<4x8xf32> to vector<4xf32>
    %101 = vector.shape_cast %100 : vector<4xf32> to vector<4x1xf32>
    %102 = tpu.reciprocal %101 {approx = true} : vector<4x1xf32> -> vector<4x1xf32>
    %103 = vector.broadcast %102 : vector<4x1xf32> to vector<4x8xf32>
    %104 = arith.mulf %99, %103 : vector<4x8xf32>
    %cst_61 = arith.constant dense<0.000000e+00> : vector<4x16xf32>
    %105 = tpu.matmul %104, %91, %cst_61 {dimension_numbers = #tpu.dot_dimension_numbers<[1], [0], [0], [1], [0, 0, 1, 1], [], []>} : vector<4x8xf32>, vector<8x16xf32>, vector<4x16xf32> -> vector<4x16xf32>
    %106 = vector.extract_strided_slice %46 {offsets = [0, 48], sizes = [4, 16], strides = [1, 1]} : vector<4x64xf32> to vector<4x16xf32>
    %107 = vector.extract_strided_slice %53 {offsets = [0, 48], sizes = [8, 16], strides = [1, 1]} : vector<8x64xf32> to vector<8x16xf32>
    %108 = vector.extract_strided_slice %54 {offsets = [0, 48], sizes = [8, 16], strides = [1, 1]} : vector<8x64xf32> to vector<8x16xf32>
    %cst_62 = arith.constant dense<0.000000e+00> : vector<4x8xf32>
    %109 = tpu.matmul %106, %107, %cst_62 {dimension_numbers = #tpu.dot_dimension_numbers<[1], [1], [0], [0], [0, 0, 1, 0], [], []>} : vector<4x16xf32>, vector<8x16xf32>, vector<4x8xf32> -> vector<4x8xf32>
    %cst_63 = arith.constant 2.500000e-01 : f32
    %110 = vector.broadcast %cst_63 : f32 to vector<4x8xf32>
    %111 = arith.mulf %109, %110 : vector<4x8xf32>
    %cst_64 = arith.constant dense<0xFF800000> : vector<4xf32>
    %112 = vector.multi_reduction <maximumf>, %111, %cst_64 [1] : vector<4x8xf32> to vector<4xf32>
    %113 = vector.shape_cast %112 : vector<4xf32> to vector<4x1xf32>
    %114 = vector.broadcast %113 : vector<4x1xf32> to vector<4x8xf32>
    %115 = arith.subf %111, %114 : vector<4x8xf32>
    %116 = math.exp %115 : vector<4x8xf32>
    %cst_65 = arith.constant dense<0.000000e+00> : vector<4xf32>
    %117 = vector.multi_reduction <add>, %116, %cst_65 [1] : vector<4x8xf32> to vector<4xf32>
    %118 = vector.shape_cast %117 : vector<4xf32> to vector<4x1xf32>
    %119 = tpu.reciprocal %118 {approx = true} : vector<4x1xf32> -> vector<4x1xf32>
    %120 = vector.broadcast %119 : vector<4x1xf32> to vector<4x8xf32>
    %121 = arith.mulf %116, %120 : vector<4x8xf32>
    %cst_66 = arith.constant dense<0.000000e+00> : vector<4x16xf32>
    %122 = tpu.matmul %121, %108, %cst_66 {dimension_numbers = #tpu.dot_dimension_numbers<[1], [0], [0], [1], [0, 0, 1, 1], [], []>} : vector<4x8xf32>, vector<8x16xf32>, vector<4x16xf32> -> vector<4x16xf32>
    %123 = tpu.concatenate %71, %88, %105, %122 in 1 : vector<4x16xf32>, vector<4x16xf32>, vector<4x16xf32>, vector<4x16xf32> -> vector<4x64xf32>
    %124 = vector.extract_strided_slice %49 {offsets = [8, 0], sizes = [8, 64], strides = [1, 1]} : vector<16x64xf32> to vector<8x64xf32>
    %125 = vector.extract_strided_slice %52 {offsets = [8, 0], sizes = [8, 64], strides = [1, 1]} : vector<16x64xf32> to vector<8x64xf32>
    %126 = vector.extract_strided_slice %46 {offsets = [0, 0], sizes = [4, 16], strides = [1, 1]} : vector<4x64xf32> to vector<4x16xf32>
    %127 = vector.extract_strided_slice %124 {offsets = [0, 0], sizes = [8, 16], strides = [1, 1]} : vector<8x64xf32> to vector<8x16xf32>
    %128 = vector.extract_strided_slice %125 {offsets = [0, 0], sizes = [8, 16], strides = [1, 1]} : vector<8x64xf32> to vector<8x16xf32>
    %cst_67 = arith.constant dense<0.000000e+00> : vector<4x8xf32>
    %129 = tpu.matmul %126, %127, %cst_67 {dimension_numbers = #tpu.dot_dimension_numbers<[1], [1], [0], [0], [0, 0, 1, 0], [], []>} : vector<4x16xf32>, vector<8x16xf32>, vector<4x8xf32> -> vector<4x8xf32>
    %cst_68 = arith.constant 2.500000e-01 : f32
    %130 = vector.broadcast %cst_68 : f32 to vector<4x8xf32>
    %131 = arith.mulf %129, %130 : vector<4x8xf32>
    %cst_69 = arith.constant dense<0xFF800000> : vector<4xf32>
    %132 = vector.multi_reduction <maximumf>, %131, %cst_69 [1] : vector<4x8xf32> to vector<4xf32>
    %133 = vector.shape_cast %132 : vector<4xf32> to vector<4x1xf32>
    %134 = vector.broadcast %133 : vector<4x1xf32> to vector<4x8xf32>
    %135 = arith.subf %131, %134 : vector<4x8xf32>
    %136 = math.exp %135 : vector<4x8xf32>
    %cst_70 = arith.constant dense<0.000000e+00> : vector<4xf32>
    %137 = vector.multi_reduction <add>, %136, %cst_70 [1] : vector<4x8xf32> to vector<4xf32>
    %138 = vector.shape_cast %137 : vector<4xf32> to vector<4x1xf32>
    %139 = tpu.reciprocal %138 {approx = true} : vector<4x1xf32> -> vector<4x1xf32>
    %140 = vector.broadcast %139 : vector<4x1xf32> to vector<4x8xf32>
    %141 = arith.mulf %136, %140 : vector<4x8xf32>
    %cst_71 = arith.constant dense<0.000000e+00> : vector<4x16xf32>
    %142 = tpu.matmul %141, %128, %cst_71 {dimension_numbers = #tpu.dot_dimension_numbers<[1], [0], [0], [1], [0, 0, 1, 1], [], []>} : vector<4x8xf32>, vector<8x16xf32>, vector<4x16xf32> -> vector<4x16xf32>
    %143 = vector.extract_strided_slice %46 {offsets = [0, 16], sizes = [4, 16], strides = [1, 1]} : vector<4x64xf32> to vector<4x16xf32>
    %144 = vector.extract_strided_slice %124 {offsets = [0, 16], sizes = [8, 16], strides = [1, 1]} : vector<8x64xf32> to vector<8x16xf32>
    %145 = vector.extract_strided_slice %125 {offsets = [0, 16], sizes = [8, 16], strides = [1, 1]} : vector<8x64xf32> to vector<8x16xf32>
    %cst_72 = arith.constant dense<0.000000e+00> : vector<4x8xf32>
    %146 = tpu.matmul %143, %144, %cst_72 {dimension_numbers = #tpu.dot_dimension_numbers<[1], [1], [0], [0], [0, 0, 1, 0], [], []>} : vector<4x16xf32>, vector<8x16xf32>, vector<4x8xf32> -> vector<4x8xf32>
    %cst_73 = arith.constant 2.500000e-01 : f32
    %147 = vector.broadcast %cst_73 : f32 to vector<4x8xf32>
    %148 = arith.mulf %146, %147 : vector<4x8xf32>
    %cst_74 = arith.constant dense<0xFF800000> : vector<4xf32>
    %149 = vector.multi_reduction <maximumf>, %148, %cst_74 [1] : vector<4x8xf32> to vector<4xf32>
    %150 = vector.shape_cast %149 : vector<4xf32> to vector<4x1xf32>
    %151 = vector.broadcast %150 : vector<4x1xf32> to vector<4x8xf32>
    %152 = arith.subf %148, %151 : vector<4x8xf32>
    %153 = math.exp %152 : vector<4x8xf32>
    %cst_75 = arith.constant dense<0.000000e+00> : vector<4xf32>
    %154 = vector.multi_reduction <add>, %153, %cst_75 [1] : vector<4x8xf32> to vector<4xf32>
    %155 = vector.shape_cast %154 : vector<4xf32> to vector<4x1xf32>
    %156 = tpu.reciprocal %155 {approx = true} : vector<4x1xf32> -> vector<4x1xf32>
    %157 = vector.broadcast %156 : vector<4x1xf32> to vector<4x8xf32>
    %158 = arith.mulf %153, %157 : vector<4x8xf32>
    %cst_76 = arith.constant dense<0.000000e+00> : vector<4x16xf32>
    %159 = tpu.matmul %158, %145, %cst_76 {dimension_numbers = #tpu.dot_dimension_numbers<[1], [0], [0], [1], [0, 0, 1, 1], [], []>} : vector<4x8xf32>, vector<8x16xf32>, vector<4x16xf32> -> vector<4x16xf32>
    %160 = vector.extract_strided_slice %46 {offsets = [0, 32], sizes = [4, 16], strides = [1, 1]} : vector<4x64xf32> to vector<4x16xf32>
    %161 = vector.extract_strided_slice %124 {offsets = [0, 32], sizes = [8, 16], strides = [1, 1]} : vector<8x64xf32> to vector<8x16xf32>
    %162 = vector.extract_strided_slice %125 {offsets = [0, 32], sizes = [8, 16], strides = [1, 1]} : vector<8x64xf32> to vector<8x16xf32>
    %cst_77 = arith.constant dense<0.000000e+00> : vector<4x8xf32>
    %163 = tpu.matmul %160, %161, %cst_77 {dimension_numbers = #tpu.dot_dimension_numbers<[1], [1], [0], [0], [0, 0, 1, 0], [], []>} : vector<4x16xf32>, vector<8x16xf32>, vector<4x8xf32> -> vector<4x8xf32>
    %cst_78 = arith.constant 2.500000e-01 : f32
    %164 = vector.broadcast %cst_78 : f32 to vector<4x8xf32>
    %165 = arith.mulf %163, %164 : vector<4x8xf32>
    %cst_79 = arith.constant dense<0xFF800000> : vector<4xf32>
    %166 = vector.multi_reduction <maximumf>, %165, %cst_79 [1] : vector<4x8xf32> to vector<4xf32>
    %167 = vector.shape_cast %166 : vector<4xf32> to vector<4x1xf32>
    %168 = vector.broadcast %167 : vector<4x1xf32> to vector<4x8xf32>
    %169 = arith.subf %165, %168 : vector<4x8xf32>
    %170 = math.exp %169 : vector<4x8xf32>
    %cst_80 = arith.constant dense<0.000000e+00> : vector<4xf32>
    %171 = vector.multi_reduction <add>, %170, %cst_80 [1] : vector<4x8xf32> to vector<4xf32>
    %172 = vector.shape_cast %171 : vector<4xf32> to vector<4x1xf32>
    %173 = tpu.reciprocal %172 {approx = true} : vector<4x1xf32> -> vector<4x1xf32>
    %174 = vector.broadcast %173 : vector<4x1xf32> to vector<4x8xf32>
    %175 = arith.mulf %170, %174 : vector<4x8xf32>
    %cst_81 = arith.constant dense<0.000000e+00> : vector<4x16xf32>
    %176 = tpu.matmul %175, %162, %cst_81 {dimension_numbers = #tpu.dot_dimension_numbers<[1], [0], [0], [1], [0, 0, 1, 1], [], []>} : vector<4x8xf32>, vector<8x16xf32>, vector<4x16xf32> -> vector<4x16xf32>
    %177 = vector.extract_strided_slice %46 {offsets = [0, 48], sizes = [4, 16], strides = [1, 1]} : vector<4x64xf32> to vector<4x16xf32>
    %178 = vector.extract_strided_slice %124 {offsets = [0, 48], sizes = [8, 16], strides = [1, 1]} : vector<8x64xf32> to vector<8x16xf32>
    %179 = vector.extract_strided_slice %125 {offsets = [0, 48], sizes = [8, 16], strides = [1, 1]} : vector<8x64xf32> to vector<8x16xf32>
    %cst_82 = arith.constant dense<0.000000e+00> : vector<4x8xf32>
    %180 = tpu.matmul %177, %178, %cst_82 {dimension_numbers = #tpu.dot_dimension_numbers<[1], [1], [0], [0], [0, 0, 1, 0], [], []>} : vector<4x16xf32>, vector<8x16xf32>, vector<4x8xf32> -> vector<4x8xf32>
    %cst_83 = arith.constant 2.500000e-01 : f32
    %181 = vector.broadcast %cst_83 : f32 to vector<4x8xf32>
    %182 = arith.mulf %180, %181 : vector<4x8xf32>
    %cst_84 = arith.constant dense<0xFF800000> : vector<4xf32>
    %183 = vector.multi_reduction <maximumf>, %182, %cst_84 [1] : vector<4x8xf32> to vector<4xf32>
    %184 = vector.shape_cast %183 : vector<4xf32> to vector<4x1xf32>
    %185 = vector.broadcast %184 : vector<4x1xf32> to vector<4x8xf32>
    %186 = arith.subf %182, %185 : vector<4x8xf32>
    %187 = math.exp %186 : vector<4x8xf32>
    %cst_85 = arith.constant dense<0.000000e+00> : vector<4xf32>
    %188 = vector.multi_reduction <add>, %187, %cst_85 [1] : vector<4x8xf32> to vector<4xf32>
    %189 = vector.shape_cast %188 : vector<4xf32> to vector<4x1xf32>
    %190 = tpu.reciprocal %189 {approx = true} : vector<4x1xf32> -> vector<4x1xf32>
    %191 = vector.broadcast %190 : vector<4x1xf32> to vector<4x8xf32>
    %192 = arith.mulf %187, %191 : vector<4x8xf32>
    %cst_86 = arith.constant dense<0.000000e+00> : vector<4x16xf32>
    %193 = tpu.matmul %192, %179, %cst_86 {dimension_numbers = #tpu.dot_dimension_numbers<[1], [0], [0], [1], [0, 0, 1, 1], [], []>} : vector<4x8xf32>, vector<8x16xf32>, vector<4x16xf32> -> vector<4x16xf32>
    %194 = tpu.concatenate %142, %159, %176, %193 in 1 : vector<4x16xf32>, vector<4x16xf32>, vector<4x16xf32>, vector<4x16xf32> -> vector<4x64xf32>
    %195 = tpu.concatenate %123, %194 in 0 : vector<4x64xf32>, vector<4x64xf32> -> vector<8x64xf32>
    %cst_87 = arith.constant dense<0.000000e+00> : vector<8x64xf32>
    %196 = tpu.matmul %195, %39, %cst_87 {dimension_numbers = #tpu.dot_dimension_numbers<[1], [0], [0], [1], [0, 0, 1, 1], [], []>} : vector<8x64xf32>, vector<64x64xf32>, vector<8x64xf32> -> vector<8x64xf32>
    %197 = vector.broadcast %43 : vector<1x64xf32> to vector<8x64xf32>
    %198 = arith.addf %196, %197 : vector<8x64xf32>
    %c2_88 = arith.constant 2 : index
    %c0_89 = arith.constant 0 : index
    %c0_90 = arith.constant 0 : index
    %199 = vector.load %arg7[%c2_88, %c0_89, %c0_90] : memref<3x64x64xf32, #tpu.memory_space<vmem>>, vector<1x64x64xf32>
    %200 = vector.shape_cast %199 : vector<1x64x64xf32> to vector<64x64xf32>
    %c0_91 = arith.constant 0 : index
    %c2_92 = arith.constant 2 : index
    %201 = vector.load %arg8[%c0_91, %c2_92] : memref<1x3xf32, #tpu.memory_space<vmem>>, vector<1x1xf32>
    %cst_93 = arith.constant dense<0.000000e+00> : vector<8x64xf32>
    %202 = tpu.matmul %3, %200, %cst_93 {dimension_numbers = #tpu.dot_dimension_numbers<[1], [0], [0], [1], [0, 0, 1, 1], [], []>} : vector<8x64xf32>, vector<64x64xf32>, vector<8x64xf32> -> vector<8x64xf32>
    %203 = arith.mulf %202, %198 : vector<8x64xf32>
    %cst_94 = arith.constant dense<0.000000e+00> : vector<8xf32>
    %204 = vector.multi_reduction <add>, %203, %cst_94 [1] : vector<8x64xf32> to vector<8xf32>
    %205 = vector.shape_cast %204 : vector<8xf32> to vector<8x1xf32>
    %206 = vector.broadcast %201 : vector<1x1xf32> to vector<8x1xf32>
    %207 = arith.addf %205, %206 : vector<8x1xf32>
    %c2_95 = arith.constant 2 : index
    %c0_96 = arith.constant 0 : index
    %c0_97 = arith.constant 0 : index
    %208 = vector.load %arg7[%c2_95, %c0_96, %c0_97] : memref<3x64x64xf32, #tpu.memory_space<vmem>>, vector<1x64x64xf32>
    %209 = vector.shape_cast %208 : vector<1x64x64xf32> to vector<64x64xf32>
    %c0_98 = arith.constant 0 : index
    %c2_99 = arith.constant 2 : index
    %210 = vector.load %arg8[%c0_98, %c2_99] : memref<1x3xf32, #tpu.memory_space<vmem>>, vector<1x1xf32>
    %cst_100 = arith.constant dense<0.000000e+00> : vector<8x64xf32>
    %211 = tpu.matmul %4, %209, %cst_100 {dimension_numbers = #tpu.dot_dimension_numbers<[1], [0], [0], [1], [0, 0, 1, 1], [], []>} : vector<8x64xf32>, vector<64x64xf32>, vector<8x64xf32> -> vector<8x64xf32>
    %212 = arith.mulf %211, %198 : vector<8x64xf32>
    %cst_101 = arith.constant dense<0.000000e+00> : vector<8xf32>
    %213 = vector.multi_reduction <add>, %212, %cst_101 [1] : vector<8x64xf32> to vector<8xf32>
    %214 = vector.shape_cast %213 : vector<8xf32> to vector<8x1xf32>
    %215 = vector.broadcast %210 : vector<1x1xf32> to vector<8x1xf32>
    %216 = arith.addf %214, %215 : vector<8x1xf32>
    %cst_102 = arith.constant 0.000000e+00 : f32
    %217 = vector.broadcast %cst_102 : f32 to vector<8x126xf32>
    %218 = tpu.concatenate %207, %216, %217 in 1 : vector<8x1xf32>, vector<8x1xf32>, vector<8x126xf32> -> vector<8x128xf32>
    %c0_103 = arith.constant 0 : index
    %c0_104 = arith.constant 0 : index
    %219 = vector.load %arg20[%c0_103, %c0_104] : memref<8x128xf32, #tpu.memory_space<vmem>>, vector<8x128xf32>
    tpu.vector_store %arg20[%c0_103, %c0_104], %218 {strides = array<i32>} : memref<8x128xf32, #tpu.memory_space<vmem>>, vector<8x128xf32>,
    %c0_105 = arith.constant 0 : index
    %c0_106 = arith.constant 0 : index
    %c0_107 = arith.constant 0 : index
    %220 = vector.load %arg11[%c0_105, %c0_106, %c0_107] : memref<4x64x64xf32, #tpu.memory_space<vmem>>, vector<1x64x64xf32>
    %221 = vector.shape_cast %220 : vector<1x64x64xf32> to vector<64x64xf32>
    %c1_108 = arith.constant 1 : index
    %c0_109 = arith.constant 0 : index
    %c0_110 = arith.constant 0 : index
    %222 = vector.load %arg11[%c1_108, %c0_109, %c0_110] : memref<4x64x64xf32, #tpu.memory_space<vmem>>, vector<1x64x64xf32>
    %223 = vector.shape_cast %222 : vector<1x64x64xf32> to vector<64x64xf32>
    %c2_111 = arith.constant 2 : index
    %c0_112 = arith.constant 0 : index
    %c0_113 = arith.constant 0 : index
    %224 = vector.load %arg11[%c2_111, %c0_112, %c0_113] : memref<4x64x64xf32, #tpu.memory_space<vmem>>, vector<1x64x64xf32>
    %225 = vector.shape_cast %224 : vector<1x64x64xf32> to vector<64x64xf32>
    %c3_114 = arith.constant 3 : index
    %c0_115 = arith.constant 0 : index
    %c0_116 = arith.constant 0 : index
    %226 = vector.load %arg11[%c3_114, %c0_115, %c0_116] : memref<4x64x64xf32, #tpu.memory_space<vmem>>, vector<1x64x64xf32>
    %227 = vector.shape_cast %226 : vector<1x64x64xf32> to vector<64x64xf32>
    %c0_117 = arith.constant 0 : index
    %c0_118 = arith.constant 0 : index
    %228 = vector.load %arg12[%c0_117, %c0_118] : memref<4x64xf32, #tpu.memory_space<vmem>>, vector<1x64xf32>
    %c1_119 = arith.constant 1 : index
    %c0_120 = arith.constant 0 : index
    %229 = vector.load %arg12[%c1_119, %c0_120] : memref<4x64xf32, #tpu.memory_space<vmem>>, vector<1x64xf32>
    %c2_121 = arith.constant 2 : index
    %c0_122 = arith.constant 0 : index
    %230 = vector.load %arg12[%c2_121, %c0_122] : memref<4x64xf32, #tpu.memory_space<vmem>>, vector<1x64xf32>
    %c3_123 = arith.constant 3 : index
    %c0_124 = arith.constant 0 : index
    %231 = vector.load %arg12[%c3_123, %c0_124] : memref<4x64xf32, #tpu.memory_space<vmem>>, vector<1x64xf32>
    %cst_125 = arith.constant dense<0.000000e+00> : vector<8x64xf32>
    %232 = tpu.matmul %3, %221, %cst_125 {dimension_numbers = #tpu.dot_dimension_numbers<[1], [0], [0], [1], [0, 0, 1, 1], [], []>} : vector<8x64xf32>, vector<64x64xf32>, vector<8x64xf32> -> vector<8x64xf32>
    %233 = vector.broadcast %228 : vector<1x64xf32> to vector<8x64xf32>
    %234 = arith.addf %232, %233 : vector<8x64xf32>
    %cst_126 = arith.constant dense<0.000000e+00> : vector<16x64xf32>
    %235 = tpu.matmul %0, %223, %cst_126 {dimension_numbers = #tpu.dot_dimension_numbers<[1], [0], [0], [1], [0, 0, 1, 1], [], []>} : vector<16x64xf32>, vector<64x64xf32>, vector<16x64xf32> -> vector<16x64xf32>
    %236 = vector.broadcast %229 : vector<1x64xf32> to vector<16x64xf32>
    %237 = arith.addf %235, %236 : vector<16x64xf32>
    %cst_127 = arith.constant dense<0.000000e+00> : vector<16x64xf32>
    %238 = tpu.matmul %0, %225, %cst_127 {dimension_numbers = #tpu.dot_dimension_numbers<[1], [0], [0], [1], [0, 0, 1, 1], [], []>} : vector<16x64xf32>, vector<64x64xf32>, vector<16x64xf32> -> vector<16x64xf32>
    %239 = vector.broadcast %230 : vector<1x64xf32> to vector<16x64xf32>
    %240 = arith.addf %238, %239 : vector<16x64xf32>
    %241 = vector.extract_strided_slice %234 {offsets = [0, 0], sizes = [4, 64], strides = [1, 1]} : vector<8x64xf32> to vector<4x64xf32>
    %242 = vector.extract_strided_slice %237 {offsets = [0, 0], sizes = [8, 64], strides = [1, 1]} : vector<16x64xf32> to vector<8x64xf32>
    %243 = vector.extract_strided_slice %240 {offsets = [0, 0], sizes = [8, 64], strides = [1, 1]} : vector<16x64xf32> to vector<8x64xf32>
    %244 = vector.extract_strided_slice %22 {offsets = [0, 0], sizes = [1, 1], strides = [1, 1]} : vector<2x1xf32> to vector<1x1xf32>
    %245 = vector.extract_strided_slice %241 {offsets = [0, 0], sizes = [4, 16], strides = [1, 1]} : vector<4x64xf32> to vector<4x16xf32>
    %246 = vector.extract_strided_slice %242 {offsets = [0, 0], sizes = [8, 16], strides = [1, 1]} : vector<8x64xf32> to vector<8x16xf32>
    %247 = vector.extract_strided_slice %243 {offsets = [0, 0], sizes = [8, 16], strides = [1, 1]} : vector<8x64xf32> to vector<8x16xf32>
    %cst_128 = arith.constant dense<0.000000e+00> : vector<4x8xf32>
    %248 = tpu.matmul %245, %246, %cst_128 {dimension_numbers = #tpu.dot_dimension_numbers<[1], [1], [0], [0], [0, 0, 1, 0], [], []>} : vector<4x16xf32>, vector<8x16xf32>, vector<4x8xf32> -> vector<4x8xf32>
    %cst_129 = arith.constant 2.500000e-01 : f32
    %249 = vector.broadcast %cst_129 : f32 to vector<4x8xf32>
    %250 = arith.mulf %248, %249 : vector<4x8xf32>
    %251 = vector.broadcast %244 : vector<1x1xf32> to vector<4x8xf32>
    %252 = arith.addf %250, %251 : vector<4x8xf32>
    %cst_130 = arith.constant dense<0xFF800000> : vector<4xf32>
    %253 = vector.multi_reduction <maximumf>, %252, %cst_130 [1] : vector<4x8xf32> to vector<4xf32>
    %254 = vector.shape_cast %253 : vector<4xf32> to vector<4x1xf32>
    %255 = vector.broadcast %254 : vector<4x1xf32> to vector<4x8xf32>
    %256 = arith.subf %252, %255 : vector<4x8xf32>
    %257 = math.exp %256 : vector<4x8xf32>
    %cst_131 = arith.constant dense<0.000000e+00> : vector<4xf32>
    %258 = vector.multi_reduction <add>, %257, %cst_131 [1] : vector<4x8xf32> to vector<4xf32>
    %259 = vector.shape_cast %258 : vector<4xf32> to vector<4x1xf32>
    %260 = tpu.reciprocal %259 {approx = true} : vector<4x1xf32> -> vector<4x1xf32>
    %261 = vector.broadcast %260 : vector<4x1xf32> to vector<4x8xf32>
    %262 = arith.mulf %257, %261 : vector<4x8xf32>
    %cst_132 = arith.constant dense<0.000000e+00> : vector<4x16xf32>
    %263 = tpu.matmul %262, %247, %cst_132 {dimension_numbers = #tpu.dot_dimension_numbers<[1], [0], [0], [1], [0, 0, 1, 1], [], []>} : vector<4x8xf32>, vector<8x16xf32>, vector<4x16xf32> -> vector<4x16xf32>
    %264 = vector.extract_strided_slice %241 {offsets = [0, 16], sizes = [4, 16], strides = [1, 1]} : vector<4x64xf32> to vector<4x16xf32>
    %265 = vector.extract_strided_slice %242 {offsets = [0, 16], sizes = [8, 16], strides = [1, 1]} : vector<8x64xf32> to vector<8x16xf32>
    %266 = vector.extract_strided_slice %243 {offsets = [0, 16], sizes = [8, 16], strides = [1, 1]} : vector<8x64xf32> to vector<8x16xf32>
    %cst_133 = arith.constant dense<0.000000e+00> : vector<4x8xf32>
    %267 = tpu.matmul %264, %265, %cst_133 {dimension_numbers = #tpu.dot_dimension_numbers<[1], [1], [0], [0], [0, 0, 1, 0], [], []>} : vector<4x16xf32>, vector<8x16xf32>, vector<4x8xf32> -> vector<4x8xf32>
    %cst_134 = arith.constant 2.500000e-01 : f32
    %268 = vector.broadcast %cst_134 : f32 to vector<4x8xf32>
    %269 = arith.mulf %267, %268 : vector<4x8xf32>
    %270 = vector.broadcast %244 : vector<1x1xf32> to vector<4x8xf32>
    %271 = arith.addf %269, %270 : vector<4x8xf32>
    %cst_135 = arith.constant dense<0xFF800000> : vector<4xf32>
    %272 = vector.multi_reduction <maximumf>, %271, %cst_135 [1] : vector<4x8xf32> to vector<4xf32>
    %273 = vector.shape_cast %272 : vector<4xf32> to vector<4x1xf32>
    %274 = vector.broadcast %273 : vector<4x1xf32> to vector<4x8xf32>
    %275 = arith.subf %271, %274 : vector<4x8xf32>
    %276 = math.exp %275 : vector<4x8xf32>
    %cst_136 = arith.constant dense<0.000000e+00> : vector<4xf32>
    %277 = vector.multi_reduction <add>, %276, %cst_136 [1] : vector<4x8xf32> to vector<4xf32>
    %278 = vector.shape_cast %277 : vector<4xf32> to vector<4x1xf32>
    %279 = tpu.reciprocal %278 {approx = true} : vector<4x1xf32> -> vector<4x1xf32>
    %280 = vector.broadcast %279 : vector<4x1xf32> to vector<4x8xf32>
    %281 = arith.mulf %276, %280 : vector<4x8xf32>
    %cst_137 = arith.constant dense<0.000000e+00> : vector<4x16xf32>
    %282 = tpu.matmul %281, %266, %cst_137 {dimension_numbers = #tpu.dot_dimension_numbers<[1], [0], [0], [1], [0, 0, 1, 1], [], []>} : vector<4x8xf32>, vector<8x16xf32>, vector<4x16xf32> -> vector<4x16xf32>
    %283 = vector.extract_strided_slice %241 {offsets = [0, 32], sizes = [4, 16], strides = [1, 1]} : vector<4x64xf32> to vector<4x16xf32>
    %284 = vector.extract_strided_slice %242 {offsets = [0, 32], sizes = [8, 16], strides = [1, 1]} : vector<8x64xf32> to vector<8x16xf32>
    %285 = vector.extract_strided_slice %243 {offsets = [0, 32], sizes = [8, 16], strides = [1, 1]} : vector<8x64xf32> to vector<8x16xf32>
    %cst_138 = arith.constant dense<0.000000e+00> : vector<4x8xf32>
    %286 = tpu.matmul %283, %284, %cst_138 {dimension_numbers = #tpu.dot_dimension_numbers<[1], [1], [0], [0], [0, 0, 1, 0], [], []>} : vector<4x16xf32>, vector<8x16xf32>, vector<4x8xf32> -> vector<4x8xf32>
    %cst_139 = arith.constant 2.500000e-01 : f32
    %287 = vector.broadcast %cst_139 : f32 to vector<4x8xf32>
    %288 = arith.mulf %286, %287 : vector<4x8xf32>
    %289 = vector.broadcast %244 : vector<1x1xf32> to vector<4x8xf32>
    %290 = arith.addf %288, %289 : vector<4x8xf32>
    %cst_140 = arith.constant dense<0xFF800000> : vector<4xf32>
    %291 = vector.multi_reduction <maximumf>, %290, %cst_140 [1] : vector<4x8xf32> to vector<4xf32>
    %292 = vector.shape_cast %291 : vector<4xf32> to vector<4x1xf32>
    %293 = vector.broadcast %292 : vector<4x1xf32> to vector<4x8xf32>
    %294 = arith.subf %290, %293 : vector<4x8xf32>
    %295 = math.exp %294 : vector<4x8xf32>
    %cst_141 = arith.constant dense<0.000000e+00> : vector<4xf32>
    %296 = vector.multi_reduction <add>, %295, %cst_141 [1] : vector<4x8xf32> to vector<4xf32>
    %297 = vector.shape_cast %296 : vector<4xf32> to vector<4x1xf32>
    %298 = tpu.reciprocal %297 {approx = true} : vector<4x1xf32> -> vector<4x1xf32>
    %299 = vector.broadcast %298 : vector<4x1xf32> to vector<4x8xf32>
    %300 = arith.mulf %295, %299 : vector<4x8xf32>
    %cst_142 = arith.constant dense<0.000000e+00> : vector<4x16xf32>
    %301 = tpu.matmul %300, %285, %cst_142 {dimension_numbers = #tpu.dot_dimension_numbers<[1], [0], [0], [1], [0, 0, 1, 1], [], []>} : vector<4x8xf32>, vector<8x16xf32>, vector<4x16xf32> -> vector<4x16xf32>
    %302 = vector.extract_strided_slice %241 {offsets = [0, 48], sizes = [4, 16], strides = [1, 1]} : vector<4x64xf32> to vector<4x16xf32>
    %303 = vector.extract_strided_slice %242 {offsets = [0, 48], sizes = [8, 16], strides = [1, 1]} : vector<8x64xf32> to vector<8x16xf32>
    %304 = vector.extract_strided_slice %243 {offsets = [0, 48], sizes = [8, 16], strides = [1, 1]} : vector<8x64xf32> to vector<8x16xf32>
    %cst_143 = arith.constant dense<0.000000e+00> : vector<4x8xf32>
    %305 = tpu.matmul %302, %303, %cst_143 {dimension_numbers = #tpu.dot_dimension_numbers<[1], [1], [0], [0], [0, 0, 1, 0], [], []>} : vector<4x16xf32>, vector<8x16xf32>, vector<4x8xf32> -> vector<4x8xf32>
    %cst_144 = arith.constant 2.500000e-01 : f32
    %306 = vector.broadcast %cst_144 : f32 to vector<4x8xf32>
    %307 = arith.mulf %305, %306 : vector<4x8xf32>
    %308 = vector.broadcast %244 : vector<1x1xf32> to vector<4x8xf32>
    %309 = arith.addf %307, %308 : vector<4x8xf32>
    %cst_145 = arith.constant dense<0xFF800000> : vector<4xf32>
    %310 = vector.multi_reduction <maximumf>, %309, %cst_145 [1] : vector<4x8xf32> to vector<4xf32>
    %311 = vector.shape_cast %310 : vector<4xf32> to vector<4x1xf32>
    %312 = vector.broadcast %311 : vector<4x1xf32> to vector<4x8xf32>
    %313 = arith.subf %309, %312 : vector<4x8xf32>
    %314 = math.exp %313 : vector<4x8xf32>
    %cst_146 = arith.constant dense<0.000000e+00> : vector<4xf32>
    %315 = vector.multi_reduction <add>, %314, %cst_146 [1] : vector<4x8xf32> to vector<4xf32>
    %316 = vector.shape_cast %315 : vector<4xf32> to vector<4x1xf32>
    %317 = tpu.reciprocal %316 {approx = true} : vector<4x1xf32> -> vector<4x1xf32>
    %318 = vector.broadcast %317 : vector<4x1xf32> to vector<4x8xf32>
    %319 = arith.mulf %314, %318 : vector<4x8xf32>
    %cst_147 = arith.constant dense<0.000000e+00> : vector<4x16xf32>
    %320 = tpu.matmul %319, %304, %cst_147 {dimension_numbers = #tpu.dot_dimension_numbers<[1], [0], [0], [1], [0, 0, 1, 1], [], []>} : vector<4x8xf32>, vector<8x16xf32>, vector<4x16xf32> -> vector<4x16xf32>
    %321 = tpu.concatenate %263, %282, %301, %320 in 1 : vector<4x16xf32>, vector<4x16xf32>, vector<4x16xf32>, vector<4x16xf32> -> vector<4x64xf32>
    %322 = vector.extract_strided_slice %234 {offsets = [4, 0], sizes = [4, 64], strides = [1, 1]} : vector<8x64xf32> to vector<4x64xf32>
    %323 = vector.extract_strided_slice %237 {offsets = [8, 0], sizes = [8, 64], strides = [1, 1]} : vector<16x64xf32> to vector<8x64xf32>
    %324 = vector.extract_strided_slice %240 {offsets = [8, 0], sizes = [8, 64], strides = [1, 1]} : vector<16x64xf32> to vector<8x64xf32>
    %325 = vector.extract_strided_slice %22 {offsets = [1, 0], sizes = [1, 1], strides = [1, 1]} : vector<2x1xf32> to vector<1x1xf32>
    %326 = vector.extract_strided_slice %322 {offsets = [0, 0], sizes = [4, 16], strides = [1, 1]} : vector<4x64xf32> to vector<4x16xf32>
    %327 = vector.extract_strided_slice %323 {offsets = [0, 0], sizes = [8, 16], strides = [1, 1]} : vector<8x64xf32> to vector<8x16xf32>
    %328 = vector.extract_strided_slice %324 {offsets = [0, 0], sizes = [8, 16], strides = [1, 1]} : vector<8x64xf32> to vector<8x16xf32>
    %cst_148 = arith.constant dense<0.000000e+00> : vector<4x8xf32>
    %329 = tpu.matmul %326, %327, %cst_148 {dimension_numbers = #tpu.dot_dimension_numbers<[1], [1], [0], [0], [0, 0, 1, 0], [], []>} : vector<4x16xf32>, vector<8x16xf32>, vector<4x8xf32> -> vector<4x8xf32>
    %cst_149 = arith.constant 2.500000e-01 : f32
    %330 = vector.broadcast %cst_149 : f32 to vector<4x8xf32>
    %331 = arith.mulf %329, %330 : vector<4x8xf32>
    %332 = vector.broadcast %325 : vector<1x1xf32> to vector<4x8xf32>
    %333 = arith.addf %331, %332 : vector<4x8xf32>
    %cst_150 = arith.constant dense<0xFF800000> : vector<4xf32>
    %334 = vector.multi_reduction <maximumf>, %333, %cst_150 [1] : vector<4x8xf32> to vector<4xf32>
    %335 = vector.shape_cast %334 : vector<4xf32> to vector<4x1xf32>
    %336 = vector.broadcast %335 : vector<4x1xf32> to vector<4x8xf32>
    %337 = arith.subf %333, %336 : vector<4x8xf32>
    %338 = math.exp %337 : vector<4x8xf32>
    %cst_151 = arith.constant dense<0.000000e+00> : vector<4xf32>
    %339 = vector.multi_reduction <add>, %338, %cst_151 [1] : vector<4x8xf32> to vector<4xf32>
    %340 = vector.shape_cast %339 : vector<4xf32> to vector<4x1xf32>
    %341 = tpu.reciprocal %340 {approx = true} : vector<4x1xf32> -> vector<4x1xf32>
    %342 = vector.broadcast %341 : vector<4x1xf32> to vector<4x8xf32>
    %343 = arith.mulf %338, %342 : vector<4x8xf32>
    %cst_152 = arith.constant dense<0.000000e+00> : vector<4x16xf32>
    %344 = tpu.matmul %343, %328, %cst_152 {dimension_numbers = #tpu.dot_dimension_numbers<[1], [0], [0], [1], [0, 0, 1, 1], [], []>} : vector<4x8xf32>, vector<8x16xf32>, vector<4x16xf32> -> vector<4x16xf32>
    %345 = vector.extract_strided_slice %322 {offsets = [0, 16], sizes = [4, 16], strides = [1, 1]} : vector<4x64xf32> to vector<4x16xf32>
    %346 = vector.extract_strided_slice %323 {offsets = [0, 16], sizes = [8, 16], strides = [1, 1]} : vector<8x64xf32> to vector<8x16xf32>
    %347 = vector.extract_strided_slice %324 {offsets = [0, 16], sizes = [8, 16], strides = [1, 1]} : vector<8x64xf32> to vector<8x16xf32>
    %cst_153 = arith.constant dense<0.000000e+00> : vector<4x8xf32>
    %348 = tpu.matmul %345, %346, %cst_153 {dimension_numbers = #tpu.dot_dimension_numbers<[1], [1], [0], [0], [0, 0, 1, 0], [], []>} : vector<4x16xf32>, vector<8x16xf32>, vector<4x8xf32> -> vector<4x8xf32>
    %cst_154 = arith.constant 2.500000e-01 : f32
    %349 = vector.broadcast %cst_154 : f32 to vector<4x8xf32>
    %350 = arith.mulf %348, %349 : vector<4x8xf32>
    %351 = vector.broadcast %325 : vector<1x1xf32> to vector<4x8xf32>
    %352 = arith.addf %350, %351 : vector<4x8xf32>
    %cst_155 = arith.constant dense<0xFF800000> : vector<4xf32>
    %353 = vector.multi_reduction <maximumf>, %352, %cst_155 [1] : vector<4x8xf32> to vector<4xf32>
    %354 = vector.shape_cast %353 : vector<4xf32> to vector<4x1xf32>
    %355 = vector.broadcast %354 : vector<4x1xf32> to vector<4x8xf32>
    %356 = arith.subf %352, %355 : vector<4x8xf32>
    %357 = math.exp %356 : vector<4x8xf32>
    %cst_156 = arith.constant dense<0.000000e+00> : vector<4xf32>
    %358 = vector.multi_reduction <add>, %357, %cst_156 [1] : vector<4x8xf32> to vector<4xf32>
    %359 = vector.shape_cast %358 : vector<4xf32> to vector<4x1xf32>
    %360 = tpu.reciprocal %359 {approx = true} : vector<4x1xf32> -> vector<4x1xf32>
    %361 = vector.broadcast %360 : vector<4x1xf32> to vector<4x8xf32>
    %362 = arith.mulf %357, %361 : vector<4x8xf32>
    %cst_157 = arith.constant dense<0.000000e+00> : vector<4x16xf32>
    %363 = tpu.matmul %362, %347, %cst_157 {dimension_numbers = #tpu.dot_dimension_numbers<[1], [0], [0], [1], [0, 0, 1, 1], [], []>} : vector<4x8xf32>, vector<8x16xf32>, vector<4x16xf32> -> vector<4x16xf32>
    %364 = vector.extract_strided_slice %322 {offsets = [0, 32], sizes = [4, 16], strides = [1, 1]} : vector<4x64xf32> to vector<4x16xf32>
    %365 = vector.extract_strided_slice %323 {offsets = [0, 32], sizes = [8, 16], strides = [1, 1]} : vector<8x64xf32> to vector<8x16xf32>
    %366 = vector.extract_strided_slice %324 {offsets = [0, 32], sizes = [8, 16], strides = [1, 1]} : vector<8x64xf32> to vector<8x16xf32>
    %cst_158 = arith.constant dense<0.000000e+00> : vector<4x8xf32>
    %367 = tpu.matmul %364, %365, %cst_158 {dimension_numbers = #tpu.dot_dimension_numbers<[1], [1], [0], [0], [0, 0, 1, 0], [], []>} : vector<4x16xf32>, vector<8x16xf32>, vector<4x8xf32> -> vector<4x8xf32>
    %cst_159 = arith.constant 2.500000e-01 : f32
    %368 = vector.broadcast %cst_159 : f32 to vector<4x8xf32>
    %369 = arith.mulf %367, %368 : vector<4x8xf32>
    %370 = vector.broadcast %325 : vector<1x1xf32> to vector<4x8xf32>
    %371 = arith.addf %369, %370 : vector<4x8xf32>
    %cst_160 = arith.constant dense<0xFF800000> : vector<4xf32>
    %372 = vector.multi_reduction <maximumf>, %371, %cst_160 [1] : vector<4x8xf32> to vector<4xf32>
    %373 = vector.shape_cast %372 : vector<4xf32> to vector<4x1xf32>
    %374 = vector.broadcast %373 : vector<4x1xf32> to vector<4x8xf32>
    %375 = arith.subf %371, %374 : vector<4x8xf32>
    %376 = math.exp %375 : vector<4x8xf32>
    %cst_161 = arith.constant dense<0.000000e+00> : vector<4xf32>
    %377 = vector.multi_reduction <add>, %376, %cst_161 [1] : vector<4x8xf32> to vector<4xf32>
    %378 = vector.shape_cast %377 : vector<4xf32> to vector<4x1xf32>
    %379 = tpu.reciprocal %378 {approx = true} : vector<4x1xf32> -> vector<4x1xf32>
    %380 = vector.broadcast %379 : vector<4x1xf32> to vector<4x8xf32>
    %381 = arith.mulf %376, %380 : vector<4x8xf32>
    %cst_162 = arith.constant dense<0.000000e+00> : vector<4x16xf32>
    %382 = tpu.matmul %381, %366, %cst_162 {dimension_numbers = #tpu.dot_dimension_numbers<[1], [0], [0], [1], [0, 0, 1, 1], [], []>} : vector<4x8xf32>, vector<8x16xf32>, vector<4x16xf32> -> vector<4x16xf32>
    %383 = vector.extract_strided_slice %322 {offsets = [0, 48], sizes = [4, 16], strides = [1, 1]} : vector<4x64xf32> to vector<4x16xf32>
    %384 = vector.extract_strided_slice %323 {offsets = [0, 48], sizes = [8, 16], strides = [1, 1]} : vector<8x64xf32> to vector<8x16xf32>
    %385 = vector.extract_strided_slice %324 {offsets = [0, 48], sizes = [8, 16], strides = [1, 1]} : vector<8x64xf32> to vector<8x16xf32>
    %cst_163 = arith.constant dense<0.000000e+00> : vector<4x8xf32>
    %386 = tpu.matmul %383, %384, %cst_163 {dimension_numbers = #tpu.dot_dimension_numbers<[1], [1], [0], [0], [0, 0, 1, 0], [], []>} : vector<4x16xf32>, vector<8x16xf32>, vector<4x8xf32> -> vector<4x8xf32>
    %cst_164 = arith.constant 2.500000e-01 : f32
    %387 = vector.broadcast %cst_164 : f32 to vector<4x8xf32>
    %388 = arith.mulf %386, %387 : vector<4x8xf32>
    %389 = vector.broadcast %325 : vector<1x1xf32> to vector<4x8xf32>
    %390 = arith.addf %388, %389 : vector<4x8xf32>
    %cst_165 = arith.constant dense<0xFF800000> : vector<4xf32>
    %391 = vector.multi_reduction <maximumf>, %390, %cst_165 [1] : vector<4x8xf32> to vector<4xf32>
    %392 = vector.shape_cast %391 : vector<4xf32> to vector<4x1xf32>
    %393 = vector.broadcast %392 : vector<4x1xf32> to vector<4x8xf32>
    %394 = arith.subf %390, %393 : vector<4x8xf32>
    %395 = math.exp %394 : vector<4x8xf32>
    %cst_166 = arith.constant dense<0.000000e+00> : vector<4xf32>
    %396 = vector.multi_reduction <add>, %395, %cst_166 [1] : vector<4x8xf32> to vector<4xf32>
    %397 = vector.shape_cast %396 : vector<4xf32> to vector<4x1xf32>
    %398 = tpu.reciprocal %397 {approx = true} : vector<4x1xf32> -> vector<4x1xf32>
    %399 = vector.broadcast %398 : vector<4x1xf32> to vector<4x8xf32>
    %400 = arith.mulf %395, %399 : vector<4x8xf32>
    %cst_167 = arith.constant dense<0.000000e+00> : vector<4x16xf32>
    %401 = tpu.matmul %400, %385, %cst_167 {dimension_numbers = #tpu.dot_dimension_numbers<[1], [0], [0], [1], [0, 0, 1, 1], [], []>} : vector<4x8xf32>, vector<8x16xf32>, vector<4x16xf32> -> vector<4x16xf32>
    %402 = tpu.concatenate %344, %363, %382, %401 in 1 : vector<4x16xf32>, vector<4x16xf32>, vector<4x16xf32>, vector<4x16xf32> -> vector<4x64xf32>
    %403 = tpu.concatenate %321, %402 in 0 : vector<4x64xf32>, vector<4x64xf32> -> vector<8x64xf32>
    %cst_168 = arith.constant dense<0.000000e+00> : vector<8x64xf32>
    %404 = tpu.matmul %403, %227, %cst_168 {dimension_numbers = #tpu.dot_dimension_numbers<[1], [0], [0], [1], [0, 0, 1, 1], [], []>} : vector<8x64xf32>, vector<64x64xf32>, vector<8x64xf32> -> vector<8x64xf32>
    %405 = vector.broadcast %231 : vector<1x64xf32> to vector<8x64xf32>
    %406 = arith.addf %404, %405 : vector<8x64xf32>
    %c0_169 = arith.constant 0 : index
    %c0_170 = arith.constant 0 : index
    %c0_171 = arith.constant 0 : index
    %407 = vector.load %arg13[%c0_169, %c0_170, %c0_171] : memref<4x64x64xf32, #tpu.memory_space<vmem>>, vector<1x64x64xf32>
    %408 = vector.shape_cast %407 : vector<1x64x64xf32> to vector<64x64xf32>
    %c1_172 = arith.constant 1 : index
    %c0_173 = arith.constant 0 : index
    %c0_174 = arith.constant 0 : index
    %409 = vector.load %arg13[%c1_172, %c0_173, %c0_174] : memref<4x64x64xf32, #tpu.memory_space<vmem>>, vector<1x64x64xf32>
    %410 = vector.shape_cast %409 : vector<1x64x64xf32> to vector<64x64xf32>
    %c2_175 = arith.constant 2 : index
    %c0_176 = arith.constant 0 : index
    %c0_177 = arith.constant 0 : index
    %411 = vector.load %arg13[%c2_175, %c0_176, %c0_177] : memref<4x64x64xf32, #tpu.memory_space<vmem>>, vector<1x64x64xf32>
    %412 = vector.shape_cast %411 : vector<1x64x64xf32> to vector<64x64xf32>
    %c3_178 = arith.constant 3 : index
    %c0_179 = arith.constant 0 : index
    %c0_180 = arith.constant 0 : index
    %413 = vector.load %arg13[%c3_178, %c0_179, %c0_180] : memref<4x64x64xf32, #tpu.memory_space<vmem>>, vector<1x64x64xf32>
    %414 = vector.shape_cast %413 : vector<1x64x64xf32> to vector<64x64xf32>
    %c0_181 = arith.constant 0 : index
    %c0_182 = arith.constant 0 : index
    %415 = vector.load %arg14[%c0_181, %c0_182] : memref<4x64xf32, #tpu.memory_space<vmem>>, vector<1x64xf32>
    %c1_183 = arith.constant 1 : index
    %c0_184 = arith.constant 0 : index
    %416 = vector.load %arg14[%c1_183, %c0_184] : memref<4x64xf32, #tpu.memory_space<vmem>>, vector<1x64xf32>
    %c2_185 = arith.constant 2 : index
    %c0_186 = arith.constant 0 : index
    %417 = vector.load %arg14[%c2_185, %c0_186] : memref<4x64xf32, #tpu.memory_space<vmem>>, vector<1x64xf32>
    %c3_187 = arith.constant 3 : index
    %c0_188 = arith.constant 0 : index
    %418 = vector.load %arg14[%c3_187, %c0_188] : memref<4x64xf32, #tpu.memory_space<vmem>>, vector<1x64xf32>
    %cst_189 = arith.constant dense<0.000000e+00> : vector<16x64xf32>
    %419 = tpu.matmul %0, %408, %cst_189 {dimension_numbers = #tpu.dot_dimension_numbers<[1], [0], [0], [1], [0, 0, 1, 1], [], []>} : vector<16x64xf32>, vector<64x64xf32>, vector<16x64xf32> -> vector<16x64xf32>
    %420 = vector.broadcast %415 : vector<1x64xf32> to vector<16x64xf32>
    %421 = arith.addf %419, %420 : vector<16x64xf32>
    %cst_190 = arith.constant dense<0.000000e+00> : vector<8x64xf32>
    %422 = tpu.matmul %406, %410, %cst_190 {dimension_numbers = #tpu.dot_dimension_numbers<[1], [0], [0], [1], [0, 0, 1, 1], [], []>} : vector<8x64xf32>, vector<64x64xf32>, vector<8x64xf32> -> vector<8x64xf32>
    %423 = vector.broadcast %416 : vector<1x64xf32> to vector<8x64xf32>
    %424 = arith.addf %422, %423 : vector<8x64xf32>
    %cst_191 = arith.constant dense<0.000000e+00> : vector<8x64xf32>
    %425 = tpu.matmul %3, %412, %cst_191 {dimension_numbers = #tpu.dot_dimension_numbers<[1], [0], [0], [1], [0, 0, 1, 1], [], []>} : vector<8x64xf32>, vector<64x64xf32>, vector<8x64xf32> -> vector<8x64xf32>
    %426 = vector.broadcast %417 : vector<1x64xf32> to vector<8x64xf32>
    %427 = arith.addf %425, %426 : vector<8x64xf32>
    %428 = vector.extract_strided_slice %421 {offsets = [0, 0], sizes = [8, 64], strides = [1, 1]} : vector<16x64xf32> to vector<8x64xf32>
    %429 = vector.extract_strided_slice %424 {offsets = [0, 0], sizes = [4, 64], strides = [1, 1]} : vector<8x64xf32> to vector<4x64xf32>
    %430 = vector.extract_strided_slice %427 {offsets = [0, 0], sizes = [4, 64], strides = [1, 1]} : vector<8x64xf32> to vector<4x64xf32>
    %431 = vector.extract_strided_slice %31 {offsets = [0, 0], sizes = [1, 1], strides = [1, 1]} : vector<2x1xf32> to vector<1x1xf32>
    %432 = vector.extract_strided_slice %428 {offsets = [0, 0], sizes = [8, 16], strides = [1, 1]} : vector<8x64xf32> to vector<8x16xf32>
    %433 = vector.extract_strided_slice %429 {offsets = [0, 0], sizes = [4, 16], strides = [1, 1]} : vector<4x64xf32> to vector<4x16xf32>
    %434 = vector.extract_strided_slice %430 {offsets = [0, 0], sizes = [4, 16], strides = [1, 1]} : vector<4x64xf32> to vector<4x16xf32>
    %cst_192 = arith.constant dense<0.000000e+00> : vector<8x4xf32>
    %435 = tpu.matmul %432, %433, %cst_192 {dimension_numbers = #tpu.dot_dimension_numbers<[1], [1], [0], [0], [0, 0, 1, 0], [], []>} : vector<8x16xf32>, vector<4x16xf32>, vector<8x4xf32> -> vector<8x4xf32>
    %cst_193 = arith.constant 2.500000e-01 : f32
    %436 = vector.broadcast %cst_193 : f32 to vector<8x4xf32>
    %437 = arith.mulf %435, %436 : vector<8x4xf32>
    %438 = vector.broadcast %431 : vector<1x1xf32> to vector<8x4xf32>
    %439 = arith.addf %437, %438 : vector<8x4xf32>
    %cst_194 = arith.constant dense<0xFF800000> : vector<8xf32>
    %440 = vector.multi_reduction <maximumf>, %439, %cst_194 [1] : vector<8x4xf32> to vector<8xf32>
    %441 = vector.shape_cast %440 : vector<8xf32> to vector<8x1xf32>
    %442 = vector.broadcast %441 : vector<8x1xf32> to vector<8x4xf32>
    %443 = arith.subf %439, %442 : vector<8x4xf32>
    %444 = math.exp %443 : vector<8x4xf32>
    %cst_195 = arith.constant dense<0.000000e+00> : vector<8xf32>
    %445 = vector.multi_reduction <add>, %444, %cst_195 [1] : vector<8x4xf32> to vector<8xf32>
    %446 = vector.shape_cast %445 : vector<8xf32> to vector<8x1xf32>
    %447 = tpu.reciprocal %446 {approx = true} : vector<8x1xf32> -> vector<8x1xf32>
    %448 = vector.broadcast %447 : vector<8x1xf32> to vector<8x4xf32>
    %449 = arith.mulf %444, %448 : vector<8x4xf32>
    %cst_196 = arith.constant dense<0.000000e+00> : vector<8x16xf32>
    %450 = tpu.matmul %449, %434, %cst_196 {dimension_numbers = #tpu.dot_dimension_numbers<[1], [0], [0], [1], [0, 0, 1, 1], [], []>} : vector<8x4xf32>, vector<4x16xf32>, vector<8x16xf32> -> vector<8x16xf32>
    %451 = vector.extract_strided_slice %428 {offsets = [0, 16], sizes = [8, 16], strides = [1, 1]} : vector<8x64xf32> to vector<8x16xf32>
    %452 = vector.extract_strided_slice %429 {offsets = [0, 16], sizes = [4, 16], strides = [1, 1]} : vector<4x64xf32> to vector<4x16xf32>
    %453 = vector.extract_strided_slice %430 {offsets = [0, 16], sizes = [4, 16], strides = [1, 1]} : vector<4x64xf32> to vector<4x16xf32>
    %cst_197 = arith.constant dense<0.000000e+00> : vector<8x4xf32>
    %454 = tpu.matmul %451, %452, %cst_197 {dimension_numbers = #tpu.dot_dimension_numbers<[1], [1], [0], [0], [0, 0, 1, 0], [], []>} : vector<8x16xf32>, vector<4x16xf32>, vector<8x4xf32> -> vector<8x4xf32>
    %cst_198 = arith.constant 2.500000e-01 : f32
    %455 = vector.broadcast %cst_198 : f32 to vector<8x4xf32>
    %456 = arith.mulf %454, %455 : vector<8x4xf32>
    %457 = vector.broadcast %431 : vector<1x1xf32> to vector<8x4xf32>
    %458 = arith.addf %456, %457 : vector<8x4xf32>
    %cst_199 = arith.constant dense<0xFF800000> : vector<8xf32>
    %459 = vector.multi_reduction <maximumf>, %458, %cst_199 [1] : vector<8x4xf32> to vector<8xf32>
    %460 = vector.shape_cast %459 : vector<8xf32> to vector<8x1xf32>
    %461 = vector.broadcast %460 : vector<8x1xf32> to vector<8x4xf32>
    %462 = arith.subf %458, %461 : vector<8x4xf32>
    %463 = math.exp %462 : vector<8x4xf32>
    %cst_200 = arith.constant dense<0.000000e+00> : vector<8xf32>
    %464 = vector.multi_reduction <add>, %463, %cst_200 [1] : vector<8x4xf32> to vector<8xf32>
    %465 = vector.shape_cast %464 : vector<8xf32> to vector<8x1xf32>
    %466 = tpu.reciprocal %465 {approx = true} : vector<8x1xf32> -> vector<8x1xf32>
    %467 = vector.broadcast %466 : vector<8x1xf32> to vector<8x4xf32>
    %468 = arith.mulf %463, %467 : vector<8x4xf32>
    %cst_201 = arith.constant dense<0.000000e+00> : vector<8x16xf32>
    %469 = tpu.matmul %468, %453, %cst_201 {dimension_numbers = #tpu.dot_dimension_numbers<[1], [0], [0], [1], [0, 0, 1, 1], [], []>} : vector<8x4xf32>, vector<4x16xf32>, vector<8x16xf32> -> vector<8x16xf32>
    %470 = vector.extract_strided_slice %428 {offsets = [0, 32], sizes = [8, 16], strides = [1, 1]} : vector<8x64xf32> to vector<8x16xf32>
    %471 = vector.extract_strided_slice %429 {offsets = [0, 32], sizes = [4, 16], strides = [1, 1]} : vector<4x64xf32> to vector<4x16xf32>
    %472 = vector.extract_strided_slice %430 {offsets = [0, 32], sizes = [4, 16], strides = [1, 1]} : vector<4x64xf32> to vector<4x16xf32>
    %cst_202 = arith.constant dense<0.000000e+00> : vector<8x4xf32>
    %473 = tpu.matmul %470, %471, %cst_202 {dimension_numbers = #tpu.dot_dimension_numbers<[1], [1], [0], [0], [0, 0, 1, 0], [], []>} : vector<8x16xf32>, vector<4x16xf32>, vector<8x4xf32> -> vector<8x4xf32>
    %cst_203 = arith.constant 2.500000e-01 : f32
    %474 = vector.broadcast %cst_203 : f32 to vector<8x4xf32>
    %475 = arith.mulf %473, %474 : vector<8x4xf32>
    %476 = vector.broadcast %431 : vector<1x1xf32> to vector<8x4xf32>
    %477 = arith.addf %475, %476 : vector<8x4xf32>
    %cst_204 = arith.constant dense<0xFF800000> : vector<8xf32>
    %478 = vector.multi_reduction <maximumf>, %477, %cst_204 [1] : vector<8x4xf32> to vector<8xf32>
    %479 = vector.shape_cast %478 : vector<8xf32> to vector<8x1xf32>
    %480 = vector.broadcast %479 : vector<8x1xf32> to vector<8x4xf32>
    %481 = arith.subf %477, %480 : vector<8x4xf32>
    %482 = math.exp %481 : vector<8x4xf32>
    %cst_205 = arith.constant dense<0.000000e+00> : vector<8xf32>
    %483 = vector.multi_reduction <add>, %482, %cst_205 [1] : vector<8x4xf32> to vector<8xf32>
    %484 = vector.shape_cast %483 : vector<8xf32> to vector<8x1xf32>
    %485 = tpu.reciprocal %484 {approx = true} : vector<8x1xf32> -> vector<8x1xf32>
    %486 = vector.broadcast %485 : vector<8x1xf32> to vector<8x4xf32>
    %487 = arith.mulf %482, %486 : vector<8x4xf32>
    %cst_206 = arith.constant dense<0.000000e+00> : vector<8x16xf32>
    %488 = tpu.matmul %487, %472, %cst_206 {dimension_numbers = #tpu.dot_dimension_numbers<[1], [0], [0], [1], [0, 0, 1, 1], [], []>} : vector<8x4xf32>, vector<4x16xf32>, vector<8x16xf32> -> vector<8x16xf32>
    %489 = vector.extract_strided_slice %428 {offsets = [0, 48], sizes = [8, 16], strides = [1, 1]} : vector<8x64xf32> to vector<8x16xf32>
    %490 = vector.extract_strided_slice %429 {offsets = [0, 48], sizes = [4, 16], strides = [1, 1]} : vector<4x64xf32> to vector<4x16xf32>
    %491 = vector.extract_strided_slice %430 {offsets = [0, 48], sizes = [4, 16], strides = [1, 1]} : vector<4x64xf32> to vector<4x16xf32>
    %cst_207 = arith.constant dense<0.000000e+00> : vector<8x4xf32>
    %492 = tpu.matmul %489, %490, %cst_207 {dimension_numbers = #tpu.dot_dimension_numbers<[1], [1], [0], [0], [0, 0, 1, 0], [], []>} : vector<8x16xf32>, vector<4x16xf32>, vector<8x4xf32> -> vector<8x4xf32>
    %cst_208 = arith.constant 2.500000e-01 : f32
    %493 = vector.broadcast %cst_208 : f32 to vector<8x4xf32>
    %494 = arith.mulf %492, %493 : vector<8x4xf32>
    %495 = vector.broadcast %431 : vector<1x1xf32> to vector<8x4xf32>
    %496 = arith.addf %494, %495 : vector<8x4xf32>
    %cst_209 = arith.constant dense<0xFF800000> : vector<8xf32>
    %497 = vector.multi_reduction <maximumf>, %496, %cst_209 [1] : vector<8x4xf32> to vector<8xf32>
    %498 = vector.shape_cast %497 : vector<8xf32> to vector<8x1xf32>
    %499 = vector.broadcast %498 : vector<8x1xf32> to vector<8x4xf32>
    %500 = arith.subf %496, %499 : vector<8x4xf32>
    %501 = math.exp %500 : vector<8x4xf32>
    %cst_210 = arith.constant dense<0.000000e+00> : vector<8xf32>
    %502 = vector.multi_reduction <add>, %501, %cst_210 [1] : vector<8x4xf32> to vector<8xf32>
    %503 = vector.shape_cast %502 : vector<8xf32> to vector<8x1xf32>
    %504 = tpu.reciprocal %503 {approx = true} : vector<8x1xf32> -> vector<8x1xf32>
    %505 = vector.broadcast %504 : vector<8x1xf32> to vector<8x4xf32>
    %506 = arith.mulf %501, %505 : vector<8x4xf32>
    %cst_211 = arith.constant dense<0.000000e+00> : vector<8x16xf32>
    %507 = tpu.matmul %506, %491, %cst_211 {dimension_numbers = #tpu.dot_dimension_numbers<[1], [0], [0], [1], [0, 0, 1, 1], [], []>} : vector<8x4xf32>, vector<4x16xf32>, vector<8x16xf32> -> vector<8x16xf32>
    %508 = tpu.concatenate %450, %469, %488, %507 in 1 : vector<8x16xf32>, vector<8x16xf32>, vector<8x16xf32>, vector<8x16xf32> -> vector<8x64xf32>
    %509 = vector.extract_strided_slice %421 {offsets = [8, 0], sizes = [8, 64], strides = [1, 1]} : vector<16x64xf32> to vector<8x64xf32>
    %510 = vector.extract_strided_slice %424 {offsets = [4, 0], sizes = [4, 64], strides = [1, 1]} : vector<8x64xf32> to vector<4x64xf32>
    %511 = vector.extract_strided_slice %427 {offsets = [4, 0], sizes = [4, 64], strides = [1, 1]} : vector<8x64xf32> to vector<4x64xf32>
    %512 = vector.extract_strided_slice %31 {offsets = [1, 0], sizes = [1, 1], strides = [1, 1]} : vector<2x1xf32> to vector<1x1xf32>
    %513 = vector.extract_strided_slice %509 {offsets = [0, 0], sizes = [8, 16], strides = [1, 1]} : vector<8x64xf32> to vector<8x16xf32>
    %514 = vector.extract_strided_slice %510 {offsets = [0, 0], sizes = [4, 16], strides = [1, 1]} : vector<4x64xf32> to vector<4x16xf32>
    %515 = vector.extract_strided_slice %511 {offsets = [0, 0], sizes = [4, 16], strides = [1, 1]} : vector<4x64xf32> to vector<4x16xf32>
    %cst_212 = arith.constant dense<0.000000e+00> : vector<8x4xf32>
    %516 = tpu.matmul %513, %514, %cst_212 {dimension_numbers = #tpu.dot_dimension_numbers<[1], [1], [0], [0], [0, 0, 1, 0], [], []>} : vector<8x16xf32>, vector<4x16xf32>, vector<8x4xf32> -> vector<8x4xf32>
    %cst_213 = arith.constant 2.500000e-01 : f32
    %517 = vector.broadcast %cst_213 : f32 to vector<8x4xf32>
    %518 = arith.mulf %516, %517 : vector<8x4xf32>
    %519 = vector.broadcast %512 : vector<1x1xf32> to vector<8x4xf32>
    %520 = arith.addf %518, %519 : vector<8x4xf32>
    %cst_214 = arith.constant dense<0xFF800000> : vector<8xf32>
    %521 = vector.multi_reduction <maximumf>, %520, %cst_214 [1] : vector<8x4xf32> to vector<8xf32>
    %522 = vector.shape_cast %521 : vector<8xf32> to vector<8x1xf32>
    %523 = vector.broadcast %522 : vector<8x1xf32> to vector<8x4xf32>
    %524 = arith.subf %520, %523 : vector<8x4xf32>
    %525 = math.exp %524 : vector<8x4xf32>
    %cst_215 = arith.constant dense<0.000000e+00> : vector<8xf32>
    %526 = vector.multi_reduction <add>, %525, %cst_215 [1] : vector<8x4xf32> to vector<8xf32>
    %527 = vector.shape_cast %526 : vector<8xf32> to vector<8x1xf32>
    %528 = tpu.reciprocal %527 {approx = true} : vector<8x1xf32> -> vector<8x1xf32>
    %529 = vector.broadcast %528 : vector<8x1xf32> to vector<8x4xf32>
    %530 = arith.mulf %525, %529 : vector<8x4xf32>
    %cst_216 = arith.constant dense<0.000000e+00> : vector<8x16xf32>
    %531 = tpu.matmul %530, %515, %cst_216 {dimension_numbers = #tpu.dot_dimension_numbers<[1], [0], [0], [1], [0, 0, 1, 1], [], []>} : vector<8x4xf32>, vector<4x16xf32>, vector<8x16xf32> -> vector<8x16xf32>
    %532 = vector.extract_strided_slice %509 {offsets = [0, 16], sizes = [8, 16], strides = [1, 1]} : vector<8x64xf32> to vector<8x16xf32>
    %533 = vector.extract_strided_slice %510 {offsets = [0, 16], sizes = [4, 16], strides = [1, 1]} : vector<4x64xf32> to vector<4x16xf32>
    %534 = vector.extract_strided_slice %511 {offsets = [0, 16], sizes = [4, 16], strides = [1, 1]} : vector<4x64xf32> to vector<4x16xf32>
    %cst_217 = arith.constant dense<0.000000e+00> : vector<8x4xf32>
    %535 = tpu.matmul %532, %533, %cst_217 {dimension_numbers = #tpu.dot_dimension_numbers<[1], [1], [0], [0], [0, 0, 1, 0], [], []>} : vector<8x16xf32>, vector<4x16xf32>, vector<8x4xf32> -> vector<8x4xf32>
    %cst_218 = arith.constant 2.500000e-01 : f32
    %536 = vector.broadcast %cst_218 : f32 to vector<8x4xf32>
    %537 = arith.mulf %535, %536 : vector<8x4xf32>
    %538 = vector.broadcast %512 : vector<1x1xf32> to vector<8x4xf32>
    %539 = arith.addf %537, %538 : vector<8x4xf32>
    %cst_219 = arith.constant dense<0xFF800000> : vector<8xf32>
    %540 = vector.multi_reduction <maximumf>, %539, %cst_219 [1] : vector<8x4xf32> to vector<8xf32>
    %541 = vector.shape_cast %540 : vector<8xf32> to vector<8x1xf32>
    %542 = vector.broadcast %541 : vector<8x1xf32> to vector<8x4xf32>
    %543 = arith.subf %539, %542 : vector<8x4xf32>
    %544 = math.exp %543 : vector<8x4xf32>
    %cst_220 = arith.constant dense<0.000000e+00> : vector<8xf32>
    %545 = vector.multi_reduction <add>, %544, %cst_220 [1] : vector<8x4xf32> to vector<8xf32>
    %546 = vector.shape_cast %545 : vector<8xf32> to vector<8x1xf32>
    %547 = tpu.reciprocal %546 {approx = true} : vector<8x1xf32> -> vector<8x1xf32>
    %548 = vector.broadcast %547 : vector<8x1xf32> to vector<8x4xf32>
    %549 = arith.mulf %544, %548 : vector<8x4xf32>
    %cst_221 = arith.constant dense<0.000000e+00> : vector<8x16xf32>
    %550 = tpu.matmul %549, %534, %cst_221 {dimension_numbers = #tpu.dot_dimension_numbers<[1], [0], [0], [1], [0, 0, 1, 1], [], []>} : vector<8x4xf32>, vector<4x16xf32>, vector<8x16xf32> -> vector<8x16xf32>
    %551 = vector.extract_strided_slice %509 {offsets = [0, 32], sizes = [8, 16], strides = [1, 1]} : vector<8x64xf32> to vector<8x16xf32>
    %552 = vector.extract_strided_slice %510 {offsets = [0, 32], sizes = [4, 16], strides = [1, 1]} : vector<4x64xf32> to vector<4x16xf32>
    %553 = vector.extract_strided_slice %511 {offsets = [0, 32], sizes = [4, 16], strides = [1, 1]} : vector<4x64xf32> to vector<4x16xf32>
    %cst_222 = arith.constant dense<0.000000e+00> : vector<8x4xf32>
    %554 = tpu.matmul %551, %552, %cst_222 {dimension_numbers = #tpu.dot_dimension_numbers<[1], [1], [0], [0], [0, 0, 1, 0], [], []>} : vector<8x16xf32>, vector<4x16xf32>, vector<8x4xf32> -> vector<8x4xf32>
    %cst_223 = arith.constant 2.500000e-01 : f32
    %555 = vector.broadcast %cst_223 : f32 to vector<8x4xf32>
    %556 = arith.mulf %554, %555 : vector<8x4xf32>
    %557 = vector.broadcast %512 : vector<1x1xf32> to vector<8x4xf32>
    %558 = arith.addf %556, %557 : vector<8x4xf32>
    %cst_224 = arith.constant dense<0xFF800000> : vector<8xf32>
    %559 = vector.multi_reduction <maximumf>, %558, %cst_224 [1] : vector<8x4xf32> to vector<8xf32>
    %560 = vector.shape_cast %559 : vector<8xf32> to vector<8x1xf32>
    %561 = vector.broadcast %560 : vector<8x1xf32> to vector<8x4xf32>
    %562 = arith.subf %558, %561 : vector<8x4xf32>
    %563 = math.exp %562 : vector<8x4xf32>
    %cst_225 = arith.constant dense<0.000000e+00> : vector<8xf32>
    %564 = vector.multi_reduction <add>, %563, %cst_225 [1] : vector<8x4xf32> to vector<8xf32>
    %565 = vector.shape_cast %564 : vector<8xf32> to vector<8x1xf32>
    %566 = tpu.reciprocal %565 {approx = true} : vector<8x1xf32> -> vector<8x1xf32>
    %567 = vector.broadcast %566 : vector<8x1xf32> to vector<8x4xf32>
    %568 = arith.mulf %563, %567 : vector<8x4xf32>
    %cst_226 = arith.constant dense<0.000000e+00> : vector<8x16xf32>
    %569 = tpu.matmul %568, %553, %cst_226 {dimension_numbers = #tpu.dot_dimension_numbers<[1], [0], [0], [1], [0, 0, 1, 1], [], []>} : vector<8x4xf32>, vector<4x16xf32>, vector<8x16xf32> -> vector<8x16xf32>
    %570 = vector.extract_strided_slice %509 {offsets = [0, 48], sizes = [8, 16], strides = [1, 1]} : vector<8x64xf32> to vector<8x16xf32>
    %571 = vector.extract_strided_slice %510 {offsets = [0, 48], sizes = [4, 16], strides = [1, 1]} : vector<4x64xf32> to vector<4x16xf32>
    %572 = vector.extract_strided_slice %511 {offsets = [0, 48], sizes = [4, 16], strides = [1, 1]} : vector<4x64xf32> to vector<4x16xf32>
    %cst_227 = arith.constant dense<0.000000e+00> : vector<8x4xf32>
    %573 = tpu.matmul %570, %571, %cst_227 {dimension_numbers = #tpu.dot_dimension_numbers<[1], [1], [0], [0], [0, 0, 1, 0], [], []>} : vector<8x16xf32>, vector<4x16xf32>, vector<8x4xf32> -> vector<8x4xf32>
    %cst_228 = arith.constant 2.500000e-01 : f32
    %574 = vector.broadcast %cst_228 : f32 to vector<8x4xf32>
    %575 = arith.mulf %573, %574 : vector<8x4xf32>
    %576 = vector.broadcast %512 : vector<1x1xf32> to vector<8x4xf32>
    %577 = arith.addf %575, %576 : vector<8x4xf32>
    %cst_229 = arith.constant dense<0xFF800000> : vector<8xf32>
    %578 = vector.multi_reduction <maximumf>, %577, %cst_229 [1] : vector<8x4xf32> to vector<8xf32>
    %579 = vector.shape_cast %578 : vector<8xf32> to vector<8x1xf32>
    %580 = vector.broadcast %579 : vector<8x1xf32> to vector<8x4xf32>
    %581 = arith.subf %577, %580 : vector<8x4xf32>
    %582 = math.exp %581 : vector<8x4xf32>
    %cst_230 = arith.constant dense<0.000000e+00> : vector<8xf32>
    %583 = vector.multi_reduction <add>, %582, %cst_230 [1] : vector<8x4xf32> to vector<8xf32>
    %584 = vector.shape_cast %583 : vector<8xf32> to vector<8x1xf32>
    %585 = tpu.reciprocal %584 {approx = true} : vector<8x1xf32> -> vector<8x1xf32>
    %586 = vector.broadcast %585 : vector<8x1xf32> to vector<8x4xf32>
    %587 = arith.mulf %582, %586 : vector<8x4xf32>
    %cst_231 = arith.constant dense<0.000000e+00> : vector<8x16xf32>
    %588 = tpu.matmul %587, %572, %cst_231 {dimension_numbers = #tpu.dot_dimension_numbers<[1], [0], [0], [1], [0, 0, 1, 1], [], []>} : vector<8x4xf32>, vector<4x16xf32>, vector<8x16xf32> -> vector<8x16xf32>
    %589 = tpu.concatenate %531, %550, %569, %588 in 1 : vector<8x16xf32>, vector<8x16xf32>, vector<8x16xf32>, vector<8x16xf32> -> vector<8x64xf32>
    %590 = tpu.concatenate %508, %589 in 0 : vector<8x64xf32>, vector<8x64xf32> -> vector<16x64xf32>
    %cst_232 = arith.constant dense<0.000000e+00> : vector<16x64xf32>
    %591 = tpu.matmul %590, %414, %cst_232 {dimension_numbers = #tpu.dot_dimension_numbers<[1], [0], [0], [1], [0, 0, 1, 1], [], []>} : vector<16x64xf32>, vector<64x64xf32>, vector<16x64xf32> -> vector<16x64xf32>
    %592 = vector.broadcast %418 : vector<1x64xf32> to vector<16x64xf32>
    %593 = arith.addf %591, %592 : vector<16x64xf32>
    %594 = tpu.concatenate %593, %0 in 1 : vector<16x64xf32>, vector<16x64xf32> -> vector<16x128xf32>
    %c0_233 = arith.constant 0 : index
    %c0_234 = arith.constant 0 : index
    %595 = vector.load %arg15[%c0_233, %c0_234] : memref<128x64xf32, #tpu.memory_space<vmem>>, vector<128x64xf32>
    %cst_235 = arith.constant dense<0.000000e+00> : vector<16x64xf32>
    %596 = tpu.matmul %594, %595, %cst_235 {dimension_numbers = #tpu.dot_dimension_numbers<[1], [0], [0], [1], [0, 0, 1, 1], [], []>} : vector<16x128xf32>, vector<128x64xf32>, vector<16x64xf32> -> vector<16x64xf32>
    %c0_236 = arith.constant 0 : index
    %c0_237 = arith.constant 0 : index
    %597 = vector.load %arg16[%c0_236, %c0_237] : memref<1x64xf32, #tpu.memory_space<vmem>>, vector<1x64xf32>
    %598 = vector.broadcast %597 : vector<1x64xf32> to vector<16x64xf32>
    %599 = arith.addf %596, %598 : vector<16x64xf32>
    %c0_238 = arith.constant 0 : index
    %c0_239 = arith.constant 0 : index
    %600 = vector.load %arg17[%c0_238, %c0_239] : memref<64x128xf32, #tpu.memory_space<vmem>>, vector<64x128xf32>
    %cst_240 = arith.constant dense<0.000000e+00> : vector<16x128xf32>
    %601 = tpu.matmul %599, %600, %cst_240 {dimension_numbers = #tpu.dot_dimension_numbers<[1], [0], [0], [1], [0, 0, 1, 1], [], []>} : vector<16x64xf32>, vector<64x128xf32>, vector<16x128xf32> -> vector<16x128xf32>
    %c0_241 = arith.constant 0 : index
    %c0_242 = arith.constant 0 : index
    %602 = vector.load %arg18[%c0_241, %c0_242] : memref<1x128xf32, #tpu.memory_space<vmem>>, vector<1x128xf32>
    %603 = vector.broadcast %602 : vector<1x128xf32> to vector<16x128xf32>
    %604 = arith.addf %601, %603 : vector<16x128xf32>
    %c0_243 = arith.constant 0 : index
    %c0_244 = arith.constant 0 : index
    %605 = vector.load %arg19[%c0_243, %c0_244] : memref<16x128xf32, #tpu.memory_space<vmem>>, vector<16x128xf32>
    tpu.vector_store %arg19[%c0_243, %c0_244], %604 {strides = array<i32>} : memref<16x128xf32, #tpu.memory_space<vmem>>, vector<16x128xf32>,
    return
  }
}

</mosaic_0001>

<bundles_post_ra>
// kernel: hvpnet_ner_forward.4
= control target key start
LH: loop header
LB: loop body
LE: loop exit
PB: predicated region body
PF: predicated region fallthrough
CT: control target
= control target key end

     0   :  { %vm45_vm0 = vcmask 1042432   ;;  %v895_v52 = vmov 0.0   ;;  %vm164_vm1 = vcmask 1041409   ;;  %vm168_vm2 = vcmask 23552   ;;  %s1267_s1 = inlined_call_operand.vmem [shape: f32[8,3,256], index: 1, kind: input, shape index: {}]   ;;  %s1268_s0 = inlined_call_operand.vmem [shape: f32[2,3,256], index: 0, kind: input, shape index: {}]   ;;  %s1269_s2 = inlined_call_operand.vmem [shape: f32[3,256], index: 2, kind: input, shape index: {}]   ;;  %s1270_s4 = inlined_call_operand.vmem [shape: f32[256,64], index: 4, kind: input, shape index: {}]   ;;  %s1271_s6 = inlined_call_operand.vmem [shape: f32[256,64], index: 6, kind: input, shape index: {}]   ;;  %s1272_s3 = inlined_call_operand.vmem [shape: f32[1,256], index: 3, kind: input, shape index: {}]   ;;  %s1273_s8 = inlined_call_operand.vmem [shape: f32[64,64], index: 8, kind: input, shape index: {}]   ;;  %s1274_s5 = inlined_call_operand.vmem [shape: f32[1,64], index: 5, kind: input, shape index: {}]   ;;  %s1275_s10 = inlined_call_operand.vmem [shape: f32[2,64], index: 10, kind: output, shape index: {0}]   ;;  %s1276_s7 = inlined_call_operand.vmem [shape: f32[1,64], index: 7, kind: input, shape index: {}]   ;;  %s1277_s9 = inlined_call_operand.vmem [shape: f32[1,64], index: 9, kind: input, shape index: {}]   ;;  %s1278_s11 = inlined_call_operand.vmem [shape: f32[8,64], index: 11, kind: output, shape index: {1}]  }
   0x1   :  { %v61_v0 = vld [vmem:[%s1267_s1 + $0x10] sm:$0x77]  ;;  %v59_v1 = vld [vmem:[%s1267_s1] sm:$0x77]  ;;  %v60_v2 = vld [vmem:[%s1267_s1 + $0x8] sm:$0x77]  ;;  %239 = vmatprep.mubr.f32.mxu1 %v895_v52 }
   0x2   :  { %v77_v3 = vcombine.high %v61_v0, %v61_v0  ;;  %v101_v4 = vsel %vm45_vm0, %v61_v0, 0.0  ;;  %v75_v5 = vcombine.high %v59_v1, %v59_v1  ;;  %v91_v6 = vsel %vm45_vm0, %v59_v1, 0.0  ;;  %v37_v7 = vld [vmem:[%s1268_s0] sm:$0x77]  ;;  %v38_v8 = vld [vmem:[%s1268_s0 + $0x8] sm:$0x77] }
   0x3   :  { %v76_v9 = vcombine.high %v60_v2, %v60_v2  ;;  %v96_v10 = vsel %vm45_vm0, %v60_v2, 0.0  ;;  %v41_v11 = vcombine.high %v37_v7, %v37_v7  ;;  %v62_v12 = vld [vmem:[%s1267_s1 + $0x18] sm:$0x77]  ;;  %v46_v15 = vsel %vm45_vm0, %v37_v7, 0.0  ;;  %v63_v21 = vld [vmem:[%s1267_s1 + $0x20] sm:$0x77] }
   0x4   :  { %v102_v13 = vsel %vm45_vm0, %v77_v3, 0.0  ;;  %v92_v14 = vsel %vm45_vm0, %v75_v5, 0.0  ;;  %v42_v16 = vcombine.high %v38_v8, %v38_v8  ;;  %v64_v22 = vld [vmem:[%s1267_s1 + $0x28] sm:$0x77]  ;;  %v78_v23 = vcombine.high %v62_v12, %v62_v12  ;;  %v65_v32 = vld [vmem:[%s1267_s1 + $0x30] sm:$0x77] }
   0x5   :  { %v103_v17 = vadd.f32 %v102_v13, %v101_v4  ;;  %v93_v18 = vadd.f32 %v92_v14, %v91_v6  ;;  %v97_v19 = vsel %vm45_vm0, %v76_v9, 0.0  ;;  %v47_v20 = vsel %vm45_vm0, %v41_v11, 0.0  ;;  %v66_v33 = vld [vmem:[%s1267_s1 + $0x38] sm:$0x77]  ;;  %v1011_v50 = vld [vmem:[%s1269_s2] sm:$0x77] }
   0x6   :  { %v98_v24 = vadd.f32 %v97_v19, %v96_v10  ;;  %v48_v25 = vadd.f32 %v47_v20, %v46_v15  ;;  %v51_v26 = vsel %vm45_vm0, %v38_v8, 0.0  ;;  %v52_v27 = vsel %vm45_vm0, %v42_v16, 0.0  ;;  %v392_v53 = vld [vmem:[%s1270_s4 + $0x80] sm:$0xff]  ;;  %v393_v54 = vld [vmem:[%s1270_s4 + $0x88] sm:$0xff]  ;;  %v394_v58 = vld [vmem:[%s1270_s4 + $0x90] sm:$0xff] }
   0x7   :  { %104 = vadd.xlane.f32.xlu1 %v103_v17  ;;  %94 = vadd.xlane.f32.xlu0 %v93_v18  ;;  %v106_v28 = vsel %vm45_vm0, %v62_v12, 0.0  ;;  %v107_v29 = vsel %vm45_vm0, %v78_v23, 0.0  ;;  %v79_v30 = vcombine.high %v63_v21, %v63_v21  ;;  %v80_v31 = vcombine.high %v64_v22, %v64_v22  ;;  %v376_v55 = vld [vmem:[%s1270_s4] sm:$0xff]  ;;  %v377_v57 = vld [vmem:[%s1270_s4 + $0x8] sm:$0xff]  ;;  %v395_v59 = vld [vmem:[%s1270_s4 + $0x98] sm:$0xff] }
   0x8   :  { %v53_v34 = vadd.f32 %v52_v27, %v51_v26  ;;  %v108_v35 = vadd.f32 %v107_v29, %v106_v28  ;;  %v111_v36 = vsel %vm45_vm0, %v63_v21, 0.0  ;;  %v116_v37 = vsel %vm45_vm0, %v64_v22, 0.0  ;;  %v378_v62 = vld [vmem:[%s1270_s4 + $0x10] sm:$0xff]  ;;  %v379_v63 = vld [vmem:[%s1270_s4 + $0x18] sm:$0xff]  ;;  %v396_v0 = vld [vmem:[%s1270_s4 + $0xa0] sm:$0xff] }
   0x9   :  { %v112_v38 = vsel %vm45_vm0, %v79_v30, 0.0  ;;  %v117_v39 = vsel %vm45_vm0, %v80_v31, 0.0  ;;  %v81_v40 = vcombine.high %v65_v32, %v65_v32  ;;  %v82_v41 = vcombine.high %v66_v33, %v66_v33  ;;  %v397_v1 = vld [vmem:[%s1270_s4 + $0xa8] sm:$0xff]  ;;  %v380_v4 = vld [vmem:[%s1270_s4 + $0x20] sm:$0xff]  ;;  %v398_v6 = vld [vmem:[%s1270_s4 + $0xb0] sm:$0xff] }
   0xa   :  { %v113_v42 = vadd.f32 %v112_v38, %v111_v36  ;;  %v118_v43 = vadd.f32 %v117_v39, %v116_v37  ;;  %v121_v44 = vsel %vm45_vm0, %v65_v32, 0.0  ;;  %v126_v46 = vsel %vm45_vm0, %v66_v33, 0.0  ;;  %v381_v5 = vld [vmem:[%s1270_s4 + $0x28] sm:$0xff]  ;;  %v399_v7 = vld [vmem:[%s1270_s4 + $0xb8] sm:$0xff]  ;;  %v382_v10 = vld [vmem:[%s1270_s4 + $0x30] sm:$0xff] }
   0xb   :  { %99 = vadd.xlane.f32.xlu0 %v98_v24  ;;  %49 = vadd.xlane.f32.xlu1 %v48_v25  ;;  %v122_v45 = vsel %vm45_vm0, %v81_v40, 0.0  ;;  %v127_v47 = vsel %vm45_vm0, %v82_v41, 0.0  ;;  %v167_v51 = vcombine.high %v1011_v50, %v1011_v50  ;;  %v803_v56 = vpack.c.bf16 %v393_v54, %v392_v53  ;;  %v383_v11 = vld [vmem:[%s1270_s4 + $0x38] sm:$0xff]  ;;  %v400_v12 = vld [vmem:[%s1270_s4 + $0xc0] sm:$0xff]  ;;  %v401_v13 = vld [vmem:[%s1270_s4 + $0xc8] sm:$0xff] }
   0xc   :  { %v123_v48 = vadd.f32 %v122_v45, %v121_v44  ;;  %v128_v49 = vadd.f32 %v127_v47, %v126_v46  ;;  %v805_v60 = vpack.c.bf16 %v377_v57, %v376_v55  ;;  %v807_v61 = vpack.c.bf16 %v395_v59, %v394_v58  ;;  %v384_v16 = vld [vmem:[%s1270_s4 + $0x40] sm:$0xff]  ;;  %v385_v17 = vld [vmem:[%s1270_s4 + $0x48] sm:$0xff]  ;;  %v402_v18 = vld [vmem:[%s1270_s4 + $0xd0] sm:$0xff] }
   0xd   :  { %695 = vmatprep.subr.msk.mxu1 %vm45_vm0, %v167_v51  ;;  %804 = vmatprep.subr.bf16.mxu0 %v803_v56  ;;  %v809_v2 = vpack.c.bf16 %v379_v63, %v378_v62  ;;  %v811_v3 = vpack.c.bf16 %v397_v1, %v396_v0  ;;  %v813_v8 = vpack.c.bf16 %v381_v5, %v380_v4  ;;  %v403_v19 = vld [vmem:[%s1270_s4 + $0xd8] sm:$0xff]  ;;  %v386_v22 = vld [vmem:[%s1270_s4 + $0x50] sm:$0xff]  ;;  %v404_v24 = vld [vmem:[%s1270_s4 + $0xe0] sm:$0xff]  ;;  %v142_v28 = vlaneseq }
   0xe   :  { %696 = vmatpush1.msk.msra.mxu1 %vm45_vm0, %v1011_v50  ;;  %806 = vmatpush3.bf16.msra.mxu0 %v805_v60  ;;  %v815_v9 = vpack.c.bf16 %v399_v7, %v398_v6  ;;  %v817_v14 = vpack.c.bf16 %v383_v11, %v382_v10  ;;  %v819_v15 = vpack.c.bf16 %v401_v13, %v400_v12  ;;  %v387_v23 = vld [vmem:[%s1270_s4 + $0x58] sm:$0xff]  ;;  %v405_v25 = vld [vmem:[%s1270_s4 + $0xe8] sm:$0xff]  ;;  %v503_v45 = vld [vmem:[%s1271_s6 + $0x80] sm:$0xff]  ;;  %vm289_vm3 = vcmask 1042434  }
   0xf   :  { %54 = vadd.xlane.f32.xlu0 %v53_v34  ;;  %109 = vadd.xlane.f32.xlu1 %v108_v35  ;;  %v821_v20 = vpack.c.bf16 %v385_v17, %v384_v16  ;;  %v823_v21 = vpack.c.bf16 %v403_v19, %v402_v18  ;;  %v825_v26 = vpack.c.bf16 %v387_v23, %v386_v22  ;;  %v1098_v31 = vshrl.u32 %v142_v28, 7  ;;  %v504_v46 = vld [vmem:[%s1271_s6 + $0x88] sm:$0xff]  ;;  %v487_v6 = vld [vmem:[%s1271_s6] sm:$0xff]  ;;  %v490_v16 = vld [vmem:[%s1271_s6 + $0x18] sm:$0xff] }
  0x10   :  { %698 = vmatprep.subr.msk.mxu1 %vm45_vm0, %v167_v51  ;;  %808 = vmatprep.subr.bf16.mxu0 %v807_v61  ;;  %v827_v27 = vpack.c.bf16 %v405_v25, %v404_v24  ;;  %v155_v32 = vand.u32 127, %v142_v28  ;;  %vm291_vm4 = vcmask 1043459   ;;  %v835_v56 = vpack.c.bf16 %v504_v46, %v503_v45  ;;  %v488_v7 = vld [vmem:[%s1271_s6 + $0x8] sm:$0xff]  ;;  %v507_v18 = vld [vmem:[%s1271_s6 + $0xa0] sm:$0xff]  ;;  %v509_v24 = vld [vmem:[%s1271_s6 + $0xb0] sm:$0xff] }
  0x11   :  { %vm293_vm5 = vcmask 1044484   ;;  %vm295_vm6 = vcmask 1045509   ;;  %vm297_vm7 = vcmask 1046534   ;;  %vm299_vm8 = vcmask 1047559   ;;  %v508_v19 = vld [vmem:[%s1271_s6 + $0xa8] sm:$0xff]  ;;  %v491_v22 = vld [vmem:[%s1271_s6 + $0x20] sm:$0xff] }
  0x12   :  { %810 = vmatpush3.bf16.msra.mxu0 %v809_v2  ;;  %v158_v36 = vsub.s32 %v155_v32, %v1098_v31  ;;  %v837_v12 = vpack.c.bf16 %v488_v7, %v487_v6  ;;  %v492_v23 = vld [vmem:[%s1271_s6 + $0x28] sm:$0xff]  ;;  %v510_v25 = vld [vmem:[%s1271_s6 + $0xb8] sm:$0xff]  ;;  %v493_v28 = vld [vmem:[%s1271_s6 + $0x30] sm:$0xff]  ;;  %vm897_vm9 = vmmov 0   ;;  %vm485_vm10 = vcmask 517120  }
  0x13   :  { %114 = vadd.xlane.f32.xlu0 %v113_v42  ;;  %119 = vadd.xlane.f32.xlu1 %v118_v43  ;;  %v388_v32 = vld [vmem:[%s1270_s4 + $0x60] sm:$0xff]  ;;  %v391_v45 = vld [vmem:[%s1270_s4 + $0x78] sm:$0xff]  ;;  %v513_v46 = vld [vmem:[%s1271_s6 + $0xd0] sm:$0xff]  ;;  %vm612_vm11 = vcmask 523264  }
  0x14   :  { %812 = vmatprep.subr.bf16.mxu0 %v811_v3 }
  0x16   :  { %814 = vmatpush3.bf16.msra.mxu0 %v813_v8  ;;  %v506_v8 = vld [vmem:[%s1271_s6 + $0x98] sm:$0xff] }
  0x17   :  { %124 = vadd.xlane.f32.xlu0 %v123_v48  ;;  %129 = vadd.xlane.f32.xlu1 %v128_v49 }
  0x18   :  { %816 = vmatprep.subr.bf16.mxu0 %v815_v9 }
  0x1a   :  { %818 = vmatpush3.bf16.msra.mxu0 %v817_v14 }
  0x1b   :  { %820 = vmatprep.subr.bf16.mxu0 %v819_v15  ;;  %v489_v15 = vld [vmem:[%s1271_s6 + $0x10] sm:$0xff] }
  0x1e   :  { %822 = vmatpush3.bf16.msra.mxu0 %v821_v20  ;;  %v841_v20 = vpack.c.bf16 %v490_v16, %v489_v15 }
  0x1f   :  { %824 = vmatprep.subr.bf16.mxu0 %v823_v21  ;;  %v843_v21 = vpack.c.bf16 %v508_v19, %v507_v18  ;;  %v598_v19 = vld [vmem:[%s1273_s8 + $0x8] sm:$0xff] }
  0x22   :  { %826 = vmatpush3.bf16.msra.mxu0 %v825_v26  ;;  %v845_v26 = vpack.c.bf16 %v492_v23, %v491_v22  ;;  %v599_v22 = vld [vmem:[%s1273_s8 + $0x10] sm:$0xff]  ;;  %v600_v23 = vld [vmem:[%s1273_s8 + $0x18] sm:$0xff] }
  0x23   :  { %828 = vmatprep.subr.bf16.mxu0 %v827_v27  ;;  %v847_v27 = vpack.c.bf16 %v510_v25, %v509_v24  ;;  %v871_v24 = vpack.c.bf16 %v600_v23, %v599_v22  ;;  %v601_v25 = vld [vmem:[%s1273_s8 + $0x20] sm:$0xff] }
  0x94   :  { %v105_v29 = vpop.xlane.xlu1 %104  ;;  %v95_v30 = vpop.xlane.xlu0 %94 }
  0x95   :  { %v131_v37 = vmul.f32 0.00390625, %v95_v30  ;;  %v133_v42 = vmul.f32 0.00390625, %v105_v29  ;;  %v494_v29 = vld [vmem:[%s1271_s6 + $0x38] sm:$0xff] }
  0x96   :  { %v849_v30 = vpack.c.bf16 %v494_v29, %v493_v28  ;;  %v603_v28 = vld [vmem:[%s1273_s8 + $0x30] sm:$0xff]  ;;  %v604_v29 = vld [vmem:[%s1273_s8 + $0x38] sm:$0xff] }
  0x97   :  { %v259_v47 = vrot.slane %v131_v37, %v158_v36  ;;  %v267_v57 = vrot.slane %v133_v42, %v158_v36  ;;  %v495_v37 = vld [vmem:[%s1271_s6 + $0x40] sm:$0xff]  ;;  %v407_v42 = vld [vmem:[%s1270_s4 + $0xf8] sm:$0xff] }
  0x98   :  { %v100_v33 = vpop.xlane.xlu0 %99  ;;  %v50_v34 = vpop.xlane.xlu1 %49 }
  0x99   :  { %v132_v35 = vmul.f32 0.00390625, %v100_v33  ;;  %v57_v38 = vmul.f32 0.00390625, %v50_v34  ;;  %v389_v33 = vld [vmem:[%s1270_s4 + $0x68] sm:$0xff]  ;;  %v511_v34 = vld [vmem:[%s1271_s6 + $0xc0] sm:$0xff] }
  0x9b   :  { %v263_v39 = vrot.slane %v132_v35, %v158_v36  ;;  %v159_v48 = vrot.slane %v57_v38, %v158_v36  ;;  %v829_v35 = vpack.c.bf16 %v389_v33, %v388_v32  ;;  %v496_v38 = vld [vmem:[%s1271_s6 + $0x48] sm:$0xff]  ;;  %v701_v33 = vld [vmem:[%s1274_s5] ss:$0 sm:$0xff] }
  0x9c   :  { %v55_v40 = vpop.xlane.xlu0 %54  ;;  %v110_v41 = vpop.xlane.xlu1 %109 }
  0x9d   :  { %v58_v43 = vmul.f32 0.00390625, %v55_v40  ;;  %v134_v44 = vmul.f32 0.00390625, %v110_v41  ;;  %v288_v55 = vsel %vm164_vm1, %v263_v39, %v259_v47  ;;  %v853_v40 = vpack.c.bf16 %v496_v38, %v495_v37  ;;  %830 = vmatpush3.bf16.msra.mxu0 %v829_v35  ;;  %v406_v41 = vld [vmem:[%s1270_s4 + $0xf0] sm:$0xff] }
  0x9e   :  { %v290_v62 = vsel %vm289_vm3, %v267_v57, %v288_v55  ;;  %v515_v55 = vld [vmem:[%s1271_s6 + $0xe0] sm:$0xff] }
  0x9f   :  { %v163_v49 = vrot.slane %v58_v43, %v158_v36  ;;  %v271_v51 = vrot.slane %v134_v44, %v158_v36  ;;  %v831_v43 = vpack.c.bf16 %v407_v42, %v406_v41  ;;  %v390_v44 = vld [vmem:[%s1270_s4 + $0x70] sm:$0xff]  ;;  %v703_v42 = vld [vmem:[%s1277_s9] ss:$0 sm:$0xff] }
  0xa0   :  { %v115_v53 = vpop.xlane.xlu0 %114  ;;  %v120_v54 = vpop.xlane.xlu1 %119  ;;  %v833_v47 = vpack.c.bf16 %v391_v45, %v390_v44 }
  0xa1   :  { %v135_v58 = vmul.f32 0.00390625, %v115_v53  ;;  %v136_v59 = vmul.f32 0.00390625, %v120_v54  ;;  %v165_v60 = vsel %vm164_vm1, %v163_v49, %v159_v48  ;;  %v292_v0 = vsel %vm291_vm4, %v271_v51, %v290_v62  ;;  %v514_v48 = vld [vmem:[%s1271_s6 + $0xd8] sm:$0xff]  ;;  %v497_v49 = vld [vmem:[%s1271_s6 + $0x50] sm:$0xff]  ;;  %832 = vmatprep.subr.bf16.mxu0 %v831_v43 }
  0xa2   :  { %697 = vmatmul.mubr.msk.f32.vlgmr.msra.gmra.mrb[0].mxu1 %vm168_vm2, %v165_v60  ;;  %v498_v51 = vld [vmem:[%s1271_s6 + $0x58] sm:$0xff]  ;;  %v855_v53 = vpack.c.bf16 %v514_v48, %v513_v46  ;;  %834 = vmatpush3.bf16.msra.mxu0 %v833_v47 }
  0xa3   :  { %v275_v61 = vrot.slane %v135_v58, %v158_v36  ;;  %699 = vmatpush1.msk.msra.mxu1 %vm45_vm0, %v1011_v50  ;;  %367 = vmatprep.mubr.f32.mxu1 %v895_v52  ;;  %v279_v63 = vrot.slane %v136_v59, %v158_v36  ;;  %v505_v50 = vld [vmem:[%s1271_s6 + $0x90] sm:$0xff]  ;;  %v857_v54 = vpack.c.bf16 %v498_v51, %v497_v49  ;;  %v499_v58 = vld [vmem:[%s1271_s6 + $0x60] sm:$0xff]  ;;  %v500_v59 = vld [vmem:[%s1271_s6 + $0x68] sm:$0xff] }
  0xa4   :  { %v125_v1 = vpop.xlane.xlu0 %124  ;;  %v130_v2 = vpop.xlane.xlu1 %129  ;;  %836 = vmatprep.subr.bf16.mxu1 %v835_v56  ;;  %v839_v14 = vpack.c.bf16 %v506_v8, %v505_v50  ;;  %v516_v56 = vld [vmem:[%s1271_s6 + $0xe8] sm:$0xff]  ;;  %v861_v60 = vpack.c.bf16 %v500_v59, %v499_v58  ;;  %v518_v62 = vld [vmem:[%s1271_s6 + $0xf8] sm:$0xff] }
  0xa5   :  { %v137_v3 = vmul.f32 0.00390625, %v125_v1  ;;  %v294_v4 = vsel %vm293_vm5, %v275_v61, %v292_v0  ;;  %v138_v5 = vmul.f32 0.00390625, %v130_v2  ;;  %v859_v57 = vpack.c.bf16 %v516_v56, %v515_v55  ;;  %v517_v61 = vld [vmem:[%s1271_s6 + $0xf0] sm:$0xff]  ;;  %v502_v1 = vld [vmem:[%s1271_s6 + $0x78] sm:$0xff] }
  0xa6   :  { %v296_v11 = vsel %vm295_vm6, %v279_v63, %v294_v4  ;;  %v863_v63 = vpack.c.bf16 %v518_v62, %v517_v61  ;;  %v501_v0 = vld [vmem:[%s1271_s6 + $0x70] sm:$0xff]  ;;  %v140_v4 = vld [vmem:[%s1272_s3] sm:$0x3] }
  0xa7   :  { %v283_v9 = vrot.slane %v137_v3, %v158_v36  ;;  %v287_v10 = vrot.slane %v138_v5, %v158_v36  ;;  %v512_v36 = vld [vmem:[%s1271_s6 + $0xc8] sm:$0xff]  ;;  %v865_v2 = vpack.c.bf16 %v502_v1, %v501_v0  ;;  %v144_v3 = vsub.s32 0, %v1098_v31 }
  0xa8   :  { %v851_v39 = vpack.c.bf16 %v512_v36, %v511_v34  ;;  %v148_v5 = vsub.s32 1, %v1098_v31  ;;  %v597_v31 = vld [vmem:[%s1273_s8] sm:$0xff] }
  0xa9   :  { %v298_v13 = vsel %vm297_vm7, %v283_v9, %v296_v11  ;;  %v145_v6 = vrot.slane %v140_v4, %v144_v3 }
  0xaa   :  { %v300_v17 = vsel %vm299_vm8, %v287_v10, %v298_v13  ;;  %v149_v7 = vrot.slane %v140_v4, %v148_v5 }
  0xab   :  { %700 = vmatmul.mubr.msk.f32.vlgmr.msra.gmra.mrb[2].mxu1 %vm168_vm2, %v300_v17 }
  0xac   :  { %838 = vmatpush3.bf16.msra.mxu1 %v837_v12 }
  0xad   :  { %840 = vmatprep.subr.bf16.mxu1 %v839_v14 }
  0xb0   :  { %842 = vmatpush3.bf16.msra.mxu1 %v841_v20  ;;  %v868_v20 = vpack.c.bf16 %v598_v19, %v597_v31 }
  0xb1   :  { %844 = vmatprep.subr.bf16.mxu1 %v843_v21  ;;  %v896_v21 = vmov 0.0|0.0  }
  0xb2   :  { %867 = vmatprep.subr.bf16.mxu0 %v896_v21 }
  0xb4   :  { %846 = vmatpush3.bf16.msra.mxu1 %v845_v26  ;;  %v602_v26 = vld [vmem:[%s1273_s8 + $0x28] sm:$0xff] }
  0xb5   :  { %848 = vmatprep.subr.bf16.mxu1 %v847_v27  ;;  %v874_v27 = vpack.c.bf16 %v602_v26, %v601_v25 }
  0xb8   :  { %850 = vmatpush3.bf16.msra.mxu1 %v849_v30  ;;  %v877_v30 = vpack.c.bf16 %v604_v29, %v603_v28 }
  0xb9   :  { %852 = vmatprep.subr.bf16.mxu1 %v851_v39 }
  0xbc   :  { %854 = vmatpush3.bf16.msra.mxu1 %v853_v40 }
  0xbd   :  { %856 = vmatprep.subr.bf16.mxu1 %v855_v53 }
  0xc0   :  { %858 = vmatpush3.bf16.msra.mxu1 %v857_v54 }
  0xc1   :  { %860 = vmatprep.subr.bf16.mxu1 %v859_v57 }
  0xc4   :  { %862 = vmatpush3.bf16.msra.mxu1 %v861_v60 }
  0xc5   :  { %864 = vmatprep.subr.bf16.mxu1 %v863_v63 }
  0xc8   :  { %866 = vmatpush3.bf16.msra.mxu1 %v865_v2 }
 0x175   :  { %v241_v50 = vpop.f32.mrb[0].mxu1 }
 0x176   :  { %v242_v8 = vadd.f32 %v241_v50, %v145_v6  ;;  %v243_v9 = vpop.f32.mrb[1].mxu1 }
 0x177   :  { %v244_v10 = vadd.f32 %v243_v9, %v149_v7 }
 0x178   :  { %v246_v12 = vmax.f32 %v242_v8, 0.0 }
 0x179   :  { %v247_v11 = vmax.f32 %v244_v10, 0.0 }
 0x17b   :  { %479 = vmatprep.mubr.f32.mxu0 %v247_v11 }
 0x17c   :  { %480 = vmatmul.mubr.f32.vlgmr.msra.gmra.mrb[0].mxu0 %v246_v12 }
 0x17d   :  { %869 = vmatpush3.bf16.msra.mxu0 %v868_v20  ;;  %800 = vmatprep.mubr.msk.f32.mxu0 %vm897_vm9, %v895_v52  ;;  %v702_v52 = vld [vmem:[%s1276_s7] ss:$0 sm:$0xff] }
 0x17e   :  { %v369_v13 = vpop.f32.mrb[2].mxu1  ;;  %870 = vmatprep.subr.bf16.mxu0 %v896_v21 }
 0x17f   :  { %v370_v14 = vadd.f32 %v369_v13, %v145_v6  ;;  %v371_v15 = vpop.f32.mrb[3].mxu1 }
 0x180   :  { %v372_v16 = vadd.f32 %v371_v15, %v149_v7 }
 0x181   :  { %v374_v18 = vmax.f32 %v370_v14, 0.0  ;;  %872 = vmatpush3.bf16.msra.mxu0 %v871_v24 }
 0x182   :  { %v375_v17 = vmax.f32 %v372_v16, 0.0  ;;  %873 = vmatprep.subr.bf16.mxu0 %v896_v21 }
 0x184   :  { %590 = vmatprep.mubr.f32.mxu1 %v375_v17 }
 0x185   :  { %591 = vmatmul.mubr.f32.vlgmr.msra.gmra.mrb[4].mxu1 %v374_v18  ;;  %875 = vmatpush3.bf16.msra.mxu0 %v874_v27 }
 0x186   :  { %876 = vmatprep.subr.bf16.mxu0 %v896_v21 }
 0x189   :  { %878 = vmatpush3.bf16.msra.mxu0 %v877_v30 }
 0x24f   :  { %v737_v32 = vpop.f32.mrb[0].mxu0 }
 0x250   :  { %v738_v34 = vpop.f32.mrb[1].mxu0 }
 0x251   :  { %v739_v35 = vadd.f32 %v738_v34, %v737_v32 }
 0x253   :  { %v482_v36 = vadd.f32 %v739_v35, %v701_v33 }
 0x255   :  { %486 = vst.msk [vmem:[%s1275_s10] sm:$0x3] %vm485_vm10, %v482_v36 }
 0x258   :  { %v772_v37 = vpop.f32.mrb[4].mxu1 }
 0x259   :  { %v773_v38 = vpop.f32.mrb[5].mxu1 }
 0x25a   :  { %v774_v39 = vadd.f32 %v773_v38, %v772_v37 }
 0x25c   :  { %v593_v40 = vadd.f32 %v774_v39, %v702_v52 }
 0x25e   :  { %893 = vtanh.f32 %v593_v40 }
 0x268   :  { %v894_v41 = vpop.eup %893 }
 0x269   :  { %801 = vmatmul.mubr.msk.f32.vlgmr.msra.gmra.mrb[2].mxu0 %vm612_vm11, %v894_v41 }
 0x33c   :  { %v682_v43 = vpop.f32.mrb[2].mxu0 }
 0x33d   :  { %v683_v44 = vadd.f32 %v703_v42, %v682_v43  ;;  %v802_v45 = vpop.f32.mrb[3].mxu0 }
 0x33f   :  { %686 = vst.msk [vmem:[%s1278_s11] sm:$0xff] %vm612_vm11, %v683_v44 }

// kernel: hvpnet_ner_forward.3
= control target key start
LH: loop header
LB: loop body
LE: loop exit
PB: predicated region body
PF: predicated region fallthrough
CT: control target
= control target key end

     0   :  { %s3319_s21 = smov 0   ;;  %s3735_s0 = inlined_call_operand.vmem [shape: f32[16,64], index: 0, kind: input, shape index: {}]   ;;  %s3736_s1 = inlined_call_operand.vmem [shape: f32[2,8], index: 1, kind: input, shape index: {}]   ;;  %s3737_s2 = inlined_call_operand.vmem [shape: f32[1,64], index: 2, kind: input, shape index: {}]   ;;  %s3738_s3 = inlined_call_operand.vmem [shape: f32[1,64], index: 3, kind: input, shape index: {}]   ;;  %s3739_s4 = inlined_call_operand.vmem [shape: f32[4,64,192], index: 4, kind: input, shape index: {}]   ;;  %s3740_s5 = inlined_call_operand.vmem [shape: f32[4,1,192], index: 5, kind: input, shape index: {}]   ;;  %s3741_s6 = inlined_call_operand.vmem [shape: f32[4,64,64], index: 6, kind: input, shape index: {}]   ;;  %s3742_s7 = inlined_call_operand.vmem [shape: f32[4,1,64], index: 7, kind: input, shape index: {}]   ;;  %s3743_s8 = inlined_call_operand.vmem [shape: f32[4,1,64], index: 8, kind: input, shape index: {}]   ;;  %s3744_s9 = inlined_call_operand.vmem [shape: f32[4,1,64], index: 9, kind: input, shape index: {}]   ;;  %s3745_s10 = inlined_call_operand.vmem [shape: f32[4,64,256], index: 10, kind: input, shape index: {}]   ;;  %s3746_s11 = inlined_call_operand.vmem [shape: f32[4,1,256], index: 11, kind: input, shape index: {}]   ;;  %s3747_s12 = inlined_call_operand.vmem [shape: f32[4,256,64], index: 12, kind: input, shape index: {}]   ;;  %s3748_s13 = inlined_call_operand.vmem [shape: f32[4,1,64], index: 13, kind: input, shape index: {}]   ;;  %s3749_s14 = inlined_call_operand.vmem [shape: f32[4,1,64], index: 14, kind: input, shape index: {}]   ;;  %s3750_s15 = inlined_call_operand.vmem [shape: f32[4,1,64], index: 15, kind: input, shape index: {}]   ;;  %s3751_s16 = inlined_call_operand.vmem [shape: f32[16,64], index: 16, kind: output, shape index: {}]  }
   0x1   :  { %3756 = sst [smem:[#allocation5_spill]] %s3735_s0 }
   0x2   :  { %3757 = sst [smem:[#allocation6_spill]] %s3736_s1 }
   0x3   :  { %3758 = sst [smem:[#allocation7_spill]] %s3737_s2 }
   0x4   :  { %3759 = sst [smem:[#allocation8_spill]] %s3738_s3 }
   0x5   :  { %3760 = sst [smem:[#allocation9_spill]] %s3739_s4 }
   0x6   :  { %3761 = sst [smem:[#allocation10_spill]] %s3740_s5 }
   0x7   :  { %3762 = sst [smem:[#allocation11_spill]] %s3741_s6 }
   0x8   :  { %3763 = sst [smem:[#allocation12_spill]] %s3751_s16 }
   0x9 LB: > { %3764 = sst [smem:[#allocation3_spill]] %s3223_s21  ;;  %s3325_s22 = sadd.s32 4294967295, %s3223_s21   ;;  %s3223_s21 = sphi %s3319_s21, %s26_s21  }
   0xa   : > { %p2830_p0 = scmp.ge.s32.totalorder %s3223_s21, 1  ;;  %p553_p1 = scmp.lt.s32.totalorder %s3223_s21, 5 }
   0xc   : > { %p554_p2 = pnand %p2830_p0, %p553_p1 }
   0xe   : > { %557 = sbr.rel (%p554_p2) target bundleno = 4007 (0xfa7), region = 84 }
  0x15   : > { %p639_p3 = scmp.lt.s32.totalorder %s3325_s22, 3  ;;  %s3765_s4 = sld [smem:[#allocation9_spill]] }
  0x16   : > { %s3766_s5 = sld [smem:[#allocation10_spill]]  ;;  %s3768_s6 = sld [smem:[#allocation11_spill]] }
  0x17   : > { %s3331_s23 = scalar_select %p639_p3, %s3325_s22, 3 }
  0x18   : > { %p2841_p4 = scmp.ne.s32.totalorder %s3325_s22, 0 }
  0x19   : > { %s2885_s24 = sshll.u32 %s3331_s23, 7  ;;  %s2833_s25 = sshll.u32 %s3331_s23, 1  ;;  %vm693_vm0 = vcmask (!%p2841_p4), 523264  }
  0x1a   : > { %s2886_s17 = sshll.u32 %s3331_s23, 6  ;;  %s3371_s20 = scalar_lea.vmem %s3746_s11, %s2833_s25 }
  0x1b   : > { %s3338_s28 = scalar_lea.vmem %s3765_s4, %s2885_s24  ;;  %s2888_s16 = sshll.u32 %s3331_s23, 8 }
  0x1c   : > { %s3343_s0 = scalar_lea.vmem %s3766_s5, %s2833_s25  ;;  %s3353_s1 = scalar_lea.vmem %s3768_s6, %s2886_s17 }
  0x1d   : > { %3767 = sst [smem:[#allocation4_spill]] %s3343_s0  ;;  %s3366_s0 = scalar_lea.vmem %s3745_s10, %s2885_s24 }
  0x1e   : > { %s3377_s2 = scalar_lea.vmem %s3747_s12, %s2888_s16  ;;  %s678_s4 = scalar_lea.vmem %s3748_s13, %s3331_s23 }
  0x1f   : > { %s681_s5 = scalar_lea.vmem %s3749_s14, %s3331_s23  ;;  %s684_s18 = scalar_lea.vmem %s3750_s15, %s3331_s23 }
  0x20   : > { %688 = sbr.rel (%p2841_p4) target bundleno = 357 (0x165), region = 88  ;;  %s3769_s21 = sld [smem:[#allocation5_spill]] (!%p2841_p4) }
  0x21   : > { %s3771_s29 = sld [smem:[#allocation7_spill]] (!%p2841_p4)  ;;  %s3772_s24 = sld [smem:[#allocation8_spill]] (!%p2841_p4) }
  0x26   : > { %s3770_s17 = smov (!%p2841_p4), %s3769_s21  ;;  %v689_v0 = vld [vmem:[%s3769_s21] sm:$0xff] (!%p2841_p4) }
  0x27   : > { %v690_v1 = vld [vmem:[%s3770_s17 + $0x8] sm:$0xff]  ;;  %v694_v2 = vsel %vm693_vm0, %v689_v0, 0.0  ;;  %v2842_v21 = vld [vmem:[%s3771_s29] ss:$0 sm:$0xff] }
  0x28   : > { %695 = vadd.xlane.f32.xlu0 %v694_v2  ;;  %v697_v3 = vsel %vm693_vm0, %v690_v1, 0.0  ;;  %v2843_v23 = vld [vmem:[%s3772_s24] ss:$0 sm:$0xff] }
  0x2c   : > { %698 = vadd.xlane.f32.xlu0 %v697_v3 }
  0xb5   : > { %v696_v4 = vpop.xlane.xlu0 %695 }
  0xb6   : > { %v701_v5 = vmul.f32 0.015625, %v696_v4 }
  0xb8   : > { %v703_v6 = vsub.f32 %v689_v0, %v701_v5 }
  0xb9   : > { %v699_v7 = vpop.xlane.xlu0 %698 }
  0xba   : > { %v702_v8 = vmul.f32 0.015625, %v699_v7  ;;  %v705_v9 = vmul.f32 %v703_v6, %v703_v6 }
  0xbc   : > { %v704_v10 = vsub.f32 %v690_v1, %v702_v8  ;;  %v707_v11 = vsel %vm693_vm0, %v705_v9, 0.0 }
  0xbd   : > { %708 = vadd.xlane.f32.xlu1 %v707_v11 }
  0xbe   : > { %v706_v12 = vmul.f32 %v704_v10, %v704_v10 }
  0xc0   : > { %v710_v13 = vsel %vm693_vm0, %v706_v12, 0.0 }
  0xc1   : > { %711 = vadd.xlane.f32.xlu1 %v710_v13 }
 0x14a   : > { %v709_v14 = vpop.xlane.xlu1 %708 }
 0x14b   : > { %v713_v15 = vmul.f32 0.015625, %v709_v14 }
 0x14d   : > { %v715_v16 = vadd.f32 1e-12, %v713_v15 }
 0x14e   : > { %v712_v17 = vpop.xlane.xlu1 %711 }
 0x14f   : > { %3165 = vrsqrt.f32 %v715_v16  ;;  %v714_v18 = vmul.f32 0.015625, %v712_v17 }
 0x151   : > { %v716_v19 = vadd.f32 1e-12, %v714_v18 }
 0x153   : > { %3167 = vrsqrt.f32 %v716_v19 }
 0x159   : > { %v3166_v20 = vpop.eup %3165 }
 0x15a   : > { %v719_v22 = vmul.f32 %v3166_v20, %v703_v6 }
 0x15c   : > { %v727_v24 = vmul.f32 %v2842_v21, %v719_v22 }
 0x15d   : > { %v3168_v25 = vpop.eup %3167 }
 0x15e   : > { %v735_v26 = vadd.f32 %v2843_v23, %v727_v24  ;;  %v720_v27 = vmul.f32 %v3168_v25, %v704_v10 }
 0x160   : > { %737 = vst.msk [vmem:[#allocation2] sm:$0xff] %vm693_vm0, %v735_v26  ;;  %v728_v28 = vmul.f32 %v2842_v21, %v720_v27 }
 0x162   : > { %v736_v29 = vadd.f32 %v2843_v23, %v728_v28 }
 0x164   : > { %738 = vst.msk [vmem:[#allocation2 + $0x8] sm:$0xff] %vm693_vm0, %v736_v29 }
 0x165 PF: > { %v742_v30 = vld [vmem:[%s3338_s28 + $0x8] sm:$0xff]  ;;  %v744_v31 = vld [vmem:[%s3338_s28 + $0x18] sm:$0xff]  ;;  %v741_v32 = vld [vmem:[%s3338_s28] sm:$0xff]  ;;  %v3225_v37 = vmov 0.0   ;;  %s3773_s30 = sld [smem:[#allocation4_spill]]  ;;  %vm769_vm1 = vcmask 523264   ;;  %v759_v56 = vlaneseq  ;;  %s3776_s21 = scalar_lea.vmem %s3743_s8, %s3331_s23 }
 0x166   : > { %v3068_v33 = vpack.c.bf16 %v744_v31, %v742_v30  ;;  %v743_v34 = vld [vmem:[%s3338_s28 + $0x10] sm:$0xff]  ;;  %v746_v35 = vld [vmem:[%s3338_s28 + $0x28] sm:$0xff]  ;;  %v748_v36 = vld [vmem:[%s3338_s28 + $0x38] sm:$0xff]  ;;  %840 = vmatprep.mubr.f32.mxu0 %v3225_v37  ;;  %2969 = vmatprep.subr.mxu1 %v3225_v37  ;;  %vm3226_vm2 = vmmov 0   ;;  %s3228_s25 = smov 64   ;;  %vm857_vm3 = vcmask 130048  }
 0x167   : > { %v3070_v38 = vpack.c.bf16 %v743_v34, %v741_v32  ;;  %v3072_v39 = vpack.c.bf16 %v748_v36, %v746_v35  ;;  %v745_v40 = vld [vmem:[%s3338_s28 + $0x20] sm:$0xff]  ;;  %v747_v41 = vld [vmem:[%s3338_s28 + $0x30] sm:$0xff]  ;;  %v750_v42 = vld [vmem:[%s3338_s28 + $0x48] sm:$0xff]  ;;  %v3434_v57 = vshrl.u32 %v759_v56, 7  ;;  %2971 = vmatprep.mubr.msk.f32.mxu1 %vm3226_vm2, %v3225_v37  ;;  %s3774_s16 = sld [smem:[#allocation6_spill]]  ;;  %vm938_vm4 = vcmask 64512  }
 0x168   : > { %3069 = vmatprep.subr.bf16.mxu0 %v3068_v33  ;;  %v752_v43 = vld [vmem:[%s3338_s28 + $0x58] sm:$0xff]  ;;  %v3074_v44 = vpack.c.bf16 %v747_v41, %v745_v40  ;;  %v749_v46 = vld [vmem:[%s3338_s28 + $0x40] sm:$0xff]  ;;  %v751_v47 = vld [vmem:[%s3338_s28 + $0x50] sm:$0xff]  ;;  %s3229_s6 = smov 112   ;;  %s3230_s26 = smov 32   ;;  %vm1538_vm5 = vcmask 261120  }
 0x169   : > { %3071 = vmatpush1.bf16.msra.mxu0 %v3070_v38  ;;  %v3076_v45 = vpack.c.bf16 %v752_v43, %v750_v42  ;;  %v754_v48 = vld [vmem:[%s3338_s28 + $0x68] sm:$0xff]  ;;  %v756_v49 = vld [vmem:[%s3338_s28 + $0x78] sm:$0xff]  ;;  %v3078_v50 = vpack.c.bf16 %v751_v47, %v749_v46  ;;  %v753_v52 = vld [vmem:[%s3338_s28 + $0x60] sm:$0xff]  ;;  %v761_v58 = vsub.s32 0, %v3434_v57  ;;  %v765_v0 = vsub.s32 1, %v3434_v57  ;;  %s3231_s29 = smov 96  }
 0x16a   : > { %3073 = vmatprep.subr.bf16.mxu0 %v3072_v39  ;;  %v3080_v51 = vpack.c.bf16 %v756_v49, %v754_v48  ;;  %v755_v53 = vld [vmem:[%s3338_s28 + $0x70] sm:$0xff]  ;;  %v3428_v55 = vld [vmem:[#allocation2] sm:$0xff]  ;;  %s3227_s28 = smov 48   ;;  %s3232_s3 = smov 80   ;;  %vm1540_vm6 = vcmask 392192  }
 0x16b   : > { %v3082_v54 = vpack.c.bf16 %v755_v53, %v753_v52  ;;  %v757_v59 = vld [vmem:[%s3773_s30] sm:$0x3]  ;;  %v3490_v21 = vld [vmem:[#allocation2 + $0x8] sm:$0xff]  ;;  %s3233_s27 = smov 16   ;;  %p2882_p5 = scmp.ne.s32.totalorder %s3325_s22, 3 }
 0x16c   : > { %v3442_v60 = vrot.slane %v757_v59, %v761_v58  ;;  %v3454_v1 = vrot.slane %v757_v59, %v765_v0 }
 0x16d   : > { %3075 = vmatpush1.bf16.msra.mxu0 %v3074_v44  ;;  %v3470_v5 = vld [vmem:[%s3774_s16] ss:$0 sm:$0xff] }
 0x16e   : > { %3077 = vmatprep.subr.bf16.mxu0 %v3076_v45 }
 0x171   : > { %3079 = vmatpush1.bf16.msra.mxu0 %v3078_v50 }
 0x172   : > { %3081 = vmatprep.subr.bf16.mxu0 %v3080_v51 }
 0x175   : > { %3083 = vmatpush1.bf16.msra.mxu0 %v3082_v54 }
 0x176   : > { %2994 = vmatprep.subr.mxu0 %v3225_v37 }
 0x178   : > { %2844 = vmatmul.mubr.msk.f32.vlgmr.msra.gmra.mrb[0].mxu0 %vm769_vm1, %v3428_v55 }
 0x179   : > { %846 = vmatprep.mubr.f32.mxu0 %v3225_v37 }
 0x17c   : > { %2845 = vmatmul.mubr.msk.f32.gmra.mrb[2].mxu0 %vm769_vm1, %v3490_v21 }
 0x17d   : > { %2996 = vmatprep.mubr.msk.f32.mxu0 %vm3226_vm2, %v3225_v37 }
 0x24b   : > { %v842_v61 = vpop.f32.mrb[0].mxu0 }
 0x24c   : > { %v3445_v62 = vadd.f32 %v842_v61, %v3442_v60  ;;  %v844_v63 = vpop.f32.mrb[1].mxu0 }
 0x24d   : > { %v3459_v3 = vadd.f32 %v844_v63, %v3454_v1 }
 0x24e   : > { %1025 = vrot.lane.b32.xlu1 %v3445_v62, %s3227_s28  ;;  %855 = vrot.lane.b32.xlu0 %v3445_v62, %s3228_s25 }
 0x24f   : > { %v848_v29 = vpop.f32.mrb[2].mxu0 }
 0x250   : > { %v849_v30 = vadd.f32 %v848_v29, %v3442_v60  ;;  %v3503_v31 = vpop.f32.mrb[3].mxu0 }
 0x2c0   : > { %v856_v2 = vpop.permute.xlu0 %855  ;;  %v1026_v15 = vpop.permute.xlu1 %1025 }
 0x2c1   : > { %2970 = vmatpush3.xpose.msk.msra.mxu1 %vm857_vm3, %v856_v2 }
 0x2c2   : > { %2974 = vmatprep.subr.mxu1 %v3225_v37 }
 0x2c4   : > { %2972 = vmatmul.mubr.msk.f32.vlgmr.msra.gmra.mrb[0].mxu1 %vm857_vm3, %v3445_v62 }
 0x2c5   : > { %2975 = vmatpush3.msra.mxu1 %v3459_v3  ;;  %2976 = vmatprep.mubr.msk.f32.mxu1 %vm3226_vm2, %v3225_v37 }
 0x2c6   : > { %2979 = vmatprep.subr.mxu1 %v3225_v37 }
 0x397   : > { %v928_v4 = vpop.f32.mrb[0].mxu1 }
 0x398   : > { %v932_v6 = vmul.f32 0.25, %v928_v4  ;;  %v2973_v7 = vpop.f32.mrb[1].mxu1 }
 0x399   : > { %v2861_v7 = vld [vmem:[%s3774_s16 + $0x1] ss:$0 sm:$0xff] }
 0x39a   : > { %v937_v8 = vadd.f32 %v3470_v5, %v932_v6 }
 0x39c   : > { %v939_v9 = vsel %vm938_vm4, %v937_v8, -inf }
 0x39d   : > { %940 = vmax.xlane.f32.xlu0 %v939_v9 }
 0x3b3   : > { %1115 = vrot.lane.b32.xlu0 %v3459_v3, %s3229_s6 }
 0x3b7   : > { %1193 = vrot.lane.b32.xlu0 %v3445_v62, %s3230_s26 }
 0x42a   : > { %v941_v10 = vpop.xlane.xlu0 %940 }
 0x42b   : > { %v942_v11 = vsub.f32 %v937_v8, %v941_v10 }
 0x42d   : > { %v943_v12 = vmul.f32 1.442695, %v942_v11 }
 0x42e   : > { %v1116_v20 = vpop.permute.xlu0 %1115 }
 0x42f   : > { %3169 = vpow2.f32 %v943_v12 }
 0x432   : > { %v1194_v38 = vpop.permute.xlu0 %1193 }
 0x439   : > { %v3170_v13 = vpop.eup %3169 }
 0x43a   : > { %v945_v14 = vsel %vm938_vm4, %v3170_v13, 0.0 }
 0x43b   : > { %946 = vadd.xlane.f32.xlu1 %v945_v14 }
 0x44c   : > { %1023 = vrot.lane.b32.xlu1 %v3445_v62, %s3229_s6 }
 0x4c8   : > { %v947_v16 = vpop.xlane.xlu1 %946 }
 0x4c9   : > { %3171 = vrcp.f32 %v947_v16 }
 0x4cc   : > { %v1024_v19 = vpop.permute.xlu1 %1023 }
 0x4d3   : > { %v3172_v17 = vpop.eup %3171 }
 0x4d4   : > { %v949_v18 = vmul.f32 %v3172_v17, %v3170_v13 }
 0x4d6   : > { %2977 = vmatmul.mubr.msk.f32.vlgmr.msra.gmra.mrb[2].mxu1 %vm938_vm4, %v949_v18 }
 0x4d7   : > { %2980 = vmatpush3.xpose.msk.msra.mxu1 %vm857_vm3, %v1026_v15  ;;  %2981 = vmatprep.mubr.msk.f32.mxu1 %vm3226_vm2, %v3225_v37 }
 0x4d8   : > { %2984 = vmatprep.subr.mxu1 %v3225_v37 }
 0x4da   : > { %2982 = vmatmul.mubr.msk.f32.vlgmr.msra.gmra.mrb[4].mxu1 %vm857_vm3, %v1024_v19 }
 0x4db   : > { %2985 = vmatpush3.msra.mxu1 %v1116_v20  ;;  %2986 = vmatprep.mubr.msk.f32.mxu1 %vm3226_vm2, %v3225_v37 }
 0x4dc   : > { %2989 = vmatprep.subr.mxu1 %v3225_v37 }
 0x5a9   : > { %v3496_v22 = vpop.f32.mrb[2].mxu1 }
 0x5aa   : > { %v2978_v23 = vpop.f32.mrb[3].mxu1 }
 0x5ad   : > { %v1097_v24 = vpop.f32.mrb[4].mxu1 }
 0x5ae   : > { %v1101_v25 = vmul.f32 0.25, %v1097_v24  ;;  %v2983_v26 = vpop.f32.mrb[5].mxu1 }
 0x5b0   : > { %v1102_v27 = vadd.f32 %v3470_v5, %v1101_v25 }
 0x5b2   : > { %v1103_v28 = vsel %vm938_vm4, %v1102_v27, -inf }
 0x5b3   : > { %1104 = vmax.xlane.f32.xlu1 %v1103_v28 }
 0x5c4   : > { %1191 = vrot.lane.b32.xlu1 %v3445_v62, %s3231_s29 }
 0x5c8   : > { %1710 = vrot.lane.b32.xlu1 %v849_v30, %s3229_s6 }
 0x5cc   : > { %1878 = vrot.lane.b32.xlu1 %v849_v30, %s3231_s29 }
 0x5d0   : > { %2045 = vrot.lane.b32.xlu1 %v849_v30, %s3232_s3 }
 0x640   : > { %v1105_v32 = vpop.xlane.xlu1 %1104 }
 0x641   : > { %v1106_v33 = vsub.f32 %v1102_v27, %v1105_v32 }
 0x643   : > { %v1107_v34 = vmul.f32 1.442695, %v1106_v33 }
 0x644   : > { %v1192_v45 = vpop.permute.xlu1 %1191 }
 0x645   : > { %3173 = vpow2.f32 %v1107_v34 }
 0x648   : > { %v1711_v47 = vpop.permute.xlu1 %1710 }
 0x64c   : > { %v1879_v49 = vpop.permute.xlu1 %1878 }
 0x64f   : > { %v3174_v35 = vpop.eup %3173 }
 0x650   : > { %v1109_v36 = vsel %vm938_vm4, %v3174_v35, 0.0  ;;  %v2046_v51 = vpop.permute.xlu1 %2045 }
 0x651   : > { %1110 = vadd.xlane.f32.xlu0 %v1109_v36 }
 0x667   : > { %1360 = vrot.lane.b32.xlu0 %v3445_v62, %s3233_s27 }
 0x66b   : > { %1358 = vrot.lane.b32.xlu0 %v3445_v62, %s3232_s3 }
 0x66f   : > { %1544 = vrot.lane.b32.xlu0 %v849_v30, %s3228_s25  ;;  %s3775_s25 = scalar_lea.vmem %s3742_s7, %s3331_s23 }
 0x673   : > { %1712 = vrot.lane.b32.xlu0 %v849_v30, %s3227_s28 }
 0x677   : > { %1880 = vrot.lane.b32.xlu0 %v849_v30, %s3230_s26 }
 0x67b   : > { %2047 = vrot.lane.b32.xlu0 %v849_v30, %s3233_s27 }
 0x6de   : > { %v1111_v39 = vpop.xlane.xlu0 %1110 }
 0x6df   : > { %3175 = vrcp.f32 %v1111_v39 }
 0x6e2   : > { %v1361_v40 = vpop.permute.xlu0 %1360 }
 0x6e6   : > { %v1359_v41 = vpop.permute.xlu0 %1358 }
 0x6e9   : > { %v3176_v42 = vpop.eup %3175 }
 0x6ea   : > { %v1113_v43 = vmul.f32 %v3176_v42, %v3174_v35  ;;  %v1545_v44 = vpop.permute.xlu0 %1544 }
 0x6ec   : > { %2987 = vmatmul.mubr.msk.f32.vlgmr.msra.gmra.mrb[6].mxu1 %vm938_vm4, %v1113_v43  ;;  %v851_v43 = vadd.f32 %v3503_v31, %v3454_v1 }
 0x6ed   : > { %2990 = vmatpush3.xpose.msk.msra.mxu1 %vm857_vm3, %v1194_v38  ;;  %2991 = vmatprep.mubr.msk.f32.mxu1 %vm3226_vm2, %v3225_v37 }
 0x6ee   : > { %2999 = vmatprep.subr.mxu1 %v3225_v37  ;;  %v1713_v46 = vpop.permute.xlu0 %1712 }
 0x6f0   : > { %2992 = vmatmul.mubr.msk.f32.vlgmr.msra.gmra.mrb[8].mxu1 %vm857_vm3, %v1192_v45 }
 0x6f1   : > { %3000 = vmatpush3.xpose.msk.msra.mxu1 %vm857_vm3, %v1361_v40  ;;  %3001 = vmatprep.mubr.msk.f32.mxu1 %vm3226_vm2, %v3225_v37 }
 0x6f2   : > { %3009 = vmatprep.subr.mxu1 %v3225_v37  ;;  %v1881_v48 = vpop.permute.xlu0 %1880 }
 0x6f4   : > { %3002 = vmatmul.mubr.msk.f32.vlgmr.msra.gmra.mrb[10].mxu1 %vm857_vm3, %v1359_v41 }
 0x6f5   : > { %3010 = vmatpush3.xpose.msk.msra.mxu1 %vm857_vm3, %v1545_v44  ;;  %3011 = vmatprep.mubr.msk.f32.mxu1 %vm3226_vm2, %v3225_v37 }
 0x6f6   : > { %3019 = vmatprep.subr.mxu1 %v3225_v37  ;;  %v2048_v50 = vpop.permute.xlu0 %2047 }
 0x6f8   : > { %3012 = vmatmul.mubr.msk.f32.vlgmr.msra.gmra.mrb[12].mxu1 %vm857_vm3, %v849_v30 }
 0x6f9   : > { %3020 = vmatpush3.xpose.msk.msra.mxu1 %vm857_vm3, %v1713_v46  ;;  %3021 = vmatprep.mubr.msk.f32.mxu1 %vm3226_vm2, %v3225_v37 }
 0x6fa   : > { %3029 = vmatprep.subr.mxu1 %v3225_v37 }
 0x6fc   : > { %3022 = vmatmul.mubr.msk.f32.vlgmr.msra.gmra.mrb[14].mxu1 %vm857_vm3, %v1711_v47 }
 0x6fd   : > { %3030 = vmatpush3.xpose.msk.msra.mxu1 %vm857_vm3, %v1881_v48  ;;  %3031 = vmatprep.mubr.msk.f32.mxu1 %vm3226_vm2, %v3225_v37 }
 0x6fe   : > { %3039 = vmatprep.subr.mxu1 %v3225_v37 }
 0x700   : > { %3032 = vmatmul.mubr.msk.f32.vlgmr.msra.gmra.mrb[16].mxu1 %vm857_vm3, %v1879_v49 }
 0x701   : > { %3040 = vmatpush3.xpose.msk.msra.mxu1 %vm857_vm3, %v2048_v50  ;;  %3041 = vmatprep.mubr.msk.f32.mxu1 %vm3226_vm2, %v3225_v37 }
 0x704   : > { %3042 = vmatmul.mubr.msk.f32.vlgmr.msra.gmra.mrb[18].mxu1 %vm857_vm3, %v2046_v51 }
 0x7bf   : > { %v3547_v52 = vpop.f32.mrb[6].mxu1 }
 0x7c0   : > { %v2988_v53 = vpop.f32.mrb[7].mxu1 }
 0x7c3   : > { %v1265_v54 = vpop.f32.mrb[8].mxu1 }
 0x7c4   : > { %v1269_v56 = vmul.f32 0.25, %v1265_v54  ;;  %v2993_v59 = vpop.f32.mrb[9].mxu1 }
 0x7c6   : > { %v1270_v60 = vadd.f32 %v3470_v5, %v1269_v56 }
 0x7c7   : > { %v1432_v61 = vpop.f32.mrb[10].mxu1 }
 0x7c8   : > { %v1436_v62 = vmul.f32 0.25, %v1432_v61  ;;  %v3003_v63 = vpop.f32.mrb[11].mxu1  ;;  %v1271_v2 = vsel %vm938_vm4, %v1270_v60, -inf }
 0x7c9   : > { %1272 = vmax.xlane.f32.xlu0 %v1271_v2 }
 0x7ca   : > { %v1437_v4 = vadd.f32 %v3470_v5, %v1436_v62 }
 0x7cb   : > { %v1616_v6 = vpop.f32.mrb[12].mxu1 }
 0x7cc   : > { %v1620_v8 = vmul.f32 0.25, %v1616_v6  ;;  %v3013_v9 = vpop.f32.mrb[13].mxu1  ;;  %v1438_v10 = vsel %vm938_vm4, %v1437_v4, -inf }
 0x7cd   : > { %1439 = vmax.xlane.f32.xlu1 %v1438_v10 }
 0x7ce   : > { %v1625_v11 = vadd.f32 %v2861_v7, %v1620_v8 }
 0x7cf   : > { %v1784_v12 = vpop.f32.mrb[14].mxu1 }
 0x7d0   : > { %v1788_v13 = vmul.f32 0.25, %v1784_v12  ;;  %v1626_v14 = vsel %vm938_vm4, %v1625_v11, -inf  ;;  %v3023_v15 = vpop.f32.mrb[15].mxu1 }
 0x7d1   : > { %1627 = vmax.xlane.f32.xlu0 %v1626_v14 }
 0x7d2   : > { %v1789_v16 = vadd.f32 %v2861_v7, %v1788_v13 }
 0x7d3   : > { %v1952_v17 = vpop.f32.mrb[16].mxu1 }
 0x7d4   : > { %v1956_v5 = vmul.f32 0.25, %v1952_v17  ;;  %v1790_v18 = vsel %vm938_vm4, %v1789_v16, -inf  ;;  %v3033_v19 = vpop.f32.mrb[17].mxu1 }
 0x7d5   : > { %1791 = vmax.xlane.f32.xlu0 %v1790_v18 }
 0x7d6   : > { %v1957_v20 = vadd.f32 %v2861_v7, %v1956_v5 }
 0x7d7   : > { %v2119_v23 = vpop.f32.mrb[18].mxu1 }
 0x7d8   : > { %v2123_v24 = vmul.f32 0.25, %v2119_v23  ;;  %v1958_v25 = vsel %vm938_vm4, %v1957_v20, -inf  ;;  %v3043_v26 = vpop.f32.mrb[19].mxu1 }
 0x7d9   : > { %1959 = vmax.xlane.f32.xlu1 %v1958_v25  ;;  %v2227_v26 = vld [vmem:[%s3353_s1] sm:$0xff] }
 0x7da   : > { %v2124_v27 = vadd.f32 %v2861_v7, %v2123_v24 }
 0x7dc   : > { %v2125_v28 = vsel %vm938_vm4, %v2124_v27, -inf }
 0x7dd   : > { %2126 = vmax.xlane.f32.xlu0 %v2125_v28  ;;  %v2229_v28 = vld [vmem:[%s3353_s1 + $0x10] sm:$0xff] }
 0x7ea   : > { %1282 = vrot.lane.b32.xlu1 %v3459_v3, %s3231_s29 }
 0x856   : > { %v1273_v29 = vpop.xlane.xlu0 %1272 }
 0x857   : > { %v1274_v30 = vsub.f32 %v1270_v60, %v1273_v29 }
 0x859   : > { %v1275_v32 = vmul.f32 1.442695, %v1274_v30  ;;  %v2230_v30 = vld [vmem:[%s3353_s1 + $0x18] sm:$0xff] }
 0x85a   : > { %v1440_v33 = vpop.xlane.xlu1 %1439 }
 0x85b   : > { %3177 = vpow2.f32 %v1275_v32  ;;  %v1441_v34 = vsub.f32 %v1437_v4, %v1440_v33  ;;  %v3088_v32 = vpack.c.bf16 %v2230_v30, %v2229_v28  ;;  %v2377_v28 = vld [vmem:[%s3366_s0 + $0x38] sm:$0xff]  ;;  %v2374_v30 = vld [vmem:[%s3366_s0 + $0x20] sm:$0xff] }
 0x85d   : > { %v1442_v35 = vmul.f32 1.442695, %v1441_v34 }
 0x85e   : > { %v1628_v44 = vpop.xlane.xlu0 %1627 }
 0x85f   : > { %3179 = vpow2.f32 %v1442_v35  ;;  %v1629_v45 = vsub.f32 %v1625_v11, %v1628_v44 }
 0x861   : > { %v1630_v48 = vmul.f32 1.442695, %v1629_v45 }
 0x862   : > { %v1792_v46 = vpop.xlane.xlu0 %1791 }
 0x863   : > { %v1793_v47 = vsub.f32 %v1789_v16, %v1792_v46  ;;  %3181 = vpow2.f32 %v1630_v48 }
 0x865   : > { %v3178_v36 = vpop.eup %3177  ;;  %v1794_v51 = vmul.f32 1.442695, %v1793_v47 }
 0x866   : > { %v1960_v38 = vpop.xlane.xlu1 %1959  ;;  %v1277_v39 = vsel %vm938_vm4, %v3178_v36, 0.0 }
 0x867   : > { %1278 = vadd.xlane.f32.xlu1 %v1277_v39  ;;  %v1961_v49 = vsub.f32 %v1957_v20, %v1960_v38  ;;  %3183 = vpow2.f32 %v1794_v51  ;;  %v2231_v38 = vld [vmem:[%s3353_s1 + $0x20] sm:$0xff]  ;;  %v2232_v39 = vld [vmem:[%s3353_s1 + $0x28] sm:$0xff] }
 0x869   : > { %v3180_v40 = vpop.eup %3179  ;;  %v1962_v53 = vmul.f32 1.442695, %v1961_v49 }
 0x86a   : > { %v1283_v41 = vpop.permute.xlu1 %1282  ;;  %v1444_v42 = vsel %vm938_vm4, %v3180_v40, 0.0  ;;  %v2127_v50 = vpop.xlane.xlu0 %2126 }
 0x86b   : > { %2995 = vmatpush3.msra.mxu0 %v1283_v41  ;;  %1445 = vadd.xlane.f32.xlu0 %v1444_v42  ;;  %v2128_v54 = vsub.f32 %v2124_v27, %v2127_v50  ;;  %3185 = vpow2.f32 %v1962_v53  ;;  %v2228_v27 = vld [vmem:[%s3353_s1 + $0x8] sm:$0xff]  ;;  %v2233_v41 = vld [vmem:[%s3353_s1 + $0x30] sm:$0xff]  ;;  %v2234_v42 = vld [vmem:[%s3353_s1 + $0x38] sm:$0xff]  ;;  %s3778_s1 = sld [smem:[#allocation12_spill]] (!%p2882_p5) }
 0x86c   : > { %3004 = vmatprep.subr.mxu0 %v3225_v37  ;;  %v3084_v29 = vpack.c.bf16 %v2228_v27, %v2227_v26  ;;  %v2375_v27 = vld [vmem:[%s3366_s0 + $0x28] sm:$0xff] }
 0x86d   : > { %v2129_v56 = vmul.f32 1.442695, %v2128_v54  ;;  %v3182_v1 = vpop.eup %3181 }
 0x86e   : > { %v1632_v59 = vsel %vm938_vm4, %v3182_v1, 0.0 }
 0x86f   : > { %3187 = vpow2.f32 %v2129_v56 }
 0x871   : > { %v3184_v31 = vpop.eup %3183 }
 0x872   : > { %v1796_v61 = vsel %vm938_vm4, %v3184_v31, 0.0 }
 0x875   : > { %v3186_v60 = vpop.eup %3185 }
 0x878   : > { %1802 = vrot.lane.b32.xlu1 %v851_v43, %s3229_s6 }
 0x879   : > { %v3188_v62 = vpop.eup %3187 }
 0x87a   : > { %v2131_v63 = vsel %vm938_vm4, %v3188_v62, 0.0 }
 0x881   : > { %1449 = vrot.lane.b32.xlu0 %v3459_v3, %s3232_s3  ;;  %v1964_v3 = vsel %vm938_vm4, %v3186_v60, 0.0 }
 0x89c   : > { %1633 = vadd.xlane.f32.xlu1 %v1632_v59 }
 0x8a0   : > { %1965 = vadd.xlane.f32.xlu1 %v1964_v3  ;;  %1797 = vadd.xlane.f32.xlu0 %v1796_v61 }
 0x8a4   : > { %2132 = vadd.xlane.f32.xlu0 %v2131_v63 }
 0x8b1   : > { %1969 = vrot.lane.b32.xlu1 %v851_v43, %s3231_s29  ;;  %s3777_s29 = scalar_lea.vmem %s3744_s9, %s3331_s23 }
 0x8b5   : > { %1526 = vrot.lane.b32.xlu1 %v3547_v52, %s3233_s27 }
 0x8ba   : > { %2136 = vrot.lane.b32.xlu0 %v851_v43, %s3232_s3 }
 0x8f4   : > { %v1279_v2 = vpop.xlane.xlu1 %1278 }
 0x8f5   : > { %3189 = vrcp.f32 %v1279_v2 }
 0x8f8   : > { %v1446_v4 = vpop.xlane.xlu0 %1445  ;;  %v1803_v52 = vpop.permute.xlu1 %1802 }
 0x8f9   : > { %3191 = vrcp.f32 %v1446_v4 }
 0x8fc   : > { %v1450_v8 = vpop.permute.xlu0 %1449 }
 0x8ff   : > { %v3190_v6 = vpop.eup %3189 }
 0x900   : > { %v1281_v7 = vmul.f32 %v3190_v6, %v3178_v36 }
 0x902   : > { %2997 = vmatmul.mubr.msk.f32.vlgmr.msra.gmra.mrb[4].mxu0 %vm938_vm4, %v1281_v7 }
 0x903   : > { %v3192_v9 = vpop.eup %3191  ;;  %3005 = vmatpush3.msra.mxu0 %v1450_v8  ;;  %3006 = vmatprep.mubr.msk.f32.mxu0 %vm3226_vm2, %v3225_v37 }
 0x904   : > { %v1448_v10 = vmul.f32 %v3192_v9, %v3180_v40  ;;  %3014 = vmatprep.subr.mxu0 %v3225_v37  ;;  %v3092_v40 = vpack.c.bf16 %v2232_v39, %v2231_v38  ;;  %v2378_v38 = vld [vmem:[%s3366_s0 + $0x40] sm:$0xff]  ;;  %v2380_v39 = vld [vmem:[%s3366_s0 + $0x50] sm:$0xff] }
 0x906   : > { %3007 = vmatmul.mubr.msk.f32.vlgmr.msra.gmra.mrb[6].mxu0 %vm938_vm4, %v1448_v10 }
 0x907   : > { %3015 = vmatpush3.msra.mxu0 %v851_v43  ;;  %3016 = vmatprep.mubr.msk.f32.mxu0 %vm3226_vm2, %v3225_v37  ;;  %v3096_v43 = vpack.c.bf16 %v2234_v42, %v2233_v41  ;;  %v2383_v41 = vld [vmem:[%s3366_s0 + $0x68] sm:$0xff]  ;;  %v2385_v42 = vld [vmem:[%s3366_s0 + $0x78] sm:$0xff] }
 0x908   : > { %3024 = vmatprep.subr.mxu0 %v3225_v37 }
 0x929   : > { %v1634_v11 = vpop.xlane.xlu1 %1633 }
 0x92a   : > { %3193 = vrcp.f32 %v1634_v11 }
 0x92d   : > { %v1798_v12 = vpop.xlane.xlu0 %1797  ;;  %v1966_v13 = vpop.xlane.xlu1 %1965 }
 0x92e   : > { %3195 = vrcp.f32 %v1798_v12 }
 0x92f   : > { %3197 = vrcp.f32 %v1966_v13 }
 0x931   : > { %v2133_v14 = vpop.xlane.xlu0 %2132  ;;  %v1970_v19 = vpop.permute.xlu1 %1969 }
 0x932   : > { %3199 = vrcp.f32 %v2133_v14 }
 0x934   : > { %v3194_v15 = vpop.eup %3193 }
 0x935   : > { %v1636_v16 = vmul.f32 %v3194_v15, %v3182_v1  ;;  %v2137_v24 = vpop.permute.xlu0 %2136  ;;  %v1527_v53 = vpop.permute.xlu1 %1526 }
 0x936   : > { %v1537_v56 = vsel %vm857_vm3, %v3496_v22, %v1527_v53  ;;  %v2872_v22 = vld [vmem:[%s3775_s25] ss:$0 sm:$0xff] }
 0x937   : > { %3017 = vmatmul.mubr.msk.f32.vlgmr.msra.gmra.mrb[8].mxu0 %vm938_vm4, %v1636_v16 }
 0x938   : > { %3025 = vmatpush3.msra.mxu0 %v1803_v52  ;;  %3026 = vmatprep.mubr.msk.f32.mxu0 %vm3226_vm2, %v3225_v37  ;;  %v3196_v17 = vpop.eup %3195 }
 0x939   : > { %3034 = vmatprep.subr.mxu0 %v3225_v37  ;;  %v1800_v5 = vmul.f32 %v3196_v17, %v3184_v31  ;;  %v3198_v18 = vpop.eup %3197 }
 0x93a   : > { %v1968_v20 = vmul.f32 %v3198_v18, %v3186_v60 }
 0x93b   : > { %3027 = vmatmul.mubr.msk.f32.vlgmr.msra.gmra.mrb[10].mxu0 %vm938_vm4, %v1800_v5 }
 0x93c   : > { %3035 = vmatpush3.msra.mxu0 %v1970_v19  ;;  %3036 = vmatprep.mubr.msk.f32.mxu0 %vm3226_vm2, %v3225_v37  ;;  %v3200_v23 = vpop.eup %3199  ;;  %v2371_v19 = vld [vmem:[%s3366_s0 + $0x8] sm:$0xff] }
 0x93d   : > { %3044 = vmatprep.subr.mxu0 %v3225_v37  ;;  %v2135_v25 = vmul.f32 %v3200_v23, %v3188_v62 }
 0x93f   : > { %3037 = vmatmul.mubr.msk.f32.vlgmr.msra.gmra.mrb[12].mxu0 %vm938_vm4, %v1968_v20  ;;  %v2373_v20 = vld [vmem:[%s3366_s0 + $0x18] sm:$0xff] }
 0x940   : > { %3045 = vmatpush3.msra.mxu0 %v2137_v24  ;;  %3046 = vmatprep.mubr.msk.f32.mxu0 %vm3226_vm2, %v3225_v37  ;;  %v3100_v23 = vpack.c.bf16 %v2373_v20, %v2371_v19  ;;  %v2370_v24 = vld [vmem:[%s3366_s0] sm:$0xff]  ;;  %v2523_v19 = vld [vmem:[%s3377_s2 + $0x30] sm:$0xff]  ;;  %v2524_v20 = vld [vmem:[%s3377_s2 + $0x38] sm:$0xff] }
 0x941   : > { %3085 = vmatprep.subr.bf16.mxu0 %v3084_v29 }
 0x943   : > { %3047 = vmatmul.mubr.msk.f32.vlgmr.msra.gmra.mrb[14].mxu0 %vm938_vm4, %v2135_v25  ;;  %v2372_v25 = vld [vmem:[%s3366_s0 + $0x10] sm:$0xff] }
 0x944   : > { %3087 = vmatpush3.bf16.msra.mxu0 %v3084_v29  ;;  %v3102_v26 = vpack.c.bf16 %v2372_v25, %v2370_v24  ;;  %v3104_v29 = vpack.c.bf16 %v2377_v28, %v2375_v27  ;;  %v2541_v24 = vld [vmem:[%s3377_s2 + $0xc0] sm:$0xff]  ;;  %v2542_v25 = vld [vmem:[%s3377_s2 + $0xc8] sm:$0xff] }
 0x945   : > { %3089 = vmatprep.subr.bf16.mxu0 %v3088_v32  ;;  %v3132_v27 = vpack.c.bf16 %v2542_v25, %v2541_v24  ;;  %v2526_v28 = vld [vmem:[%s3377_s2 + $0x48] sm:$0xff] }
 0x948   : > { %3091 = vmatpush3.bf16.msra.mxu0 %v3088_v32  ;;  %v2376_v32 = vld [vmem:[%s3366_s0 + $0x30] sm:$0xff] }
 0x949   : > { %3093 = vmatprep.subr.bf16.mxu0 %v3092_v40 }
 0x94c   : > { %3095 = vmatpush3.bf16.msra.mxu0 %v3092_v40  ;;  %v3110_v40 = vpack.c.bf16 %v2380_v39, %v2378_v38  ;;  %v2546_v38 = vld [vmem:[%s3377_s2 + $0xe8] sm:$0xff] }
 0x94d   : > { %3097 = vmatprep.subr.bf16.mxu0 %v3096_v43 }
 0x950   : > { %3099 = vmatpush3.bf16.msra.mxu0 %v3096_v43  ;;  %v2382_v43 = vld [vmem:[%s3366_s0 + $0x60] sm:$0xff] }
 0x951   : > { %3101 = vmatprep.subr.bf16.mxu0 %v3100_v23  ;;  %v3130_v23 = vpack.c.bf16 %v2524_v20, %v2523_v19 }
 0x9d5   : > { %v1354_v33 = vpop.f32.mrb[4].mxu0 }
 0x9d6   : > { %v2998_v34 = vpop.f32.mrb[5].mxu0  ;;  %1530 = vrot.lane.b32.xlu0 %v1354_v33, %s3230_s26  ;;  %v3106_v33 = vpack.c.bf16 %v2376_v32, %v2374_v30  ;;  %v2544_v30 = vld [vmem:[%s3377_s2 + $0xd8] sm:$0xff] }
 0x9d7   : > { %v2379_v34 = vld [vmem:[%s3366_s0 + $0x48] sm:$0xff] }
 0x9d9   : > { %v1521_v35 = vpop.f32.mrb[6].mxu0 }
 0x9da   : > { %1534 = vrot.lane.b32.xlu0 %v1521_v35, %s3227_s28  ;;  %v3008_v36 = vpop.f32.mrb[7].mxu0  ;;  %v2381_v35 = vld [vmem:[%s3366_s0 + $0x58] sm:$0xff] }
 0x9db   : > { %v3108_v36 = vpack.c.bf16 %v2381_v35, %v2379_v34  ;;  %v2527_v34 = vld [vmem:[%s3377_s2 + $0x50] sm:$0xff]  ;;  %v2528_v35 = vld [vmem:[%s3377_s2 + $0x58] sm:$0xff] }
 0x9dc   : > { %v3138_v39 = vpack.c.bf16 %v2528_v35, %v2527_v34  ;;  %v2879_v35 = vld [vmem:[%s678_s4] ss:$0 sm:$0xff] }
 0xa0a   : > { %v1706_v44 = vpop.f32.mrb[8].mxu0 }
 0xa0b   : > { %v3018_v45 = vpop.f32.mrb[9].mxu0 }
 0xa0c   : > { %v2384_v45 = vld [vmem:[%s3366_s0 + $0x70] sm:$0xff] }
 0xa0e   : > { %v1874_v46 = vpop.f32.mrb[10].mxu0 }
 0xa0f   : > { %2213 = vrot.lane.b32.xlu1 %v1874_v46, %s3233_s27  ;;  %v3028_v47 = vpop.f32.mrb[11].mxu0  ;;  %v3114_v46 = vpack.c.bf16 %v2384_v45, %v2382_v43  ;;  %v2547_v43 = vld [vmem:[%s3377_s2 + $0xf0] sm:$0xff] }
 0xa10   : > { %v2533_v47 = vld [vmem:[%s3377_s2 + $0x80] sm:$0xff] }
 0xa12   : > { %v2041_v48 = vpop.f32.mrb[12].mxu0 }
 0xa13   : > { %2217 = vrot.lane.b32.xlu1 %v2041_v48, %s3230_s26  ;;  %v3038_v49 = vpop.f32.mrb[13].mxu0  ;;  %v2534_v48 = vld [vmem:[%s3377_s2 + $0x88] sm:$0xff] }
 0xa14   : > { %v2517_v49 = vld [vmem:[%s3377_s2] sm:$0xff] }
 0xa16   : > { %v2208_v50 = vpop.f32.mrb[14].mxu0 }
 0xa17   : > { %2221 = vrot.lane.b32.xlu0 %v2208_v50, %s3227_s28  ;;  %v3048_v51 = vpop.f32.mrb[15].mxu0  ;;  %v3116_v50 = vpack.c.bf16 %v2534_v48, %v2533_v47  ;;  %v2531_v47 = vld [vmem:[%s3377_s2 + $0x70] sm:$0xff]  ;;  %v2532_v48 = vld [vmem:[%s3377_s2 + $0x78] sm:$0xff] }
 0xa18   : > { %v2518_v51 = vld [vmem:[%s3377_s2 + $0x8] sm:$0xff] }
 0xa19   : > { %v3118_v53 = vpack.c.bf16 %v2518_v51, %v2517_v49  ;;  %3117 = vmatprep.subr.bf16.mxu1 %v3116_v50  ;;  %v3146_v49 = vpack.c.bf16 %v2532_v48, %v2531_v47  ;;  %v2386_v50 = vld [vmem:[%s3371_s20] sm:$0x3] }
 0xa1a   : > { %v2391_v51 = vrot.slane %v2386_v50, %v761_v58 }
 0xa1b   : > { %3119 = vmatpush3.bf16.msra.mxu1 %v3118_v53  ;;  %v2395_v53 = vrot.slane %v2386_v50, %v765_v0 }
 0xa48   : > { %v1531_v54 = vpop.permute.xlu0 %1530 }
 0xa49   : > { %v1539_v1 = vsel %vm1538_vm5, %v1537_v56, %v1531_v54 }
 0xa4c   : > { %v1535_v31 = vpop.permute.xlu0 %1534 }
 0xa4d   : > { %v1541_v59 = vsel %vm1540_vm6, %v1539_v1, %v1535_v31 }
 0xa4e   : > { %3065 = vmatprep.mubr.msk.f32.mxu0 %vm769_vm1, %v1541_v59 }
 0xa81   : > { %v2214_v60 = vpop.permute.xlu1 %2213 }
 0xa82   : > { %v2224_v61 = vsel %vm857_vm3, %v1706_v44, %v2214_v60  ;;  %v3112_v44 = vpack.c.bf16 %v2385_v42, %v2383_v41  ;;  %v2529_v41 = vld [vmem:[%s3377_s2 + $0x60] sm:$0xff]  ;;  %v2530_v42 = vld [vmem:[%s3377_s2 + $0x68] sm:$0xff] }
 0xa83   : > { %v3142_v45 = vpack.c.bf16 %v2530_v42, %v2529_v41 }
 0xa85   : > { %v2218_v3 = vpop.permute.xlu1 %2217 }
 0xa86   : > { %v2225_v62 = vsel %vm1538_vm5, %v2224_v61, %v2218_v3 }
 0xa89   : > { %v2222_v63 = vpop.permute.xlu0 %2221 }
 0xa8a   : > { %v2226_v2 = vsel %vm1540_vm6, %v2225_v62, %v2222_v63  ;;  %v2875_v62 = vld [vmem:[%s3776_s21] ss:$0 sm:$0xff] }
 0xa8b   : > { %3066 = vmatmul.mubr.msk.f32.vlgmr.msra.gmra.mrb[16].mxu0 %vm769_vm1, %v2226_v2 }
 0xa8c   : > { %2468 = vmatprep.mubr.f32.mxu0 %v3225_v37  ;;  %3103 = vmatpush1.bf16.msra.mxu0 %v3102_v26  ;;  %v2525_v26 = vld [vmem:[%s3377_s2 + $0x40] sm:$0xff] }
 0xa8d   : > { %3105 = vmatprep.subr.bf16.mxu0 %v3104_v29  ;;  %v2543_v29 = vld [vmem:[%s3377_s2 + $0xd0] sm:$0xff]  ;;  %v3134_v32 = vpack.c.bf16 %v2526_v28, %v2525_v26 }
 0xa90   : > { %3107 = vmatpush1.bf16.msra.mxu0 %v3106_v33  ;;  %v3136_v33 = vpack.c.bf16 %v2544_v30, %v2543_v29 }
 0xa91   : > { %3109 = vmatprep.subr.bf16.mxu0 %v3108_v36  ;;  %v2545_v36 = vld [vmem:[%s3377_s2 + $0xe0] sm:$0xff] }
 0xa94   : > { %3111 = vmatpush1.bf16.msra.mxu0 %v3110_v40  ;;  %v3140_v40 = vpack.c.bf16 %v2546_v38, %v2545_v36 }
 0xa95   : > { %3113 = vmatprep.subr.bf16.mxu0 %v3112_v44  ;;  %v2548_v44 = vld [vmem:[%s3377_s2 + $0xf8] sm:$0xff] }
 0xa98   : > { %3115 = vmatpush1.bf16.msra.mxu0 %v3114_v46  ;;  %v3144_v46 = vpack.c.bf16 %v2548_v44, %v2547_v43 }
 0xb5e   : > { %v3067_v4 = vpop.f32.mrb[16].mxu0 }
 0xb5f   : > { %v2320_v6 = vadd.f32 %v3067_v4, %v2872_v22  ;;  %v2314_v7 = vpop.f32.mrb[17].mxu0 }
 0xb60   : > { %v2315_v8 = vadd.f32 %v2872_v22, %v2314_v7  ;;  %v2876_v22 = vld [vmem:[%s3777_s29] ss:$0 sm:$0xff] }
 0xb61   : > { %v2324_v9 = vadd.f32 %v2320_v6, %v3490_v21 }
 0xb62   : > { %v2323_v10 = vadd.f32 %v2315_v8, %v3428_v55 }
 0xb63   : > { %v2330_v52 = vsel %vm769_vm1, %v2324_v9, 0.0 }
 0xb64   : > { %2331 = vadd.xlane.f32.xlu0 %v2330_v52  ;;  %v2327_v11 = vsel %vm769_vm1, %v2323_v10, 0.0 }
 0xb65   : > { %2328 = vadd.xlane.f32.xlu1 %v2327_v11  ;;  %v2519_v11 = vld [vmem:[%s3377_s2 + $0x10] sm:$0xff] }
 0xbf1   : > { %v2332_v12 = vpop.xlane.xlu0 %2331 }
 0xbf2   : > { %v2335_v13 = vmul.f32 0.015625, %v2332_v12  ;;  %v2329_v14 = vpop.xlane.xlu1 %2328  ;;  %v2520_v12 = vld [vmem:[%s3377_s2 + $0x18] sm:$0xff] }
 0xbf3   : > { %v2334_v15 = vmul.f32 0.015625, %v2329_v14  ;;  %v2538_v14 = vld [vmem:[%s3377_s2 + $0xa8] sm:$0xff] }
 0xbf4   : > { %v2337_v16 = vsub.f32 %v2324_v9, %v2335_v13  ;;  %v2535_v9 = vld [vmem:[%s3377_s2 + $0x90] sm:$0xff]  ;;  %v3122_v13 = vpack.c.bf16 %v2520_v12, %v2519_v11 }
 0xbf5   : > { %v2336_v17 = vsub.f32 %v2323_v10, %v2334_v15  ;;  %v2536_v10 = vld [vmem:[%s3377_s2 + $0x98] sm:$0xff] }
 0xbf6   : > { %v2339_v21 = vmul.f32 %v2337_v16, %v2337_v16  ;;  %v3120_v52 = vpack.c.bf16 %v2536_v10, %v2535_v9 }
 0xbf7   : > { %v2338_v55 = vmul.f32 %v2336_v17, %v2336_v17 }
 0xbf8   : > { %v2343_v5 = vsel %vm769_vm1, %v2339_v21, 0.0  ;;  %3121 = vmatprep.subr.bf16.mxu1 %v3120_v52 }
 0xbf9   : > { %2344 = vadd.xlane.f32.xlu1 %v2343_v5  ;;  %v2340_v18 = vsel %vm769_vm1, %v2338_v55, 0.0  ;;  %3123 = vmatpush3.bf16.msra.mxu1 %v3122_v13  ;;  %v2539_v55 = vld [vmem:[%s3377_s2 + $0xb0] sm:$0xff]  ;;  %v2540_v5 = vld [vmem:[%s3377_s2 + $0xb8] sm:$0xff] }
 0xbfa   : > { %2341 = vadd.xlane.f32.xlu0 %v2340_v18  ;;  %v3128_v18 = vpack.c.bf16 %v2540_v5, %v2539_v55 }
 0xc86   : > { %v2345_v54 = vpop.xlane.xlu1 %2344 }
 0xc87   : > { %v2347_v56 = vmul.f32 0.015625, %v2345_v54  ;;  %v2342_v1 = vpop.xlane.xlu0 %2341 }
 0xc88   : > { %v2346_v31 = vmul.f32 0.015625, %v2342_v1 }
 0xc89   : > { %v2349_v59 = vadd.f32 1e-12, %v2347_v56 }
 0xc8a   : > { %v2348_v60 = vadd.f32 1e-12, %v2346_v31 }
 0xc8b   : > { %3201 = vrsqrt.f32 %v2349_v59 }
 0xc8c   : > { %3203 = vrsqrt.f32 %v2348_v60 }
 0xc95   : > { %v3202_v3 = vpop.eup %3201 }
 0xc96   : > { %v3204_v61 = vpop.eup %3203  ;;  %v2353_v2 = vmul.f32 %v3202_v3, %v2337_v16  ;;  %v2521_v16 = vld [vmem:[%s3377_s2 + $0x20] sm:$0xff] }
 0xc97   : > { %v2352_v63 = vmul.f32 %v3204_v61, %v2336_v17  ;;  %v2522_v17 = vld [vmem:[%s3377_s2 + $0x28] sm:$0xff] }
 0xc98   : > { %v2361_v7 = vmul.f32 %v2875_v62, %v2353_v2  ;;  %v3126_v21 = vpack.c.bf16 %v2522_v17, %v2521_v16 }
 0xc99   : > { %v2360_v4 = vmul.f32 %v2875_v62, %v2352_v63 }
 0xc9a   : > { %v3663_v8 = vadd.f32 %v2876_v22, %v2361_v7 }
 0xc9b   : > { %v3658_v6 = vadd.f32 %v2876_v22, %v2360_v4 }
 0xc9d   : > { %2877 = vmatmul.mubr.msk.f32.vlgmr.msra.gmra.mrb[18].mxu0 %vm769_vm1, %v3658_v6 }
 0xc9e   : > { %2474 = vmatprep.mubr.f32.mxu0 %v3225_v37  ;;  %v2537_v37 = vld [vmem:[%s3377_s2 + $0xa0] sm:$0xff] }
 0xc9f   : > { %v3124_v15 = vpack.c.bf16 %v2538_v14, %v2537_v37 }
 0xca1   : > { %2878 = vmatmul.mubr.msk.f32.gmra.mrb[20].mxu0 %vm769_vm1, %v3663_v8  ;;  %3125 = vmatprep.subr.bf16.mxu1 %v3124_v15 }
 0xca2   : > { %3127 = vmatpush3.bf16.msra.mxu1 %v3126_v21 }
 0xca3   : > { %3129 = vmatprep.subr.bf16.mxu1 %v3128_v18 }
 0xca6   : > { %3131 = vmatpush3.bf16.msra.mxu1 %v3130_v23 }
 0xca7   : > { %3133 = vmatprep.subr.bf16.mxu1 %v3132_v27 }
 0xcaa   : > { %3135 = vmatpush3.bf16.msra.mxu1 %v3134_v32 }
 0xcab   : > { %3137 = vmatprep.subr.bf16.mxu1 %v3136_v33 }
 0xcae   : > { %3139 = vmatpush3.bf16.msra.mxu1 %v3138_v39 }
 0xcaf   : > { %3141 = vmatprep.subr.bf16.mxu1 %v3140_v40 }
 0xcb2   : > { %3143 = vmatpush3.bf16.msra.mxu1 %v3142_v45 }
 0xcb3   : > { %3145 = vmatprep.subr.bf16.mxu1 %v3144_v46 }
 0xcb6   : > { %3147 = vmatpush3.bf16.msra.mxu1 %v3146_v49 }
 0xd70   : > { %v2470_v54 = vpop.f32.mrb[18].mxu0 }
 0xd71   : > { %v2471_v56 = vadd.f32 %v2470_v54, %v2391_v51  ;;  %v2472_v1 = vpop.f32.mrb[19].mxu0 }
 0xd72   : > { %v2473_v31 = vadd.f32 %v2472_v1, %v2395_v53 }
 0xd73   : > { %v2485_v59 = vmul.f32 0.044715, %v2471_v56  ;;  %v2481_v20 = vmul.f32 0.5, %v2471_v56 }
 0xd74   : > { %v2486_v60 = vmul.f32 0.044715, %v2473_v31  ;;  %v2476_v3 = vpop.f32.mrb[20].mxu0  ;;  %v2482_v18 = vmul.f32 0.5, %v2473_v31 }
 0xd75   : > { %v2489_v61 = vmul.f32 %v2485_v59, %v2471_v56  ;;  %v2477_v62 = vadd.f32 %v2476_v3, %v2391_v51  ;;  %v2478_v63 = vpop.f32.mrb[21].mxu0 }
 0xd76   : > { %v2490_v2 = vmul.f32 %v2486_v60, %v2473_v31  ;;  %v2479_v22 = vadd.f32 %v2478_v63, %v2395_v53 }
 0xd77   : > { %v2493_v4 = vmul.f32 %v2489_v61, %v2471_v56  ;;  %v2487_v7 = vmul.f32 0.044715, %v2477_v62  ;;  %v2483_v30 = vmul.f32 0.5, %v2477_v62 }
 0xd78   : > { %v2488_v9 = vmul.f32 0.044715, %v2479_v22  ;;  %v2494_v10 = vmul.f32 %v2490_v2, %v2473_v31  ;;  %v2484_v28 = vmul.f32 0.5, %v2479_v22  ;;  %v2880_v2 = vld [vmem:[%s681_s5] ss:$0 sm:$0xff] }
 0xd79   : > { %v2497_v58 = vadd.f32 %v2493_v4, %v2471_v56  ;;  %v2491_v52 = vmul.f32 %v2487_v7, %v2477_v62  ;;  %v2881_v4 = vld [vmem:[%s684_s18] ss:$0 sm:$0xff] }
 0xd7a   : > { %v2492_v57 = vmul.f32 %v2488_v9, %v2479_v22  ;;  %v2498_v0 = vadd.f32 %v2494_v10, %v2473_v31 }
 0xd7b   : > { %v2501_v11 = vmul.f32 0.7978846, %v2497_v58  ;;  %v2495_v12 = vmul.f32 %v2491_v52, %v2477_v62 }
 0xd7c   : > { %v2502_v13 = vmul.f32 0.7978846, %v2498_v0  ;;  %v2496_v37 = vmul.f32 %v2492_v57, %v2479_v22 }
 0xd7d   : > { %3205 = vtanh.f32 %v2501_v11  ;;  %v2499_v14 = vadd.f32 %v2495_v12, %v2477_v62 }
 0xd7e   : > { %3207 = vtanh.f32 %v2502_v13  ;;  %v2500_v15 = vadd.f32 %v2496_v37, %v2479_v22 }
 0xd7f   : > { %v2503_v16 = vmul.f32 0.7978846, %v2499_v14 }
 0xd80   : > { %v2504_v17 = vmul.f32 0.7978846, %v2500_v15 }
 0xd81   : > { %3209 = vtanh.f32 %v2503_v16 }
 0xd82   : > { %3211 = vtanh.f32 %v2504_v17 }
 0xd87   : > { %v3206_v21 = vpop.eup %3205 }
 0xd88   : > { %v3208_v55 = vpop.eup %3207  ;;  %v2509_v5 = vadd.f32 1.0, %v3206_v21 }
 0xd89   : > { %v2510_v19 = vadd.f32 1.0, %v3208_v55 }
 0xd8a   : > { %v2513_v26 = vmul.f32 %v2509_v5, %v2481_v20 }
 0xd8b   : > { %v3210_v23 = vpop.eup %3209  ;;  %v2514_v24 = vmul.f32 %v2510_v19, %v2482_v18 }
 0xd8c   : > { %v3212_v25 = vpop.eup %3211  ;;  %v2511_v27 = vadd.f32 1.0, %v3210_v23 }
 0xd8d   : > { %2620 = vmatprep.mubr.f32.mxu1 %v2514_v24  ;;  %v2512_v29 = vadd.f32 1.0, %v3212_v25 }
 0xd8e   : > { %2621 = vmatmul.mubr.f32.vlgmr.msra.gmra.mrb[20].mxu1 %v2513_v26  ;;  %v2515_v33 = vmul.f32 %v2511_v27, %v2483_v30 }
 0xd8f   : > { %v2516_v32 = vmul.f32 %v2512_v29, %v2484_v28 }
 0xd91   : > { %2625 = vmatprep.mubr.f32.mxu1 %v2516_v32 }
 0xd92   : > { %2626 = vmatmul.mubr.f32.gmra.mrb[22].mxu1 %v2515_v33 }
 0xe61   : > { %v2963_v34 = vpop.f32.mrb[20].mxu1 }
 0xe62   : > { %v2964_v36 = vpop.f32.mrb[21].mxu1 }
 0xe63   : > { %v2965_v38 = vadd.f32 %v2964_v36, %v2963_v34 }
 0xe65   : > { %v2623_v39 = vadd.f32 %v2965_v38, %v2879_v35  ;;  %v2966_v40 = vpop.f32.mrb[22].mxu1 }
 0xe66   : > { %v2967_v41 = vpop.f32.mrb[23].mxu1 }
 0xe67   : > { %v2968_v42 = vadd.f32 %v2967_v41, %v2966_v40  ;;  %v2631_v43 = vadd.f32 %v2623_v39, %v3658_v6 }
 0xe69   : > { %v2628_v44 = vadd.f32 %v2968_v42, %v2879_v35  ;;  %v2635_v45 = vsel %vm769_vm1, %v2631_v43, 0.0 }
 0xe6a   : > { %2636 = vadd.xlane.f32.xlu0 %v2635_v45 }
 0xe6b   : > { %v2632_v46 = vadd.f32 %v2628_v44, %v3663_v8 }
 0xe6d   : > { %v2638_v47 = vsel %vm769_vm1, %v2632_v46, 0.0 }
 0xe6e   : > { %2639 = vadd.xlane.f32.xlu1 %v2638_v47 }
 0xef7   : > { %v2637_v48 = vpop.xlane.xlu0 %2636 }
 0xef8   : > { %v2641_v49 = vmul.f32 0.015625, %v2637_v48 }
 0xefa   : > { %v2643_v50 = vsub.f32 %v2631_v43, %v2641_v49 }
 0xefb   : > { %v2640_v51 = vpop.xlane.xlu1 %2639 }
 0xefc   : > { %v2642_v53 = vmul.f32 0.015625, %v2640_v51  ;;  %v2645_v54 = vmul.f32 %v2643_v50, %v2643_v50 }
 0xefe   : > { %v2644_v56 = vsub.f32 %v2632_v46, %v2642_v53  ;;  %v2647_v1 = vsel %vm769_vm1, %v2645_v54, 0.0 }
 0xeff   : > { %2648 = vadd.xlane.f32.xlu0 %v2647_v1 }
 0xf00   : > { %v2646_v6 = vmul.f32 %v2644_v56, %v2644_v56 }
 0xf02   : > { %v2650_v31 = vsel %vm769_vm1, %v2646_v6, 0.0 }
 0xf03   : > { %2651 = vadd.xlane.f32.xlu1 %v2650_v31 }
 0xf8c   : > { %v2649_v8 = vpop.xlane.xlu0 %2648 }
 0xf8d   : > { %v2653_v59 = vmul.f32 0.015625, %v2649_v8 }
 0xf8f   : > { %v2655_v60 = vadd.f32 1e-12, %v2653_v59 }
 0xf90   : > { %v2652_v3 = vpop.xlane.xlu1 %2651 }
 0xf91   : > { %3213 = vrsqrt.f32 %v2655_v60  ;;  %v2654_v61 = vmul.f32 0.015625, %v2652_v3 }
 0xf93   : > { %v2656_v62 = vadd.f32 1e-12, %v2654_v61 }
 0xf95   : > { %3215 = vrsqrt.f32 %v2656_v62 }
 0xf9b   : > { %v3214_v63 = vpop.eup %3213 }
 0xf9c   : > { %v2659_v22 = vmul.f32 %v3214_v63, %v2643_v50 }
 0xf9e   : > { %v2667_v7 = vmul.f32 %v2880_v2, %v2659_v22 }
 0xf9f   : > { %v3216_v9 = vpop.eup %3215 }
 0xfa0   : > { %v2675_v10 = vadd.f32 %v2881_v4, %v2667_v7  ;;  %v2660_v58 = vmul.f32 %v3216_v9, %v2644_v56  ;;  %2682 = sbr.rel (%p2882_p5) target bundleno = 4007 (0xfa7), region = 92 }
 0xfa2   : > { %2677 = vst.msk [vmem:[#allocation2] sm:$0xff] %vm769_vm1, %v2675_v10  ;;  %v2668_v52 = vmul.f32 %v2880_v2, %v2660_v58  ;;  %2683 = vst.msk [vmem:[%s3778_s1] sm:$0xff] (!%p2882_p5), %vm769_vm1, %v2675_v10 }
 0xfa4   : > { %v2676_v57 = vadd.f32 %v2881_v4, %v2668_v52 }
 0xfa6   : > { %2678 = vst.msk [vmem:[#allocation2 + $0x8] sm:$0xff] %vm769_vm1, %v2676_v57  ;;  %2684 = vst.msk [vmem:[%s3778_s1 + $0x8] sm:$0xff] (!%p2882_p5), %vm769_vm1, %v2676_v57 }
 0xfa7 PF: > { %s3779_s28 = sld [smem:[#allocation3_spill]] }
 0xfad   : > { %s26_s21 = sadd.s32 1, %s3779_s28  }
 0xfae   : > { %p23_p6 = scmp.ge.s32.totalorder %s26_s21, 6  }
 0xfb0   :  { %25 = sbr.rel (!%p23_p6) target bundleno = 9 (0x9), region = 151 }

// kernel: hvpnet_ner_forward.5
= control target key start
LH: loop header
LB: loop body
LE: loop exit
PB: predicated region body
PF: predicated region fallthrough
CT: control target
= control target key end

     0   :  { %v7404_v0 = vmov 0.0|0.0   ;;  %vm7405_vm0 = vmmov 0   ;;  %v7406_v6 = vmov 0.0   ;;  %vm73_vm1 = vcmask 1040384   ;;  %s7408_s30 = smov 112   ;;  %s8715_s21 = smov 80   ;;  %s8677_s5 = inlined_call_operand.vmem [shape: f32[64,64], index: 5, kind: input, shape index: {}]   ;;  %s8678_s7 = inlined_call_operand.vmem [shape: f32[3,64,64], index: 7, kind: input, shape index: {}]   ;;  %s8679_s0 = inlined_call_operand.vmem [shape: f32[16,64], index: 0, kind: input, shape index: {}]   ;;  %s8680_s2 = inlined_call_operand.vmem [shape: f32[2,64], index: 2, kind: input, shape index: {}]   ;;  %s8681_s9 = inlined_call_operand.vmem [shape: f32[4,64,64], index: 9, kind: input, shape index: {}]   ;;  %s8682_s1 = inlined_call_operand.vmem [shape: f32[4,64], index: 1, kind: input, shape index: {}]   ;;  %s8683_s6 = inlined_call_operand.vmem [shape: f32[1,64], index: 6, kind: input, shape index: {}]   ;;  %s8684_s10 = inlined_call_operand.vmem [shape: f32[4,64], index: 10, kind: input, shape index: {}]   ;;  %s8685_s11 = inlined_call_operand.vmem [shape: f32[4,64,64], index: 11, kind: input, shape index: {}]   ;;  %s8686_s3 = inlined_call_operand.vmem [shape: f32[8,64], index: 3, kind: input, shape index: {}]   ;;  %s8687_s4 = inlined_call_operand.vmem [shape: f32[8,64], index: 4, kind: input, shape index: {}]   ;;  %s8688_s12 = inlined_call_operand.vmem [shape: f32[4,64], index: 12, kind: input, shape index: {}]   ;;  %s8689_s8 = inlined_call_operand.vmem [shape: f32[1,3], index: 8, kind: input, shape index: {}]   ;;  %s8690_s13 = inlined_call_operand.vmem [shape: f32[4,64,64], index: 13, kind: input, shape index: {}]   ;;  %s8691_s14 = inlined_call_operand.vmem [shape: f32[4,64], index: 14, kind: input, shape index: {}]   ;;  %s8692_s15 = inlined_call_operand.vmem [shape: f32[128,64], index: 15, kind: input, shape index: {}]   ;;  %s8693_s17 = inlined_call_operand.vmem [shape: f32[64,128], index: 17, kind: input, shape index: {}]   ;;  %s8694_s20 = inlined_call_operand.vmem [shape: f32[8,128], index: 20, kind: output, shape index: {1}]   ;;  %s8695_s16 = inlined_call_operand.vmem [shape: f32[1,64], index: 16, kind: input, shape index: {}]   ;;  %s8696_s18 = inlined_call_operand.vmem [shape: f32[1,128], index: 18, kind: input, shape index: {}]   ;;  %s8697_s19 = inlined_call_operand.vmem [shape: f32[16,128], index: 19, kind: output, shape index: {0}]  }
   0x1   :  { %8705 = sst [smem:[#allocation2_spill]] %s8677_s5  ;;  %6999 = vmatprep.subr.bf16.mxu0 %v7404_v0  ;;  %7011 = vmatprep.subr.bf16.mxu1 %v7404_v0  ;;  %vm90_vm2 = vcmask 523264   ;;  %v66_v58 = vld [vmem:[%s8682_s1] sm:$0xf]  ;;  %vm625_vm3 = vcmask 130048   ;;  %s8703_s5 = smov 80  }
   0x2   :  { %8706 = sst [smem:[#allocation3_spill]] %s8678_s7  ;;  %s8710_s23 = sld [smem:[#allocation2_spill]]  ;;  %6398 = vmatprep.mubr.msk.f32.mxu0 %vm7405_vm0, %v7406_v6  ;;  %6417 = vmatprep.mubr.msk.f32.mxu1 %vm7405_vm0, %v7406_v6  ;;  %v5890_v59 = vld [vmem:[%s8683_s6] ss:$0 sm:$0xff]  ;;  %vm703_vm4 = vcmask 60416   ;;  %vm715_vm5 = vcmask 64512  }
   0x3   :  { %8707 = sst [smem:[#allocation4_spill]] %s8679_s0  ;;  %s8711_s29 = sld [smem:[#allocation3_spill]]  ;;  %vm1303_vm6 = vcmask 392192   ;;  %vm1301_vm7 = vcmask 261120   ;;  %vm1968_vm8 = vcmask 1043456   ;;  %vm248_vm9 = vcmask 517120  }
   0x4   :  { %8708 = sst [smem:[#allocation5_spill]] %s8680_s2  ;;  %s8712_s25 = sld [smem:[#allocation4_spill]]  ;;  %vm4296_vm10 = vcmask 31744   ;;  %vm2220_vm11 = vcmask 7168   ;;  %vm2222_vm12 = vcmask 15360  }
   0x5   :  { %8709 = sst [smem:[#allocation6_spill]] %s8681_s9  ;;  %s8713_s0 = sld [smem:[#allocation5_spill]] }
   0x6   :  { %s8714_s27 = sld [smem:[#allocation6_spill]]  ;;  %s7407_s9 = smov 96  }
   0x7   :  { %s7412_s7 = smov 48  }
   0x8   :  { %v75_v1 = vld [vmem:[%s8710_s23] sm:$0xff]  ;;  %v76_v2 = vld [vmem:[%s8710_s23 + $0x8] sm:$0xff]  ;;  %v77_v3 = vld [vmem:[%s8710_s23 + $0x10] sm:$0xff] }
   0x9   :  { %v7000_v4 = vpack.c.bf16 %v76_v2, %v75_v1  ;;  %v78_v5 = vld [vmem:[%s8710_s23 + $0x18] sm:$0xff]  ;;  %v165_v7 = vld [vmem:[%s8711_s29] sm:$0xff]  ;;  %v166_v10 = vld [vmem:[%s8711_s29 + $0x8] sm:$0xff] }
   0xa   :  { %v7003_v8 = vpack.c.bf16 %v78_v5, %v77_v3  ;;  %v79_v9 = vld [vmem:[%s8710_s23 + $0x20] sm:$0xff]  ;;  %v80_v11 = vld [vmem:[%s8710_s23 + $0x28] sm:$0xff]  ;;  %v7012_v12 = vpack.c.bf16 %v166_v10, %v165_v7  ;;  %v167_v13 = vld [vmem:[%s8711_s29 + $0x10] sm:$0xff] }
   0xb   :  { %7001 = vmatpush3.bf16.msra.mxu0 %v7000_v4  ;;  %v168_v14 = vld [vmem:[%s8711_s29 + $0x18] sm:$0xff]  ;;  %v7006_v16 = vpack.c.bf16 %v80_v11, %v79_v9  ;;  %v169_v17 = vld [vmem:[%s8711_s29 + $0x20] sm:$0xff]  ;;  %v170_v18 = vld [vmem:[%s8711_s29 + $0x28] sm:$0xff] }
   0xc   :  { %7002 = vmatprep.subr.bf16.mxu0 %v7404_v0  ;;  %7013 = vmatpush3.bf16.msra.mxu1 %v7012_v12  ;;  %v7015_v15 = vpack.c.bf16 %v168_v14, %v167_v13  ;;  %v81_v19 = vld [vmem:[%s8710_s23 + $0x30] sm:$0xff]  ;;  %v82_v20 = vld [vmem:[%s8710_s23 + $0x38] sm:$0xff]  ;;  %v7575_v21 = vld [vmem:[%s8712_s25 + $0x8] sm:$0xff]  ;;  %v7018_v22 = vpack.c.bf16 %v170_v18, %v169_v17  ;;  %s7410_s23 = smov 16  }
   0xd   :  { %7014 = vmatprep.subr.bf16.mxu1 %v7404_v0  ;;  %v7009_v23 = vpack.c.bf16 %v82_v20, %v81_v19  ;;  %v71_v24 = vrot.slane %v7575_v21, 7  ;;  %v171_v25 = vld [vmem:[%s8711_s29 + $0x30] sm:$0xff]  ;;  %v172_v26 = vld [vmem:[%s8711_s29 + $0x38] sm:$0xff]  ;;  %v7589_v27 = vld [vmem:[%s8712_s25] sm:$0xff] }
   0xe   :  { %v5894_v28 = vld [vmem:[%s8711_s29 + $0x40] sm:$0xff]  ;;  %v5895_v29 = vld [vmem:[%s8711_s29 + $0x48] sm:$0xff]  ;;  %v7021_v30 = vpack.c.bf16 %v172_v26, %v171_v25  ;;  %v5896_v34 = vld [vmem:[%s8711_s29 + $0x50] sm:$0xff] }
   0xf   :  { %7004 = vmatpush3.bf16.msra.mxu0 %v7003_v8  ;;  %v74_v31 = vsel %vm73_vm1, %v7589_v27, %v71_v24  ;;  %v7024_v32 = vpack.c.bf16 %v5895_v29, %v5894_v28  ;;  %v67_v33 = vld [vmem:[%s8713_s0] sm:$0x3]  ;;  %v5897_v35 = vld [vmem:[%s8711_s29 + $0x58] sm:$0xff]  ;;  %v5899_v38 = vld [vmem:[%s8711_s29 + $0x68] sm:$0xff] }
  0x10   :  { %7005 = vmatprep.subr.bf16.mxu0 %v7404_v0  ;;  %7016 = vmatpush3.bf16.msra.mxu1 %v7015_v15  ;;  %v7027_v36 = vpack.c.bf16 %v5897_v35, %v5896_v34  ;;  %v5898_v37 = vld [vmem:[%s8711_s29 + $0x60] sm:$0xff]  ;;  %v5900_v39 = vld [vmem:[%s8711_s29 + $0x70] sm:$0xff]  ;;  %v5901_v41 = vld [vmem:[%s8711_s29 + $0x78] sm:$0xff] }
  0x11   :  { %7017 = vmatprep.subr.bf16.mxu1 %v7404_v0  ;;  %v7030_v40 = vpack.c.bf16 %v5899_v38, %v5898_v37  ;;  %v7033_v42 = vpack.c.bf16 %v5901_v41, %v5900_v39  ;;  %v5903_v43 = vld [vmem:[%s8714_s27 + $0x40] sm:$0xff]  ;;  %v5904_v44 = vld [vmem:[%s8714_s27 + $0x48] sm:$0xff]  ;;  %v348_v49 = vld [vmem:[%s8714_s27 + $0x10] sm:$0xff] }
  0x12   :  { %v7047_v45 = vpack.c.bf16 %v5904_v44, %v5903_v43  ;;  %v346_v46 = vld [vmem:[%s8714_s27] sm:$0xff]  ;;  %v347_v47 = vld [vmem:[%s8714_s27 + $0x8] sm:$0xff]  ;;  %v349_v50 = vld [vmem:[%s8714_s27 + $0x18] sm:$0xff] }
  0x13   :  { %7007 = vmatpush3.bf16.msra.mxu0 %v7006_v16  ;;  %v7036_v48 = vpack.c.bf16 %v347_v47, %v346_v46  ;;  %v7039_v51 = vpack.c.bf16 %v349_v50, %v348_v49  ;;  %v350_v52 = vld [vmem:[%s8714_s27 + $0x20] sm:$0xff]  ;;  %v351_v53 = vld [vmem:[%s8714_s27 + $0x28] sm:$0xff]  ;;  %v352_v55 = vld [vmem:[%s8714_s27 + $0x30] sm:$0xff] }
  0x14   :  { %7008 = vmatprep.subr.bf16.mxu0 %v7404_v0  ;;  %7019 = vmatpush3.bf16.msra.mxu1 %v7018_v22  ;;  %v7042_v54 = vpack.c.bf16 %v351_v53, %v350_v52  ;;  %v353_v56 = vld [vmem:[%s8714_s27 + $0x38] sm:$0xff]  ;;  %v5905_v2 = vld [vmem:[%s8714_s27 + $0x50] sm:$0xff]  ;;  %v5907_v7 = vld [vmem:[%s8714_s27 + $0x60] sm:$0xff] }
  0x15   :  { %7020 = vmatprep.subr.bf16.mxu1 %v7404_v0  ;;  %v7045_v57 = vpack.c.bf16 %v353_v56, %v352_v55  ;;  %v5906_v3 = vld [vmem:[%s8714_s27 + $0x58] sm:$0xff]  ;;  %v5908_v8 = vld [vmem:[%s8714_s27 + $0x68] sm:$0xff]  ;;  %v5909_v11 = vld [vmem:[%s8714_s27 + $0x70] sm:$0xff] }
  0x16   :  { %v7051_v4 = vpack.c.bf16 %v5906_v3, %v5905_v2  ;;  %v7055_v10 = vpack.c.bf16 %v5908_v8, %v5907_v7  ;;  %v5910_v12 = vld [vmem:[%s8714_s27 + $0x78] sm:$0xff]  ;;  %v5929_v18 = vld [vmem:[%s8684_s10 + $0x1] ss:$0 sm:$0xff]  ;;  %v5927_v22 = vld [vmem:[%s8684_s10] ss:$0 sm:$0xff] }
  0x17   :  { %7010 = vmatpush3.bf16.msra.mxu0 %v7009_v23  ;;  %v7059_v13 = vpack.c.bf16 %v5910_v12, %v5909_v11  ;;  %v5911_v26 = vld [vmem:[%s8714_s27 + $0x80] sm:$0xff]  ;;  %v5912_v28 = vld [vmem:[%s8714_s27 + $0x88] sm:$0xff]  ;;  %v5913_v29 = vld [vmem:[%s8714_s27 + $0x90] sm:$0xff] }
  0x18   :  { %7023 = vmatprep.subr.bf16.mxu0 %v7404_v0  ;;  %7022 = vmatpush3.bf16.msra.mxu1 %v7021_v30  ;;  %v7063_v30 = vpack.c.bf16 %v5912_v28, %v5911_v26  ;;  %v5916_v34 = vld [vmem:[%s8714_s27 + $0xa8] sm:$0xff]  ;;  %v5918_v37 = vld [vmem:[%s8714_s27 + $0xb8] sm:$0xff] }
  0x19   :  { %7035 = vmatprep.subr.bf16.mxu1 %v7404_v0 }
  0x1a   :  { %6399 = vmatmul.mubr.msk.f32.vlgmr.msra.gmra.mrb[0].mxu0 %vm90_vm2, %v74_v31  ;;  %v5914_v31 = vld [vmem:[%s8714_s27 + $0x98] sm:$0xff] }
  0x1b   :  { %7025 = vmatpush3.bf16.msra.mxu0 %v7024_v32  ;;  %6436 = vmatprep.mubr.msk.f32.mxu0 %vm7405_vm0, %v7406_v6  ;;  %v7067_v32 = vpack.c.bf16 %v5914_v31, %v5913_v29 }
  0x1c   :  { %7026 = vmatprep.subr.bf16.mxu0 %v7404_v0  ;;  %6418 = vmatmul.mubr.msk.f32.vlgmr.msra.gmra.mrb[0].mxu1 %vm90_vm2, %v67_v33  ;;  %v5915_v33 = vld [vmem:[%s8714_s27 + $0xa0] sm:$0xff] }
  0x1d   :  { %6455 = vmatprep.mubr.msk.f32.mxu1 %vm7405_vm0, %v7406_v6  ;;  %7037 = vmatpush3.bf16.msra.mxu1 %v7036_v48  ;;  %v7071_v35 = vpack.c.bf16 %v5916_v34, %v5915_v33 }
  0x1e   :  { %7038 = vmatprep.subr.bf16.mxu1 %v7404_v0 }
  0x1f   :  { %7028 = vmatpush3.bf16.msra.mxu0 %v7027_v36  ;;  %v5917_v36 = vld [vmem:[%s8714_s27 + $0xb0] sm:$0xff] }
  0x20   :  { %7029 = vmatprep.subr.bf16.mxu0 %v7404_v0  ;;  %v7075_v38 = vpack.c.bf16 %v5918_v37, %v5917_v36 }
  0x21   :  { %7040 = vmatpush3.bf16.msra.mxu1 %v7039_v51  ;;  %v5932_v51 = vld [vmem:[%s8684_s10 + $0x2] ss:$0 sm:$0xff] }
  0x22   :  { %7041 = vmatprep.subr.bf16.mxu1 %v7404_v0 }
  0x23   :  { %7031 = vmatpush3.bf16.msra.mxu0 %v7030_v40 }
  0x24   :  { %7032 = vmatprep.subr.bf16.mxu0 %v7404_v0 }
  0x25   :  { %7043 = vmatpush3.bf16.msra.mxu1 %v7042_v54 }
  0x26   :  { %7044 = vmatprep.subr.bf16.mxu1 %v7404_v0 }
  0x27   :  { %7034 = vmatpush3.bf16.msra.mxu0 %v7033_v42 }
  0x28   :  { %7048 = vmatprep.subr.bf16.mxu0 %v7047_v45 }
  0x29   :  { %7046 = vmatpush3.bf16.msra.mxu1 %v7045_v57 }
  0x2a   :  { %7064 = vmatprep.subr.bf16.mxu1 %v7063_v30 }
  0x2c   :  { %6456 = vmatmul.mubr.msk.f32.vlgmr.msra.gmra.mrb[2].mxu1 %vm90_vm2, %v66_v58 }
  0x2d   :  { %6493 = vmatprep.mubr.msk.f32.mxu1 %vm90_vm2, %v7589_v27  ;;  %7066 = vmatpush3.bf16.msra.mxu1 %v7063_v30 }
  0x2e   :  { %7068 = vmatprep.subr.bf16.mxu1 %v7067_v32 }
  0x31   :  { %7070 = vmatpush3.bf16.msra.mxu1 %v7067_v32 }
  0x32   :  { %7072 = vmatprep.subr.bf16.mxu1 %v7071_v35 }
  0x35   :  { %7074 = vmatpush3.bf16.msra.mxu1 %v7071_v35 }
  0x36   :  { %7076 = vmatprep.subr.bf16.mxu1 %v7075_v38 }
  0x39   :  { %7078 = vmatpush3.bf16.msra.mxu1 %v7075_v38 }
  0x3a   :  { %6501 = vmatprep.subr.mxu1 %v7406_v6 }
  0x3c   :  { %6494 = vmatmul.mubr.msk.f32.vlgmr.msra.gmra.mrb[4].mxu1 %vm90_vm2, %v7575_v21 }
  0x3d   :  { %6503 = vmatprep.mubr.msk.f32.mxu1 %vm7405_vm0, %v7406_v6 }
  0xed   :  { %v160_v60 = vpop.f32.mrb[0].mxu0 }
  0xee   :  { %v161_v61 = vadd.f32 %v5890_v59, %v160_v60  ;;  %v6400_v62 = vpop.f32.mrb[1].mxu0 }
  0xef   :  { %v243_v63 = vpop.f32.mrb[0].mxu1 }
  0xf0   :  { %7300 = vtanh.f32 %v161_v61  ;;  %v6419_v1 = vpop.f32.mrb[1].mxu1 }
  0xfa   :  { %v7301_v5 = vpop.eup %7300 }
  0xfb   :  { %v7685_v9 = vmul.f32 %v7301_v5, %v243_v63  ;;  %6437 = vmatmul.mubr.msk.f32.vlgmr.msra.gmra.mrb[2].mxu0 %vm90_vm2, %v7301_v5 }
  0xfc   :  { %7050 = vmatpush3.bf16.msra.mxu0 %v7047_v45  ;;  %6474 = vmatprep.mubr.msk.f32.mxu0 %vm90_vm2, %v7589_v27 }
  0xfd   :  { %7052 = vmatprep.subr.bf16.mxu0 %v7051_v4 }
  0xff   :  { %v458_v14 = vpop.f32.mrb[2].mxu1 }
 0x100   :  { %7054 = vmatpush3.bf16.msra.mxu0 %v7051_v4  ;;  %v6457_v15 = vpop.f32.mrb[3].mxu1  ;;  %v459_v24 = vadd.f32 %v5927_v22, %v458_v14 }
 0x101   :  { %7056 = vmatprep.subr.bf16.mxu0 %v7055_v10 }
 0x104   :  { %7058 = vmatpush3.bf16.msra.mxu0 %v7055_v10 }
 0x105   :  { %7060 = vmatprep.subr.bf16.mxu0 %v7059_v13 }
 0x108   :  { %7062 = vmatpush3.bf16.msra.mxu0 %v7059_v13 }
 0x109   :  { %6496 = vmatprep.subr.mxu0 %v7406_v6 }
 0x10b   :  { %6475 = vmatmul.mubr.msk.f32.vlgmr.msra.gmra.mrb[4].mxu0 %vm90_vm2, %v7575_v21 }
 0x10c   :  { %6498 = vmatprep.mubr.msk.f32.mxu0 %vm7405_vm0, %v7406_v6 }
 0x10f   :  { %v6495_v52 = vpop.f32.mrb[4].mxu1 }
 0x110   :  { %v7791_v53 = vadd.f32 %v6495_v52, %v5932_v51  ;;  %v616_v54 = vpop.f32.mrb[5].mxu1 }
 0x111   :  { %v617_v55 = vadd.f32 %v5932_v51, %v616_v54 }
 0x113   :  { %6502 = vmatpush3.msra.mxu1 %v617_v55 }
 0x114   :  { %6511 = vmatprep.subr.mxu1 %v7406_v6 }
 0x1ce   :  { %v7701_v16 = vpop.f32.mrb[2].mxu0 }
 0x1cf   :  { %v6438_v17 = vpop.f32.mrb[3].mxu0 }
 0x1de   :  { %v6476_v19 = vpop.f32.mrb[4].mxu0 }
 0x1df   :  { %v537_v20 = vpop.f32.mrb[5].mxu0  ;;  %v543_v25 = vadd.f32 %v6476_v19, %v5929_v18 }
 0x1e0   :  { %v538_v23 = vadd.f32 %v5929_v18, %v537_v20 }
 0x1e2   :  { %958 = vrot.lane.b32.xlu1 %v538_v23, %s7407_s9  ;;  %791 = vrot.lane.b32.xlu0 %v538_v23, %s7408_s30 }
 0x1e3   :  { %6497 = vmatpush3.xpose.msk.msra.mxu0 %vm625_vm3, %v538_v23 }
 0x1e4   :  { %6506 = vmatprep.subr.mxu0 %v7406_v6 }
 0x1e6   :  { %6499 = vmatmul.mubr.msk.f32.vlgmr.msra.gmra.mrb[6].mxu0 %vm625_vm3, %v459_v24  ;;  %956 = vrot.lane.b32.xlu1 %v459_v24, %s7407_s9 }
 0x1e7   :  { %789 = vrot.lane.b32.xlu0 %v459_v24, %s7408_s30  ;;  %6508 = vmatprep.mubr.msk.f32.mxu0 %vm7405_vm0, %v7406_v6 }
 0x1ea   :  { %1122 = vrot.lane.b32.xlu1 %v459_v24, %s8703_s5 }
 0x1eb   :  { %1124 = vrot.lane.b32.xlu0 %v538_v23, %s8703_s5 }
 0x1ee   :  { %1626 = vrot.lane.b32.xlu1 %v543_v25, %s7407_s9 }
 0x1ef   :  { %1463 = vrot.lane.b32.xlu0 %v543_v25, %s7408_s30 }
 0x1f3   :  { %1788 = vrot.lane.b32.xlu0 %v543_v25, %s8703_s5 }
 0x254   :  { %v792_v39 = vpop.permute.xlu0 %791  ;;  %v959_v40 = vpop.permute.xlu1 %958 }
 0x255   :  { %6507 = vmatpush3.xpose.msk.msra.mxu0 %vm625_vm3, %v792_v39 }
 0x256   :  { %6516 = vmatprep.subr.mxu0 %v7406_v6 }
 0x258   :  { %v957_v42 = vpop.permute.xlu1 %956 }
 0x259   :  { %v790_v41 = vpop.permute.xlu0 %789 }
 0x25a   :  { %6509 = vmatmul.mubr.msk.f32.vlgmr.msra.gmra.mrb[8].mxu0 %vm625_vm3, %v790_v41 }
 0x25b   :  { %6517 = vmatpush3.xpose.msk.msra.mxu0 %vm625_vm3, %v959_v40  ;;  %6518 = vmatprep.mubr.msk.f32.mxu0 %vm7405_vm0, %v7406_v6 }
 0x25c   :  { %6526 = vmatprep.subr.mxu0 %v7406_v6  ;;  %v1123_v43 = vpop.permute.xlu1 %1122 }
 0x25d   :  { %v1125_v21 = vpop.permute.xlu0 %1124 }
 0x25e   :  { %6519 = vmatmul.mubr.msk.f32.vlgmr.msra.gmra.mrb[10].mxu0 %vm625_vm3, %v957_v42 }
 0x25f   :  { %6527 = vmatpush3.xpose.msk.msra.mxu0 %vm625_vm3, %v1125_v21  ;;  %6528 = vmatprep.mubr.msk.f32.mxu0 %vm7405_vm0, %v7406_v6 }
 0x260   :  { %6536 = vmatprep.subr.mxu0 %v7406_v6  ;;  %v1627_v45 = vpop.permute.xlu1 %1626 }
 0x261   :  { %v1464_v44 = vpop.permute.xlu0 %1463 }
 0x262   :  { %6529 = vmatmul.mubr.msk.f32.vlgmr.msra.gmra.mrb[12].mxu0 %vm625_vm3, %v1123_v43 }
 0x263   :  { %6537 = vmatpush3.xpose.msk.msra.mxu0 %vm625_vm3, %v543_v25  ;;  %6538 = vmatprep.mubr.msk.f32.mxu0 %vm7405_vm0, %v7406_v6 }
 0x264   :  { %6546 = vmatprep.subr.mxu0 %v7406_v6 }
 0x265   :  { %v1789_v46 = vpop.permute.xlu0 %1788 }
 0x266   :  { %6539 = vmatmul.mubr.msk.f32.vlgmr.msra.gmra.mrb[14].mxu0 %vm625_vm3, %v459_v24 }
 0x267   :  { %6547 = vmatpush3.xpose.msk.msra.mxu0 %vm625_vm3, %v1464_v44  ;;  %6548 = vmatprep.mubr.msk.f32.mxu0 %vm7405_vm0, %v7406_v6 }
 0x268   :  { %6556 = vmatprep.subr.mxu0 %v7406_v6 }
 0x26a   :  { %6549 = vmatmul.mubr.msk.f32.vlgmr.msra.gmra.mrb[16].mxu0 %vm625_vm3, %v790_v41 }
 0x26b   :  { %6557 = vmatpush3.xpose.msk.msra.mxu0 %vm625_vm3, %v1627_v45  ;;  %6558 = vmatprep.mubr.msk.f32.mxu0 %vm7405_vm0, %v7406_v6 }
 0x26c   :  { %6566 = vmatprep.subr.mxu0 %v7406_v6 }
 0x26e   :  { %6559 = vmatmul.mubr.msk.f32.vlgmr.msra.gmra.mrb[18].mxu0 %vm625_vm3, %v957_v42 }
 0x26f   :  { %6567 = vmatpush3.xpose.msk.msra.mxu0 %vm625_vm3, %v1789_v46  ;;  %6568 = vmatprep.mubr.msk.f32.mxu0 %vm7405_vm0, %v7406_v6 }
 0x270   :  { %7079 = vmatprep.subr.bf16.mxu0 %v7404_v0 }
 0x272   :  { %6569 = vmatmul.mubr.msk.f32.vlgmr.msra.gmra.mrb[20].mxu0 %vm625_vm3, %v1123_v43 }
 0x273   :  { %6592 = vmatprep.mubr.msk.f32.mxu0 %vm7405_vm0, %v7406_v6 }
 0x2b9   :  { %v698_v47 = vpop.f32.mrb[6].mxu0 }
 0x2ba   :  { %v702_v48 = vmul.f32 0.25, %v698_v47  ;;  %v6500_v49 = vpop.f32.mrb[7].mxu0 }
 0x2bc   :  { %v704_v50 = vsel %vm703_vm4, %v702_v48, -inf }
 0x2bd   :  { %705 = vmax.xlane.f32.xlu1 %v704_v50 }
 0x32d   :  { %v863_v56 = vpop.f32.mrb[8].mxu0 }
 0x32e   :  { %v867_v57 = vmul.f32 0.25, %v863_v56  ;;  %v6510_v58 = vpop.f32.mrb[9].mxu0 }
 0x330   :  { %v868_v59 = vsel %vm703_vm4, %v867_v57, -inf }
 0x331   :  { %869 = vmax.xlane.f32.xlu0 %v868_v59  ;;  %v1030_v60 = vpop.f32.mrb[10].mxu0 }
 0x332   :  { %v1034_v61 = vmul.f32 0.25, %v1030_v60  ;;  %v6520_v62 = vpop.f32.mrb[11].mxu0 }
 0x334   :  { %v1035_v63 = vsel %vm703_vm4, %v1034_v61, -inf }
 0x335   :  { %1036 = vmax.xlane.f32.xlu0 %v1035_v63  ;;  %v1196_v1 = vpop.f32.mrb[12].mxu0 }
 0x336   :  { %v1200_v2 = vmul.f32 0.25, %v1196_v1  ;;  %v6530_v3 = vpop.f32.mrb[13].mxu0 }
 0x338   :  { %v1201_v4 = vsel %vm703_vm4, %v1200_v2, -inf }
 0x339   :  { %1202 = vmax.xlane.f32.xlu1 %v1201_v4  ;;  %v1374_v5 = vpop.f32.mrb[14].mxu0 }
 0x33a   :  { %v1378_v7 = vmul.f32 0.25, %v1374_v5  ;;  %v6540_v8 = vpop.f32.mrb[15].mxu0 }
 0x33c   :  { %v1379_v10 = vsel %vm703_vm4, %v1378_v7, -inf }
 0x33d   :  { %1380 = vmax.xlane.f32.xlu0 %v1379_v10  ;;  %v1533_v11 = vpop.f32.mrb[16].mxu0 }
 0x33e   :  { %v1537_v12 = vmul.f32 0.25, %v1533_v11  ;;  %v6550_v13 = vpop.f32.mrb[17].mxu0 }
 0x340   :  { %v1538_v14 = vsel %vm703_vm4, %v1537_v12, -inf }
 0x341   :  { %1539 = vmax.xlane.f32.xlu1 %v1538_v14  ;;  %v1696_v15 = vpop.f32.mrb[18].mxu0 }
 0x342   :  { %v7799_v17 = vmul.f32 0.25, %v1696_v15  ;;  %v6560_v18 = vpop.f32.mrb[19].mxu0 }
 0x344   :  { %v1701_v19 = vsel %vm703_vm4, %v7799_v17, -inf }
 0x345   :  { %1702 = vmax.xlane.f32.xlu0 %v1701_v19  ;;  %v1858_v20 = vpop.f32.mrb[20].mxu0 }
 0x346   :  { %v1862_v22 = vmul.f32 0.25, %v1858_v20  ;;  %v6570_v23 = vpop.f32.mrb[21].mxu0 }
 0x348   :  { %v1863_v24 = vsel %vm703_vm4, %v1862_v22, -inf }
 0x349   :  { %1864 = vmax.xlane.f32.xlu1 %v1863_v24 }
 0x34a   :  { %v706_v25 = vpop.xlane.xlu1 %705 }
 0x34b   :  { %v707_v26 = vsub.f32 %v702_v48, %v706_v25 }
 0x34d   :  { %v708_v28 = vmul.f32 1.442695, %v707_v26 }
 0x34f   :  { %7302 = vpow2.f32 %v708_v28 }
 0x359   :  { %v7303_v29 = vpop.eup %7302 }
 0x35a   :  { %1046 = vrot.lane.b32.xlu1 %v617_v55, %s7407_s9  ;;  %v710_v30 = vsel %vm703_vm4, %v7303_v29, 0.0 }
 0x35b   :  { %880 = vrot.lane.b32.xlu0 %v617_v55, %s7408_s30 }
 0x35e   :  { %1212 = vrot.lane.b32.xlu1 %v617_v55, %s8703_s5 }
 0x37a   :  { %711 = vadd.xlane.f32.xlu0 %v710_v30 }
 0x3be   :  { %v870_v31 = vpop.xlane.xlu0 %869 }
 0x3bf   :  { %v871_v32 = vsub.f32 %v867_v57, %v870_v31 }
 0x3c1   :  { %v872_v33 = vmul.f32 1.442695, %v871_v32 }
 0x3c2   :  { %v1037_v34 = vpop.xlane.xlu0 %1036 }
 0x3c3   :  { %7304 = vpow2.f32 %v872_v33  ;;  %v1038_v35 = vsub.f32 %v1034_v61, %v1037_v34 }
 0x3c5   :  { %v1039_v36 = vmul.f32 1.442695, %v1038_v35 }
 0x3c6   :  { %v1203_v37 = vpop.xlane.xlu1 %1202 }
 0x3c7   :  { %7306 = vpow2.f32 %v1039_v36  ;;  %v1204_v38 = vsub.f32 %v1200_v2, %v1203_v37 }
 0x3c9   :  { %v1205_v39 = vmul.f32 1.442695, %v1204_v38 }
 0x3ca   :  { %v1381_v40 = vpop.xlane.xlu0 %1380 }
 0x3cb   :  { %7308 = vpow2.f32 %v1205_v39  ;;  %v1382_v41 = vsub.f32 %v1378_v7, %v1381_v40 }
 0x3cd   :  { %v7305_v42 = vpop.eup %7304  ;;  %v1383_v21 = vmul.f32 1.442695, %v1382_v41 }
 0x3ce   :  { %v1540_v43 = vpop.xlane.xlu1 %1539  ;;  %v874_v44 = vsel %vm703_vm4, %v7305_v42, 0.0 }
 0x3cf   :  { %7310 = vpow2.f32 %v1383_v21  ;;  %v1541_v45 = vsub.f32 %v1537_v12, %v1540_v43  ;;  %875 = vadd.xlane.f32.xlu1 %v874_v44  ;;  %v5919_v43 = vld [vmem:[%s8714_s27 + $0xc0] sm:$0xff]  ;;  %v5920_v44 = vld [vmem:[%s8714_s27 + $0xc8] sm:$0xff] }
 0x3d1   :  { %v7307_v46 = vpop.eup %7306  ;;  %v1542_v47 = vmul.f32 1.442695, %v1541_v45  ;;  %v5961_v45 = vld [vmem:[%s8711_s29 + $0x80] sm:$0xff] }
 0x3d2   :  { %v1041_v48 = vsel %vm703_vm4, %v7307_v46, 0.0  ;;  %v1703_v61 = vpop.xlane.xlu0 %1702 }
 0x3d3   :  { %7312 = vpow2.f32 %v1542_v47  ;;  %1042 = vadd.xlane.f32.xlu0 %v1041_v48  ;;  %v1704_v62 = vsub.f32 %v7799_v17, %v1703_v61  ;;  %v7080_v47 = vpack.c.bf16 %v5920_v44, %v5919_v43  ;;  %v5962_v48 = vld [vmem:[%s8711_s29 + $0x88] sm:$0xff]  ;;  %v5923_v61 = vld [vmem:[%s8714_s27 + $0xe0] sm:$0xff] }
 0x3d5   :  { %v7309_v49 = vpop.eup %7308  ;;  %v1705_v63 = vmul.f32 1.442695, %v1704_v62  ;;  %7081 = vmatpush3.bf16.msra.mxu0 %v7080_v47  ;;  %v5924_v62 = vld [vmem:[%s8714_s27 + $0xe8] sm:$0xff]  ;;  %v5973_v47 = vld [vmem:[%s8685_s11 + $0x50] sm:$0xff] }
 0x3d6   :  { %v1865_v50 = vpop.xlane.xlu1 %1864  ;;  %v1207_v51 = vsel %vm703_vm4, %v7309_v49, 0.0  ;;  %v881_v1 = vpop.permute.xlu0 %880  ;;  %7082 = vmatprep.subr.bf16.mxu0 %v7404_v0 }
 0x3d7   :  { %v1866_v52 = vsub.f32 %v1862_v22, %v1865_v50  ;;  %1208 = vadd.xlane.f32.xlu1 %v1207_v51  ;;  %v5922_v50 = vld [vmem:[%s8714_s27 + $0xd8] sm:$0xff]  ;;  %v7889_v51 = vpack.c.bf16 %v5962_v48, %v5961_v45  ;;  %v5972_v45 = vld [vmem:[%s8685_s11 + $0x48] sm:$0xff] }
 0x3d8   :  { %v5974_v48 = vld [vmem:[%s8685_s11 + $0x58] sm:$0xff] }
 0x3d9   :  { %v7811_v54 = vpop.eup %7310  ;;  %v1867_v55 = vmul.f32 1.442695, %v1866_v52 }
 0x3da   :  { %v1385_v56 = vsel %vm703_vm4, %v7811_v54, 0.0  ;;  %v1047_v8 = vpop.permute.xlu1 %1046 }
 0x3db   :  { %7314 = vpow2.f32 %v1867_v55  ;;  %1386 = vadd.xlane.f32.xlu0 %v1385_v56 }
 0x3dc   :  { %7316 = vpow2.f32 %v1705_v63  ;;  %v7086_v63 = vpack.c.bf16 %v5924_v62, %v5923_v61 }
 0x3dd   :  { %v7815_v57 = vpop.eup %7312 }
 0x3de   :  { %v1544_v58 = vsel %vm703_vm4, %v7815_v57, 0.0  ;;  %v1213_v10 = vpop.permute.xlu1 %1212 }
 0x3df   :  { %1545 = vadd.xlane.f32.xlu1 %v1544_v58  ;;  %v5963_v58 = vld [vmem:[%s8711_s29 + $0x90] sm:$0xff] }
 0x3e5   :  { %v7819_v59 = vpop.eup %7314 }
 0x3e6   :  { %v1869_v60 = vsel %vm703_vm4, %v7819_v59, 0.0  ;;  %v7317_v3 = vpop.eup %7316 }
 0x3e7   :  { %1870 = vadd.xlane.f32.xlu1 %v1869_v60  ;;  %v1707_v4 = vsel %vm703_vm4, %v7317_v3, 0.0 }
 0x3f1   :  { %1550 = vrot.lane.b32.xlu0 %v7791_v53, %s7408_s30 }
 0x3f8   :  { %1712 = vrot.lane.b32.xlu1 %v7791_v53, %s7407_s9 }
 0x407   :  { %v712_v2 = vpop.xlane.xlu0 %711 }
 0x408   :  { %7318 = vrcp.f32 %v712_v2  ;;  %v5966_v2 = vld [vmem:[%s8711_s29 + $0xa8] sm:$0xff] }
 0x410   :  { %1708 = vadd.xlane.f32.xlu0 %v1707_v4  ;;  %v5925_v4 = vld [vmem:[%s8714_s27 + $0xf0] sm:$0xff] }
 0x412   :  { %v7319_v5 = vpop.eup %7318 }
 0x413   :  { %v714_v7 = vmul.f32 %v7319_v5, %v7303_v29  ;;  %v5926_v5 = vld [vmem:[%s8714_s27 + $0xf8] sm:$0xff] }
 0x415   :  { %6504 = vmatmul.mubr.msk.f32.vlgmr.msra.gmra.mrb[6].mxu1 %vm715_vm5, %v714_v7  ;;  %v7089_v7 = vpack.c.bf16 %v5926_v5, %v5925_v4 }
 0x416   :  { %6512 = vmatpush3.msra.mxu1 %v881_v1  ;;  %6513 = vmatprep.mubr.msk.f32.mxu1 %vm7405_vm0, %v7406_v6  ;;  %v5965_v1 = vld [vmem:[%s8711_s29 + $0xa0] sm:$0xff] }
 0x417   :  { %6521 = vmatprep.subr.mxu1 %v7406_v6 }
 0x426   :  { %1874 = vrot.lane.b32.xlu0 %v7791_v53, %s8703_s5  ;;  %s7411_s5 = smov 32  }
 0x45c   :  { %v876_v11 = vpop.xlane.xlu1 %875 }
 0x45d   :  { %7320 = vrcp.f32 %v876_v11 }
 0x460   :  { %v1043_v12 = vpop.xlane.xlu0 %1042 }
 0x461   :  { %7322 = vrcp.f32 %v1043_v12  ;;  %v2225_v12 = vld [vmem:[%s8685_s11] sm:$0xff] }
 0x464   :  { %v1209_v13 = vpop.xlane.xlu1 %1208 }
 0x465   :  { %7324 = vrcp.f32 %v1209_v13  ;;  %v2226_v13 = vld [vmem:[%s8685_s11 + $0x8] sm:$0xff] }
 0x467   :  { %v7321_v14 = vpop.eup %7320 }
 0x468   :  { %v1387_v15 = vpop.xlane.xlu0 %1386  ;;  %v878_v17 = vmul.f32 %v7321_v14, %v7305_v42  ;;  %v7116_v14 = vpack.c.bf16 %v2226_v13, %v2225_v12  ;;  %v5997_v12 = vld [vmem:[%s8688_s12 + $0x1] ss:$0 sm:$0xff] }
 0x469   :  { %7326 = vrcp.f32 %v1387_v15 }
 0x46a   :  { %6514 = vmatmul.mubr.msk.f32.vlgmr.msra.gmra.mrb[8].mxu1 %vm715_vm5, %v878_v17  ;;  %v68_v17 = vld [vmem:[%s8686_s3] sm:$0xff] }
 0x46b   :  { %v7323_v18 = vpop.eup %7322  ;;  %6522 = vmatpush3.msra.mxu1 %v1047_v8  ;;  %6523 = vmatprep.mubr.msk.f32.mxu1 %vm7405_vm0, %v7406_v6  ;;  %v5967_v8 = vld [vmem:[%s8711_s29 + $0xb0] sm:$0xff] }
 0x46c   :  { %v1546_v19 = vpop.xlane.xlu1 %1545  ;;  %6531 = vmatprep.subr.mxu1 %v7406_v6  ;;  %v1045_v20 = vmul.f32 %v7323_v18, %v7307_v46  ;;  %v1551_v28 = vpop.permute.xlu0 %1550 }
 0x46d   :  { %7328 = vrcp.f32 %v1546_v19  ;;  %v2227_v19 = vld [vmem:[%s8685_s11 + $0x10] sm:$0xff] }
 0x46e   :  { %6524 = vmatmul.mubr.msk.f32.vlgmr.msra.gmra.mrb[10].mxu1 %vm715_vm5, %v1045_v20  ;;  %v2228_v20 = vld [vmem:[%s8685_s11 + $0x18] sm:$0xff] }
 0x46f   :  { %v7325_v22 = vpop.eup %7324  ;;  %6532 = vmatpush3.msra.mxu1 %v1213_v10  ;;  %6533 = vmatprep.mubr.msk.f32.mxu1 %vm7405_vm0, %v7406_v6  ;;  %v5968_v10 = vld [vmem:[%s8711_s29 + $0xb8] sm:$0xff] }
 0x470   :  { %6541 = vmatprep.subr.mxu1 %v7406_v6  ;;  %v1211_v23 = vmul.f32 %v7325_v22, %v7309_v49  ;;  %v5921_v49 = vld [vmem:[%s8714_s27 + $0xd0] sm:$0xff]  ;;  %v7938_v11 = vpack.c.bf16 %v5968_v10, %v5967_v8  ;;  %v7119_v22 = vpack.c.bf16 %v2228_v20, %v2227_v19  ;;  %v5980_v19 = vld [vmem:[%s8685_s11 + $0x88] sm:$0xff] }
 0x471   :  { %v7083_v52 = vpack.c.bf16 %v5922_v50, %v5921_v49  ;;  %v69_v49 = vld [vmem:[%s8687_s4] sm:$0xff]  ;;  %v7131_v50 = vpack.c.bf16 %v5974_v48, %v5973_v47  ;;  %v5981_v20 = vld [vmem:[%s8685_s11 + $0x90] sm:$0xff] }
 0x472   :  { %6534 = vmatmul.mubr.msk.f32.vlgmr.msra.gmra.mrb[12].mxu1 %vm715_vm5, %v1211_v23  ;;  %v6000_v48 = vld [vmem:[%s8688_s12 + $0x2] ss:$0 sm:$0xff] }
 0x473   :  { %v7327_v24 = vpop.eup %7326  ;;  %6542 = vmatpush3.msra.mxu1 %v7791_v53  ;;  %6543 = vmatprep.mubr.msk.f32.mxu1 %vm7405_vm0, %v7406_v6 }
 0x474   :  { %v1871_v25 = vpop.xlane.xlu1 %1870  ;;  %6551 = vmatprep.subr.mxu1 %v7406_v6  ;;  %v1389_v26 = vmul.f32 %v7327_v24, %v7811_v54  ;;  %7084 = vmatpush3.bf16.msra.mxu0 %v7083_v52  ;;  %v5976_v52 = vld [vmem:[%s8685_s11 + $0x68] sm:$0xff] }
 0x475   :  { %7085 = vmatprep.subr.bf16.mxu0 %v7404_v0 }
 0x476   :  { %6544 = vmatmul.mubr.msk.f32.vlgmr.msra.gmra.mrb[14].mxu1 %vm715_vm5, %v1389_v26  ;;  %v2230_v26 = vld [vmem:[%s8685_s11 + $0x28] sm:$0xff] }
 0x477   :  { %v7329_v29 = vpop.eup %7328  ;;  %6552 = vmatpush3.msra.mxu1 %v1551_v28  ;;  %6553 = vmatprep.mubr.msk.f32.mxu1 %vm7405_vm0, %v7406_v6 }
 0x478   :  { %v1713_v30 = vpop.permute.xlu1 %1712  ;;  %6561 = vmatprep.subr.mxu1 %v7406_v6  ;;  %v1548_v53 = vmul.f32 %v7329_v29, %v7815_v57  ;;  %7087 = vmatpush3.bf16.msra.mxu0 %v7086_v63  ;;  %v2231_v29 = vld [vmem:[%s8685_s11 + $0x30] sm:$0xff] }
 0x479   :  { %7088 = vmatprep.subr.bf16.mxu0 %v7404_v0 }
 0x47a   :  { %6554 = vmatmul.mubr.msk.f32.vlgmr.msra.gmra.mrb[16].mxu1 %vm715_vm5, %v1548_v53 }
 0x47b   :  { %6562 = vmatpush3.msra.mxu1 %v1713_v30  ;;  %6563 = vmatprep.mubr.msk.f32.mxu1 %vm7405_vm0, %v7406_v6  ;;  %v2232_v30 = vld [vmem:[%s8685_s11 + $0x38] sm:$0xff] }
 0x47c   :  { %6571 = vmatprep.subr.mxu1 %v7406_v6  ;;  %7090 = vmatpush3.bf16.msra.mxu0 %v7089_v7  ;;  %v7125_v53 = vpack.c.bf16 %v2232_v30, %v2231_v29  ;;  %v5985_v29 = vld [vmem:[%s8685_s11 + $0xb0] sm:$0xff]  ;;  %v5986_v30 = vld [vmem:[%s8685_s11 + $0xb8] sm:$0xff] }
 0x47d   :  { %7103 = vmatprep.subr.bf16.mxu0 %v7404_v0 }
 0x49d   :  { %v1709_v31 = vpop.xlane.xlu0 %1708 }
 0x49e   :  { %7330 = vrcp.f32 %v1709_v31 }
 0x49f   :  { %7332 = vrcp.f32 %v1871_v25  ;;  %v2229_v25 = vld [vmem:[%s8685_s11 + $0x20] sm:$0xff] }
 0x4a0   :  { %v7122_v28 = vpack.c.bf16 %v2230_v26, %v2229_v25  ;;  %v5983_v25 = vld [vmem:[%s8685_s11 + $0xa0] sm:$0xff]  ;;  %v5984_v26 = vld [vmem:[%s8685_s11 + $0xa8] sm:$0xff] }
 0x4a1   :  { %v1875_v35 = vpop.permute.xlu0 %1874 }
 0x4a8   :  { %v7331_v32 = vpop.eup %7330 }
 0x4a9   :  { %v1711_v33 = vmul.f32 %v7331_v32, %v7317_v3  ;;  %v7333_v34 = vpop.eup %7332  ;;  %v7921_v3 = vpack.c.bf16 %v5966_v2, %v5965_v1  ;;  %v5959_v2 = vld [vmem:[%s8684_s10 + $0x3] ss:$0 sm:$0xff]  ;;  %s7415_s10 = smov 126  }
 0x4aa   :  { %v1873_v36 = vmul.f32 %v7333_v34, %v7819_v59  ;;  %v5964_v59 = vld [vmem:[%s8711_s29 + $0x98] sm:$0xff] }
 0x4ab   :  { %6564 = vmatmul.mubr.msk.f32.vlgmr.msra.gmra.mrb[18].mxu1 %vm715_vm5, %v1711_v33  ;;  %v7905_v60 = vpack.c.bf16 %v5964_v59, %v5963_v58 }
 0x4ac   :  { %6572 = vmatpush3.msra.mxu1 %v1875_v35  ;;  %6573 = vmatprep.mubr.msk.f32.mxu1 %vm7405_vm0, %v7406_v6 }
 0x4ad   :  { %7091 = vmatprep.subr.bf16.mxu1 %v7404_v0 }
 0x4af   :  { %6574 = vmatmul.mubr.msk.f32.vlgmr.msra.gmra.mrb[20].mxu1 %vm715_vm5, %v1873_v36 }
 0x4b0   :  { %6611 = vmatprep.mubr.msk.f32.mxu1 %vm7405_vm0, %v7406_v6  ;;  %7093 = vmatpush3.bf16.msra.mxu1 %v7889_v51 }
 0x4b1   :  { %7094 = vmatprep.subr.bf16.mxu1 %v7404_v0 }
 0x4b4   :  { %7096 = vmatpush3.bf16.msra.mxu1 %v7905_v60 }
 0x4b5   :  { %7097 = vmatprep.subr.bf16.mxu1 %v7404_v0 }
 0x4b8   :  { %7099 = vmatpush3.bf16.msra.mxu1 %v7921_v3 }
 0x4b9   :  { %7100 = vmatprep.subr.bf16.mxu1 %v7404_v0 }
 0x4bc   :  { %7102 = vmatpush3.bf16.msra.mxu1 %v7938_v11 }
 0x4bd   :  { %7115 = vmatprep.subr.bf16.mxu1 %v7404_v0 }
 0x4bf   :  { %6612 = vmatmul.mubr.msk.f32.vlgmr.msra.gmra.mrb[22].mxu1 %vm90_vm2, %v68_v17 }
 0x4c0   :  { %7117 = vmatpush3.bf16.msra.mxu1 %v7116_v14  ;;  %6649 = vmatprep.mubr.msk.f32.mxu1 %vm7405_vm0, %v7406_v6 }
 0x4c1   :  { %7118 = vmatprep.subr.bf16.mxu1 %v7404_v0 }
 0x4c4   :  { %7120 = vmatpush3.bf16.msra.mxu1 %v7119_v22 }
 0x4c5   :  { %7121 = vmatprep.subr.bf16.mxu1 %v7404_v0 }
 0x4c8   :  { %7123 = vmatpush3.bf16.msra.mxu1 %v7122_v28  ;;  %v7151_v28 = vpack.c.bf16 %v5984_v26, %v5983_v25 }
 0x4c9   :  { %7124 = vmatprep.subr.bf16.mxu1 %v7404_v0 }
 0x4cc   :  { %7126 = vmatpush3.bf16.msra.mxu1 %v7125_v53  ;;  %v7155_v53 = vpack.c.bf16 %v5986_v30, %v5985_v29 }
 0x4cf   :  { %6650 = vmatmul.mubr.msk.f32.vlgmr.msra.gmra.mrb[24].mxu1 %vm90_vm2, %v68_v17 }
 0x4d0   :  { %6687 = vmatprep.mubr.msk.f32.mxu1 %vm90_vm2, %v7589_v27 }
 0x4e8   :  { %v7866_v37 = vpop.f32.mrb[6].mxu1 }
 0x4e9   :  { %v6505_v38 = vpop.f32.mrb[7].mxu1 }
 0x53d   :  { %v952_v39 = vpop.f32.mrb[8].mxu1 }
 0x53e   :  { %1289 = vrot.lane.b32.xlu1 %v952_v39, %s7410_s23  ;;  %v6515_v40 = vpop.f32.mrb[9].mxu1 }
 0x541   :  { %v1118_v41 = vpop.f32.mrb[10].mxu1 }
 0x542   :  { %v6525_v42 = vpop.f32.mrb[11].mxu1 }
 0x545   :  { %v7869_v21 = vpop.f32.mrb[12].mxu1 }
 0x546   :  { %v6535_v46 = vpop.f32.mrb[13].mxu1 }
 0x549   :  { %v7891_v54 = vpop.f32.mrb[14].mxu1 }
 0x54a   :  { %v6545_v55 = vpop.f32.mrb[15].mxu1 }
 0x54b   :  { %v5977_v55 = vld [vmem:[%s8685_s11 + $0x70] sm:$0xff] }
 0x54d   :  { %v1622_v56 = vpop.f32.mrb[16].mxu1 }
 0x54e   :  { %1951 = vrot.lane.b32.xlu1 %v1622_v56, %s7410_s23  ;;  %v6555_v57 = vpop.f32.mrb[17].mxu1  ;;  %v5978_v56 = vld [vmem:[%s8685_s11 + $0x78] sm:$0xff] }
 0x54f   :  { %v7139_v57 = vpack.c.bf16 %v5978_v56, %v5977_v55 }
 0x552   :  { %1293 = vrot.lane.b32.xlu1 %v1118_v41, %s7411_s5 }
 0x57e   :  { %v1784_v15 = vpop.f32.mrb[18].mxu1 }
 0x57f   :  { %1955 = vrot.lane.b32.xlu0 %v1784_v15, %s7411_s5  ;;  %v6565_v18 = vpop.f32.mrb[19].mxu1 }
 0x580   :  { %v5979_v18 = vld [vmem:[%s8685_s11 + $0x80] sm:$0xff] }
 0x581   :  { %v7143_v22 = vpack.c.bf16 %v5980_v19, %v5979_v18 }
 0x582   :  { %v1946_v23 = vpop.f32.mrb[20].mxu1 }
 0x583   :  { %1959 = vrot.lane.b32.xlu0 %v1946_v23, %s7412_s7  ;;  %v6575_v24 = vpop.f32.mrb[21].mxu1  ;;  %v5982_v23 = vld [vmem:[%s8685_s11 + $0x98] sm:$0xff]  ;;  %7144 = vmatprep.subr.bf16.mxu1 %v7143_v22 }
 0x584   :  { %v7147_v24 = vpack.c.bf16 %v5982_v23, %v5981_v20  ;;  %7146 = vmatpush3.bf16.msra.mxu1 %v7143_v22 }
 0x586   :  { %7148 = vmatprep.subr.bf16.mxu1 %v7147_v24 }
 0x587   :  { %1297 = vrot.lane.b32.xlu0 %v7869_v21, %s7412_s7 }
 0x588   :  { %7150 = vmatpush3.bf16.msra.mxu1 %v7147_v24 }
 0x589   :  { %7152 = vmatprep.subr.bf16.mxu1 %v7151_v28 }
 0x58c   :  { %7154 = vmatpush3.bf16.msra.mxu1 %v7151_v28 }
 0x58d   :  { %7156 = vmatprep.subr.bf16.mxu1 %v7155_v53 }
 0x590   :  { %7158 = vmatpush3.bf16.msra.mxu1 %v7155_v53 }
 0x591   :  { %6695 = vmatprep.subr.mxu1 %v7406_v6 }
 0x592   :  { %v2125_v58 = vpop.f32.mrb[22].mxu1 }
 0x593   :  { %v6613_v59 = vpop.f32.mrb[23].mxu1 }
 0x5a2   :  { %v2334_v61 = vpop.f32.mrb[24].mxu1 }
 0x5a3   :  { %v6651_v63 = vpop.f32.mrb[25].mxu1 }
 0x5b0   :  { %v1290_v31 = vpop.permute.xlu1 %1289 }
 0x5b1   :  { %v1300_v40 = vsel %vm625_vm3, %v7866_v37, %v1290_v31  ;;  %v5971_v37 = vld [vmem:[%s8685_s11 + $0x40] sm:$0xff]  ;;  %v249_v31 = vsel %vm248_vm9, %v7685_v9, 0.0 }
 0x5b2   :  { %v7127_v46 = vpack.c.bf16 %v5972_v45, %v5971_v37 }
 0x5c0   :  { %v1952_v32 = vpop.permute.xlu1 %1951 }
 0x5c1   :  { %v1962_v34 = vsel %vm625_vm3, %v7891_v54, %v1952_v32 }
 0x5c4   :  { %v1294_v38 = vpop.permute.xlu1 %1293 }
 0x5c5   :  { %v1302_v41 = vsel %vm1301_vm7, %v1300_v40, %v1294_v38 }
 0x5f1   :  { %v1956_v33 = vpop.permute.xlu0 %1955 }
 0x5f2   :  { %v1963_v35 = vsel %vm1301_vm7, %v1962_v34, %v1956_v33 }
 0x5f5   :  { %v1960_v36 = vpop.permute.xlu0 %1959 }
 0x5f6   :  { %v1964_v39 = vsel %vm1303_vm6, %v1963_v35, %v1960_v36 }
 0x5f7   :  { %v1966_v42 = vrot.slane %v1964_v39, 4 }
 0x5f9   :  { %v1298_v21 = vpop.permute.xlu0 %1297 }
 0x5fa   :  { %v1304_v43 = vsel %vm1303_vm6, %v1302_v41, %v1298_v21 }
 0x5fb   :  { %v1969_v44 = vsel %vm1968_vm8, %v1304_v43, %v1966_v42  ;;  %v8147_v43 = vld [vmem:[%s8689_s8] ss:$0 sm:$0xff] }
 0x5fc   :  { %6593 = vmatmul.mubr.msk.f32.vlgmr.msra.gmra.mrb[22].mxu0 %vm90_vm2, %v1969_v44 }
 0x5fd   :  { %7105 = vmatpush3.bf16.msra.mxu0 %v7889_v51  ;;  %6630 = vmatprep.mubr.msk.f32.mxu0 %vm7405_vm0, %v7406_v6  ;;  %v5975_v51 = vld [vmem:[%s8685_s11 + $0x60] sm:$0xff] }
 0x5fe   :  { %7106 = vmatprep.subr.bf16.mxu0 %v7404_v0  ;;  %v7135_v54 = vpack.c.bf16 %v5976_v52, %v5975_v51 }
 0x601   :  { %7108 = vmatpush3.bf16.msra.mxu0 %v7905_v60  ;;  %v5995_v60 = vld [vmem:[%s8688_s12] ss:$0 sm:$0xff] }
 0x602   :  { %7109 = vmatprep.subr.bf16.mxu0 %v7404_v0  ;;  %v2335_v62 = vadd.f32 %v5995_v60, %v2334_v61 }
 0x604   :  { %2662 = vrot.lane.b32.xlu0 %v2335_v62, %s7408_s30  ;;  %v8048_v1 = vrot.slane %v2335_v62, 4 }
 0x605   :  { %7111 = vmatpush3.bf16.msra.mxu0 %v7921_v3 }
 0x606   :  { %7112 = vmatprep.subr.bf16.mxu0 %v7404_v0 }
 0x608   :  { %2830 = vrot.lane.b32.xlu0 %v2335_v62, %s7407_s9 }
 0x609   :  { %7114 = vmatpush3.bf16.msra.mxu0 %v7938_v11 }
 0x60a   :  { %7128 = vmatprep.subr.bf16.mxu0 %v7127_v46 }
 0x60c   :  { %6631 = vmatmul.mubr.msk.f32.vlgmr.msra.gmra.mrb[24].mxu0 %vm90_vm2, %v69_v49  ;;  %2997 = vrot.lane.b32.xlu0 %v2335_v62, %s8715_s21 }
 0x60d   :  { %7130 = vmatpush3.bf16.msra.mxu0 %v7127_v46  ;;  %6668 = vmatprep.mubr.msk.f32.mxu0 %vm90_vm2, %v7589_v27  ;;  %v8036_v27 = vld [vmem:[%s8712_s25 + $0x8] sm:$0xff] }
 0x60e   :  { %7132 = vmatprep.subr.bf16.mxu0 %v7131_v50  ;;  %6688 = vmatmul.mubr.msk.f32.vlgmr.msra.gmra.mrb[26].mxu1 %vm90_vm2, %v8036_v27 }
 0x60f   :  { %6697 = vmatprep.mubr.msk.f32.mxu1 %vm7405_vm0, %v7406_v6 }
 0x610   :  { %3345 = vrot.lane.b32.xlu0 %v8048_v1, %s7408_s30 }
 0x611   :  { %7134 = vmatpush3.bf16.msra.mxu0 %v7131_v50 }
 0x612   :  { %7136 = vmatprep.subr.bf16.mxu0 %v7135_v54 }
 0x614   :  { %3513 = vrot.lane.b32.xlu0 %v8048_v1, %s7407_s9 }
 0x615   :  { %7138 = vmatpush3.bf16.msra.mxu0 %v7135_v54 }
 0x616   :  { %7140 = vmatprep.subr.bf16.mxu0 %v7139_v57 }
 0x618   :  { %3680 = vrot.lane.b32.xlu0 %v8048_v1, %s8715_s21 }
 0x619   :  { %7142 = vmatpush3.bf16.msra.mxu0 %v7139_v57 }
 0x61a   :  { %6690 = vmatprep.subr.mxu0 %v7406_v6 }
 0x61c   :  { %6669 = vmatmul.mubr.msk.f32.vlgmr.msra.gmra.mrb[26].mxu0 %vm90_vm2, %v8036_v27 }
 0x61d   :  { %6692 = vmatprep.mubr.msk.f32.mxu0 %vm7405_vm0, %v7406_v6 }
 0x676   :  { %v2663_v32 = vpop.permute.xlu0 %2662 }
 0x67a   :  { %v2831_v34 = vpop.permute.xlu0 %2830 }
 0x67e   :  { %v2998_v9 = vpop.permute.xlu0 %2997 }
 0x682   :  { %v3346_v39 = vpop.permute.xlu0 %3345 }
 0x686   :  { %v3514_v41 = vpop.permute.xlu0 %3513 }
 0x68a   :  { %v3681_v21 = vpop.permute.xlu0 %3680 }
 0x6cf   :  { %v2043_v3 = vpop.f32.mrb[22].mxu0 }
 0x6d0   :  { %v2044_v4 = vadd.f32 %v5959_v2, %v2043_v3  ;;  %v6594_v5 = vpop.f32.mrb[23].mxu0 }
 0x6d2   :  { %v8059_v7 = vmul.f32 %v2125_v58, %v2044_v4 }
 0x6df   :  { %v2203_v8 = vpop.f32.mrb[24].mxu0 }
 0x6e0   :  { %v8061_v10 = vmul.f32 %v2203_v8, %v2044_v4  ;;  %v6632_v11 = vpop.f32.mrb[25].mxu0 }
 0x6e1   :  { %v6689_v49 = vpop.f32.mrb[26].mxu1 }
 0x6e2   :  { %v8153_v50 = vadd.f32 %v6689_v49, %v6000_v48  ;;  %v2487_v51 = vpop.f32.mrb[27].mxu1 }
 0x6e3   :  { %v8155_v52 = vadd.f32 %v6000_v48, %v2487_v51 }
 0x6e5   :  { %6696 = vmatpush3.msra.mxu1 %v8155_v52 }
 0x6e6   :  { %6705 = vmatprep.subr.mxu1 %v7406_v6 }
 0x6ef   :  { %v6670_v13 = vpop.f32.mrb[26].mxu0 }
 0x6f0   :  { %v2408_v14 = vpop.f32.mrb[27].mxu0  ;;  %v2414_v17 = vadd.f32 %v6670_v13, %v5997_v12 }
 0x6f1   :  { %v2409_v15 = vadd.f32 %v5997_v12, %v2408_v14 }
 0x6f3   :  { %2664 = vrot.lane.b32.xlu1 %v2409_v15, %s7408_s30  ;;  %6691 = vmatpush3.xpose.msk.msra.mxu0 %vm625_vm3, %v2409_v15 }
 0x6f4   :  { %6700 = vmatprep.subr.mxu0 %v7406_v6 }
 0x6f6   :  { %6693 = vmatmul.mubr.msk.f32.vlgmr.msra.gmra.mrb[28].mxu0 %vm625_vm3, %v2335_v62 }
 0x6f7   :  { %2832 = vrot.lane.b32.xlu1 %v2409_v15, %s7407_s9  ;;  %6702 = vmatprep.mubr.msk.f32.mxu0 %vm7405_vm0, %v7406_v6 }
 0x6fb   :  { %2999 = vrot.lane.b32.xlu1 %v2409_v15, %s8715_s21 }
 0x6ff   :  { %3347 = vrot.lane.b32.xlu1 %v2414_v17, %s7408_s30 }
 0x703   :  { %3515 = vrot.lane.b32.xlu1 %v2414_v17, %s7407_s9 }
 0x707   :  { %3682 = vrot.lane.b32.xlu1 %v2414_v17, %s8715_s21 }
 0x72b   :  { %250 = vadd.xlane.f32.xlu1 %v249_v31 }
 0x765   :  { %v2665_v33 = vpop.permute.xlu1 %2664 }
 0x766   :  { %6701 = vmatpush3.xpose.msk.msra.mxu0 %vm625_vm3, %v2665_v33 }
 0x767   :  { %6710 = vmatprep.subr.mxu0 %v7406_v6 }
 0x769   :  { %v2833_v35 = vpop.permute.xlu1 %2832  ;;  %6703 = vmatmul.mubr.msk.f32.vlgmr.msra.gmra.mrb[30].mxu0 %vm625_vm3, %v2663_v32 }
 0x76a   :  { %6711 = vmatpush3.xpose.msk.msra.mxu0 %vm625_vm3, %v2833_v35  ;;  %6712 = vmatprep.mubr.msk.f32.mxu0 %vm7405_vm0, %v7406_v6 }
 0x76b   :  { %6720 = vmatprep.subr.mxu0 %v7406_v6 }
 0x76d   :  { %v3000_v36 = vpop.permute.xlu1 %2999  ;;  %6713 = vmatmul.mubr.msk.f32.vlgmr.msra.gmra.mrb[32].mxu0 %vm625_vm3, %v2831_v34 }
 0x76e   :  { %6721 = vmatpush3.xpose.msk.msra.mxu0 %vm625_vm3, %v3000_v36  ;;  %6722 = vmatprep.mubr.msk.f32.mxu0 %vm7405_vm0, %v7406_v6 }
 0x76f   :  { %6730 = vmatprep.subr.mxu0 %v7406_v6 }
 0x771   :  { %v3348_v38 = vpop.permute.xlu1 %3347  ;;  %6723 = vmatmul.mubr.msk.f32.vlgmr.msra.gmra.mrb[34].mxu0 %vm625_vm3, %v2998_v9 }
 0x772   :  { %6731 = vmatpush3.xpose.msk.msra.mxu0 %vm625_vm3, %v2414_v17  ;;  %6732 = vmatprep.mubr.msk.f32.mxu0 %vm7405_vm0, %v7406_v6 }
 0x773   :  { %6740 = vmatprep.subr.mxu0 %v7406_v6 }
 0x775   :  { %6733 = vmatmul.mubr.msk.f32.vlgmr.msra.gmra.mrb[36].mxu0 %vm625_vm3, %v8048_v1  ;;  %v3516_v40 = vpop.permute.xlu1 %3515 }
 0x776   :  { %6741 = vmatpush3.xpose.msk.msra.mxu0 %vm625_vm3, %v3348_v38  ;;  %6742 = vmatprep.mubr.msk.f32.mxu0 %vm7405_vm0, %v7406_v6 }
 0x777   :  { %6750 = vmatprep.subr.mxu0 %v7406_v6 }
 0x779   :  { %6743 = vmatmul.mubr.msk.f32.vlgmr.msra.gmra.mrb[38].mxu0 %vm625_vm3, %v3346_v39  ;;  %v3683_v42 = vpop.permute.xlu1 %3682 }
 0x77a   :  { %6751 = vmatpush3.xpose.msk.msra.mxu0 %vm625_vm3, %v3516_v40  ;;  %6752 = vmatprep.mubr.msk.f32.mxu0 %vm7405_vm0, %v7406_v6 }
 0x77b   :  { %6760 = vmatprep.subr.mxu0 %v7406_v6 }
 0x77d   :  { %6753 = vmatmul.mubr.msk.f32.vlgmr.msra.gmra.mrb[40].mxu0 %vm625_vm3, %v3514_v41 }
 0x77e   :  { %6761 = vmatpush3.xpose.msk.msra.mxu0 %vm625_vm3, %v3683_v42  ;;  %6762 = vmatprep.mubr.msk.f32.mxu0 %vm7405_vm0, %v7406_v6 }
 0x77f   :  { %7159 = vmatprep.subr.bf16.mxu0 %v7404_v0 }
 0x781   :  { %6763 = vmatmul.mubr.msk.f32.vlgmr.msra.gmra.mrb[42].mxu0 %vm625_vm3, %v3681_v21 }
 0x782   :  { %6786 = vmatprep.mubr.msk.f32.mxu0 %vm7405_vm0, %v7406_v6 }
 0x7b8   :  { %v251_v44 = vpop.xlane.xlu1 %250 }
 0x7b9   :  { %v258_v37 = vadd.f32 %v8147_v43, %v251_v44 }
 0x7bb   :  { %7275 = vpush %v258_v37  ;;  %v3256_v45 = vrot.slane %v258_v37, 1 }
 0x7bd   :  { %7277 = vpush %v3256_v45 }
 0x7c9   :  { %v2568_v46 = vpop.f32.mrb[28].mxu0 }
 0x7ca   :  { %v6694_v47 = vpop.f32.mrb[29].mxu0  ;;  %v2572_v54 = vmul.f32 0.25, %v2568_v46 }
 0x7ec   :  { %s7276_s24 = spop %7275 }
 0x7ed   :  { %v2575_v55 = vstv %s7276_s24 }
 0x7ee   :  { %v2577_v56 = vadd.f32 %v2575_v55, %v2572_v54  ;;  %s7278_s4 = spop %7277 }
 0x7ef   :  { %v3258_v18 = vstv %s7278_s4 }
 0x7f0   :  { %v2578_v57 = vsel %vm703_vm4, %v2577_v56, -inf }
 0x7f1   :  { %2579 = vmax.xlane.f32.xlu0 %v2578_v57 }
 0x83c   :  { %v2736_v58 = vpop.f32.mrb[30].mxu0 }
 0x83d   :  { %v2740_v59 = vmul.f32 0.25, %v2736_v58  ;;  %v6704_v60 = vpop.f32.mrb[31].mxu0 }
 0x83f   :  { %v2741_v61 = vadd.f32 %v2740_v59, %v2575_v55 }
 0x840   :  { %v2904_v62 = vpop.f32.mrb[32].mxu0 }
 0x841   :  { %v2908_v63 = vmul.f32 0.25, %v2904_v62  ;;  %v6714_v1 = vpop.f32.mrb[33].mxu0  ;;  %v2742_v2 = vsel %vm703_vm4, %v2741_v61, -inf }
 0x842   :  { %2743 = vmax.xlane.f32.xlu0 %v2742_v2 }
 0x843   :  { %v2909_v3 = vadd.f32 %v2908_v63, %v2575_v55 }
 0x844   :  { %v3071_v4 = vpop.f32.mrb[34].mxu0 }
 0x845   :  { %v3075_v5 = vmul.f32 0.25, %v3071_v4  ;;  %v6724_v8 = vpop.f32.mrb[35].mxu0  ;;  %v2910_v11 = vsel %vm703_vm4, %v2909_v3, -inf }
 0x846   :  { %2911 = vmax.xlane.f32.xlu1 %v2910_v11 }
 0x847   :  { %v3076_v12 = vadd.f32 %v3075_v5, %v2575_v55 }
 0x848   :  { %v3251_v13 = vpop.f32.mrb[36].mxu0 }
 0x849   :  { %v3255_v14 = vmul.f32 0.25, %v3251_v13  ;;  %v6734_v15 = vpop.f32.mrb[37].mxu0  ;;  %v3077_v17 = vsel %vm703_vm4, %v3076_v12, -inf }
 0x84a   :  { %3078 = vmax.xlane.f32.xlu0 %v3077_v17 }
 0x84b   :  { %v3260_v19 = vadd.f32 %v3258_v18, %v3255_v14 }
 0x84c   :  { %v3419_v20 = vpop.f32.mrb[38].mxu0 }
 0x84d   :  { %v3423_v22 = vmul.f32 0.25, %v3419_v20  ;;  %v6744_v23 = vpop.f32.mrb[39].mxu0  ;;  %v3261_v24 = vsel %vm703_vm4, %v3260_v19, -inf }
 0x84e   :  { %3262 = vmax.xlane.f32.xlu1 %v3261_v24 }
 0x84f   :  { %v3424_v25 = vadd.f32 %v3423_v22, %v3258_v18 }
 0x850   :  { %v3587_v26 = vpop.f32.mrb[40].mxu0 }
 0x851   :  { %v3591_v28 = vmul.f32 0.25, %v3587_v26  ;;  %v6754_v29 = vpop.f32.mrb[41].mxu0  ;;  %v3425_v30 = vsel %vm703_vm4, %v3424_v25, -inf }
 0x852   :  { %3426 = vmax.xlane.f32.xlu0 %v3425_v30 }
 0x853   :  { %v3592_v53 = vadd.f32 %v3591_v28, %v3258_v18 }
 0x854   :  { %v3754_v31 = vpop.f32.mrb[42].mxu0 }
 0x855   :  { %v3758_v32 = vmul.f32 0.25, %v3754_v31  ;;  %v6764_v33 = vpop.f32.mrb[43].mxu0  ;;  %v3593_v34 = vsel %vm703_vm4, %v3592_v53, -inf }
 0x856   :  { %3594 = vmax.xlane.f32.xlu1 %v3593_v34 }
 0x857   :  { %v3759_v35 = vadd.f32 %v3758_v32, %v3258_v18 }
 0x859   :  { %v3760_v36 = vsel %vm703_vm4, %v3759_v35, -inf }
 0x85a   :  { %3761 = vmax.xlane.f32.xlu0 %v3760_v36 }
 0x867   :  { %2754 = vrot.lane.b32.xlu1 %v8155_v52, %s7408_s30 }
 0x87e   :  { %v2580_v9 = vpop.xlane.xlu0 %2579 }
 0x87f   :  { %v2581_v38 = vsub.f32 %v2577_v56, %v2580_v9 }
 0x881   :  { %v2582_v39 = vmul.f32 1.442695, %v2581_v38 }
 0x883   :  { %7334 = vpow2.f32 %v2582_v39 }
 0x88d   :  { %v7335_v40 = vpop.eup %7334 }
 0x88e   :  { %v2584_v41 = vsel %vm703_vm4, %v7335_v40, 0.0 }
 0x88f   :  { %2585 = vadd.xlane.f32.xlu1 %v2584_v41 }
 0x8a0   :  { %3088 = vrot.lane.b32.xlu1 %v8155_v52, %s8715_s21 }
 0x8cf   :  { %v2744_v42 = vpop.xlane.xlu0 %2743 }
 0x8d0   :  { %v2745_v21 = vsub.f32 %v2741_v61, %v2744_v42 }
 0x8d2   :  { %v2746_v44 = vmul.f32 1.442695, %v2745_v21 }
 0x8d3   :  { %v2912_v37 = vpop.xlane.xlu1 %2911 }
 0x8d4   :  { %7336 = vpow2.f32 %v2746_v44  ;;  %v2913_v45 = vsub.f32 %v2909_v3, %v2912_v37 }
 0x8d6   :  { %v2914_v46 = vmul.f32 1.442695, %v2913_v45 }
 0x8d7   :  { %v3079_v54 = vpop.xlane.xlu0 %3078 }
 0x8d8   :  { %7338 = vpow2.f32 %v2914_v46  ;;  %v3080_v55 = vsub.f32 %v3076_v12, %v3079_v54 }
 0x8da   :  { %v3081_v59 = vmul.f32 1.442695, %v3080_v55  ;;  %v5987_v55 = vld [vmem:[%s8685_s11 + $0xc0] sm:$0xff] }
 0x8db   :  { %v3263_v56 = vpop.xlane.xlu1 %3262 }
 0x8dc   :  { %v3264_v58 = vsub.f32 %v3260_v19, %v3263_v56  ;;  %7340 = vpow2.f32 %v3081_v59  ;;  %v5988_v56 = vld [vmem:[%s8685_s11 + $0xc8] sm:$0xff] }
 0x8de   :  { %v7337_v47 = vpop.eup %7336  ;;  %v3265_v63 = vmul.f32 1.442695, %v3264_v58 }
 0x8df   :  { %v2748_v48 = vsel %vm703_vm4, %v7337_v47, 0.0  ;;  %v3427_v57 = vpop.xlane.xlu0 %3426 }
 0x8e0   :  { %2749 = vadd.xlane.f32.xlu0 %v2748_v48  ;;  %v3428_v60 = vsub.f32 %v3424_v25, %v3427_v57  ;;  %7342 = vpow2.f32 %v3265_v63  ;;  %v7160_v57 = vpack.c.bf16 %v5988_v56, %v5987_v55  ;;  %v5990_v63 = vld [vmem:[%s8685_s11 + $0xd8] sm:$0xff]  ;;  %v6034_v55 = vld [vmem:[%s8690_s13 + $0x68] sm:$0xff] }
 0x8e2   :  { %v8173_v49 = vpop.eup %7338  ;;  %v3429_v2 = vmul.f32 1.442695, %v3428_v60  ;;  %7161 = vmatpush3.bf16.msra.mxu0 %v7160_v57  ;;  %v6035_v57 = vld [vmem:[%s8690_s13 + $0x70] sm:$0xff] }
 0x8e3   :  { %v2916_v51 = vsel %vm703_vm4, %v8173_v49, 0.0  ;;  %v3595_v61 = vpop.xlane.xlu1 %3594  ;;  %7162 = vmatprep.subr.bf16.mxu0 %v7404_v0 }
 0x8e4   :  { %2917 = vadd.xlane.f32.xlu1 %v2916_v51  ;;  %v3596_v1 = vsub.f32 %v3592_v53, %v3595_v61  ;;  %7344 = vpow2.f32 %v3429_v2 }
 0x8e6   :  { %v3597_v4 = vmul.f32 1.442695, %v3596_v1 }
 0x8e7   :  { %v3762_v62 = vpop.xlane.xlu0 %3761  ;;  %v2755_v14 = vpop.permute.xlu1 %2754 }
 0x8e8   :  { %v3763_v3 = vsub.f32 %v3759_v35, %v3762_v62  ;;  %7346 = vpow2.f32 %v3597_v4  ;;  %v5989_v62 = vld [vmem:[%s8685_s11 + $0xd0] sm:$0xff]  ;;  %v5992_v4 = vld [vmem:[%s8685_s11 + $0xe8] sm:$0xff] }
 0x8e9   :  { %v7163_v1 = vpack.c.bf16 %v5990_v63, %v5989_v62  ;;  %v6027_v63 = vld [vmem:[%s8688_s12 + $0x3] ss:$0 sm:$0xff] }
 0x8ea   :  { %v3764_v5 = vmul.f32 1.442695, %v3763_v3  ;;  %v5991_v3 = vld [vmem:[%s8685_s11 + $0xe0] sm:$0xff] }
 0x8eb   :  { %7164 = vmatpush3.bf16.msra.mxu0 %v7163_v1 }
 0x8ec   :  { %7348 = vpow2.f32 %v3764_v5  ;;  %7165 = vmatprep.subr.bf16.mxu0 %v7404_v0 }
 0x8f5   :  { %3437 = vrot.lane.b32.xlu1 %v8153_v50, %s7408_s30 }
 0x8f6   :  { %2921 = vrot.lane.b32.xlu0 %v8155_v52, %s7407_s9  ;;  %v7341_v52 = vpop.eup %7340 }
 0x8f7   :  { %v7343_v8 = vpop.eup %7342  ;;  %v3083_v11 = vsel %vm703_vm4, %v7341_v52, 0.0 }
 0x8f8   :  { %v8182_v12 = vpop.eup %7344  ;;  %v3267_v15 = vsel %vm703_vm4, %v7343_v8, 0.0 }
 0x8f9   :  { %v8184_v13 = vpop.eup %7346  ;;  %v3431_v17 = vsel %vm703_vm4, %v8182_v12, 0.0 }
 0x8fa   :  { %v8189_v18 = vpop.eup %7348  ;;  %v3599_v20 = vsel %vm703_vm4, %v8184_v13, 0.0 }
 0x8fb   :  { %v3766_v22 = vsel %vm703_vm4, %v8189_v18, 0.0 }
 0x915   :  { %3084 = vadd.xlane.f32.xlu0 %v3083_v11 }
 0x919   :  { %3268 = vadd.xlane.f32.xlu1 %v3267_v15  ;;  %3432 = vadd.xlane.f32.xlu0 %v3431_v17 }
 0x91c   :  { %v2586_v19 = vpop.xlane.xlu1 %2585 }
 0x91d   :  { %7350 = vrcp.f32 %v2586_v19  ;;  %3600 = vadd.xlane.f32.xlu1 %v3599_v20  ;;  %3767 = vadd.xlane.f32.xlu0 %v3766_v22  ;;  %v3944_v20 = vld [vmem:[%s8690_s13 + $0x8] sm:$0xff] }
 0x920   :  { %v3089_v25 = vpop.permute.xlu1 %3088 }
 0x927   :  { %v7351_v23 = vpop.eup %7350 }
 0x928   :  { %v2588_v24 = vmul.f32 %v7351_v23, %v7335_v40 }
 0x92a   :  { %6698 = vmatmul.mubr.msk.f32.vlgmr.msra.gmra.mrb[28].mxu1 %vm715_vm5, %v2588_v24  ;;  %v3945_v24 = vld [vmem:[%s8690_s13 + $0x10] sm:$0xff] }
 0x92b   :  { %6706 = vmatpush3.msra.mxu1 %v2755_v14  ;;  %6707 = vmatprep.mubr.msk.f32.mxu1 %vm7405_vm0, %v7406_v6 }
 0x92c   :  { %6715 = vmatprep.subr.mxu1 %v7406_v6 }
 0x92e   :  { %3771 = vrot.lane.b32.xlu1 %v8153_v50, %s8715_s21 }
 0x933   :  { %3604 = vrot.lane.b32.xlu0 %v8153_v50, %s7407_s9 }
 0x96d   :  { %v2750_v26 = vpop.xlane.xlu0 %2749 }
 0x96e   :  { %7352 = vrcp.f32 %v2750_v26 }
 0x971   :  { %v2918_v28 = vpop.xlane.xlu1 %2917  ;;  %v2922_v53 = vpop.permute.xlu0 %2921 }
 0x972   :  { %7354 = vrcp.f32 %v2918_v28 }
 0x975   :  { %v3438_v33 = vpop.permute.xlu1 %3437 }
 0x978   :  { %v7353_v29 = vpop.eup %7352 }
 0x979   :  { %v2752_v30 = vmul.f32 %v7353_v29, %v7337_v47 }
 0x97b   :  { %6708 = vmatmul.mubr.msk.f32.vlgmr.msra.gmra.mrb[30].mxu1 %vm715_vm5, %v2752_v30  ;;  %v3947_v30 = vld [vmem:[%s8690_s13 + $0x20] sm:$0xff] }
 0x97c   :  { %v7355_v31 = vpop.eup %7354  ;;  %6716 = vmatpush3.msra.mxu1 %v2922_v53  ;;  %6717 = vmatprep.mubr.msk.f32.mxu1 %vm7405_vm0, %v7406_v6  ;;  %v3948_v53 = vld [vmem:[%s8690_s13 + $0x28] sm:$0xff] }
 0x97d   :  { %v2920_v32 = vmul.f32 %v7355_v31, %v8173_v49  ;;  %6725 = vmatprep.subr.mxu1 %v7406_v6  ;;  %v8235_v49 = vld [vmem:[%s8712_s25] sm:$0xff]  ;;  %v7179_v31 = vpack.c.bf16 %v3948_v53, %v3947_v30  ;;  %v6043_v30 = vld [vmem:[%s8690_s13 + $0xb0] sm:$0xff]  ;;  %v6044_v53 = vld [vmem:[%s8690_s13 + $0xb8] sm:$0xff] }
 0x97f   :  { %6718 = vmatmul.mubr.msk.f32.vlgmr.msra.gmra.mrb[32].mxu1 %vm715_vm5, %v2920_v32 }
 0x980   :  { %6726 = vmatpush3.msra.mxu1 %v3089_v25  ;;  %6727 = vmatprep.mubr.msk.f32.mxu1 %vm7405_vm0, %v7406_v6  ;;  %v3946_v25 = vld [vmem:[%s8690_s13 + $0x18] sm:$0xff] }
 0x981   :  { %6735 = vmatprep.subr.mxu1 %v7406_v6  ;;  %v7175_v28 = vpack.c.bf16 %v3946_v25, %v3945_v24 }
 0x9a2   :  { %v3085_v34 = vpop.xlane.xlu0 %3084 }
 0x9a3   :  { %7356 = vrcp.f32 %v3085_v34 }
 0x9a6   :  { %v3269_v35 = vpop.xlane.xlu1 %3268  ;;  %v3433_v36 = vpop.xlane.xlu0 %3432 }
 0x9a7   :  { %7358 = vrcp.f32 %v3269_v35 }
 0x9a8   :  { %7360 = vrcp.f32 %v3433_v36 }
 0x9aa   :  { %v3601_v9 = vpop.xlane.xlu1 %3600  ;;  %v3768_v40 = vpop.xlane.xlu0 %3767 }
 0x9ab   :  { %7362 = vrcp.f32 %v3601_v9 }
 0x9ac   :  { %7364 = vrcp.f32 %v3768_v40  ;;  %v6029_v40 = vld [vmem:[%s8690_s13 + $0x40] sm:$0xff] }
 0x9ad   :  { %v7357_v38 = vpop.eup %7356 }
 0x9ae   :  { %v3087_v39 = vmul.f32 %v7357_v38, %v7341_v52  ;;  %v3605_v45 = vpop.permute.xlu0 %3604  ;;  %v3772_v47 = vpop.permute.xlu1 %3771  ;;  %v7166_v52 = vpack.c.bf16 %v5992_v4, %v5991_v3  ;;  %v6053_v4 = vld [vmem:[%s8691_s14] ss:$0 sm:$0xff] }
 0x9b0   :  { %6728 = vmatmul.mubr.msk.f32.vlgmr.msra.gmra.mrb[34].mxu1 %vm715_vm5, %v3087_v39  ;;  %7167 = vmatpush3.bf16.msra.mxu0 %v7166_v52 }
 0x9b1   :  { %v7359_v41 = vpop.eup %7358  ;;  %6736 = vmatpush3.msra.mxu1 %v8153_v50  ;;  %6737 = vmatprep.mubr.msk.f32.mxu1 %vm7405_vm0, %v7406_v6 }
 0x9b2   :  { %v3271_v42 = vmul.f32 %v7359_v41, %v7343_v8  ;;  %6745 = vmatprep.subr.mxu1 %v7406_v6  ;;  %v7361_v21 = vpop.eup %7360  ;;  %7168 = vmatprep.subr.bf16.mxu0 %v7404_v0  ;;  %v6030_v41 = vld [vmem:[%s8690_s13 + $0x48] sm:$0xff] }
 0x9b3   :  { %v3435_v44 = vmul.f32 %v7361_v21, %v8182_v12  ;;  %v5993_v12 = vld [vmem:[%s8685_s11 + $0xf0] sm:$0xff] }
 0x9b4   :  { %6738 = vmatmul.mubr.msk.f32.vlgmr.msra.gmra.mrb[36].mxu1 %vm715_vm5, %v3271_v42 }
 0x9b5   :  { %6746 = vmatpush3.msra.mxu1 %v3438_v33  ;;  %6747 = vmatprep.mubr.msk.f32.mxu1 %vm7405_vm0, %v7406_v6  ;;  %v7363_v37 = vpop.eup %7362 }
 0x9b6   :  { %6755 = vmatprep.subr.mxu1 %v7406_v6  ;;  %v3603_v50 = vmul.f32 %v7363_v37, %v8184_v13  ;;  %v7365_v46 = vpop.eup %7364  ;;  %v5994_v13 = vld [vmem:[%s8685_s11 + $0xf8] sm:$0xff] }
 0x9b7   :  { %v3770_v48 = vmul.f32 %v7365_v46, %v8189_v18  ;;  %v7169_v14 = vpack.c.bf16 %v5994_v13, %v5993_v12  ;;  %v3943_v18 = vld [vmem:[%s8690_s13] sm:$0xff]  ;;  %v6031_v46 = vld [vmem:[%s8690_s13 + $0x50] sm:$0xff] }
 0x9b8   :  { %6748 = vmatmul.mubr.msk.f32.vlgmr.msra.gmra.mrb[38].mxu1 %vm715_vm5, %v3435_v44  ;;  %v7171_v23 = vpack.c.bf16 %v3944_v20, %v3943_v18  ;;  %v6037_v20 = vld [vmem:[%s8690_s13 + $0x80] sm:$0xff] }
 0x9b9   :  { %6756 = vmatpush3.msra.mxu1 %v3605_v45  ;;  %6757 = vmatprep.mubr.msk.f32.mxu1 %vm7405_vm0, %v7406_v6  ;;  %v7188_v45 = vpack.c.bf16 %v6030_v41, %v6029_v40 }
 0x9ba   :  { %6765 = vmatprep.subr.mxu1 %v7406_v6  ;;  %7170 = vmatpush3.bf16.msra.mxu0 %v7169_v14 }
 0x9bb   :  { %7187 = vmatprep.subr.bf16.mxu0 %v7404_v0 }
 0x9bc   :  { %6758 = vmatmul.mubr.msk.f32.vlgmr.msra.gmra.mrb[40].mxu1 %vm715_vm5, %v3603_v50 }
 0x9bd   :  { %6766 = vmatpush3.msra.mxu1 %v3772_v47  ;;  %6767 = vmatprep.mubr.msk.f32.mxu1 %vm7405_vm0, %v7406_v6  ;;  %v6032_v47 = vld [vmem:[%s8690_s13 + $0x58] sm:$0xff] }
 0x9be   :  { %7172 = vmatprep.subr.bf16.mxu1 %v7171_v23 }
 0x9c0   :  { %6768 = vmatmul.mubr.msk.f32.vlgmr.msra.gmra.mrb[42].mxu1 %vm715_vm5, %v3770_v48 }
 0x9c1   :  { %6805 = vmatprep.mubr.msk.f32.mxu1 %vm90_vm2, %v8235_v49  ;;  %7174 = vmatpush3.bf16.msra.mxu1 %v7171_v23  ;;  %v6039_v23 = vld [vmem:[%s8690_s13 + $0x90] sm:$0xff] }
 0x9c2   :  { %7176 = vmatprep.subr.bf16.mxu1 %v7175_v28 }
 0x9c5   :  { %7178 = vmatpush3.bf16.msra.mxu1 %v7175_v28  ;;  %v6042_v28 = vld [vmem:[%s8690_s13 + $0xa8] sm:$0xff] }
 0x9c6   :  { %7180 = vmatprep.subr.bf16.mxu1 %v7179_v31 }
 0x9c9   :  { %7182 = vmatpush3.bf16.msra.mxu1 %v7179_v31  ;;  %v7209_v31 = vpack.c.bf16 %v6044_v53, %v6043_v30 }
 0x9fd   :  { %v8239_v51 = vpop.f32.mrb[28].mxu1 }
 0x9fe   :  { %v6699_v54 = vpop.f32.mrb[29].mxu1 }
 0x9ff   :  { %v6033_v54 = vld [vmem:[%s8690_s13 + $0x60] sm:$0xff] }
 0xa00   :  { %v7194_v56 = vpack.c.bf16 %v6034_v55, %v6033_v54 }
 0xa4e   :  { %v2826_v58 = vpop.f32.mrb[30].mxu1 }
 0xa4f   :  { %3165 = vrot.lane.b32.xlu0 %v2826_v58, %s7410_s23  ;;  %v6709_v59 = vpop.f32.mrb[31].mxu1  ;;  %v6036_v58 = vld [vmem:[%s8690_s13 + $0x78] sm:$0xff] }
 0xa50   :  { %v7197_v59 = vpack.c.bf16 %v6036_v58, %v6035_v57 }
 0xa52   :  { %v2993_v60 = vpop.f32.mrb[32].mxu1 }
 0xa53   :  { %v6719_v61 = vpop.f32.mrb[33].mxu1 }
 0xa54   :  { %v3950_v61 = vld [vmem:[%s8690_s13 + $0x38] sm:$0xff] }
 0xa83   :  { %v3160_v2 = vpop.f32.mrb[34].mxu1 }
 0xa84   :  { %v6729_v5 = vpop.f32.mrb[35].mxu1 }
 0xa87   :  { %v3341_v8 = vpop.f32.mrb[36].mxu1 }
 0xa88   :  { %v6739_v11 = vpop.f32.mrb[37].mxu1 }
 0xa89   :  { %v6056_v11 = vld [vmem:[%s8691_s14 + $0x1] ss:$0 sm:$0xff] }
 0xa8b   :  { %v3509_v15 = vpop.f32.mrb[38].mxu1 }
 0xa8c   :  { %3848 = vrot.lane.b32.xlu0 %v3509_v15, %s7410_s23  ;;  %v6749_v17 = vpop.f32.mrb[39].mxu1 }
 0xa8d   :  { %v7400_v17 = vld [vmem:[%s8713_s0] sm:$0x3] }
 0xa8e   :  { %v341_v18 = vmul.f32 %v7400_v17, %v7701_v16  ;;  %v6040_v16 = vld [vmem:[%s8690_s13 + $0x98] sm:$0xff] }
 0xa8f   :  { %v3676_v19 = vpop.f32.mrb[40].mxu1  ;;  %v7203_v25 = vpack.c.bf16 %v6040_v16, %v6039_v23 }
 0xa90   :  { %3169 = vrot.lane.b32.xlu0 %v2993_v60, %s7411_s5  ;;  %3852 = vrot.lane.b32.xlu1 %v3676_v19, %s7411_s5  ;;  %v6759_v22 = vpop.f32.mrb[41].mxu1  ;;  %v3949_v60 = vld [vmem:[%s8690_s13 + $0x30] sm:$0xff]  ;;  %v342_v19 = vsel %vm248_vm9, %v341_v18, 0.0 }
 0xa91   :  { %v7183_v62 = vpack.c.bf16 %v3950_v61, %v3949_v60  ;;  %v6038_v22 = vld [vmem:[%s8690_s13 + $0x88] sm:$0xff] }
 0xa92   :  { %v7200_v24 = vpack.c.bf16 %v6038_v22, %v6037_v20 }
 0xa93   :  { %v3843_v26 = vpop.f32.mrb[42].mxu1  ;;  %7184 = vmatprep.subr.bf16.mxu1 %v7183_v62 }
 0xa94   :  { %3856 = vrot.lane.b32.xlu1 %v3843_v26, %s7412_s7  ;;  %v6769_v29 = vpop.f32.mrb[43].mxu1  ;;  %7186 = vmatpush3.bf16.msra.mxu1 %v7183_v62  ;;  %v6041_v26 = vld [vmem:[%s8690_s13 + $0xa0] sm:$0xff] }
 0xa95   :  { %7199 = vmatprep.subr.bf16.mxu1 %v7404_v0  ;;  %v7206_v29 = vpack.c.bf16 %v6042_v28, %v6041_v26 }
 0xa97   :  { %6806 = vmatmul.mubr.msk.f32.vlgmr.msra.gmra.mrb[44].mxu1 %vm90_vm2, %v8036_v27 }
 0xa98   :  { %3173 = vrot.lane.b32.xlu1 %v3160_v2, %s7412_s7  ;;  %6843 = vmatprep.mubr.msk.f32.mxu1 %vm7405_vm0, %v7406_v6 }
 0xa99   :  { %7201 = vmatpush3.bf16.msra.mxu1 %v7200_v24 }
 0xa9a   :  { %7202 = vmatprep.subr.bf16.mxu1 %v7404_v0 }
 0xa9d   :  { %7204 = vmatpush3.bf16.msra.mxu1 %v7203_v25 }
 0xa9e   :  { %7205 = vmatprep.subr.bf16.mxu1 %v7404_v0 }
 0xaa1   :  { %7207 = vmatpush3.bf16.msra.mxu1 %v7206_v29 }
 0xaa2   :  { %7208 = vmatprep.subr.bf16.mxu1 %v7404_v0 }
 0xaa5   :  { %7210 = vmatpush3.bf16.msra.mxu1 %v7209_v31 }
 0xaa6   :  { %6851 = vmatprep.subr.mxu1 %v7406_v6 }
 0xac1   :  { %v3166_v32 = vpop.permute.xlu0 %3165 }
 0xac2   :  { %v3176_v42 = vsel %vm625_vm3, %v8239_v51, %v3166_v32  ;;  %v7191_v51 = vpack.c.bf16 %v6032_v47, %v6031_v46  ;;  %v7401_v32 = vld [vmem:[%s8686_s3] sm:$0xff]  ;;  %s7413_s3 = smov 127  }
 0xac3   :  { %6844 = vmatmul.mubr.msk.f32.vlgmr.msra.gmra.mrb[46].mxu1 %vm90_vm2, %v7401_v32 }
 0xac4   :  { %6853 = vmatprep.mubr.msk.f32.mxu1 %vm7405_vm0, %v7406_v6 }
 0xafe   :  { %v3849_v33 = vpop.permute.xlu0 %3848 }
 0xaff   :  { %v3859_v35 = vsel %vm625_vm3, %v3341_v8, %v3849_v33 }
 0xb02   :  { %v3853_v34 = vpop.permute.xlu1 %3852  ;;  %v3170_v38 = vpop.permute.xlu0 %3169 }
 0xb03   :  { %v3860_v36 = vsel %vm1301_vm7, %v3859_v35, %v3853_v34  ;;  %v3177_v21 = vsel %vm1301_vm7, %v3176_v42, %v3170_v38 }
 0xb06   :  { %v3857_v9 = vpop.permute.xlu1 %3856 }
 0xb07   :  { %v3861_v39 = vsel %vm1303_vm6, %v3860_v36, %v3857_v9 }
 0xb08   :  { %v3863_v44 = vrot.slane %v3861_v39, 4 }
 0xb0a   :  { %v3174_v37 = vpop.permute.xlu1 %3173 }
 0xb0b   :  { %v3178_v50 = vsel %vm1303_vm6, %v3177_v21, %v3174_v37 }
 0xb0c   :  { %v3865_v48 = vsel %vm1968_vm8, %v3178_v50, %v3863_v44 }
 0xb0d   :  { %6787 = vmatmul.mubr.msk.f32.vlgmr.msra.gmra.mrb[44].mxu0 %vm90_vm2, %v3865_v48 }
 0xb0e   :  { %7189 = vmatpush3.bf16.msra.mxu0 %v7188_v45  ;;  %6824 = vmatprep.mubr.msk.f32.mxu0 %vm7405_vm0, %v7406_v6 }
 0xb0f   :  { %7190 = vmatprep.subr.bf16.mxu0 %v7404_v0 }
 0xb12   :  { %7192 = vmatpush3.bf16.msra.mxu0 %v7191_v51  ;;  %v6058_v51 = vld [vmem:[%s8691_s14 + $0x2] ss:$0 sm:$0xff] }
 0xb13   :  { %7193 = vmatprep.subr.bf16.mxu0 %v7404_v0 }
 0xb16   :  { %7195 = vmatpush3.bf16.msra.mxu0 %v7194_v56 }
 0xb17   :  { %7196 = vmatprep.subr.bf16.mxu0 %v7404_v0 }
 0xb1a   :  { %7198 = vmatpush3.bf16.msra.mxu0 %v7197_v59 }
 0xb1b   :  { %6846 = vmatprep.subr.mxu0 %v7406_v6 }
 0xb6a   :  { %v6807_v27 = vpop.f32.mrb[44].mxu1 }
 0xb6b   :  { %v4052_v5 = vpop.f32.mrb[45].mxu1  ;;  %v8354_v8 = vadd.f32 %v6807_v27, %v6053_v4 }
 0xb6c   :  { %v4053_v52 = vadd.f32 %v6053_v4, %v4052_v5 }
 0xb6e   :  { %4384 = vrot.lane.b32.xlu1 %v4053_v52, %s7408_s30 }
 0xb72   :  { %4552 = vrot.lane.b32.xlu1 %v4053_v52, %s7407_s9 }
 0xb76   :  { %4720 = vrot.lane.b32.xlu1 %v4053_v52, %s8715_s21 }
 0xb7a   :  { %5074 = vrot.lane.b32.xlu1 %v8354_v8, %s7408_s30 }
 0xb7e   :  { %5242 = vrot.lane.b32.xlu1 %v8354_v8, %s7407_s9 }
 0xb82   :  { %5410 = vrot.lane.b32.xlu1 %v8354_v8, %s8715_s21 }
 0xb96   :  { %v4208_v54 = vpop.f32.mrb[46].mxu1 }
 0xb97   :  { %v8455_v55 = vadd.f32 %v6058_v51, %v4208_v54 }
 0xb99   :  { %6852 = vmatpush3.msk.msra.mxu1 %vm1968_vm8, %v8455_v55 }
 0xb9a   :  { %6861 = vmatprep.subr.mxu1 %v7406_v6 }
 0xbe0   :  { %v3939_v1 = vpop.f32.mrb[44].mxu0  ;;  %v4385_v33 = vpop.permute.xlu1 %4384 }
 0xbe1   :  { %v3940_v2 = vadd.f32 %v6027_v63, %v3939_v1  ;;  %v6788_v3 = vpop.f32.mrb[45].mxu0 }
 0xbe3   :  { %6825 = vmatmul.mubr.msk.f32.vlgmr.msra.gmra.mrb[46].mxu0 %vm90_vm2, %v3940_v2 }
 0xbe4   :  { %6848 = vmatprep.mubr.msk.f32.mxu0 %vm7405_vm0, %v7406_v6  ;;  %v4553_v35 = vpop.permute.xlu1 %4552 }
 0xbe8   :  { %v4721_v9 = vpop.permute.xlu1 %4720 }
 0xbec   :  { %v5075_v39 = vpop.permute.xlu1 %5074 }
 0xbf0   :  { %v5243_v41 = vpop.permute.xlu1 %5242 }
 0xbf4   :  { %v5411_v21 = vpop.permute.xlu1 %5410 }
 0xcb6   :  { %v4134_v12 = vpop.f32.mrb[46].mxu0 }
 0xcb7   :  { %v4135_v13 = vadd.f32 %v6056_v11, %v4134_v12  ;;  %v6826_v14 = vpop.f32.mrb[47].mxu0 }
 0xcb9   :  { %4386 = vrot.lane.b32.xlu0 %v4135_v13, %s7408_s30  ;;  %6847 = vmatpush3.xpose.msk.msra.mxu0 %vm625_vm3, %v4135_v13  ;;  %v4903_v15 = vrot.slane %v4135_v13, 4 }
 0xcba   :  { %6856 = vmatprep.subr.mxu0 %v7406_v6 }
 0xcbc   :  { %6849 = vmatmul.mubr.msk.f32.vlgmr.msra.gmra.mrb[48].mxu0 %vm625_vm3, %v4053_v52 }
 0xcbd   :  { %4554 = vrot.lane.b32.xlu0 %v4135_v13, %s7407_s9  ;;  %6858 = vmatprep.mubr.msk.f32.mxu0 %vm7405_vm0, %v7406_v6 }
 0xcc1   :  { %4722 = vrot.lane.b32.xlu0 %v4135_v13, %s8715_s21 }
 0xcc5   :  { %5076 = vrot.lane.b32.xlu0 %v4903_v15, %s7408_s30 }
 0xcc9   :  { %5244 = vrot.lane.b32.xlu0 %v4903_v15, %s7407_s9 }
 0xccd   :  { %5412 = vrot.lane.b32.xlu0 %v4903_v15, %s8715_s21 }
 0xcec   :  { %343 = vadd.xlane.f32.xlu0 %v342_v19 }
 0xd2b   :  { %v4387_v34 = vpop.permute.xlu0 %4386 }
 0xd2c   :  { %6857 = vmatpush3.xpose.msk.msra.mxu0 %vm625_vm3, %v4387_v34 }
 0xd2d   :  { %6866 = vmatprep.subr.mxu0 %v7406_v6 }
 0xd2f   :  { %v4555_v0 = vpop.permute.xlu0 %4554  ;;  %6859 = vmatmul.mubr.msk.f32.vlgmr.msra.gmra.mrb[50].mxu0 %vm625_vm3, %v4385_v33 }
 0xd30   :  { %6867 = vmatpush3.xpose.msk.msra.mxu0 %vm625_vm3, %v4555_v0  ;;  %6868 = vmatprep.mubr.msk.f32.mxu0 %vm7405_vm0, %v7406_v6 }
 0xd31   :  { %6876 = vmatprep.subr.mxu0 %v7406_v6 }
 0xd33   :  { %v4723_v36 = vpop.permute.xlu0 %4722  ;;  %6869 = vmatmul.mubr.msk.f32.vlgmr.msra.gmra.mrb[52].mxu0 %vm625_vm3, %v4553_v35 }
 0xd34   :  { %6877 = vmatpush3.xpose.msk.msra.mxu0 %vm625_vm3, %v4723_v36  ;;  %6878 = vmatprep.mubr.msk.f32.mxu0 %vm7405_vm0, %v7406_v6 }
 0xd35   :  { %6886 = vmatprep.subr.mxu0 %v7406_v6 }
 0xd37   :  { %v5077_v38 = vpop.permute.xlu0 %5076  ;;  %6879 = vmatmul.mubr.msk.f32.vlgmr.msra.gmra.mrb[54].mxu0 %vm625_vm3, %v4721_v9 }
 0xd38   :  { %6887 = vmatpush3.xpose.msk.msra.mxu0 %vm625_vm3, %v4903_v15  ;;  %6888 = vmatprep.mubr.msk.f32.mxu0 %vm7405_vm0, %v7406_v6 }
 0xd39   :  { %6896 = vmatprep.subr.mxu0 %v7406_v6 }
 0xd3b   :  { %6889 = vmatmul.mubr.msk.f32.vlgmr.msra.gmra.mrb[56].mxu0 %vm625_vm3, %v8354_v8  ;;  %v5245_v40 = vpop.permute.xlu0 %5244 }
 0xd3c   :  { %6897 = vmatpush3.xpose.msk.msra.mxu0 %vm625_vm3, %v5077_v38  ;;  %6898 = vmatprep.mubr.msk.f32.mxu0 %vm7405_vm0, %v7406_v6 }
 0xd3d   :  { %6906 = vmatprep.subr.mxu0 %v7406_v6 }
 0xd3f   :  { %6899 = vmatmul.mubr.msk.f32.vlgmr.msra.gmra.mrb[58].mxu0 %vm625_vm3, %v5075_v39  ;;  %v5413_v42 = vpop.permute.xlu0 %5412 }
 0xd40   :  { %6907 = vmatpush3.xpose.msk.msra.mxu0 %vm625_vm3, %v5245_v40  ;;  %6908 = vmatprep.mubr.msk.f32.mxu0 %vm7405_vm0, %v7406_v6 }
 0xd41   :  { %6916 = vmatprep.subr.mxu0 %v7406_v6 }
 0xd43   :  { %6909 = vmatmul.mubr.msk.f32.vlgmr.msra.gmra.mrb[60].mxu0 %vm625_vm3, %v5243_v41 }
 0xd44   :  { %6917 = vmatpush3.xpose.msk.msra.mxu0 %vm625_vm3, %v5413_v42  ;;  %6918 = vmatprep.mubr.msk.f32.mxu0 %vm7405_vm0, %v7406_v6 }
 0xd47   :  { %6919 = vmatmul.mubr.msk.f32.vlgmr.msra.gmra.mrb[62].mxu0 %vm625_vm3, %v5411_v21 }
 0xd79   :  { %v344_v44 = vpop.xlane.xlu0 %343 }
 0xd7a   :  { %v345_v37 = vadd.f32 %v8147_v43, %v344_v44  ;;  %v6845_v43 = vpop.f32.mrb[47].mxu1 }
 0xd7c   :  { %4290 = vrot.lane.b32.xlu1 %v345_v37, %s7413_s3  ;;  %v4980_v45 = vrot.slane %v345_v37, 1 }
 0xd80   :  { %4981 = vrot.lane.b32.xlu1 %v4980_v45, %s7413_s3 }
 0xd8f   :  { %v4284_v50 = vpop.f32.mrb[48].mxu0 }
 0xd90   :  { %v6850_v46 = vpop.f32.mrb[49].mxu0  ;;  %v4288_v8 = vmul.f32 0.25, %v4284_v50 }
 0xdee   :  { %v4291_v47 = vpop.permute.xlu1 %4290 }
 0xdef   :  { %7279 = vpush %v4291_v47 }
 0xdf2   :  { %v4982_v48 = vpop.permute.xlu1 %4981 }
 0xdf3   :  { %7281 = vpush %v4982_v48 }
 0xe02   :  { %v4458_v56 = vpop.f32.mrb[50].mxu0 }
 0xe03   :  { %v6860_v57 = vpop.f32.mrb[51].mxu0  ;;  %v4462_v52 = vmul.f32 0.25, %v4458_v56 }
 0xe06   :  { %v4626_v58 = vpop.f32.mrb[52].mxu0 }
 0xe07   :  { %v6870_v59 = vpop.f32.mrb[53].mxu0  ;;  %v4630_v11 = vmul.f32 0.25, %v4626_v58 }
 0xe0a   :  { %v4794_v60 = vpop.f32.mrb[54].mxu0 }
 0xe0b   :  { %v6880_v61 = vpop.f32.mrb[55].mxu0  ;;  %v4798_v15 = vmul.f32 0.25, %v4794_v60 }
 0xe0e   :  { %v4975_v62 = vpop.f32.mrb[56].mxu0 }
 0xe0f   :  { %v6890_v63 = vpop.f32.mrb[57].mxu0  ;;  %v4979_v29 = vmul.f32 0.25, %v4975_v62 }
 0xe12   :  { %v5148_v1 = vpop.f32.mrb[58].mxu0 }
 0xe13   :  { %v6900_v2 = vpop.f32.mrb[59].mxu0  ;;  %v5152_v17 = vmul.f32 0.25, %v5148_v1 }
 0xe16   :  { %v5316_v3 = vpop.f32.mrb[60].mxu0 }
 0xe17   :  { %v6910_v4 = vpop.f32.mrb[61].mxu0  ;;  %v5320_v32 = vmul.f32 0.25, %v5316_v3 }
 0xe1a   :  { %v5484_v27 = vpop.f32.mrb[62].mxu0 }
 0xe1b   :  { %v6920_v5 = vpop.f32.mrb[63].mxu0  ;;  %v5488_v23 = vmul.f32 0.25, %v5484_v27 }
 0xe20   :  { %s7280_s28 = spop %7279 }
 0xe21   :  { %v4293_v12 = vstv %s7280_s28 }
 0xe22   :  { %v4295_v13 = vadd.f32 %v4293_v12, %v4288_v8  ;;  %v4463_v14 = vadd.f32 %v4462_v52, %v4293_v12  ;;  %v4631_v20 = vadd.f32 %v4630_v11, %v4293_v12  ;;  %v4799_v26 = vadd.f32 %v4798_v15, %v4293_v12 }
 0xe23   :  { %v4998_v11 = vrot.slane %v8455_v55, 4 }
 0xe24   :  { %s7282_s0 = spop %7281  ;;  %v4297_v18 = vsel %vm4296_vm10, %v4295_v13, -inf  ;;  %v4464_v19 = vsel %vm4296_vm10, %v4463_v14, -inf  ;;  %v4632_v16 = vsel %vm4296_vm10, %v4631_v20, -inf  ;;  %v4800_v30 = vsel %vm4296_vm10, %v4799_v26, -inf }
 0xe25   :  { %v4984_v22 = vstv %s7282_s0  ;;  %4298 = vmax.xlane.f32.xlu1 %v4297_v18  ;;  %4465 = vmax.xlane.f32.xlu0 %v4464_v19 }
 0xe26   :  { %v5153_v24 = vadd.f32 %v5152_v17, %v4984_v22  ;;  %v5489_v28 = vadd.f32 %v5488_v23, %v4984_v22  ;;  %v4986_v31 = vadd.f32 %v4984_v22, %v4979_v29  ;;  %v5321_v34 = vadd.f32 %v5320_v32, %v4984_v22 }
 0xe28   :  { %v5154_v25 = vsel %vm4296_vm10, %v5153_v24, -inf  ;;  %v5490_v53 = vsel %vm4296_vm10, %v5489_v28, -inf  ;;  %v4987_v33 = vsel %vm4296_vm10, %v4986_v31, -inf  ;;  %v5322_v35 = vsel %vm4296_vm10, %v5321_v34, -inf }
 0xe29   :  { %4633 = vmax.xlane.f32.xlu0 %v4632_v16  ;;  %5155 = vmax.xlane.f32.xlu1 %v5154_v25 }
 0xe2d   :  { %4801 = vmax.xlane.f32.xlu0 %v4800_v30  ;;  %5491 = vmax.xlane.f32.xlu1 %v5490_v53 }
 0xe31   :  { %4988 = vmax.xlane.f32.xlu0 %v4987_v33 }
 0xe35   :  { %5323 = vmax.xlane.f32.xlu0 %v5322_v35 }
 0xe3e   :  { %4643 = vrot.lane.b32.xlu1 %v8455_v55, %s7407_s9 }
 0xe42   :  { %4811 = vrot.lane.b32.xlu1 %v8455_v55, %s8715_s21 }
 0xe4b   :  { %4475 = vrot.lane.b32.xlu0 %v8455_v55, %s7408_s30 }
 0xeb2   :  { %v4299_v0 = vpop.xlane.xlu1 %4298  ;;  %v4466_v36 = vpop.xlane.xlu0 %4465 }
 0xeb3   :  { %v4300_v9 = vsub.f32 %v4295_v13, %v4299_v0  ;;  %v4467_v38 = vsub.f32 %v4463_v14, %v4466_v36 }
 0xeb5   :  { %v4301_v39 = vmul.f32 1.442695, %v4300_v9  ;;  %v4468_v40 = vmul.f32 1.442695, %v4467_v38 }
 0xeb6   :  { %v4634_v41 = vpop.xlane.xlu0 %4633  ;;  %v5156_v42 = vpop.xlane.xlu1 %5155 }
 0xeb7   :  { %7366 = vpow2.f32 %v4301_v39  ;;  %v4635_v21 = vsub.f32 %v4631_v20, %v4634_v41  ;;  %v5157_v37 = vsub.f32 %v5153_v24, %v5156_v42 }
 0xeb8   :  { %7368 = vpow2.f32 %v4468_v40 }
 0xeb9   :  { %v4636_v44 = vmul.f32 1.442695, %v4635_v21  ;;  %v5158_v47 = vmul.f32 1.442695, %v5157_v37 }
 0xeba   :  { %v4802_v45 = vpop.xlane.xlu0 %4801  ;;  %v5492_v50 = vpop.xlane.xlu1 %5491 }
 0xebb   :  { %7370 = vpow2.f32 %v4636_v44  ;;  %v4803_v46 = vsub.f32 %v4799_v26, %v4802_v45  ;;  %v5493_v51 = vsub.f32 %v5489_v28, %v5492_v50 }
 0xebd   :  { %v4804_v48 = vmul.f32 1.442695, %v4803_v46  ;;  %v5494_v57 = vmul.f32 1.442695, %v5493_v51  ;;  %v6045_v51 = vld [vmem:[%s8690_s13 + $0xc0] sm:$0xff] }
 0xebe   :  { %v4989_v54 = vpop.xlane.xlu0 %4988  ;;  %v4644_v18 = vpop.permute.xlu1 %4643 }
 0xebf   :  { %7372 = vpow2.f32 %v4804_v48  ;;  %v4990_v43 = vsub.f32 %v4986_v31, %v4989_v54  ;;  %v6046_v54 = vld [vmem:[%s8690_s13 + $0xc8] sm:$0xff] }
 0xec0   :  { %7374 = vpow2.f32 %v5158_v47 }
 0xec1   :  { %v7367_v56 = vpop.eup %7366  ;;  %v4991_v58 = vmul.f32 1.442695, %v4990_v43 }
 0xec2   :  { %v7369_v59 = vpop.eup %7368  ;;  %v4303_v60 = vsel %vm4296_vm10, %v7367_v56, 0.0  ;;  %v5324_v12 = vpop.xlane.xlu0 %5323 }
 0xec3   :  { %7376 = vpow2.f32 %v4991_v58  ;;  %4304 = vadd.xlane.f32.xlu0 %v4303_v60  ;;  %v4470_v61 = vsel %vm4296_vm10, %v7369_v59, 0.0  ;;  %v5325_v13 = vsub.f32 %v5321_v34, %v5324_v12  ;;  %v4812_v20 = vpop.permute.xlu1 %4811  ;;  %v6050_v60 = vld [vmem:[%s8690_s13 + $0xe8] sm:$0xff] }
 0xec4   :  { %4471 = vadd.xlane.f32.xlu1 %v4470_v61  ;;  %7378 = vpow2.f32 %v5494_v57  ;;  %v6048_v57 = vld [vmem:[%s8690_s13 + $0xd8] sm:$0xff]  ;;  %v7402_v12 = vld [vmem:[%s8712_s25 + $0x8] sm:$0xff] }
 0xec5   :  { %v7371_v62 = vpop.eup %7370  ;;  %v5326_v14 = vmul.f32 1.442695, %v5325_v13  ;;  %v7295_v13 = vpack.i.bf16 %v7402_v12, %v8235_v49 }
 0xec6   :  { %v4638_v63 = vsel %vm4296_vm10, %v7371_v62, 0.0  ;;  %v4476_v19 = vpop.permute.xlu0 %4475 }
 0xec7   :  { %4639 = vadd.xlane.f32.xlu0 %v4638_v63  ;;  %7380 = vpow2.f32 %v5326_v14 }
 0xec9   :  { %v7373_v1 = vpop.eup %7372 }
 0xeca   :  { %v4806_v2 = vsel %vm4296_vm10, %v7373_v1, 0.0  ;;  %v8478_v3 = vpop.eup %7374 }
 0xecb   :  { %4807 = vadd.xlane.f32.xlu1 %v4806_v2  ;;  %v5160_v5 = vsel %vm4296_vm10, %v8478_v3, 0.0 }
 0xecd   :  { %v7377_v4 = vpop.eup %7376 }
 0xece   :  { %v4993_v27 = vsel %vm4296_vm10, %v7377_v4, 0.0  ;;  %v8483_v52 = vpop.eup %7378 }
 0xecf   :  { %4994 = vadd.xlane.f32.xlu0 %v4993_v27  ;;  %5161 = vadd.xlane.f32.xlu1 %v5160_v5  ;;  %v5496_v8 = vsel %vm4296_vm10, %v8483_v52, 0.0  ;;  %v6051_v27 = vld [vmem:[%s8690_s13 + $0xf0] sm:$0xff]  ;;  %v6052_v5 = vld [vmem:[%s8690_s13 + $0xf8] sm:$0xff] }
 0xed1   :  { %v7381_v15 = vpop.eup %7380 }
 0xed2   :  { %v5328_v17 = vsel %vm4296_vm10, %v7381_v15, 0.0 }
 0xed3   :  { %5497 = vadd.xlane.f32.xlu1 %v5496_v8 }
 0xee4   :  { %5333 = vrot.lane.b32.xlu1 %v4998_v11, %s7407_s9 }
 0xee5   :  { %5165 = vrot.lane.b32.xlu0 %v4998_v11, %s7408_s30 }
 0xf04   :  { %5329 = vadd.xlane.f32.xlu0 %v5328_v17  ;;  %v2130_v17 = vsel %vm90_vm2, %v8059_v7, 0.0 }
 0xf1a   :  { %5501 = vrot.lane.b32.xlu0 %v4998_v11, %s8715_s21 }
 0xf50   :  { %v4305_v22 = vpop.xlane.xlu0 %4304 }
 0xf51   :  { %7382 = vrcp.f32 %v4305_v22  ;;  %v4472_v55 = vpop.xlane.xlu1 %4471 }
 0xf52   :  { %7384 = vrcp.f32 %v4472_v55 }
 0xf54   :  { %v4640_v23 = vpop.xlane.xlu0 %4639 }
 0xf55   :  { %7386 = vrcp.f32 %v4640_v23 }
 0xf58   :  { %v4808_v24 = vpop.xlane.xlu1 %4807 }
 0xf59   :  { %7388 = vrcp.f32 %v4808_v24 }
 0xf5b   :  { %v7383_v16 = vpop.eup %7382 }
 0xf5c   :  { %v4307_v25 = vmul.f32 %v7383_v16, %v7367_v56  ;;  %v4995_v26 = vpop.xlane.xlu0 %4994  ;;  %v7385_v28 = vpop.eup %7384  ;;  %v7211_v56 = vpack.c.bf16 %v6046_v54, %v6045_v51  ;;  %v5699_v51 = vld [vmem:[%s8692_s15 + $0x68] sm:$0xff] }
 0xf5d   :  { %7390 = vrcp.f32 %v4995_v26  ;;  %v4474_v29 = vmul.f32 %v7385_v28, %v7369_v59  ;;  %v5162_v30 = vpop.xlane.xlu1 %5161  ;;  %v6049_v59 = vld [vmem:[%s8690_s13 + $0xe0] sm:$0xff] }
 0xf5e   :  { %6854 = vmatmul.mubr.msk.f32.vlgmr.msra.gmra.mrb[48].mxu1 %vm4296_vm10, %v4307_v25  ;;  %7392 = vrcp.f32 %v5162_v30  ;;  %7212 = vmatprep.subr.bf16.mxu0 %v7211_v56  ;;  %v7219_v63 = vpack.c.bf16 %v6050_v60, %v6049_v59  ;;  %v5686_v28 = vld [vmem:[%s8692_s15] sm:$0xff]  ;;  %v5688_v30 = vld [vmem:[%s8692_s15 + $0x10] sm:$0xff] }
 0xf5f   :  { %6862 = vmatpush3.msk.msra.mxu1 %vm1968_vm8, %v4476_v19  ;;  %6863 = vmatprep.mubr.msk.f32.mxu1 %vm7405_vm0, %v7406_v6  ;;  %v7387_v53 = vpop.eup %7386  ;;  %v5786_v59 = vld [vmem:[%s8693_s17 + $0x10] sm:$0xff] }
 0xf60   :  { %6871 = vmatprep.subr.mxu1 %v7406_v6  ;;  %v4642_v31 = vmul.f32 %v7387_v53, %v7371_v62  ;;  %v5166_v9 = vpop.permute.xlu0 %5165  ;;  %7214 = vmatpush3.bf16.msra.mxu0 %v7211_v56 }
 0xf61   :  { %v5498_v0 = vpop.xlane.xlu1 %5497 }
 0xf62   :  { %6864 = vmatmul.mubr.msk.f32.vlgmr.msra.gmra.mrb[50].mxu1 %vm4296_vm10, %v4474_v29  ;;  %v5687_v29 = vld [vmem:[%s8692_s15 + $0x8] sm:$0xff] }
 0xf63   :  { %6872 = vmatpush3.msk.msra.mxu1 %vm1968_vm8, %v4644_v18  ;;  %6873 = vmatprep.mubr.msk.f32.mxu1 %vm7405_vm0, %v7406_v6  ;;  %v7389_v32 = vpop.eup %7388  ;;  %v2208_v18 = vsel %vm90_vm2, %v8061_v10, 0.0 }
 0xf64   :  { %6881 = vmatprep.subr.mxu1 %v7406_v6  ;;  %v4810_v33 = vmul.f32 %v7389_v32, %v7373_v1  ;;  %v5689_v32 = vld [vmem:[%s8692_s15 + $0x18] sm:$0xff] }
 0xf65   :  { %v5334_v39 = vpop.permute.xlu1 %5333 }
 0xf66   :  { %6874 = vmatmul.mubr.msk.f32.vlgmr.msra.gmra.mrb[52].mxu1 %vm4296_vm10, %v4642_v31  ;;  %v7227_v31 = vpack.c.bf16 %v5687_v29, %v5686_v28 }
 0xf67   :  { %6882 = vmatpush3.msk.msra.mxu1 %vm1968_vm8, %v4812_v20  ;;  %6883 = vmatprep.mubr.msk.f32.mxu1 %vm7405_vm0, %v7406_v6  ;;  %v7391_v34 = vpop.eup %7390 }
 0xf68   :  { %6891 = vmatprep.subr.mxu1 %v7406_v6  ;;  %v4997_v35 = vmul.f32 %v7391_v34, %v7377_v4  ;;  %v7393_v36 = vpop.eup %7392  ;;  %v7231_v34 = vpack.c.bf16 %v5689_v32, %v5688_v30 }
 0xf69   :  { %v5164_v38 = vmul.f32 %v7393_v36, %v8478_v3  ;;  %v7403_v36 = vld [vmem:[%s8689_s8] ss:$0 sm:$0xff] }
 0xf6a   :  { %6884 = vmatmul.mubr.msk.f32.vlgmr.msra.gmra.mrb[54].mxu1 %vm4296_vm10, %v4810_v33 }
 0xf6b   :  { %6892 = vmatpush3.msk.msra.mxu1 %vm1968_vm8, %v4998_v11  ;;  %6893 = vmatprep.mubr.msk.f32.mxu1 %vm7405_vm0, %v7406_v6 }
 0xf6c   :  { %6901 = vmatprep.subr.mxu1 %v7406_v6 }
 0xf6e   :  { %6894 = vmatmul.mubr.msk.f32.vlgmr.msra.gmra.mrb[56].mxu1 %vm4296_vm10, %v4997_v35  ;;  %v5690_v35 = vld [vmem:[%s8692_s15 + $0x20] sm:$0xff] }
 0xf6f   :  { %6902 = vmatpush3.msk.msra.mxu1 %vm1968_vm8, %v5166_v9  ;;  %6903 = vmatprep.mubr.msk.f32.mxu1 %vm7405_vm0, %v7406_v6 }
 0xf70   :  { %6911 = vmatprep.subr.mxu1 %v7406_v6 }
 0xf72   :  { %6904 = vmatmul.mubr.msk.f32.vlgmr.msra.gmra.mrb[58].mxu1 %vm4296_vm10, %v5164_v38 }
 0xf73   :  { %6912 = vmatpush3.msk.msra.mxu1 %vm1968_vm8, %v5334_v39  ;;  %6913 = vmatprep.mubr.msk.f32.mxu1 %vm7405_vm0, %v7406_v6  ;;  %v5692_v39 = vld [vmem:[%s8692_s15 + $0x30] sm:$0xff] }
 0xf74   :  { %6921 = vmatprep.subr.mxu1 %v7406_v6 }
 0xf91   :  { %v5330_v40 = vpop.xlane.xlu0 %5329 }
 0xf92   :  { %7394 = vrcp.f32 %v5330_v40  ;;  %v5693_v40 = vld [vmem:[%s8692_s15 + $0x38] sm:$0xff] }
 0xf93   :  { %7396 = vrcp.f32 %v5498_v0  ;;  %v5691_v0 = vld [vmem:[%s8692_s15 + $0x28] sm:$0xff] }
 0xf94   :  { %v7235_v38 = vpack.c.bf16 %v5691_v0, %v5690_v35 }
 0xf95   :  { %v5502_v44 = vpop.permute.xlu0 %5501 }
 0xf9c   :  { %v7395_v41 = vpop.eup %7394 }
 0xf9d   :  { %v5332_v42 = vmul.f32 %v7395_v41, %v7381_v15  ;;  %v7397_v21 = vpop.eup %7396 }
 0xf9e   :  { %v5500_v37 = vmul.f32 %v7397_v21, %v8483_v52  ;;  %v7223_v52 = vpack.c.bf16 %v6052_v5, %v6051_v27  ;;  %v7239_v21 = vpack.c.bf16 %v5693_v40, %v5692_v39 }
 0xf9f   :  { %6914 = vmatmul.mubr.msk.f32.vlgmr.msra.gmra.mrb[60].mxu1 %vm4296_vm10, %v5332_v42 }
 0xfa0   :  { %6922 = vmatpush3.msk.msra.mxu1 %vm1968_vm8, %v5502_v44  ;;  %6923 = vmatprep.mubr.msk.f32.mxu1 %vm7405_vm0, %v7406_v6  ;;  %v6047_v6 = vld [vmem:[%s8690_s13 + $0xd0] sm:$0xff]  ;;  %v5694_v44 = vld [vmem:[%s8692_s15 + $0x40] sm:$0xff] }
 0xfa1   :  { %v7215_v58 = vpack.c.bf16 %v6048_v57, %v6047_v6  ;;  %7228 = vmatprep.subr.bf16.mxu1 %v7227_v31  ;;  %v5700_v6 = vld [vmem:[%s8692_s15 + $0x70] sm:$0xff]  ;;  %v5784_v57 = vld [vmem:[%s8693_s17] sm:$0xff] }
 0xfa3   :  { %6924 = vmatmul.mubr.msk.f32.vlgmr.msra.gmra.mrb[62].mxu1 %vm4296_vm10, %v5500_v37  ;;  %7216 = vmatprep.subr.bf16.mxu0 %v7215_v58  ;;  %v5695_v37 = vld [vmem:[%s8692_s15 + $0x48] sm:$0xff] }
 0xfa4   :  { %7218 = vmatpush3.bf16.msra.mxu0 %v7215_v58  ;;  %7230 = vmatpush3.bf16.msra.mxu1 %v7227_v31  ;;  %v5785_v58 = vld [vmem:[%s8693_s17 + $0x8] sm:$0xff] }
 0xfa5   :  { %7220 = vmatprep.subr.bf16.mxu0 %v7219_v63  ;;  %7232 = vmatprep.subr.bf16.mxu1 %v7231_v34  ;;  %v7259_v60 = vpack.c.bf16 %v5785_v58, %v5784_v57 }
 0xfa8   :  { %7222 = vmatpush3.bf16.msra.mxu0 %v7219_v63  ;;  %7234 = vmatpush3.bf16.msra.mxu1 %v7231_v34  ;;  %v5788_v63 = vld [vmem:[%s8693_s17 + $0x20] sm:$0xff] }
 0xfa9   :  { %7224 = vmatprep.subr.bf16.mxu0 %v7223_v52  ;;  %7236 = vmatprep.subr.bf16.mxu1 %v7235_v38 }
 0xfac   :  { %7226 = vmatpush3.bf16.msra.mxu0 %v7223_v52  ;;  %7238 = vmatpush3.bf16.msra.mxu1 %v7235_v38  ;;  %v6092_v52 = vld [vmem:[%s8691_s14 + $0x3] ss:$0 sm:$0xff] }
 0xfad   :  { %7240 = vmatprep.subr.bf16.mxu1 %v7239_v21  ;;  %7260 = vmatprep.subr.bf16.mxu0 %v7259_v60 }
 0xfb0   :  { %7242 = vmatpush3.bf16.msra.mxu1 %v7239_v21 }
0x1031   :  { %v4380_v45 = vpop.f32.mrb[48].mxu1 }
0x1032   :  { %v6855_v50 = vpop.f32.mrb[49].mxu1 }
0x1033   :  { %v5696_v50 = vld [vmem:[%s8692_s15 + $0x50] sm:$0xff] }
0x1035   :  { %v4548_v46 = vpop.f32.mrb[50].mxu1 }
0x1036   :  { %4889 = vrot.lane.b32.xlu1 %v4548_v46, %s7410_s23  ;;  %v6865_v47 = vpop.f32.mrb[51].mxu1  ;;  %v5697_v46 = vld [vmem:[%s8692_s15 + $0x58] sm:$0xff] }
0x1037   :  { %v7247_v47 = vpack.c.bf16 %v5697_v46, %v5696_v50 }
0x1039   :  { %v4716_v48 = vpop.f32.mrb[52].mxu1 }
0x103a   :  { %4893 = vrot.lane.b32.xlu0 %v4716_v48, %s7411_s5  ;;  %v6875_v43 = vpop.f32.mrb[53].mxu1  ;;  %v5698_v48 = vld [vmem:[%s8692_s15 + $0x60] sm:$0xff] }
0x103b   :  { %v7251_v54 = vpack.c.bf16 %v5699_v51, %v5698_v48  ;;  %v5701_v43 = vld [vmem:[%s8692_s15 + $0x78] sm:$0xff] }
0x103c   :  { %v7255_v56 = vpack.c.bf16 %v5701_v43, %v5700_v6 }
0x103d   :  { %v4884_v61 = vpop.f32.mrb[54].mxu1 }
0x103e   :  { %4897 = vrot.lane.b32.xlu0 %v4884_v61, %s7412_s7  ;;  %v6885_v62 = vpop.f32.mrb[55].mxu1  ;;  %v5787_v61 = vld [vmem:[%s8693_s17 + $0x18] sm:$0xff] }
0x103f   :  { %v7263_v62 = vpack.c.bf16 %v5787_v61, %v5786_v59 }
0x1041   :  { %v5070_v1 = vpop.f32.mrb[56].mxu1 }
0x1042   :  { %v6895_v2 = vpop.f32.mrb[57].mxu1 }
0x1045   :  { %v5238_v3 = vpop.f32.mrb[58].mxu1 }
0x1046   :  { %5579 = vrot.lane.b32.xlu1 %v5238_v3, %s7410_s23  ;;  %v6905_v4 = vpop.f32.mrb[59].mxu1  ;;  %s7414_s23 = smov 64  }
0x1072   :  { %v5406_v8 = vpop.f32.mrb[60].mxu1 }
0x1073   :  { %5583 = vrot.lane.b32.xlu1 %v5406_v8, %s7411_s5  ;;  %v6915_v11 = vpop.f32.mrb[61].mxu1 }
0x1076   :  { %v5574_v14 = vpop.f32.mrb[62].mxu1 }
0x1077   :  { %7296 = vrot.lane.b32.xlu1 %v7295_v13, %s7414_s23  ;;  %5587 = vrot.lane.b32.xlu0 %v5574_v14, %s7412_s7  ;;  %v6925_v15 = vpop.f32.mrb[63].mxu1 }
0x1096   :  { %2131 = vadd.xlane.f32.xlu0 %v2130_v17 }
0x109b   :  { %2209 = vadd.xlane.f32.xlu1 %v2208_v18 }
0x10a8   :  { %v4890_v19 = vpop.permute.xlu1 %4889 }
0x10a9   :  { %v4900_v22 = vsel %vm625_vm3, %v4380_v45, %v4890_v19  ;;  %v7243_v45 = vpack.c.bf16 %v5695_v37, %v5694_v44  ;;  %v5790_v19 = vld [vmem:[%s8693_s17 + $0x30] sm:$0xff] }
0x10ab   :  { %7244 = vmatprep.subr.bf16.mxu1 %v7243_v45 }
0x10ac   :  { %v4894_v20 = vpop.permute.xlu0 %4893  ;;  %7246 = vmatpush3.bf16.msra.mxu1 %v7243_v45 }
0x10ad   :  { %v4901_v49 = vsel %vm1301_vm7, %v4900_v22, %v4894_v20  ;;  %7248 = vmatprep.subr.bf16.mxu1 %v7247_v47  ;;  %v5791_v20 = vld [vmem:[%s8693_s17 + $0x38] sm:$0xff] }
0x10ae   :  { %v7271_v22 = vpack.c.bf16 %v5791_v20, %v5790_v19 }
0x10b0   :  { %v4898_v55 = vpop.permute.xlu0 %4897  ;;  %7250 = vmatpush3.bf16.msra.mxu1 %v7247_v47 }
0x10b1   :  { %v4902_v23 = vsel %vm1303_vm6, %v4901_v49, %v4898_v55  ;;  %7252 = vmatprep.subr.bf16.mxu1 %v7251_v54  ;;  %v6095_v49 = vld [vmem:[%s8695_s16] ss:$0 sm:$0xff] }
0x10b2   :  { %6942 = vmatprep.mubr.msk.f32.mxu0 %vm90_vm2, %v4902_v23 }
0x10b4   :  { %7254 = vmatpush3.bf16.msra.mxu1 %v7251_v54 }
0x10b5   :  { %7256 = vmatprep.subr.bf16.mxu1 %v7255_v56 }
0x10b8   :  { %v5580_v24 = vpop.permute.xlu1 %5579  ;;  %7258 = vmatpush3.bf16.msra.mxu1 %v7255_v56 }
0x10b9   :  { %v5590_v7 = vsel %vm625_vm3, %v5070_v1, %v5580_v24  ;;  %v5789_v1 = vld [vmem:[%s8693_s17 + $0x28] sm:$0xff] }
0x10ba   :  { %v7267_v2 = vpack.c.bf16 %v5789_v1, %v5788_v63 }
0x10e5   :  { %v5584_v16 = vpop.permute.xlu1 %5583 }
0x10e6   :  { %v5591_v25 = vsel %vm1301_vm7, %v5590_v7, %v5584_v16  ;;  %v6096_v7 = vld [vmem:[%s8696_s18] ss:$0 sm:$0xff] }
0x10e9   :  { %v5588_v26 = vpop.permute.xlu0 %5587  ;;  %v8584_v53 = vpop.permute.xlu1 %7296 }
0x10ea   :  { %v5592_v10 = vsel %vm1303_vm6, %v5591_v25, %v5588_v26  ;;  %v7299_v8 = vunpack.i.h.bf16 %v8584_v53  ;;  %v7298_v11 = vunpack.i.l.bf16 %v8584_v53 }
0x10eb   :  { %6943 = vmatmul.mubr.msk.f32.vlgmr.msra.gmra.mrb[64].mxu0 %vm90_vm2, %v5592_v10 }
0x10ec   :  { %7262 = vmatpush3.bf16.msra.mxu0 %v7259_v60 }
0x10ed   :  { %7264 = vmatprep.subr.bf16.mxu0 %v7263_v62 }
0x10f0   :  { %7266 = vmatpush3.bf16.msra.mxu0 %v7263_v62 }
0x10f1   :  { %7268 = vmatprep.subr.bf16.mxu0 %v7267_v2 }
0x10f4   :  { %7270 = vmatpush3.bf16.msra.mxu0 %v7267_v2 }
0x10f5   :  { %7272 = vmatprep.subr.bf16.mxu0 %v7271_v22 }
0x10f8   :  { %7274 = vmatpush3.bf16.msra.mxu0 %v7271_v22 }
0x1123   :  { %v2132_v33 = vpop.xlane.xlu0 %2131 }
0x1124   :  { %v2133_v9 = vadd.f32 %v7403_v36, %v2132_v33 }
0x1126   :  { %2213 = vrot.lane.b32.xlu0 %v2133_v9, %s7415_s10 }
0x1128   :  { %v2210_v41 = vpop.xlane.xlu1 %2209 }
0x1129   :  { %v2211_v42 = vadd.f32 %v7403_v36, %v2210_v41 }
0x112b   :  { %2217 = vrot.lane.b32.xlu1 %v2211_v42, %s7413_s3 }
0x1198   :  { %v2214_v3 = vpop.permute.xlu0 %2213 }
0x119d   :  { %v2218_v4 = vpop.permute.xlu1 %2217 }
0x119e   :  { %v2221_v27 = vsel %vm2220_vm11, %v2214_v3, %v2218_v4 }
0x119f   :  { %v2223_v5 = vsel %vm2222_vm12, %v2221_v27, 0.0 }
0x11a0   :  { %2224 = vst [vmem:[%s8694_s20] sm:$0xff] %v2223_v5 }
0x11be   :  { %v6944_v12 = vpop.f32.mrb[64].mxu0 }
0x11bf   :  { %v5675_v13 = vadd.f32 %v6944_v12, %v6092_v52  ;;  %v5669_v14 = vpop.f32.mrb[65].mxu0 }
0x11c0   :  { %v5670_v15 = vadd.f32 %v6092_v52, %v5669_v14 }
0x11c1   :  { %v5685_v17 = vsel %vm90_vm2, %v5675_v13, %v7299_v8 }
0x11c2   :  { %v5684_v18 = vsel %vm90_vm2, %v5670_v15, %v7298_v11 }
0x11c3   :  { %6977 = vmatprep.mubr.f32.mxu1 %v5684_v18 }
0x11c4   :  { %6978 = vmatmul.mubr.f32.vlgmr.msra.gmra.mrb[64].mxu1 %v5685_v17 }
0x1297   :  { %v6979_v55 = vpop.f32.mrb[64].mxu1 }
0x1298   :  { %v5775_v23 = vpop.f32.mrb[65].mxu1  ;;  %v5781_v16 = vadd.f32 %v6979_v55, %v6095_v49 }
0x1299   :  { %v5776_v24 = vadd.f32 %v6095_v49, %v5775_v23 }
0x129b   :  { %6996 = vmatprep.mubr.msk.f32.mxu0 %vm90_vm2, %v5776_v24 }
0x129c   :  { %6997 = vmatmul.mubr.msk.f32.vlgmr.msra.gmra.mrb[66].mxu0 %vm90_vm2, %v5781_v16 }
0x136f   :  { %v6998_v25 = vpop.f32.mrb[66].mxu0 }
0x1370   :  { %v5877_v26 = vadd.f32 %v6998_v25, %v6096_v7  ;;  %v5871_v10 = vpop.f32.mrb[67].mxu0 }
0x1371   :  { %v5872_v28 = vadd.f32 %v6096_v7, %v5871_v10 }
0x1372   :  { %5881 = vst [vmem:[%s8697_s19 + $0x8] sm:$0xff] %v5877_v26 }
0x1373   :  { %5880 = vst [vmem:[%s8697_s19] sm:$0xff] %v5872_v28 }

</bundles_post_ra>
